<compile_context>
chip_gen: v7x
topology: tpu7x:2x2x1
jax: 0.10.0
libtpu: 0.0.40
codegen_flags: <defaults>
</compile_context>

<pallas_src>
import numpy as np
import jax
import jax.numpy as jnp
from jax import lax
from jax.experimental import pallas as pl
from jax.experimental.pallas import tpu as pltpu

# ----------------------------- model dimensions ------------------------------
B = 2                # batch
CIN = 4              # input_dim
C1 = 192             # cnn1_dim
C2 = 48              # cnn2_dim
H = W = 16           # input spatial
KENC, SENC = 8, 4    # encoder conv1 kernel / stride
OH1 = (H - KENC) // SENC + 1          # 3
KD1, SD1 = 3, 2                       # decoder deconv1 kernel / stride
OH3 = (OH1 - 1) * SD1 + KD1           # 7
KD2, SD2 = 4, 2                       # decoder deconv2 kernel / stride
OH4 = (OH3 - 1) * SD2 + KD2           # 16  (== input spatial)


# ------------------------------- Pallas kernel --------------------------------

def _magno_fwd_kernel(x_ref, l1_ref, k1_ref, b1_ref, w2_ref, b2_ref,
                      s1_ref, kd1_hbm, bd1_ref, s2_ref, kd2_hbm, bd2_ref,
                      enc_ref, dec_ref,
                      kd1_vmem, kd2_vmem, dma_sem):
    f32, bf16 = jnp.float32, jnp.bfloat16

    # Stage the large decoder weights HBM->VMEM asynchronously so the DMA overlaps
    # the encoder compute.
    cp_kd1 = pltpu.make_async_copy(kd1_hbm, kd1_vmem, dma_sem.at[0])
    cp_kd2 = pltpu.make_async_copy(kd2_hbm, kd2_vmem, dma_sem.at[1])
    cp_kd1.start()
    cp_kd2.start()

    x2d = x_ref[...]                                             # (B*H, W*CIN) bf16

    # ---- encoder layer 1: Conv2d(4, 192, k=8, s=4) + ReLU ------------------------
    acc = None
    for t in range(KENC):
        rows = jnp.dot(l1_ref[t], x2d, preferred_element_type=f32)       # (B*OH1, W*CIN)
        term = jnp.dot(rows.astype(bf16), k1_ref[t],
                       preferred_element_type=f32)                       # (B*OH1, OH1*C1)
        acc = term if acc is None else acc + term
    a1 = jnp.maximum(acc + b1_ref[...], 0.0)                             # f32

    # ---- encoder layer 2: Conv2d(192, 48, 1x1) + ReLU  -> enc --------------------
    enc = jnp.maximum(
        jnp.dot(a1.astype(bf16), w2_ref[...], preferred_element_type=f32)
        + b2_ref[...], 0.0)                                              # (B*OH1, OH1*C2)
    enc_ref[...] = enc

    # Decoder weights must be resident before the first decoder matmul.
    cp_kd1.wait()
    cp_kd2.wait()

    # ---- decoder layer 1: ConvTranspose2d(48, 192, k=3, s=2) + ReLU --------------
    # Re-associated scatter @ (act @ weight): keeps intermediates at B*OH1 rows.
    enc_bf = enc.astype(bf16)
    acc = None
    for t in range(KD1):
        term = jnp.dot(enc_bf, kd1_vmem[t], preferred_element_type=f32)  # (B*OH1, OH3*C1)
        scat = jnp.dot(s1_ref[t], term.astype(bf16),
                       preferred_element_type=f32)                       # (B*OH3, OH3*C1)
        acc = scat if acc is None else acc + scat
    a3 = jnp.maximum(acc + bd1_ref[...], 0.0)                            # f32

    # ---- decoder layer 2: ConvTranspose2d(192, 4, k=4, s=2) + Tanh  -> dec -------
    a3_bf = a3.astype(bf16)
    acc = None
    for t in range(KD2):
        term = jnp.dot(a3_bf, kd2_vmem[t], preferred_element_type=f32)   # (B*OH3, OH4*CIN)
        scat = jnp.dot(s2_ref[t], term.astype(bf16),
                       preferred_element_type=f32)                       # (B*OH4, OH4*CIN)
        acc = scat if acc is None else acc + scat
    dec_ref[...] = jnp.tanh(acc + bd2_ref[...])


# --------------------------------- wrapper ------------------------------------

@jax.jit
def magno_forward(kp, x):
    b = x.shape[0]
    if kp['L1'].shape[1] != b * OH1:
        raise ValueError("kernel params were built for a different batch size")

    # NCHW -> (B*H, W*C) bf16: the only per-call layout op outside the kernel (tiny).
    x2d = jnp.transpose(x, (0, 2, 3, 1)).reshape(b * H, W * CIN).astype(jnp.bfloat16)

    vmem = pl.BlockSpec(memory_space=pltpu.MemorySpace.VMEM)
    hbm = pl.BlockSpec(memory_space=pl.ANY)        # decoder weights: manual async DMA

    enc2d, dec2d = pl.pallas_call(
        _magno_fwd_kernel,
        out_shape=(jax.ShapeDtypeStruct((b * OH1, OH1 * C2), jnp.float32),
                   jax.ShapeDtypeStruct((b * OH4, OH4 * CIN), jnp.float32)),
        in_specs=[vmem,            # x2d
                  vmem, vmem, vmem,   # L1, K1, b1row
                  vmem, vmem,         # W2bd, b2row
                  vmem, hbm, vmem,    # S1, Kd1(HBM), bd1row
                  vmem, hbm, vmem],   # S2, Kd2(HBM), bd2row
        out_specs=(vmem, vmem),
        scratch_shapes=[
            pltpu.VMEM((KD1, OH1 * C2, OH3 * C1), jnp.bfloat16),   # Kd1 staging
            pltpu.VMEM((KD2, OH3 * C1, OH4 * CIN), jnp.bfloat16),  # Kd2 staging
            pltpu.SemaphoreType.DMA((2,)),
        ],
        compiler_params=pltpu.CompilerParams(vmem_limit_bytes=12 * 1024 * 1024),
    )(x2d, kp['L1'], kp['K1'], kp['b1row'], kp['W2bd'], kp['b2row'],
      kp['S1'], kp['Kd1'], kp['bd1row'], kp['S2'], kp['Kd2'], kp['bd2row'])

    enc = jnp.transpose(enc2d.reshape(b, OH1, OH1, C2), (0, 3, 1, 2))   # (B,48,3,3)
    dec = jnp.transpose(dec2d.reshape(b, OH4, OH4, CIN), (0, 3, 1, 2))  # (B,4,16,16)
    return enc, dec


# --------------------- parameter setup / weight expansion ---------------------

def init_torch_params(key):
    ks = jax.random.split(key, 8)

    def xavier(k, shape):
        fan_a = shape[0] * shape[2] * shape[3]
        fan_b = shape[1] * shape[2] * shape[3]
        std = (2.0 / (fan_a + fan_b)) ** 0.5
        return std * jax.random.normal(k, shape, dtype=jnp.float32)

    return dict(
        w1=xavier(ks[0], (C1, CIN, KENC, KENC)),        # Conv2d OIHW
        b1=0.05 * jax.random.normal(ks[1], (C1,), dtype=jnp.float32),
        w2=xavier(ks[2], (C2, C1, 1, 1)),               # Conv2d OIHW
        b2=0.05 * jax.random.normal(ks[3], (C2,), dtype=jnp.float32),
        wd1=xavier(ks[4], (C2, C1, KD1, KD1)),          # ConvTranspose2d (in,out,kh,kw)
        bd1=0.05 * jax.random.normal(ks[5], (C1,), dtype=jnp.float32),
        wd2=xavier(ks[6], (C1, CIN, KD2, KD2)),         # ConvTranspose2d (in,out,kh,kw)
        bd2=0.05 * jax.random.normal(ks[7], (CIN,), dtype=jnp.float32),
    )


def build_kernel_params(tp, batch):
    """Expand torch-layout weights into the (row-select, block-Toeplitz) form.

    Selectors + expanded weights are stored in bf16 (selectors are 0/1 => exact;
    the MXU multiplies in bf16 at default precision anyway). Biases stay f32.
    """
    w1 = np.asarray(tp['w1']); b1 = np.asarray(tp['b1'])
    w2 = np.asarray(tp['w2']); b2 = np.asarray(tp['b2'])
    wd1 = np.asarray(tp['wd1']); bd1 = np.asarray(tp['bd1'])
    wd2 = np.asarray(tp['wd2']); bd2 = np.asarray(tp['bd2'])

    # encoder conv1 (k=8, s=4): gather input row 4*oh+kh, width conv folded in K1m
    L1 = np.zeros((KENC, batch * OH1, batch * H), np.float32)
    K1m = np.zeros((KENC, W * CIN, OH1 * C1), np.float32)
    for kh in range(KENC):
        for bb in range(batch):
            for oh in range(OH1):
                L1[kh, bb * OH1 + oh, bb * H + SENC * oh + kh] = 1.0
        for ow in range(OH1):
            for kw in range(KENC):
                wcol = SENC * ow + kw
                K1m[kh, wcol * CIN:(wcol + 1) * CIN, ow * C1:(ow + 1) * C1] = w1[:, :, kh, kw].T

    # encoder conv2 (1x1): block-diagonal channel mixer over the 3 width positions
    W2bd = np.zeros((OH1 * C1, OH1 * C2), np.float32)
    for ow in range(OH1):
        W2bd[ow * C1:(ow + 1) * C1, ow * C2:(ow + 1) * C2] = w2[:, :, 0, 0].T

    # decoder deconv1 (k=3, s=2): scatter to output row 2*ih+kh
    S1m = np.zeros((KD1, batch * OH3, batch * OH1), np.float32)
    Kd1 = np.zeros((KD1, OH1 * C2, OH3 * C1), np.float32)
    for kh in range(KD1):
        for bb in range(batch):
            for ih in range(OH1):
                S1m[kh, bb * OH3 + SD1 * ih + kh, bb * OH1 + ih] = 1.0
        for iw in range(OH1):
            for kw in range(KD1):
                ow = SD1 * iw + kw
                Kd1[kh, iw * C2:(iw + 1) * C2, ow * C1:(ow + 1) * C1] = wd1[:, :, kh, kw]

    # decoder deconv2 (k=4, s=2)
    S2m = np.zeros((KD2, batch * OH4, batch * OH3), np.float32)
    Kd2 = np.zeros((KD2, OH3 * C1, OH4 * CIN), np.float32)
    for kh in range(KD2):
        for bb in range(batch):
            for ih in range(OH3):
                S2m[kh, bb * OH4 + SD2 * ih + kh, bb * OH3 + ih] = 1.0
        for iw in range(OH3):
            for kw in range(KD2):
                ow = SD2 * iw + kw
                Kd2[kh, iw * C1:(iw + 1) * C1, ow * CIN:(ow + 1) * CIN] = wd2[:, :, kh, kw]

    bf = jnp.bfloat16
    return dict(
        L1=jnp.asarray(L1, dtype=bf), K1=jnp.asarray(K1m, dtype=bf),
        b1row=jnp.asarray(np.tile(b1, OH1)[None, :]),
        W2bd=jnp.asarray(W2bd, dtype=bf),
        b2row=jnp.asarray(np.tile(b2, OH1)[None, :]),
        S1=jnp.asarray(S1m, dtype=bf), Kd1=jnp.asarray(Kd1, dtype=bf),
        bd1row=jnp.asarray(np.tile(bd1, OH3)[None, :]),
        S2=jnp.asarray(S2m, dtype=bf), Kd2=jnp.asarray(Kd2, dtype=bf),
        bd2row=jnp.asarray(np.tile(bd2, OH4)[None, :]),
    )


# --------------------------- plain-JAX reference -------------------------------

def reference_forward(tp, x):
    dn = ('NCHW', 'OIHW', 'NCHW')

    def conv_t(y, w_io, stride, k):
        # torch ConvTranspose2d == dilated conv with flipped, transposed kernel
        w = jnp.transpose(w_io, (1, 0, 2, 3))[:, :, ::-1, ::-1]
        return lax.conv_general_dilated(
            y, w, window_strides=(1, 1),
            padding=[(k - 1, k - 1), (k - 1, k - 1)],
            lhs_dilation=(stride, stride), dimension_numbers=dn)

    y = lax.conv_general_dilated(x, tp['w1'], (SENC, SENC), 'VALID', dimension_numbers=dn)
    y = jnp.maximum(y + tp['b1'][None, :, None, None], 0.0)
    y = lax.conv_general_dilated(y, tp['w2'], (1, 1), 'VALID', dimension_numbers=dn)
    enc = jnp.maximum(y + tp['b2'][None, :, None, None], 0.0)

    d = conv_t(enc, tp['wd1'], SD1, KD1)
    d = jnp.maximum(d + tp['bd1'][None, :, None, None], 0.0)
    d = conv_t(d, tp['wd2'], SD2, KD2)
    dec = jnp.tanh(d + tp['bd2'][None, :, None, None])
    return enc, dec


if __name__ == "__main__":
    key = jax.random.PRNGKey(0)
    k_par, k_x = jax.random.split(key)
    tp = init_torch_params(k_par)

    # Round test params/inputs to bf16-representable f32 so the bf16 weight storage
    # and the MXU's default bf16-multiply introduce no weight/input rounding; this
    # keeps the Pallas kernel vs. XLA reference comparison tight regardless of the
    # backend's default matmul precision.
    rb = lambda a: a.astype(jnp.bfloat16).astype(jnp.float32)
    tp = {k: rb(v) for k, v in tp.items()}
    x = rb(jax.random.normal(k_x, (B, CIN, H, W), dtype=jnp.float32))

    kp = build_kernel_params(tp, B)

    enc, dec = magno_forward(kp, x)
    jax.block_until_ready((enc, dec))

    enc_ref, dec_ref = reference_forward(tp, x)
    assert enc.shape == (B, C2, OH1, OH1) and dec.shape == (B, CIN, OH4, OH4)
    assert jnp.allclose(enc, enc_ref, atol=5e-3, rtol=5e-3)
    assert jnp.allclose(dec, dec_ref, atol=5e-3, rtol=5e-3)

    print("KERNEL_OK")
</pallas_src>

<mosaic_0001>
module attributes {stable_mosaic.version = 11 : i64} {
  func.func @_magno_fwd_kernel(%arg0: memref<32x64xbf16, #tpu.memory_space<vmem>>, %arg1: memref<8x6x32xbf16, #tpu.memory_space<vmem>>, %arg2: memref<8x64x576xbf16, #tpu.memory_space<vmem>>, %arg3: memref<1x576xf32, #tpu.memory_space<vmem>>, %arg4: memref<576x144xbf16, #tpu.memory_space<vmem>>, %arg5: memref<1x144xf32, #tpu.memory_space<vmem>>, %arg6: memref<3x14x6xbf16, #tpu.memory_space<vmem>>, %arg7: memref<3x144x1344xbf16, #tpu.memory_space<any>>, %arg8: memref<1x1344xf32, #tpu.memory_space<vmem>>, %arg9: memref<4x32x14xbf16, #tpu.memory_space<vmem>>, %arg10: memref<4x1344x64xbf16, #tpu.memory_space<any>>, %arg11: memref<1x64xf32, #tpu.memory_space<vmem>>, %arg12: memref<6x144xf32, #tpu.memory_space<vmem>>, %arg13: memref<32x64xf32, #tpu.memory_space<vmem>>, %arg14: memref<3x144x1344xbf16, #tpu.memory_space<vmem>>, %arg15: memref<4x1344x64xbf16, #tpu.memory_space<vmem>>, %arg16: memref<2x!tpu.dma_semaphore, #tpu.memory_space<semaphore_mem>>) attributes {dimension_semantics = [], scalar_prefetch = 0 : i64, scratch_operands = 3 : i64, tpu.core_type = #tpu.core_type<tc>} {
    %c0_i32 = arith.constant 0 : i32
    %0 = tpu.memref_slice %arg16[%c0_i32] : memref<2x!tpu.dma_semaphore, #tpu.memory_space<semaphore_mem>> -> memref<1x!tpu.dma_semaphore, #tpu.memory_space<semaphore_mem>>
    %1 = tpu.memref_squeeze %0 : memref<1x!tpu.dma_semaphore, #tpu.memory_space<semaphore_mem>> -> memref<!tpu.dma_semaphore, #tpu.memory_space<semaphore_mem>>
    tpu.enqueue_dma source(%arg7 : memref<3x144x1344xbf16, #tpu.memory_space<any>>) target(%arg14 : memref<3x144x1344xbf16, #tpu.memory_space<vmem>>) target_semaphore(%1 : memref<!tpu.dma_semaphore, #tpu.memory_space<semaphore_mem>>)
    %c1_i32 = arith.constant 1 : i32
    %2 = tpu.memref_slice %arg16[%c1_i32] : memref<2x!tpu.dma_semaphore, #tpu.memory_space<semaphore_mem>> -> memref<1x!tpu.dma_semaphore, #tpu.memory_space<semaphore_mem>>
    %3 = tpu.memref_squeeze %2 : memref<1x!tpu.dma_semaphore, #tpu.memory_space<semaphore_mem>> -> memref<!tpu.dma_semaphore, #tpu.memory_space<semaphore_mem>>
    tpu.enqueue_dma source(%arg10 : memref<4x1344x64xbf16, #tpu.memory_space<any>>) target(%arg15 : memref<4x1344x64xbf16, #tpu.memory_space<vmem>>) target_semaphore(%3 : memref<!tpu.dma_semaphore, #tpu.memory_space<semaphore_mem>>)
    %c0 = arith.constant 0 : index
    %c0_0 = arith.constant 0 : index
    %4 = vector.load %arg0[%c0, %c0_0] : memref<32x64xbf16, #tpu.memory_space<vmem>>, vector<32x64xbf16>
    %c0_1 = arith.constant 0 : index
    %c0_2 = arith.constant 0 : index
    %c0_3 = arith.constant 0 : index
    %5 = vector.load %arg1[%c0_1, %c0_2, %c0_3] : memref<8x6x32xbf16, #tpu.memory_space<vmem>>, vector<1x6x32xbf16>
    %6 = vector.shape_cast %5 : vector<1x6x32xbf16> to vector<6x32xbf16>
    %cst = arith.constant dense<0.000000e+00> : vector<6x64xf32>
    %7 = tpu.matmul %6, %4, %cst {dimension_numbers = #tpu.dot_dimension_numbers<[1], [0], [0], [1], [0, 0, 1, 1], [], []>} : vector<6x32xbf16>, vector<32x64xbf16>, vector<6x64xf32> -> vector<6x64xf32>
    %8 = arith.truncf %7 : vector<6x64xf32> to vector<6x64xbf16>
    %c0_4 = arith.constant 0 : index
    %c0_5 = arith.constant 0 : index
    %c0_6 = arith.constant 0 : index
    %9 = vector.load %arg2[%c0_4, %c0_5, %c0_6] : memref<8x64x576xbf16, #tpu.memory_space<vmem>>, vector<1x64x576xbf16>
    %10 = vector.shape_cast %9 : vector<1x64x576xbf16> to vector<64x576xbf16>
    %cst_7 = arith.constant dense<0.000000e+00> : vector<6x576xf32>
    %11 = tpu.matmul %8, %10, %cst_7 {dimension_numbers = #tpu.dot_dimension_numbers<[1], [0], [0], [1], [0, 0, 1, 1], [], []>} : vector<6x64xbf16>, vector<64x576xbf16>, vector<6x576xf32> -> vector<6x576xf32>
    %c1 = arith.constant 1 : index
    %c0_8 = arith.constant 0 : index
    %c0_9 = arith.constant 0 : index
    %12 = vector.load %arg1[%c1, %c0_8, %c0_9] : memref<8x6x32xbf16, #tpu.memory_space<vmem>>, vector<1x6x32xbf16>
    %13 = vector.shape_cast %12 : vector<1x6x32xbf16> to vector<6x32xbf16>
    %cst_10 = arith.constant dense<0.000000e+00> : vector<6x64xf32>
    %14 = tpu.matmul %13, %4, %cst_10 {dimension_numbers = #tpu.dot_dimension_numbers<[1], [0], [0], [1], [0, 0, 1, 1], [], []>} : vector<6x32xbf16>, vector<32x64xbf16>, vector<6x64xf32> -> vector<6x64xf32>
    %15 = arith.truncf %14 : vector<6x64xf32> to vector<6x64xbf16>
    %c1_11 = arith.constant 1 : index
    %c0_12 = arith.constant 0 : index
    %c0_13 = arith.constant 0 : index
    %16 = vector.load %arg2[%c1_11, %c0_12, %c0_13] : memref<8x64x576xbf16, #tpu.memory_space<vmem>>, vector<1x64x576xbf16>
    %17 = vector.shape_cast %16 : vector<1x64x576xbf16> to vector<64x576xbf16>
    %cst_14 = arith.constant dense<0.000000e+00> : vector<6x576xf32>
    %18 = tpu.matmul %15, %17, %cst_14 {dimension_numbers = #tpu.dot_dimension_numbers<[1], [0], [0], [1], [0, 0, 1, 1], [], []>} : vector<6x64xbf16>, vector<64x576xbf16>, vector<6x576xf32> -> vector<6x576xf32>
    %19 = arith.addf %11, %18 : vector<6x576xf32>
    %c2 = arith.constant 2 : index
    %c0_15 = arith.constant 0 : index
    %c0_16 = arith.constant 0 : index
    %20 = vector.load %arg1[%c2, %c0_15, %c0_16] : memref<8x6x32xbf16, #tpu.memory_space<vmem>>, vector<1x6x32xbf16>
    %21 = vector.shape_cast %20 : vector<1x6x32xbf16> to vector<6x32xbf16>
    %cst_17 = arith.constant dense<0.000000e+00> : vector<6x64xf32>
    %22 = tpu.matmul %21, %4, %cst_17 {dimension_numbers = #tpu.dot_dimension_numbers<[1], [0], [0], [1], [0, 0, 1, 1], [], []>} : vector<6x32xbf16>, vector<32x64xbf16>, vector<6x64xf32> -> vector<6x64xf32>
    %23 = arith.truncf %22 : vector<6x64xf32> to vector<6x64xbf16>
    %c2_18 = arith.constant 2 : index
    %c0_19 = arith.constant 0 : index
    %c0_20 = arith.constant 0 : index
    %24 = vector.load %arg2[%c2_18, %c0_19, %c0_20] : memref<8x64x576xbf16, #tpu.memory_space<vmem>>, vector<1x64x576xbf16>
    %25 = vector.shape_cast %24 : vector<1x64x576xbf16> to vector<64x576xbf16>
    %cst_21 = arith.constant dense<0.000000e+00> : vector<6x576xf32>
    %26 = tpu.matmul %23, %25, %cst_21 {dimension_numbers = #tpu.dot_dimension_numbers<[1], [0], [0], [1], [0, 0, 1, 1], [], []>} : vector<6x64xbf16>, vector<64x576xbf16>, vector<6x576xf32> -> vector<6x576xf32>
    %27 = arith.addf %19, %26 : vector<6x576xf32>
    %c3 = arith.constant 3 : index
    %c0_22 = arith.constant 0 : index
    %c0_23 = arith.constant 0 : index
    %28 = vector.load %arg1[%c3, %c0_22, %c0_23] : memref<8x6x32xbf16, #tpu.memory_space<vmem>>, vector<1x6x32xbf16>
    %29 = vector.shape_cast %28 : vector<1x6x32xbf16> to vector<6x32xbf16>
    %cst_24 = arith.constant dense<0.000000e+00> : vector<6x64xf32>
    %30 = tpu.matmul %29, %4, %cst_24 {dimension_numbers = #tpu.dot_dimension_numbers<[1], [0], [0], [1], [0, 0, 1, 1], [], []>} : vector<6x32xbf16>, vector<32x64xbf16>, vector<6x64xf32> -> vector<6x64xf32>
    %31 = arith.truncf %30 : vector<6x64xf32> to vector<6x64xbf16>
    %c3_25 = arith.constant 3 : index
    %c0_26 = arith.constant 0 : index
    %c0_27 = arith.constant 0 : index
    %32 = vector.load %arg2[%c3_25, %c0_26, %c0_27] : memref<8x64x576xbf16, #tpu.memory_space<vmem>>, vector<1x64x576xbf16>
    %33 = vector.shape_cast %32 : vector<1x64x576xbf16> to vector<64x576xbf16>
    %cst_28 = arith.constant dense<0.000000e+00> : vector<6x576xf32>
    %34 = tpu.matmul %31, %33, %cst_28 {dimension_numbers = #tpu.dot_dimension_numbers<[1], [0], [0], [1], [0, 0, 1, 1], [], []>} : vector<6x64xbf16>, vector<64x576xbf16>, vector<6x576xf32> -> vector<6x576xf32>
    %35 = arith.addf %27, %34 : vector<6x576xf32>
    %c4 = arith.constant 4 : index
    %c0_29 = arith.constant 0 : index
    %c0_30 = arith.constant 0 : index
    %36 = vector.load %arg1[%c4, %c0_29, %c0_30] : memref<8x6x32xbf16, #tpu.memory_space<vmem>>, vector<1x6x32xbf16>
    %37 = vector.shape_cast %36 : vector<1x6x32xbf16> to vector<6x32xbf16>
    %cst_31 = arith.constant dense<0.000000e+00> : vector<6x64xf32>
    %38 = tpu.matmul %37, %4, %cst_31 {dimension_numbers = #tpu.dot_dimension_numbers<[1], [0], [0], [1], [0, 0, 1, 1], [], []>} : vector<6x32xbf16>, vector<32x64xbf16>, vector<6x64xf32> -> vector<6x64xf32>
    %39 = arith.truncf %38 : vector<6x64xf32> to vector<6x64xbf16>
    %c4_32 = arith.constant 4 : index
    %c0_33 = arith.constant 0 : index
    %c0_34 = arith.constant 0 : index
    %40 = vector.load %arg2[%c4_32, %c0_33, %c0_34] : memref<8x64x576xbf16, #tpu.memory_space<vmem>>, vector<1x64x576xbf16>
    %41 = vector.shape_cast %40 : vector<1x64x576xbf16> to vector<64x576xbf16>
    %cst_35 = arith.constant dense<0.000000e+00> : vector<6x576xf32>
    %42 = tpu.matmul %39, %41, %cst_35 {dimension_numbers = #tpu.dot_dimension_numbers<[1], [0], [0], [1], [0, 0, 1, 1], [], []>} : vector<6x64xbf16>, vector<64x576xbf16>, vector<6x576xf32> -> vector<6x576xf32>
    %43 = arith.addf %35, %42 : vector<6x576xf32>
    %c5 = arith.constant 5 : index
    %c0_36 = arith.constant 0 : index
    %c0_37 = arith.constant 0 : index
    %44 = vector.load %arg1[%c5, %c0_36, %c0_37] : memref<8x6x32xbf16, #tpu.memory_space<vmem>>, vector<1x6x32xbf16>
    %45 = vector.shape_cast %44 : vector<1x6x32xbf16> to vector<6x32xbf16>
    %cst_38 = arith.constant dense<0.000000e+00> : vector<6x64xf32>
    %46 = tpu.matmul %45, %4, %cst_38 {dimension_numbers = #tpu.dot_dimension_numbers<[1], [0], [0], [1], [0, 0, 1, 1], [], []>} : vector<6x32xbf16>, vector<32x64xbf16>, vector<6x64xf32> -> vector<6x64xf32>
    %47 = arith.truncf %46 : vector<6x64xf32> to vector<6x64xbf16>
    %c5_39 = arith.constant 5 : index
    %c0_40 = arith.constant 0 : index
    %c0_41 = arith.constant 0 : index
    %48 = vector.load %arg2[%c5_39, %c0_40, %c0_41] : memref<8x64x576xbf16, #tpu.memory_space<vmem>>, vector<1x64x576xbf16>
    %49 = vector.shape_cast %48 : vector<1x64x576xbf16> to vector<64x576xbf16>
    %cst_42 = arith.constant dense<0.000000e+00> : vector<6x576xf32>
    %50 = tpu.matmul %47, %49, %cst_42 {dimension_numbers = #tpu.dot_dimension_numbers<[1], [0], [0], [1], [0, 0, 1, 1], [], []>} : vector<6x64xbf16>, vector<64x576xbf16>, vector<6x576xf32> -> vector<6x576xf32>
    %51 = arith.addf %43, %50 : vector<6x576xf32>
    %c6 = arith.constant 6 : index
    %c0_43 = arith.constant 0 : index
    %c0_44 = arith.constant 0 : index
    %52 = vector.load %arg1[%c6, %c0_43, %c0_44] : memref<8x6x32xbf16, #tpu.memory_space<vmem>>, vector<1x6x32xbf16>
    %53 = vector.shape_cast %52 : vector<1x6x32xbf16> to vector<6x32xbf16>
    %cst_45 = arith.constant dense<0.000000e+00> : vector<6x64xf32>
    %54 = tpu.matmul %53, %4, %cst_45 {dimension_numbers = #tpu.dot_dimension_numbers<[1], [0], [0], [1], [0, 0, 1, 1], [], []>} : vector<6x32xbf16>, vector<32x64xbf16>, vector<6x64xf32> -> vector<6x64xf32>
    %55 = arith.truncf %54 : vector<6x64xf32> to vector<6x64xbf16>
    %c6_46 = arith.constant 6 : index
    %c0_47 = arith.constant 0 : index
    %c0_48 = arith.constant 0 : index
    %56 = vector.load %arg2[%c6_46, %c0_47, %c0_48] : memref<8x64x576xbf16, #tpu.memory_space<vmem>>, vector<1x64x576xbf16>
    %57 = vector.shape_cast %56 : vector<1x64x576xbf16> to vector<64x576xbf16>
    %cst_49 = arith.constant dense<0.000000e+00> : vector<6x576xf32>
    %58 = tpu.matmul %55, %57, %cst_49 {dimension_numbers = #tpu.dot_dimension_numbers<[1], [0], [0], [1], [0, 0, 1, 1], [], []>} : vector<6x64xbf16>, vector<64x576xbf16>, vector<6x576xf32> -> vector<6x576xf32>
    %59 = arith.addf %51, %58 : vector<6x576xf32>
    %c7 = arith.constant 7 : index
    %c0_50 = arith.constant 0 : index
    %c0_51 = arith.constant 0 : index
    %60 = vector.load %arg1[%c7, %c0_50, %c0_51] : memref<8x6x32xbf16, #tpu.memory_space<vmem>>, vector<1x6x32xbf16>
    %61 = vector.shape_cast %60 : vector<1x6x32xbf16> to vector<6x32xbf16>
    %cst_52 = arith.constant dense<0.000000e+00> : vector<6x64xf32>
    %62 = tpu.matmul %61, %4, %cst_52 {dimension_numbers = #tpu.dot_dimension_numbers<[1], [0], [0], [1], [0, 0, 1, 1], [], []>} : vector<6x32xbf16>, vector<32x64xbf16>, vector<6x64xf32> -> vector<6x64xf32>
    %63 = arith.truncf %62 : vector<6x64xf32> to vector<6x64xbf16>
    %c7_53 = arith.constant 7 : index
    %c0_54 = arith.constant 0 : index
    %c0_55 = arith.constant 0 : index
    %64 = vector.load %arg2[%c7_53, %c0_54, %c0_55] : memref<8x64x576xbf16, #tpu.memory_space<vmem>>, vector<1x64x576xbf16>
    %65 = vector.shape_cast %64 : vector<1x64x576xbf16> to vector<64x576xbf16>
    %cst_56 = arith.constant dense<0.000000e+00> : vector<6x576xf32>
    %66 = tpu.matmul %63, %65, %cst_56 {dimension_numbers = #tpu.dot_dimension_numbers<[1], [0], [0], [1], [0, 0, 1, 1], [], []>} : vector<6x64xbf16>, vector<64x576xbf16>, vector<6x576xf32> -> vector<6x576xf32>
    %67 = arith.addf %59, %66 : vector<6x576xf32>
    %c0_57 = arith.constant 0 : index
    %c0_58 = arith.constant 0 : index
    %68 = vector.load %arg3[%c0_57, %c0_58] : memref<1x576xf32, #tpu.memory_space<vmem>>, vector<1x576xf32>
    %69 = vector.broadcast %68 : vector<1x576xf32> to vector<6x576xf32>
    %70 = arith.addf %67, %69 : vector<6x576xf32>
    %cst_59 = arith.constant 0.000000e+00 : f32
    %71 = vector.broadcast %cst_59 : f32 to vector<6x576xf32>
    %72 = arith.maximumf %70, %71 : vector<6x576xf32>
    %73 = arith.truncf %72 : vector<6x576xf32> to vector<6x576xbf16>
    %c0_60 = arith.constant 0 : index
    %c0_61 = arith.constant 0 : index
    %74 = vector.load %arg4[%c0_60, %c0_61] : memref<576x144xbf16, #tpu.memory_space<vmem>>, vector<576x144xbf16>
    %cst_62 = arith.constant dense<0.000000e+00> : vector<6x144xf32>
    %75 = tpu.matmul %73, %74, %cst_62 {dimension_numbers = #tpu.dot_dimension_numbers<[1], [0], [0], [1], [0, 0, 1, 1], [], []>} : vector<6x576xbf16>, vector<576x144xbf16>, vector<6x144xf32> -> vector<6x144xf32>
    %c0_63 = arith.constant 0 : index
    %c0_64 = arith.constant 0 : index
    %76 = vector.load %arg5[%c0_63, %c0_64] : memref<1x144xf32, #tpu.memory_space<vmem>>, vector<1x144xf32>
    %77 = vector.broadcast %76 : vector<1x144xf32> to vector<6x144xf32>
    %78 = arith.addf %75, %77 : vector<6x144xf32>
    %cst_65 = arith.constant 0.000000e+00 : f32
    %79 = vector.broadcast %cst_65 : f32 to vector<6x144xf32>
    %80 = arith.maximumf %78, %79 : vector<6x144xf32>
    %c0_66 = arith.constant 0 : index
    %c0_67 = arith.constant 0 : index
    %81 = vector.load %arg12[%c0_66, %c0_67] : memref<6x144xf32, #tpu.memory_space<vmem>>, vector<6x144xf32>
    tpu.vector_store %arg12[%c0_66, %c0_67], %80 {strides = array<i32>} : memref<6x144xf32, #tpu.memory_space<vmem>>, vector<6x144xf32>,
    %c0_i32_68 = arith.constant 0 : i32
    %82 = tpu.memref_slice %arg16[%c0_i32_68] : memref<2x!tpu.dma_semaphore, #tpu.memory_space<semaphore_mem>> -> memref<1x!tpu.dma_semaphore, #tpu.memory_space<semaphore_mem>>
    %83 = tpu.memref_squeeze %82 : memref<1x!tpu.dma_semaphore, #tpu.memory_space<semaphore_mem>> -> memref<!tpu.dma_semaphore, #tpu.memory_space<semaphore_mem>>
    tpu.wait_dma2 semaphore(%83 : memref<!tpu.dma_semaphore, #tpu.memory_space<semaphore_mem>>) src(%arg7 : memref<3x144x1344xbf16, #tpu.memory_space<any>>) dst(%arg14 : memref<3x144x1344xbf16, #tpu.memory_space<vmem>>)
    %c1_i32_69 = arith.constant 1 : i32
    %84 = tpu.memref_slice %arg16[%c1_i32_69] : memref<2x!tpu.dma_semaphore, #tpu.memory_space<semaphore_mem>> -> memref<1x!tpu.dma_semaphore, #tpu.memory_space<semaphore_mem>>
    %85 = tpu.memref_squeeze %84 : memref<1x!tpu.dma_semaphore, #tpu.memory_space<semaphore_mem>> -> memref<!tpu.dma_semaphore, #tpu.memory_space<semaphore_mem>>
    tpu.wait_dma2 semaphore(%85 : memref<!tpu.dma_semaphore, #tpu.memory_space<semaphore_mem>>) src(%arg10 : memref<4x1344x64xbf16, #tpu.memory_space<any>>) dst(%arg15 : memref<4x1344x64xbf16, #tpu.memory_space<vmem>>)
    %86 = arith.truncf %80 : vector<6x144xf32> to vector<6x144xbf16>
    %c0_70 = arith.constant 0 : index
    %c0_71 = arith.constant 0 : index
    %c0_72 = arith.constant 0 : index
    %87 = vector.load %arg14[%c0_70, %c0_71, %c0_72] : memref<3x144x1344xbf16, #tpu.memory_space<vmem>>, vector<1x144x1344xbf16>
    %88 = vector.shape_cast %87 : vector<1x144x1344xbf16> to vector<144x1344xbf16>
    %cst_73 = arith.constant dense<0.000000e+00> : vector<6x1344xf32>
    %89 = tpu.matmul %86, %88, %cst_73 {dimension_numbers = #tpu.dot_dimension_numbers<[1], [0], [0], [1], [0, 0, 1, 1], [], []>} : vector<6x144xbf16>, vector<144x1344xbf16>, vector<6x1344xf32> -> vector<6x1344xf32>
    %c0_74 = arith.constant 0 : index
    %c0_75 = arith.constant 0 : index
    %c0_76 = arith.constant 0 : index
    %90 = vector.load %arg6[%c0_74, %c0_75, %c0_76] : memref<3x14x6xbf16, #tpu.memory_space<vmem>>, vector<1x14x6xbf16>
    %91 = vector.shape_cast %90 : vector<1x14x6xbf16> to vector<14x6xbf16>
    %92 = arith.truncf %89 : vector<6x1344xf32> to vector<6x1344xbf16>
    %cst_77 = arith.constant dense<0.000000e+00> : vector<14x1344xf32>
    %93 = tpu.matmul %91, %92, %cst_77 {dimension_numbers = #tpu.dot_dimension_numbers<[1], [0], [0], [1], [0, 0, 1, 1], [], []>} : vector<14x6xbf16>, vector<6x1344xbf16>, vector<14x1344xf32> -> vector<14x1344xf32>
    %c1_78 = arith.constant 1 : index
    %c0_79 = arith.constant 0 : index
    %c0_80 = arith.constant 0 : index
    %94 = vector.load %arg14[%c1_78, %c0_79, %c0_80] : memref<3x144x1344xbf16, #tpu.memory_space<vmem>>, vector<1x144x1344xbf16>
    %95 = vector.shape_cast %94 : vector<1x144x1344xbf16> to vector<144x1344xbf16>
    %cst_81 = arith.constant dense<0.000000e+00> : vector<6x1344xf32>
    %96 = tpu.matmul %86, %95, %cst_81 {dimension_numbers = #tpu.dot_dimension_numbers<[1], [0], [0], [1], [0, 0, 1, 1], [], []>} : vector<6x144xbf16>, vector<144x1344xbf16>, vector<6x1344xf32> -> vector<6x1344xf32>
    %c1_82 = arith.constant 1 : index
    %c0_83 = arith.constant 0 : index
    %c0_84 = arith.constant 0 : index
    %97 = vector.load %arg6[%c1_82, %c0_83, %c0_84] : memref<3x14x6xbf16, #tpu.memory_space<vmem>>, vector<1x14x6xbf16>
    %98 = vector.shape_cast %97 : vector<1x14x6xbf16> to vector<14x6xbf16>
    %99 = arith.truncf %96 : vector<6x1344xf32> to vector<6x1344xbf16>
    %cst_85 = arith.constant dense<0.000000e+00> : vector<14x1344xf32>
    %100 = tpu.matmul %98, %99, %cst_85 {dimension_numbers = #tpu.dot_dimension_numbers<[1], [0], [0], [1], [0, 0, 1, 1], [], []>} : vector<14x6xbf16>, vector<6x1344xbf16>, vector<14x1344xf32> -> vector<14x1344xf32>
    %101 = arith.addf %93, %100 : vector<14x1344xf32>
    %c2_86 = arith.constant 2 : index
    %c0_87 = arith.constant 0 : index
    %c0_88 = arith.constant 0 : index
    %102 = vector.load %arg14[%c2_86, %c0_87, %c0_88] : memref<3x144x1344xbf16, #tpu.memory_space<vmem>>, vector<1x144x1344xbf16>
    %103 = vector.shape_cast %102 : vector<1x144x1344xbf16> to vector<144x1344xbf16>
    %cst_89 = arith.constant dense<0.000000e+00> : vector<6x1344xf32>
    %104 = tpu.matmul %86, %103, %cst_89 {dimension_numbers = #tpu.dot_dimension_numbers<[1], [0], [0], [1], [0, 0, 1, 1], [], []>} : vector<6x144xbf16>, vector<144x1344xbf16>, vector<6x1344xf32> -> vector<6x1344xf32>
    %c2_90 = arith.constant 2 : index
    %c0_91 = arith.constant 0 : index
    %c0_92 = arith.constant 0 : index
    %105 = vector.load %arg6[%c2_90, %c0_91, %c0_92] : memref<3x14x6xbf16, #tpu.memory_space<vmem>>, vector<1x14x6xbf16>
    %106 = vector.shape_cast %105 : vector<1x14x6xbf16> to vector<14x6xbf16>
    %107 = arith.truncf %104 : vector<6x1344xf32> to vector<6x1344xbf16>
    %cst_93 = arith.constant dense<0.000000e+00> : vector<14x1344xf32>
    %108 = tpu.matmul %106, %107, %cst_93 {dimension_numbers = #tpu.dot_dimension_numbers<[1], [0], [0], [1], [0, 0, 1, 1], [], []>} : vector<14x6xbf16>, vector<6x1344xbf16>, vector<14x1344xf32> -> vector<14x1344xf32>
    %109 = arith.addf %101, %108 : vector<14x1344xf32>
    %c0_94 = arith.constant 0 : index
    %c0_95 = arith.constant 0 : index
    %110 = vector.load %arg8[%c0_94, %c0_95] : memref<1x1344xf32, #tpu.memory_space<vmem>>, vector<1x1344xf32>
    %111 = vector.broadcast %110 : vector<1x1344xf32> to vector<14x1344xf32>
    %112 = arith.addf %109, %111 : vector<14x1344xf32>
    %cst_96 = arith.constant 0.000000e+00 : f32
    %113 = vector.broadcast %cst_96 : f32 to vector<14x1344xf32>
    %114 = arith.maximumf %112, %113 : vector<14x1344xf32>
    %115 = arith.truncf %114 : vector<14x1344xf32> to vector<14x1344xbf16>
    %c0_97 = arith.constant 0 : index
    %c0_98 = arith.constant 0 : index
    %c0_99 = arith.constant 0 : index
    %116 = vector.load %arg15[%c0_97, %c0_98, %c0_99] : memref<4x1344x64xbf16, #tpu.memory_space<vmem>>, vector<1x1344x64xbf16>
    %117 = vector.shape_cast %116 : vector<1x1344x64xbf16> to vector<1344x64xbf16>
    %cst_100 = arith.constant dense<0.000000e+00> : vector<14x64xf32>
    %118 = tpu.matmul %115, %117, %cst_100 {dimension_numbers = #tpu.dot_dimension_numbers<[1], [0], [0], [1], [0, 0, 1, 1], [], []>} : vector<14x1344xbf16>, vector<1344x64xbf16>, vector<14x64xf32> -> vector<14x64xf32>
    %c0_101 = arith.constant 0 : index
    %c0_102 = arith.constant 0 : index
    %c0_103 = arith.constant 0 : index
    %119 = vector.load %arg9[%c0_101, %c0_102, %c0_103] : memref<4x32x14xbf16, #tpu.memory_space<vmem>>, vector<1x32x14xbf16>
    %120 = vector.shape_cast %119 : vector<1x32x14xbf16> to vector<32x14xbf16>
    %121 = arith.truncf %118 : vector<14x64xf32> to vector<14x64xbf16>
    %cst_104 = arith.constant dense<0.000000e+00> : vector<32x64xf32>
    %122 = tpu.matmul %120, %121, %cst_104 {dimension_numbers = #tpu.dot_dimension_numbers<[1], [0], [0], [1], [0, 0, 1, 1], [], []>} : vector<32x14xbf16>, vector<14x64xbf16>, vector<32x64xf32> -> vector<32x64xf32>
    %c1_105 = arith.constant 1 : index
    %c0_106 = arith.constant 0 : index
    %c0_107 = arith.constant 0 : index
    %123 = vector.load %arg15[%c1_105, %c0_106, %c0_107] : memref<4x1344x64xbf16, #tpu.memory_space<vmem>>, vector<1x1344x64xbf16>
    %124 = vector.shape_cast %123 : vector<1x1344x64xbf16> to vector<1344x64xbf16>
    %cst_108 = arith.constant dense<0.000000e+00> : vector<14x64xf32>
    %125 = tpu.matmul %115, %124, %cst_108 {dimension_numbers = #tpu.dot_dimension_numbers<[1], [0], [0], [1], [0, 0, 1, 1], [], []>} : vector<14x1344xbf16>, vector<1344x64xbf16>, vector<14x64xf32> -> vector<14x64xf32>
    %c1_109 = arith.constant 1 : index
    %c0_110 = arith.constant 0 : index
    %c0_111 = arith.constant 0 : index
    %126 = vector.load %arg9[%c1_109, %c0_110, %c0_111] : memref<4x32x14xbf16, #tpu.memory_space<vmem>>, vector<1x32x14xbf16>
    %127 = vector.shape_cast %126 : vector<1x32x14xbf16> to vector<32x14xbf16>
    %128 = arith.truncf %125 : vector<14x64xf32> to vector<14x64xbf16>
    %cst_112 = arith.constant dense<0.000000e+00> : vector<32x64xf32>
    %129 = tpu.matmul %127, %128, %cst_112 {dimension_numbers = #tpu.dot_dimension_numbers<[1], [0], [0], [1], [0, 0, 1, 1], [], []>} : vector<32x14xbf16>, vector<14x64xbf16>, vector<32x64xf32> -> vector<32x64xf32>
    %130 = arith.addf %122, %129 : vector<32x64xf32>
    %c2_113 = arith.constant 2 : index
    %c0_114 = arith.constant 0 : index
    %c0_115 = arith.constant 0 : index
    %131 = vector.load %arg15[%c2_113, %c0_114, %c0_115] : memref<4x1344x64xbf16, #tpu.memory_space<vmem>>, vector<1x1344x64xbf16>
    %132 = vector.shape_cast %131 : vector<1x1344x64xbf16> to vector<1344x64xbf16>
    %cst_116 = arith.constant dense<0.000000e+00> : vector<14x64xf32>
    %133 = tpu.matmul %115, %132, %cst_116 {dimension_numbers = #tpu.dot_dimension_numbers<[1], [0], [0], [1], [0, 0, 1, 1], [], []>} : vector<14x1344xbf16>, vector<1344x64xbf16>, vector<14x64xf32> -> vector<14x64xf32>
    %c2_117 = arith.constant 2 : index
    %c0_118 = arith.constant 0 : index
    %c0_119 = arith.constant 0 : index
    %134 = vector.load %arg9[%c2_117, %c0_118, %c0_119] : memref<4x32x14xbf16, #tpu.memory_space<vmem>>, vector<1x32x14xbf16>
    %135 = vector.shape_cast %134 : vector<1x32x14xbf16> to vector<32x14xbf16>
    %136 = arith.truncf %133 : vector<14x64xf32> to vector<14x64xbf16>
    %cst_120 = arith.constant dense<0.000000e+00> : vector<32x64xf32>
    %137 = tpu.matmul %135, %136, %cst_120 {dimension_numbers = #tpu.dot_dimension_numbers<[1], [0], [0], [1], [0, 0, 1, 1], [], []>} : vector<32x14xbf16>, vector<14x64xbf16>, vector<32x64xf32> -> vector<32x64xf32>
    %138 = arith.addf %130, %137 : vector<32x64xf32>
    %c3_121 = arith.constant 3 : index
    %c0_122 = arith.constant 0 : index
    %c0_123 = arith.constant 0 : index
    %139 = vector.load %arg15[%c3_121, %c0_122, %c0_123] : memref<4x1344x64xbf16, #tpu.memory_space<vmem>>, vector<1x1344x64xbf16>
    %140 = vector.shape_cast %139 : vector<1x1344x64xbf16> to vector<1344x64xbf16>
    %cst_124 = arith.constant dense<0.000000e+00> : vector<14x64xf32>
    %141 = tpu.matmul %115, %140, %cst_124 {dimension_numbers = #tpu.dot_dimension_numbers<[1], [0], [0], [1], [0, 0, 1, 1], [], []>} : vector<14x1344xbf16>, vector<1344x64xbf16>, vector<14x64xf32> -> vector<14x64xf32>
    %c3_125 = arith.constant 3 : index
    %c0_126 = arith.constant 0 : index
    %c0_127 = arith.constant 0 : index
    %142 = vector.load %arg9[%c3_125, %c0_126, %c0_127] : memref<4x32x14xbf16, #tpu.memory_space<vmem>>, vector<1x32x14xbf16>
    %143 = vector.shape_cast %142 : vector<1x32x14xbf16> to vector<32x14xbf16>
    %144 = arith.truncf %141 : vector<14x64xf32> to vector<14x64xbf16>
    %cst_128 = arith.constant dense<0.000000e+00> : vector<32x64xf32>
    %145 = tpu.matmul %143, %144, %cst_128 {dimension_numbers = #tpu.dot_dimension_numbers<[1], [0], [0], [1], [0, 0, 1, 1], [], []>} : vector<32x14xbf16>, vector<14x64xbf16>, vector<32x64xf32> -> vector<32x64xf32>
    %146 = arith.addf %138, %145 : vector<32x64xf32>
    %c0_129 = arith.constant 0 : index
    %c0_130 = arith.constant 0 : index
    %147 = vector.load %arg11[%c0_129, %c0_130] : memref<1x64xf32, #tpu.memory_space<vmem>>, vector<1x64xf32>
    %148 = vector.broadcast %147 : vector<1x64xf32> to vector<32x64xf32>
    %149 = arith.addf %146, %148 : vector<32x64xf32>
    %150 = math.tanh %149 : vector<32x64xf32>
    %c0_131 = arith.constant 0 : index
    %c0_132 = arith.constant 0 : index
    %151 = vector.load %arg13[%c0_131, %c0_132] : memref<32x64xf32, #tpu.memory_space<vmem>>, vector<32x64xf32>
    tpu.vector_store %arg13[%c0_131, %c0_132], %150 {strides = array<i32>} : memref<32x64xf32, #tpu.memory_space<vmem>>, vector<32x64xf32>,
    return
  }
}

</mosaic_0001>

<bundles_post_ra>
// kernel: magno_forward.1
= control target key start
LH: loop header
LB: loop body
LE: loop exit
PB: predicated region body
PF: predicated region fallthrough
CT: control target
= control target key end

     0   :  { %s19549_s0 = inlined_call_operand.vmem [shape: bf16[32,64], index: 0, kind: input, shape index: {}]   ;;  %s19550_s1 = inlined_call_operand.vmem [shape: bf16[8,6,32], index: 1, kind: input, shape index: {}]   ;;  %s19551_s2 = inlined_call_operand.vmem [shape: bf16[8,64,576], index: 2, kind: input, shape index: {}]   ;;  %s19552_s3 = inlined_call_operand.vmem [shape: f32[1,576], index: 3, kind: input, shape index: {}]   ;;  %s19553_s4 = inlined_call_operand.vmem [shape: bf16[576,144], index: 4, kind: input, shape index: {}]   ;;  %s19554_s5 = inlined_call_operand.vmem [shape: f32[1,144], index: 5, kind: input, shape index: {}]   ;;  %s19555_s6 = inlined_call_operand.vmem [shape: bf16[3,14,6], index: 6, kind: input, shape index: {}]   ;;  %s19556_s7 = inlined_call_operand.vmem [shape: bf16[3,144,1344], index: 7, kind: input, shape index: {}]   ;;  %s19557_s8 = inlined_call_operand.vmem [shape: f32[1,1344], index: 8, kind: input, shape index: {}]   ;;  %s19558_s9 = inlined_call_operand.vmem [shape: bf16[4,32,14], index: 9, kind: input, shape index: {}]   ;;  %s19559_s10 = inlined_call_operand.vmem [shape: bf16[4,1344,64], index: 10, kind: input, shape index: {}]   ;;  %s19560_s11 = inlined_call_operand.vmem [shape: f32[1,64], index: 11, kind: input, shape index: {}]   ;;  %s19561_s12 = inlined_call_operand.vmem [shape: f32[6,144], index: 12, kind: output, shape index: {0}]   ;;  %s19562_s13 = inlined_call_operand.vmem [shape: f32[32,64], index: 13, kind: output, shape index: {1}]  }
   0x1   :  { %v57_v0 = vld [vmem:[%s19556_s7] sm:$0xf]  ;;  %v59_v1 = vld [vmem:[%s19556_s7 + $0x2c] sm:$0xf]  ;;  %v61_v2 = vld [vmem:[%s19556_s7 + $0x4] sm:$0xf] }
   0x2   :  { %58 = vst [vmem:[#allocation2] sm:$0xf] %v57_v0  ;;  %60 = vst [vmem:[#allocation2 + $0x4] sm:$0xf] %v59_v1  ;;  %v63_v3 = vld [vmem:[%s19556_s7 + $0x30] sm:$0xf] }
   0x3   :  { %62 = vst [vmem:[#allocation2 + $0x8] sm:$0xf] %v61_v2  ;;  %v65_v4 = vld [vmem:[%s19556_s7 + $0x8] sm:$0xf]  ;;  %v67_v5 = vld [vmem:[%s19556_s7 + $0x34] sm:$0xf] }
   0x4   :  { %64 = vst [vmem:[#allocation2 + $0xc] sm:$0xf] %v63_v3  ;;  %66 = vst [vmem:[#allocation2 + $0x10] sm:$0xf] %v65_v4  ;;  %v69_v6 = vld [vmem:[%s19556_s7 + $0xc] sm:$0xf] }
   0x5   :  { %68 = vst [vmem:[#allocation2 + $0x14] sm:$0xf] %v67_v5  ;;  %v71_v7 = vld [vmem:[%s19556_s7 + $0x38] sm:$0xf]  ;;  %v73_v8 = vld [vmem:[%s19556_s7 + $0x10] sm:$0xf] }
   0x6   :  { %70 = vst [vmem:[#allocation2 + $0x18] sm:$0xf] %v69_v6  ;;  %72 = vst [vmem:[#allocation2 + $0x1c] sm:$0xf] %v71_v7  ;;  %v75_v9 = vld [vmem:[%s19556_s7 + $0x3c] sm:$0xf] }
   0x7   :  { %74 = vst [vmem:[#allocation2 + $0x20] sm:$0xf] %v73_v8  ;;  %v77_v10 = vld [vmem:[%s19556_s7 + $0x14] sm:$0xf]  ;;  %v79_v11 = vld [vmem:[%s19556_s7 + $0x40] sm:$0xf] }
   0x8   :  { %76 = vst [vmem:[#allocation2 + $0x24] sm:$0xf] %v75_v9  ;;  %78 = vst [vmem:[#allocation2 + $0x28] sm:$0xf] %v77_v10  ;;  %v81_v12 = vld [vmem:[%s19556_s7 + $0x18] sm:$0xf] }
   0x9   :  { %80 = vst [vmem:[#allocation2 + $0x2c] sm:$0xf] %v79_v11  ;;  %v83_v13 = vld [vmem:[%s19556_s7 + $0x44] sm:$0xf]  ;;  %v85_v14 = vld [vmem:[%s19556_s7 + $0x1c] sm:$0xf] }
   0xa   :  { %82 = vst [vmem:[#allocation2 + $0x30] sm:$0xf] %v81_v12  ;;  %84 = vst [vmem:[#allocation2 + $0x34] sm:$0xf] %v83_v13  ;;  %v87_v15 = vld [vmem:[%s19556_s7 + $0x48] sm:$0xf] }
   0xb   :  { %86 = vst [vmem:[#allocation2 + $0x38] sm:$0xf] %v85_v14  ;;  %v89_v16 = vld [vmem:[%s19556_s7 + $0x20] sm:$0xf]  ;;  %v91_v17 = vld [vmem:[%s19556_s7 + $0x4c] sm:$0xf] }
   0xc   :  { %88 = vst [vmem:[#allocation2 + $0x3c] sm:$0xf] %v87_v15  ;;  %90 = vst [vmem:[#allocation2 + $0x40] sm:$0xf] %v89_v16  ;;  %v93_v18 = vld [vmem:[%s19556_s7 + $0x24] sm:$0xf] }
   0xd   :  { %92 = vst [vmem:[#allocation2 + $0x44] sm:$0xf] %v91_v17  ;;  %v95_v19 = vld [vmem:[%s19556_s7 + $0x50] sm:$0xf]  ;;  %v97_v20 = vld [vmem:[%s19556_s7 + $0x28] sm:$0xf] }
   0xe   :  { %94 = vst [vmem:[#allocation2 + $0x48] sm:$0xf] %v93_v18  ;;  %96 = vst [vmem:[#allocation2 + $0x4c] sm:$0xf] %v95_v19  ;;  %v99_v21 = vld [vmem:[%s19556_s7 + $0x54] sm:$0xff]   ;;  %v143_v42 = vld [vmem:[%s19556_s7 + $0xac] sm:$0xff]  }
   0xf   :  { %98 = vst [vmem:[#allocation2 + $0x50] sm:$0xf] %v97_v20  ;;  %v103_v22 = vld [vmem:[%s19556_s7 + $0x84] sm:$0xf]  ;;  %v105_v23 = vld [vmem:[%s19556_s7 + $0x5c] sm:$0xf] }
  0x10   :  { %100 = vst [vmem:[#allocation2 + $0x54] sm:$0xff] %v99_v21   ;;  %104 = vst [vmem:[#allocation2 + $0x5c] sm:$0xf] %v103_v22  ;;  %v107_v24 = vld [vmem:[%s19556_s7 + $0x88] sm:$0xf]  ;;  %v231_v20 = vld [vmem:[%s19556_s7 + $0x15c] sm:$0xff]  }
  0x11   :  { %106 = vst [vmem:[#allocation2 + $0x60] sm:$0xf] %v105_v23  ;;  %v109_v25 = vld [vmem:[%s19556_s7 + $0x60] sm:$0xf]  ;;  %v111_v26 = vld [vmem:[%s19556_s7 + $0x8c] sm:$0xf] }
  0x12   :  { %108 = vst [vmem:[#allocation2 + $0x64] sm:$0xf] %v107_v24  ;;  %110 = vst [vmem:[#allocation2 + $0x68] sm:$0xf] %v109_v25  ;;  %v113_v27 = vld [vmem:[%s19556_s7 + $0x64] sm:$0xf] }
  0x13   :  { %112 = vst [vmem:[#allocation2 + $0x6c] sm:$0xf] %v111_v26  ;;  %v115_v28 = vld [vmem:[%s19556_s7 + $0x90] sm:$0xf]  ;;  %v117_v29 = vld [vmem:[%s19556_s7 + $0x68] sm:$0xf] }
  0x14   :  { %114 = vst [vmem:[#allocation2 + $0x70] sm:$0xf] %v113_v27  ;;  %116 = vst [vmem:[#allocation2 + $0x74] sm:$0xf] %v115_v28  ;;  %v119_v30 = vld [vmem:[%s19556_s7 + $0x94] sm:$0xf] }
  0x15   :  { %118 = vst [vmem:[#allocation2 + $0x78] sm:$0xf] %v117_v29  ;;  %v121_v31 = vld [vmem:[%s19556_s7 + $0x6c] sm:$0xf]  ;;  %v123_v32 = vld [vmem:[%s19556_s7 + $0x98] sm:$0xf] }
  0x16   :  { %120 = vst [vmem:[#allocation2 + $0x7c] sm:$0xf] %v119_v30  ;;  %122 = vst [vmem:[#allocation2 + $0x80] sm:$0xf] %v121_v31  ;;  %v125_v33 = vld [vmem:[%s19556_s7 + $0x70] sm:$0xf] }
  0x17   :  { %124 = vst [vmem:[#allocation2 + $0x84] sm:$0xf] %v123_v32  ;;  %v127_v34 = vld [vmem:[%s19556_s7 + $0x9c] sm:$0xf]  ;;  %v129_v35 = vld [vmem:[%s19556_s7 + $0x74] sm:$0xf] }
  0x18   :  { %126 = vst [vmem:[#allocation2 + $0x88] sm:$0xf] %v125_v33  ;;  %128 = vst [vmem:[#allocation2 + $0x8c] sm:$0xf] %v127_v34  ;;  %v131_v36 = vld [vmem:[%s19556_s7 + $0xa0] sm:$0xf] }
  0x19   :  { %130 = vst [vmem:[#allocation2 + $0x90] sm:$0xf] %v129_v35  ;;  %v133_v37 = vld [vmem:[%s19556_s7 + $0x78] sm:$0xf]  ;;  %v135_v38 = vld [vmem:[%s19556_s7 + $0xa4] sm:$0xf] }
  0x1a   :  { %132 = vst [vmem:[#allocation2 + $0x94] sm:$0xf] %v131_v36  ;;  %134 = vst [vmem:[#allocation2 + $0x98] sm:$0xf] %v133_v37  ;;  %v137_v39 = vld [vmem:[%s19556_s7 + $0x7c] sm:$0xf] }
  0x1b   :  { %136 = vst [vmem:[#allocation2 + $0x9c] sm:$0xf] %v135_v38  ;;  %v139_v40 = vld [vmem:[%s19556_s7 + $0xa8] sm:$0xf]  ;;  %v141_v41 = vld [vmem:[%s19556_s7 + $0x80] sm:$0xf] }
  0x1c   :  { %138 = vst [vmem:[#allocation2 + $0xa0] sm:$0xf] %v137_v39  ;;  %140 = vst [vmem:[#allocation2 + $0xa4] sm:$0xf] %v139_v40  ;;  %v147_v43 = vld [vmem:[%s19556_s7 + $0xdc] sm:$0xf] }
  0x1d   :  { %142 = vst [vmem:[#allocation2 + $0xa8] sm:$0xf] %v141_v41  ;;  %v149_v44 = vld [vmem:[%s19556_s7 + $0xb4] sm:$0xf]  ;;  %144 = vst [vmem:[#allocation2 + $0xac] sm:$0xff] %v143_v42   ;;  %v187_v63 = vld [vmem:[%s19556_s7 + $0x104] sm:$0xff]  }
  0x1e   :  { %148 = vst [vmem:[#allocation2 + $0xb4] sm:$0xf] %v147_v43  ;;  %150 = vst [vmem:[#allocation2 + $0xb8] sm:$0xf] %v149_v44  ;;  %v151_v45 = vld [vmem:[%s19556_s7 + $0xe0] sm:$0xf] }
  0x1f   :  { %v153_v46 = vld [vmem:[%s19556_s7 + $0xb8] sm:$0xf]  ;;  %v155_v47 = vld [vmem:[%s19556_s7 + $0xe4] sm:$0xf]  ;;  %152 = vst [vmem:[#allocation2 + $0xbc] sm:$0xf] %v151_v45 }
  0x20   :  { %154 = vst [vmem:[#allocation2 + $0xc0] sm:$0xf] %v153_v46  ;;  %156 = vst [vmem:[#allocation2 + $0xc4] sm:$0xf] %v155_v47  ;;  %v157_v48 = vld [vmem:[%s19556_s7 + $0xbc] sm:$0xf] }
  0x21   :  { %v159_v49 = vld [vmem:[%s19556_s7 + $0xe8] sm:$0xf]  ;;  %v161_v50 = vld [vmem:[%s19556_s7 + $0xc0] sm:$0xf]  ;;  %158 = vst [vmem:[#allocation2 + $0xc8] sm:$0xf] %v157_v48 }
  0x22   :  { %160 = vst [vmem:[#allocation2 + $0xcc] sm:$0xf] %v159_v49  ;;  %162 = vst [vmem:[#allocation2 + $0xd0] sm:$0xf] %v161_v50  ;;  %v163_v51 = vld [vmem:[%s19556_s7 + $0xec] sm:$0xf] }
  0x23   :  { %v165_v52 = vld [vmem:[%s19556_s7 + $0xc4] sm:$0xf]  ;;  %v167_v53 = vld [vmem:[%s19556_s7 + $0xf0] sm:$0xf]  ;;  %164 = vst [vmem:[#allocation2 + $0xd4] sm:$0xf] %v163_v51 }
  0x24   :  { %166 = vst [vmem:[#allocation2 + $0xd8] sm:$0xf] %v165_v52  ;;  %168 = vst [vmem:[#allocation2 + $0xdc] sm:$0xf] %v167_v53  ;;  %v169_v54 = vld [vmem:[%s19556_s7 + $0xc8] sm:$0xf] }
  0x25   :  { %v171_v55 = vld [vmem:[%s19556_s7 + $0xf4] sm:$0xf]  ;;  %v173_v56 = vld [vmem:[%s19556_s7 + $0xcc] sm:$0xf]  ;;  %170 = vst [vmem:[#allocation2 + $0xe0] sm:$0xf] %v169_v54 }
  0x26   :  { %172 = vst [vmem:[#allocation2 + $0xe4] sm:$0xf] %v171_v55  ;;  %174 = vst [vmem:[#allocation2 + $0xe8] sm:$0xf] %v173_v56  ;;  %v175_v57 = vld [vmem:[%s19556_s7 + $0xf8] sm:$0xf] }
  0x27   :  { %v177_v58 = vld [vmem:[%s19556_s7 + $0xd0] sm:$0xf]  ;;  %v179_v59 = vld [vmem:[%s19556_s7 + $0xfc] sm:$0xf]  ;;  %176 = vst [vmem:[#allocation2 + $0xec] sm:$0xf] %v175_v57 }
  0x28   :  { %178 = vst [vmem:[#allocation2 + $0xf0] sm:$0xf] %v177_v58  ;;  %180 = vst [vmem:[#allocation2 + $0xf4] sm:$0xf] %v179_v59  ;;  %v181_v60 = vld [vmem:[%s19556_s7 + $0xd4] sm:$0xf] }
  0x29   :  { %v183_v61 = vld [vmem:[%s19556_s7 + $0x100] sm:$0xf]  ;;  %v185_v62 = vld [vmem:[%s19556_s7 + $0xd8] sm:$0xf]  ;;  %182 = vst [vmem:[#allocation2 + $0xf8] sm:$0xf] %v181_v60 }
  0x2a   :  { %184 = vst [vmem:[#allocation2 + $0xfc] sm:$0xf] %v183_v61  ;;  %186 = vst [vmem:[#allocation2 + $0x100] sm:$0xf] %v185_v62  ;;  %v191_v0 = vld [vmem:[%s19556_s7 + $0x134] sm:$0xf] }
  0x2b   :  { %v193_v1 = vld [vmem:[%s19556_s7 + $0x10c] sm:$0xf]  ;;  %188 = vst [vmem:[#allocation2 + $0x104] sm:$0xff] %v187_v63   ;;  %192 = vst [vmem:[#allocation2 + $0x10c] sm:$0xf] %v191_v0  ;;  %v275_v41 = vld [vmem:[%s19556_s7 + $0x1b4] sm:$0xff]  }
  0x2c   :  { %194 = vst [vmem:[#allocation2 + $0x110] sm:$0xf] %v193_v1  ;;  %v195_v2 = vld [vmem:[%s19556_s7 + $0x138] sm:$0xf]  ;;  %v197_v3 = vld [vmem:[%s19556_s7 + $0x110] sm:$0xf] }
  0x2d   :  { %v199_v4 = vld [vmem:[%s19556_s7 + $0x13c] sm:$0xf]  ;;  %196 = vst [vmem:[#allocation2 + $0x114] sm:$0xf] %v195_v2  ;;  %198 = vst [vmem:[#allocation2 + $0x118] sm:$0xf] %v197_v3 }
  0x2e   :  { %200 = vst [vmem:[#allocation2 + $0x11c] sm:$0xf] %v199_v4  ;;  %v201_v5 = vld [vmem:[%s19556_s7 + $0x114] sm:$0xf]  ;;  %v203_v6 = vld [vmem:[%s19556_s7 + $0x140] sm:$0xf] }
  0x2f   :  { %v205_v7 = vld [vmem:[%s19556_s7 + $0x118] sm:$0xf]  ;;  %202 = vst [vmem:[#allocation2 + $0x120] sm:$0xf] %v201_v5  ;;  %204 = vst [vmem:[#allocation2 + $0x124] sm:$0xf] %v203_v6 }
  0x30   :  { %206 = vst [vmem:[#allocation2 + $0x128] sm:$0xf] %v205_v7  ;;  %v207_v8 = vld [vmem:[%s19556_s7 + $0x144] sm:$0xf]  ;;  %v209_v9 = vld [vmem:[%s19556_s7 + $0x11c] sm:$0xf] }
  0x31   :  { %v211_v10 = vld [vmem:[%s19556_s7 + $0x148] sm:$0xf]  ;;  %208 = vst [vmem:[#allocation2 + $0x12c] sm:$0xf] %v207_v8  ;;  %210 = vst [vmem:[#allocation2 + $0x130] sm:$0xf] %v209_v9 }
  0x32   :  { %212 = vst [vmem:[#allocation2 + $0x134] sm:$0xf] %v211_v10  ;;  %v213_v11 = vld [vmem:[%s19556_s7 + $0x120] sm:$0xf]  ;;  %v215_v12 = vld [vmem:[%s19556_s7 + $0x14c] sm:$0xf] }
  0x33   :  { %v217_v13 = vld [vmem:[%s19556_s7 + $0x124] sm:$0xf]  ;;  %214 = vst [vmem:[#allocation2 + $0x138] sm:$0xf] %v213_v11  ;;  %216 = vst [vmem:[#allocation2 + $0x13c] sm:$0xf] %v215_v12 }
  0x34   :  { %218 = vst [vmem:[#allocation2 + $0x140] sm:$0xf] %v217_v13  ;;  %v219_v14 = vld [vmem:[%s19556_s7 + $0x150] sm:$0xf]  ;;  %v221_v15 = vld [vmem:[%s19556_s7 + $0x128] sm:$0xf] }
  0x35   :  { %v223_v16 = vld [vmem:[%s19556_s7 + $0x154] sm:$0xf]  ;;  %220 = vst [vmem:[#allocation2 + $0x144] sm:$0xf] %v219_v14  ;;  %222 = vst [vmem:[#allocation2 + $0x148] sm:$0xf] %v221_v15 }
  0x36   :  { %224 = vst [vmem:[#allocation2 + $0x14c] sm:$0xf] %v223_v16  ;;  %v225_v17 = vld [vmem:[%s19556_s7 + $0x12c] sm:$0xf]  ;;  %v227_v18 = vld [vmem:[%s19556_s7 + $0x158] sm:$0xf] }
  0x37   :  { %v229_v19 = vld [vmem:[%s19556_s7 + $0x130] sm:$0xf]  ;;  %226 = vst [vmem:[#allocation2 + $0x150] sm:$0xf] %v225_v17  ;;  %228 = vst [vmem:[#allocation2 + $0x154] sm:$0xf] %v227_v18 }
  0x38   :  { %230 = vst [vmem:[#allocation2 + $0x158] sm:$0xf] %v229_v19  ;;  %v235_v21 = vld [vmem:[%s19556_s7 + $0x18c] sm:$0xf]  ;;  %v237_v22 = vld [vmem:[%s19556_s7 + $0x164] sm:$0xf] }
  0x39   :  { %232 = vst [vmem:[#allocation2 + $0x15c] sm:$0xff] %v231_v20   ;;  %236 = vst [vmem:[#allocation2 + $0x164] sm:$0xf] %v235_v21  ;;  %v239_v23 = vld [vmem:[%s19556_s7 + $0x190] sm:$0xf]  ;;  %v363_v19 = vld [vmem:[%s19556_s7 + $0x264] sm:$0xff]  }
  0x3a   :  { %238 = vst [vmem:[#allocation2 + $0x168] sm:$0xf] %v237_v22  ;;  %v241_v24 = vld [vmem:[%s19556_s7 + $0x168] sm:$0xf]  ;;  %v243_v25 = vld [vmem:[%s19556_s7 + $0x194] sm:$0xf] }
  0x3b   :  { %240 = vst [vmem:[#allocation2 + $0x16c] sm:$0xf] %v239_v23  ;;  %242 = vst [vmem:[#allocation2 + $0x170] sm:$0xf] %v241_v24  ;;  %v245_v26 = vld [vmem:[%s19556_s7 + $0x16c] sm:$0xf] }
  0x3c   :  { %244 = vst [vmem:[#allocation2 + $0x174] sm:$0xf] %v243_v25  ;;  %v247_v27 = vld [vmem:[%s19556_s7 + $0x198] sm:$0xf]  ;;  %v249_v28 = vld [vmem:[%s19556_s7 + $0x170] sm:$0xf] }
  0x3d   :  { %246 = vst [vmem:[#allocation2 + $0x178] sm:$0xf] %v245_v26  ;;  %248 = vst [vmem:[#allocation2 + $0x17c] sm:$0xf] %v247_v27  ;;  %v251_v29 = vld [vmem:[%s19556_s7 + $0x19c] sm:$0xf] }
  0x3e   :  { %250 = vst [vmem:[#allocation2 + $0x180] sm:$0xf] %v249_v28  ;;  %v253_v30 = vld [vmem:[%s19556_s7 + $0x174] sm:$0xf]  ;;  %v255_v31 = vld [vmem:[%s19556_s7 + $0x1a0] sm:$0xf] }
  0x3f   :  { %252 = vst [vmem:[#allocation2 + $0x184] sm:$0xf] %v251_v29  ;;  %254 = vst [vmem:[#allocation2 + $0x188] sm:$0xf] %v253_v30  ;;  %v257_v32 = vld [vmem:[%s19556_s7 + $0x178] sm:$0xf] }
  0x40   :  { %256 = vst [vmem:[#allocation2 + $0x18c] sm:$0xf] %v255_v31  ;;  %v259_v33 = vld [vmem:[%s19556_s7 + $0x1a4] sm:$0xf]  ;;  %v261_v34 = vld [vmem:[%s19556_s7 + $0x17c] sm:$0xf] }
  0x41   :  { %258 = vst [vmem:[#allocation2 + $0x190] sm:$0xf] %v257_v32  ;;  %260 = vst [vmem:[#allocation2 + $0x194] sm:$0xf] %v259_v33  ;;  %v263_v35 = vld [vmem:[%s19556_s7 + $0x1a8] sm:$0xf] }
  0x42   :  { %262 = vst [vmem:[#allocation2 + $0x198] sm:$0xf] %v261_v34  ;;  %v265_v36 = vld [vmem:[%s19556_s7 + $0x180] sm:$0xf]  ;;  %v267_v37 = vld [vmem:[%s19556_s7 + $0x1ac] sm:$0xf] }
  0x43   :  { %264 = vst [vmem:[#allocation2 + $0x19c] sm:$0xf] %v263_v35  ;;  %266 = vst [vmem:[#allocation2 + $0x1a0] sm:$0xf] %v265_v36  ;;  %v269_v38 = vld [vmem:[%s19556_s7 + $0x184] sm:$0xf] }
  0x44   :  { %268 = vst [vmem:[#allocation2 + $0x1a4] sm:$0xf] %v267_v37  ;;  %v271_v39 = vld [vmem:[%s19556_s7 + $0x1b0] sm:$0xf]  ;;  %v273_v40 = vld [vmem:[%s19556_s7 + $0x188] sm:$0xf] }
  0x45   :  { %270 = vst [vmem:[#allocation2 + $0x1a8] sm:$0xf] %v269_v38  ;;  %272 = vst [vmem:[#allocation2 + $0x1ac] sm:$0xf] %v271_v39  ;;  %v279_v42 = vld [vmem:[%s19556_s7 + $0x1e4] sm:$0xf] }
  0x46   :  { %274 = vst [vmem:[#allocation2 + $0x1b0] sm:$0xf] %v273_v40  ;;  %v281_v43 = vld [vmem:[%s19556_s7 + $0x1bc] sm:$0xf]  ;;  %276 = vst [vmem:[#allocation2 + $0x1b4] sm:$0xff] %v275_v41   ;;  %v319_v62 = vld [vmem:[%s19556_s7 + $0x20c] sm:$0xff]  }
  0x47   :  { %280 = vst [vmem:[#allocation2 + $0x1bc] sm:$0xf] %v279_v42  ;;  %282 = vst [vmem:[#allocation2 + $0x1c0] sm:$0xf] %v281_v43  ;;  %v283_v44 = vld [vmem:[%s19556_s7 + $0x1e8] sm:$0xf] }
  0x48   :  { %v285_v45 = vld [vmem:[%s19556_s7 + $0x1c0] sm:$0xf]  ;;  %v287_v46 = vld [vmem:[%s19556_s7 + $0x1ec] sm:$0xf]  ;;  %284 = vst [vmem:[#allocation2 + $0x1c4] sm:$0xf] %v283_v44 }
  0x49   :  { %286 = vst [vmem:[#allocation2 + $0x1c8] sm:$0xf] %v285_v45  ;;  %288 = vst [vmem:[#allocation2 + $0x1cc] sm:$0xf] %v287_v46  ;;  %v289_v47 = vld [vmem:[%s19556_s7 + $0x1c4] sm:$0xf] }
  0x4a   :  { %v291_v48 = vld [vmem:[%s19556_s7 + $0x1f0] sm:$0xf]  ;;  %v293_v49 = vld [vmem:[%s19556_s7 + $0x1c8] sm:$0xf]  ;;  %290 = vst [vmem:[#allocation2 + $0x1d0] sm:$0xf] %v289_v47 }
  0x4b   :  { %292 = vst [vmem:[#allocation2 + $0x1d4] sm:$0xf] %v291_v48  ;;  %294 = vst [vmem:[#allocation2 + $0x1d8] sm:$0xf] %v293_v49  ;;  %v295_v50 = vld [vmem:[%s19556_s7 + $0x1f4] sm:$0xf] }
  0x4c   :  { %v297_v51 = vld [vmem:[%s19556_s7 + $0x1cc] sm:$0xf]  ;;  %v299_v52 = vld [vmem:[%s19556_s7 + $0x1f8] sm:$0xf]  ;;  %296 = vst [vmem:[#allocation2 + $0x1dc] sm:$0xf] %v295_v50 }
  0x4d   :  { %298 = vst [vmem:[#allocation2 + $0x1e0] sm:$0xf] %v297_v51  ;;  %300 = vst [vmem:[#allocation2 + $0x1e4] sm:$0xf] %v299_v52  ;;  %v301_v53 = vld [vmem:[%s19556_s7 + $0x1d0] sm:$0xf] }
  0x4e   :  { %v303_v54 = vld [vmem:[%s19556_s7 + $0x1fc] sm:$0xf]  ;;  %v305_v55 = vld [vmem:[%s19556_s7 + $0x1d4] sm:$0xf]  ;;  %302 = vst [vmem:[#allocation2 + $0x1e8] sm:$0xf] %v301_v53 }
  0x4f   :  { %304 = vst [vmem:[#allocation2 + $0x1ec] sm:$0xf] %v303_v54  ;;  %306 = vst [vmem:[#allocation2 + $0x1f0] sm:$0xf] %v305_v55  ;;  %v307_v56 = vld [vmem:[%s19556_s7 + $0x200] sm:$0xf] }
  0x50   :  { %v309_v57 = vld [vmem:[%s19556_s7 + $0x1d8] sm:$0xf]  ;;  %v311_v58 = vld [vmem:[%s19556_s7 + $0x204] sm:$0xf]  ;;  %308 = vst [vmem:[#allocation2 + $0x1f4] sm:$0xf] %v307_v56 }
  0x51   :  { %310 = vst [vmem:[#allocation2 + $0x1f8] sm:$0xf] %v309_v57  ;;  %312 = vst [vmem:[#allocation2 + $0x1fc] sm:$0xf] %v311_v58  ;;  %v313_v59 = vld [vmem:[%s19556_s7 + $0x1dc] sm:$0xf] }
  0x52   :  { %v315_v60 = vld [vmem:[%s19556_s7 + $0x208] sm:$0xf]  ;;  %v317_v61 = vld [vmem:[%s19556_s7 + $0x1e0] sm:$0xf]  ;;  %314 = vst [vmem:[#allocation2 + $0x200] sm:$0xf] %v313_v59 }
  0x53   :  { %316 = vst [vmem:[#allocation2 + $0x204] sm:$0xf] %v315_v60  ;;  %318 = vst [vmem:[#allocation2 + $0x208] sm:$0xf] %v317_v61  ;;  %v323_v63 = vld [vmem:[%s19556_s7 + $0x23c] sm:$0xf] }
  0x54   :  { %v325_v0 = vld [vmem:[%s19556_s7 + $0x214] sm:$0xf]  ;;  %320 = vst [vmem:[#allocation2 + $0x20c] sm:$0xff] %v319_v62   ;;  %324 = vst [vmem:[#allocation2 + $0x214] sm:$0xf] %v323_v63  ;;  %v407_v40 = vld [vmem:[%s19556_s7 + $0x2bc] sm:$0xff]  }
  0x55   :  { %326 = vst [vmem:[#allocation2 + $0x218] sm:$0xf] %v325_v0  ;;  %v327_v1 = vld [vmem:[%s19556_s7 + $0x240] sm:$0xf]  ;;  %v329_v2 = vld [vmem:[%s19556_s7 + $0x218] sm:$0xf] }
  0x56   :  { %v331_v3 = vld [vmem:[%s19556_s7 + $0x244] sm:$0xf]  ;;  %328 = vst [vmem:[#allocation2 + $0x21c] sm:$0xf] %v327_v1  ;;  %330 = vst [vmem:[#allocation2 + $0x220] sm:$0xf] %v329_v2 }
  0x57   :  { %332 = vst [vmem:[#allocation2 + $0x224] sm:$0xf] %v331_v3  ;;  %v333_v4 = vld [vmem:[%s19556_s7 + $0x21c] sm:$0xf]  ;;  %v335_v5 = vld [vmem:[%s19556_s7 + $0x248] sm:$0xf] }
  0x58   :  { %v337_v6 = vld [vmem:[%s19556_s7 + $0x220] sm:$0xf]  ;;  %334 = vst [vmem:[#allocation2 + $0x228] sm:$0xf] %v333_v4  ;;  %336 = vst [vmem:[#allocation2 + $0x22c] sm:$0xf] %v335_v5 }
  0x59   :  { %338 = vst [vmem:[#allocation2 + $0x230] sm:$0xf] %v337_v6  ;;  %v339_v7 = vld [vmem:[%s19556_s7 + $0x24c] sm:$0xf]  ;;  %v341_v8 = vld [vmem:[%s19556_s7 + $0x224] sm:$0xf] }
  0x5a   :  { %v343_v9 = vld [vmem:[%s19556_s7 + $0x250] sm:$0xf]  ;;  %340 = vst [vmem:[#allocation2 + $0x234] sm:$0xf] %v339_v7  ;;  %342 = vst [vmem:[#allocation2 + $0x238] sm:$0xf] %v341_v8 }
  0x5b   :  { %344 = vst [vmem:[#allocation2 + $0x23c] sm:$0xf] %v343_v9  ;;  %v345_v10 = vld [vmem:[%s19556_s7 + $0x228] sm:$0xf]  ;;  %v347_v11 = vld [vmem:[%s19556_s7 + $0x254] sm:$0xf] }
  0x5c   :  { %v349_v12 = vld [vmem:[%s19556_s7 + $0x22c] sm:$0xf]  ;;  %346 = vst [vmem:[#allocation2 + $0x240] sm:$0xf] %v345_v10  ;;  %348 = vst [vmem:[#allocation2 + $0x244] sm:$0xf] %v347_v11 }
  0x5d   :  { %350 = vst [vmem:[#allocation2 + $0x248] sm:$0xf] %v349_v12  ;;  %v351_v13 = vld [vmem:[%s19556_s7 + $0x258] sm:$0xf]  ;;  %v353_v14 = vld [vmem:[%s19556_s7 + $0x230] sm:$0xf] }
  0x5e   :  { %v355_v15 = vld [vmem:[%s19556_s7 + $0x25c] sm:$0xf]  ;;  %352 = vst [vmem:[#allocation2 + $0x24c] sm:$0xf] %v351_v13  ;;  %354 = vst [vmem:[#allocation2 + $0x250] sm:$0xf] %v353_v14 }
  0x5f   :  { %356 = vst [vmem:[#allocation2 + $0x254] sm:$0xf] %v355_v15  ;;  %v357_v16 = vld [vmem:[%s19556_s7 + $0x234] sm:$0xf]  ;;  %v359_v17 = vld [vmem:[%s19556_s7 + $0x260] sm:$0xf] }
  0x60   :  { %v361_v18 = vld [vmem:[%s19556_s7 + $0x238] sm:$0xf]  ;;  %358 = vst [vmem:[#allocation2 + $0x258] sm:$0xf] %v357_v16  ;;  %360 = vst [vmem:[#allocation2 + $0x25c] sm:$0xf] %v359_v17 }
  0x61   :  { %362 = vst [vmem:[#allocation2 + $0x260] sm:$0xf] %v361_v18  ;;  %v367_v20 = vld [vmem:[%s19556_s7 + $0x294] sm:$0xf]  ;;  %v369_v21 = vld [vmem:[%s19556_s7 + $0x26c] sm:$0xf] }
  0x62   :  { %364 = vst [vmem:[#allocation2 + $0x264] sm:$0xff] %v363_v19   ;;  %368 = vst [vmem:[#allocation2 + $0x26c] sm:$0xf] %v367_v20  ;;  %v371_v22 = vld [vmem:[%s19556_s7 + $0x298] sm:$0xf]  ;;  %v495_v18 = vld [vmem:[%s19556_s7 + $0x36c] sm:$0xff]  }
  0x63   :  { %370 = vst [vmem:[#allocation2 + $0x270] sm:$0xf] %v369_v21  ;;  %v373_v23 = vld [vmem:[%s19556_s7 + $0x270] sm:$0xf]  ;;  %v375_v24 = vld [vmem:[%s19556_s7 + $0x29c] sm:$0xf] }
  0x64   :  { %372 = vst [vmem:[#allocation2 + $0x274] sm:$0xf] %v371_v22  ;;  %374 = vst [vmem:[#allocation2 + $0x278] sm:$0xf] %v373_v23  ;;  %v377_v25 = vld [vmem:[%s19556_s7 + $0x274] sm:$0xf] }
  0x65   :  { %376 = vst [vmem:[#allocation2 + $0x27c] sm:$0xf] %v375_v24  ;;  %v379_v26 = vld [vmem:[%s19556_s7 + $0x2a0] sm:$0xf]  ;;  %v381_v27 = vld [vmem:[%s19556_s7 + $0x278] sm:$0xf] }
  0x66   :  { %378 = vst [vmem:[#allocation2 + $0x280] sm:$0xf] %v377_v25  ;;  %380 = vst [vmem:[#allocation2 + $0x284] sm:$0xf] %v379_v26  ;;  %v383_v28 = vld [vmem:[%s19556_s7 + $0x2a4] sm:$0xf] }
  0x67   :  { %382 = vst [vmem:[#allocation2 + $0x288] sm:$0xf] %v381_v27  ;;  %v385_v29 = vld [vmem:[%s19556_s7 + $0x27c] sm:$0xf]  ;;  %v387_v30 = vld [vmem:[%s19556_s7 + $0x2a8] sm:$0xf] }
  0x68   :  { %384 = vst [vmem:[#allocation2 + $0x28c] sm:$0xf] %v383_v28  ;;  %386 = vst [vmem:[#allocation2 + $0x290] sm:$0xf] %v385_v29  ;;  %v389_v31 = vld [vmem:[%s19556_s7 + $0x280] sm:$0xf] }
  0x69   :  { %388 = vst [vmem:[#allocation2 + $0x294] sm:$0xf] %v387_v30  ;;  %v391_v32 = vld [vmem:[%s19556_s7 + $0x2ac] sm:$0xf]  ;;  %v393_v33 = vld [vmem:[%s19556_s7 + $0x284] sm:$0xf] }
  0x6a   :  { %390 = vst [vmem:[#allocation2 + $0x298] sm:$0xf] %v389_v31  ;;  %392 = vst [vmem:[#allocation2 + $0x29c] sm:$0xf] %v391_v32  ;;  %v395_v34 = vld [vmem:[%s19556_s7 + $0x2b0] sm:$0xf] }
  0x6b   :  { %394 = vst [vmem:[#allocation2 + $0x2a0] sm:$0xf] %v393_v33  ;;  %v397_v35 = vld [vmem:[%s19556_s7 + $0x288] sm:$0xf]  ;;  %v399_v36 = vld [vmem:[%s19556_s7 + $0x2b4] sm:$0xf] }
  0x6c   :  { %396 = vst [vmem:[#allocation2 + $0x2a4] sm:$0xf] %v395_v34  ;;  %398 = vst [vmem:[#allocation2 + $0x2a8] sm:$0xf] %v397_v35  ;;  %v401_v37 = vld [vmem:[%s19556_s7 + $0x28c] sm:$0xf] }
  0x6d   :  { %400 = vst [vmem:[#allocation2 + $0x2ac] sm:$0xf] %v399_v36  ;;  %v403_v38 = vld [vmem:[%s19556_s7 + $0x2b8] sm:$0xf]  ;;  %v405_v39 = vld [vmem:[%s19556_s7 + $0x290] sm:$0xf] }
  0x6e   :  { %402 = vst [vmem:[#allocation2 + $0x2b0] sm:$0xf] %v401_v37  ;;  %404 = vst [vmem:[#allocation2 + $0x2b4] sm:$0xf] %v403_v38  ;;  %v411_v41 = vld [vmem:[%s19556_s7 + $0x2ec] sm:$0xf] }
  0x6f   :  { %406 = vst [vmem:[#allocation2 + $0x2b8] sm:$0xf] %v405_v39  ;;  %v413_v42 = vld [vmem:[%s19556_s7 + $0x2c4] sm:$0xf]  ;;  %408 = vst [vmem:[#allocation2 + $0x2bc] sm:$0xff] %v407_v40   ;;  %v451_v61 = vld [vmem:[%s19556_s7 + $0x314] sm:$0xff]  }
  0x70   :  { %412 = vst [vmem:[#allocation2 + $0x2c4] sm:$0xf] %v411_v41  ;;  %414 = vst [vmem:[#allocation2 + $0x2c8] sm:$0xf] %v413_v42  ;;  %v415_v43 = vld [vmem:[%s19556_s7 + $0x2f0] sm:$0xf] }
  0x71   :  { %v417_v44 = vld [vmem:[%s19556_s7 + $0x2c8] sm:$0xf]  ;;  %v419_v45 = vld [vmem:[%s19556_s7 + $0x2f4] sm:$0xf]  ;;  %416 = vst [vmem:[#allocation2 + $0x2cc] sm:$0xf] %v415_v43 }
  0x72   :  { %418 = vst [vmem:[#allocation2 + $0x2d0] sm:$0xf] %v417_v44  ;;  %420 = vst [vmem:[#allocation2 + $0x2d4] sm:$0xf] %v419_v45  ;;  %v421_v46 = vld [vmem:[%s19556_s7 + $0x2cc] sm:$0xf] }
  0x73   :  { %v423_v47 = vld [vmem:[%s19556_s7 + $0x2f8] sm:$0xf]  ;;  %v425_v48 = vld [vmem:[%s19556_s7 + $0x2d0] sm:$0xf]  ;;  %422 = vst [vmem:[#allocation2 + $0x2d8] sm:$0xf] %v421_v46 }
  0x74   :  { %424 = vst [vmem:[#allocation2 + $0x2dc] sm:$0xf] %v423_v47  ;;  %426 = vst [vmem:[#allocation2 + $0x2e0] sm:$0xf] %v425_v48  ;;  %v427_v49 = vld [vmem:[%s19556_s7 + $0x2fc] sm:$0xf] }
  0x75   :  { %v429_v50 = vld [vmem:[%s19556_s7 + $0x2d4] sm:$0xf]  ;;  %v431_v51 = vld [vmem:[%s19556_s7 + $0x300] sm:$0xf]  ;;  %428 = vst [vmem:[#allocation2 + $0x2e4] sm:$0xf] %v427_v49 }
  0x76   :  { %430 = vst [vmem:[#allocation2 + $0x2e8] sm:$0xf] %v429_v50  ;;  %432 = vst [vmem:[#allocation2 + $0x2ec] sm:$0xf] %v431_v51  ;;  %v433_v52 = vld [vmem:[%s19556_s7 + $0x2d8] sm:$0xf] }
  0x77   :  { %v435_v53 = vld [vmem:[%s19556_s7 + $0x304] sm:$0xf]  ;;  %v437_v54 = vld [vmem:[%s19556_s7 + $0x2dc] sm:$0xf]  ;;  %434 = vst [vmem:[#allocation2 + $0x2f0] sm:$0xf] %v433_v52 }
  0x78   :  { %436 = vst [vmem:[#allocation2 + $0x2f4] sm:$0xf] %v435_v53  ;;  %438 = vst [vmem:[#allocation2 + $0x2f8] sm:$0xf] %v437_v54  ;;  %v439_v55 = vld [vmem:[%s19556_s7 + $0x308] sm:$0xf] }
  0x79   :  { %v441_v56 = vld [vmem:[%s19556_s7 + $0x2e0] sm:$0xf]  ;;  %v443_v57 = vld [vmem:[%s19556_s7 + $0x30c] sm:$0xf]  ;;  %440 = vst [vmem:[#allocation2 + $0x2fc] sm:$0xf] %v439_v55 }
  0x7a   :  { %442 = vst [vmem:[#allocation2 + $0x300] sm:$0xf] %v441_v56  ;;  %444 = vst [vmem:[#allocation2 + $0x304] sm:$0xf] %v443_v57  ;;  %v445_v58 = vld [vmem:[%s19556_s7 + $0x2e4] sm:$0xf] }
  0x7b   :  { %v447_v59 = vld [vmem:[%s19556_s7 + $0x310] sm:$0xf]  ;;  %v449_v60 = vld [vmem:[%s19556_s7 + $0x2e8] sm:$0xf]  ;;  %446 = vst [vmem:[#allocation2 + $0x308] sm:$0xf] %v445_v58 }
  0x7c   :  { %448 = vst [vmem:[#allocation2 + $0x30c] sm:$0xf] %v447_v59  ;;  %450 = vst [vmem:[#allocation2 + $0x310] sm:$0xf] %v449_v60  ;;  %v455_v62 = vld [vmem:[%s19556_s7 + $0x344] sm:$0xf] }
  0x7d   :  { %v457_v63 = vld [vmem:[%s19556_s7 + $0x31c] sm:$0xf]  ;;  %452 = vst [vmem:[#allocation2 + $0x314] sm:$0xff] %v451_v61   ;;  %456 = vst [vmem:[#allocation2 + $0x31c] sm:$0xf] %v455_v62  ;;  %v539_v39 = vld [vmem:[%s19556_s7 + $0x3c4] sm:$0xff]  }
  0x7e   :  { %458 = vst [vmem:[#allocation2 + $0x320] sm:$0xf] %v457_v63  ;;  %v459_v0 = vld [vmem:[%s19556_s7 + $0x348] sm:$0xf]  ;;  %v461_v1 = vld [vmem:[%s19556_s7 + $0x320] sm:$0xf] }
  0x7f   :  { %v463_v2 = vld [vmem:[%s19556_s7 + $0x34c] sm:$0xf]  ;;  %460 = vst [vmem:[#allocation2 + $0x324] sm:$0xf] %v459_v0  ;;  %462 = vst [vmem:[#allocation2 + $0x328] sm:$0xf] %v461_v1 }
  0x80   :  { %464 = vst [vmem:[#allocation2 + $0x32c] sm:$0xf] %v463_v2  ;;  %v465_v3 = vld [vmem:[%s19556_s7 + $0x324] sm:$0xf]  ;;  %v467_v4 = vld [vmem:[%s19556_s7 + $0x350] sm:$0xf] }
  0x81   :  { %v469_v5 = vld [vmem:[%s19556_s7 + $0x328] sm:$0xf]  ;;  %466 = vst [vmem:[#allocation2 + $0x330] sm:$0xf] %v465_v3  ;;  %468 = vst [vmem:[#allocation2 + $0x334] sm:$0xf] %v467_v4 }
  0x82   :  { %470 = vst [vmem:[#allocation2 + $0x338] sm:$0xf] %v469_v5  ;;  %v471_v6 = vld [vmem:[%s19556_s7 + $0x354] sm:$0xf]  ;;  %v473_v7 = vld [vmem:[%s19556_s7 + $0x32c] sm:$0xf] }
  0x83   :  { %v475_v8 = vld [vmem:[%s19556_s7 + $0x358] sm:$0xf]  ;;  %472 = vst [vmem:[#allocation2 + $0x33c] sm:$0xf] %v471_v6  ;;  %474 = vst [vmem:[#allocation2 + $0x340] sm:$0xf] %v473_v7 }
  0x84   :  { %476 = vst [vmem:[#allocation2 + $0x344] sm:$0xf] %v475_v8  ;;  %v477_v9 = vld [vmem:[%s19556_s7 + $0x330] sm:$0xf]  ;;  %v479_v10 = vld [vmem:[%s19556_s7 + $0x35c] sm:$0xf] }
  0x85   :  { %v481_v11 = vld [vmem:[%s19556_s7 + $0x334] sm:$0xf]  ;;  %478 = vst [vmem:[#allocation2 + $0x348] sm:$0xf] %v477_v9  ;;  %480 = vst [vmem:[#allocation2 + $0x34c] sm:$0xf] %v479_v10 }
  0x86   :  { %482 = vst [vmem:[#allocation2 + $0x350] sm:$0xf] %v481_v11  ;;  %v483_v12 = vld [vmem:[%s19556_s7 + $0x360] sm:$0xf]  ;;  %v485_v13 = vld [vmem:[%s19556_s7 + $0x338] sm:$0xf] }
  0x87   :  { %v487_v14 = vld [vmem:[%s19556_s7 + $0x364] sm:$0xf]  ;;  %484 = vst [vmem:[#allocation2 + $0x354] sm:$0xf] %v483_v12  ;;  %486 = vst [vmem:[#allocation2 + $0x358] sm:$0xf] %v485_v13 }
  0x88   :  { %488 = vst [vmem:[#allocation2 + $0x35c] sm:$0xf] %v487_v14  ;;  %v489_v15 = vld [vmem:[%s19556_s7 + $0x33c] sm:$0xf]  ;;  %v491_v16 = vld [vmem:[%s19556_s7 + $0x368] sm:$0xf] }
  0x89   :  { %v493_v17 = vld [vmem:[%s19556_s7 + $0x340] sm:$0xf]  ;;  %490 = vst [vmem:[#allocation2 + $0x360] sm:$0xf] %v489_v15  ;;  %492 = vst [vmem:[#allocation2 + $0x364] sm:$0xf] %v491_v16 }
  0x8a   :  { %494 = vst [vmem:[#allocation2 + $0x368] sm:$0xf] %v493_v17  ;;  %v499_v19 = vld [vmem:[%s19556_s7 + $0x39c] sm:$0xf]  ;;  %v501_v20 = vld [vmem:[%s19556_s7 + $0x374] sm:$0xf] }
  0x8b   :  { %496 = vst [vmem:[#allocation2 + $0x36c] sm:$0xff] %v495_v18   ;;  %500 = vst [vmem:[#allocation2 + $0x374] sm:$0xf] %v499_v19  ;;  %v503_v21 = vld [vmem:[%s19556_s7 + $0x3a0] sm:$0xf]  ;;  %v627_v17 = vld [vmem:[%s19556_s7 + $0x474] sm:$0xff]  }
  0x8c   :  { %502 = vst [vmem:[#allocation2 + $0x378] sm:$0xf] %v501_v20  ;;  %v505_v22 = vld [vmem:[%s19556_s7 + $0x378] sm:$0xf]  ;;  %v507_v23 = vld [vmem:[%s19556_s7 + $0x3a4] sm:$0xf] }
  0x8d   :  { %504 = vst [vmem:[#allocation2 + $0x37c] sm:$0xf] %v503_v21  ;;  %506 = vst [vmem:[#allocation2 + $0x380] sm:$0xf] %v505_v22  ;;  %v509_v24 = vld [vmem:[%s19556_s7 + $0x37c] sm:$0xf] }
  0x8e   :  { %508 = vst [vmem:[#allocation2 + $0x384] sm:$0xf] %v507_v23  ;;  %v511_v25 = vld [vmem:[%s19556_s7 + $0x3a8] sm:$0xf]  ;;  %v513_v26 = vld [vmem:[%s19556_s7 + $0x380] sm:$0xf] }
  0x8f   :  { %510 = vst [vmem:[#allocation2 + $0x388] sm:$0xf] %v509_v24  ;;  %512 = vst [vmem:[#allocation2 + $0x38c] sm:$0xf] %v511_v25  ;;  %v515_v27 = vld [vmem:[%s19556_s7 + $0x3ac] sm:$0xf] }
  0x90   :  { %514 = vst [vmem:[#allocation2 + $0x390] sm:$0xf] %v513_v26  ;;  %v517_v28 = vld [vmem:[%s19556_s7 + $0x384] sm:$0xf]  ;;  %v519_v29 = vld [vmem:[%s19556_s7 + $0x3b0] sm:$0xf] }
  0x91   :  { %516 = vst [vmem:[#allocation2 + $0x394] sm:$0xf] %v515_v27  ;;  %518 = vst [vmem:[#allocation2 + $0x398] sm:$0xf] %v517_v28  ;;  %v521_v30 = vld [vmem:[%s19556_s7 + $0x388] sm:$0xf] }
  0x92   :  { %520 = vst [vmem:[#allocation2 + $0x39c] sm:$0xf] %v519_v29  ;;  %v523_v31 = vld [vmem:[%s19556_s7 + $0x3b4] sm:$0xf]  ;;  %v525_v32 = vld [vmem:[%s19556_s7 + $0x38c] sm:$0xf] }
  0x93   :  { %522 = vst [vmem:[#allocation2 + $0x3a0] sm:$0xf] %v521_v30  ;;  %524 = vst [vmem:[#allocation2 + $0x3a4] sm:$0xf] %v523_v31  ;;  %v527_v33 = vld [vmem:[%s19556_s7 + $0x3b8] sm:$0xf] }
  0x94   :  { %526 = vst [vmem:[#allocation2 + $0x3a8] sm:$0xf] %v525_v32  ;;  %v529_v34 = vld [vmem:[%s19556_s7 + $0x390] sm:$0xf]  ;;  %v531_v35 = vld [vmem:[%s19556_s7 + $0x3bc] sm:$0xf] }
  0x95   :  { %528 = vst [vmem:[#allocation2 + $0x3ac] sm:$0xf] %v527_v33  ;;  %530 = vst [vmem:[#allocation2 + $0x3b0] sm:$0xf] %v529_v34  ;;  %v533_v36 = vld [vmem:[%s19556_s7 + $0x394] sm:$0xf] }
  0x96   :  { %532 = vst [vmem:[#allocation2 + $0x3b4] sm:$0xf] %v531_v35  ;;  %v535_v37 = vld [vmem:[%s19556_s7 + $0x3c0] sm:$0xf]  ;;  %v537_v38 = vld [vmem:[%s19556_s7 + $0x398] sm:$0xf] }
  0x97   :  { %534 = vst [vmem:[#allocation2 + $0x3b8] sm:$0xf] %v533_v36  ;;  %536 = vst [vmem:[#allocation2 + $0x3bc] sm:$0xf] %v535_v37  ;;  %v543_v40 = vld [vmem:[%s19556_s7 + $0x3f4] sm:$0xf] }
  0x98   :  { %538 = vst [vmem:[#allocation2 + $0x3c0] sm:$0xf] %v537_v38  ;;  %v545_v41 = vld [vmem:[%s19556_s7 + $0x3cc] sm:$0xf]  ;;  %540 = vst [vmem:[#allocation2 + $0x3c4] sm:$0xff] %v539_v39   ;;  %v583_v60 = vld [vmem:[%s19556_s7 + $0x41c] sm:$0xff]  }
  0x99   :  { %544 = vst [vmem:[#allocation2 + $0x3cc] sm:$0xf] %v543_v40  ;;  %546 = vst [vmem:[#allocation2 + $0x3d0] sm:$0xf] %v545_v41  ;;  %v547_v42 = vld [vmem:[%s19556_s7 + $0x3f8] sm:$0xf] }
  0x9a   :  { %v549_v43 = vld [vmem:[%s19556_s7 + $0x3d0] sm:$0xf]  ;;  %v551_v44 = vld [vmem:[%s19556_s7 + $0x3fc] sm:$0xf]  ;;  %548 = vst [vmem:[#allocation2 + $0x3d4] sm:$0xf] %v547_v42 }
  0x9b   :  { %550 = vst [vmem:[#allocation2 + $0x3d8] sm:$0xf] %v549_v43  ;;  %552 = vst [vmem:[#allocation2 + $0x3dc] sm:$0xf] %v551_v44  ;;  %v553_v45 = vld [vmem:[%s19556_s7 + $0x3d4] sm:$0xf] }
  0x9c   :  { %v555_v46 = vld [vmem:[%s19556_s7 + $0x400] sm:$0xf]  ;;  %v557_v47 = vld [vmem:[%s19556_s7 + $0x3d8] sm:$0xf]  ;;  %554 = vst [vmem:[#allocation2 + $0x3e0] sm:$0xf] %v553_v45 }
  0x9d   :  { %556 = vst [vmem:[#allocation2 + $0x3e4] sm:$0xf] %v555_v46  ;;  %558 = vst [vmem:[#allocation2 + $0x3e8] sm:$0xf] %v557_v47  ;;  %v559_v48 = vld [vmem:[%s19556_s7 + $0x404] sm:$0xf] }
  0x9e   :  { %v561_v49 = vld [vmem:[%s19556_s7 + $0x3dc] sm:$0xf]  ;;  %v563_v50 = vld [vmem:[%s19556_s7 + $0x408] sm:$0xf]  ;;  %560 = vst [vmem:[#allocation2 + $0x3ec] sm:$0xf] %v559_v48 }
  0x9f   :  { %562 = vst [vmem:[#allocation2 + $0x3f0] sm:$0xf] %v561_v49  ;;  %564 = vst [vmem:[#allocation2 + $0x3f4] sm:$0xf] %v563_v50  ;;  %v565_v51 = vld [vmem:[%s19556_s7 + $0x3e0] sm:$0xf] }
  0xa0   :  { %v567_v52 = vld [vmem:[%s19556_s7 + $0x40c] sm:$0xf]  ;;  %v569_v53 = vld [vmem:[%s19556_s7 + $0x3e4] sm:$0xf]  ;;  %566 = vst [vmem:[#allocation2 + $0x3f8] sm:$0xf] %v565_v51 }
  0xa1   :  { %568 = vst [vmem:[#allocation2 + $0x3fc] sm:$0xf] %v567_v52  ;;  %570 = vst [vmem:[#allocation2 + $0x400] sm:$0xf] %v569_v53  ;;  %v571_v54 = vld [vmem:[%s19556_s7 + $0x410] sm:$0xf] }
  0xa2   :  { %v573_v55 = vld [vmem:[%s19556_s7 + $0x3e8] sm:$0xf]  ;;  %v575_v56 = vld [vmem:[%s19556_s7 + $0x414] sm:$0xf]  ;;  %572 = vst [vmem:[#allocation2 + $0x404] sm:$0xf] %v571_v54 }
  0xa3   :  { %574 = vst [vmem:[#allocation2 + $0x408] sm:$0xf] %v573_v55  ;;  %576 = vst [vmem:[#allocation2 + $0x40c] sm:$0xf] %v575_v56  ;;  %v577_v57 = vld [vmem:[%s19556_s7 + $0x3ec] sm:$0xf] }
  0xa4   :  { %v579_v58 = vld [vmem:[%s19556_s7 + $0x418] sm:$0xf]  ;;  %v581_v59 = vld [vmem:[%s19556_s7 + $0x3f0] sm:$0xf]  ;;  %578 = vst [vmem:[#allocation2 + $0x410] sm:$0xf] %v577_v57 }
  0xa5   :  { %580 = vst [vmem:[#allocation2 + $0x414] sm:$0xf] %v579_v58  ;;  %582 = vst [vmem:[#allocation2 + $0x418] sm:$0xf] %v581_v59  ;;  %v587_v61 = vld [vmem:[%s19556_s7 + $0x44c] sm:$0xf] }
  0xa6   :  { %v589_v62 = vld [vmem:[%s19556_s7 + $0x424] sm:$0xf]  ;;  %584 = vst [vmem:[#allocation2 + $0x41c] sm:$0xff] %v583_v60   ;;  %588 = vst [vmem:[#allocation2 + $0x424] sm:$0xf] %v587_v61  ;;  %v671_v38 = vld [vmem:[%s19556_s7 + $0x4cc] sm:$0xff]  }
  0xa7   :  { %590 = vst [vmem:[#allocation2 + $0x428] sm:$0xf] %v589_v62  ;;  %v591_v63 = vld [vmem:[%s19556_s7 + $0x450] sm:$0xf]  ;;  %v593_v0 = vld [vmem:[%s19556_s7 + $0x428] sm:$0xf] }
  0xa8   :  { %v595_v1 = vld [vmem:[%s19556_s7 + $0x454] sm:$0xf]  ;;  %592 = vst [vmem:[#allocation2 + $0x42c] sm:$0xf] %v591_v63  ;;  %594 = vst [vmem:[#allocation2 + $0x430] sm:$0xf] %v593_v0 }
  0xa9   :  { %596 = vst [vmem:[#allocation2 + $0x434] sm:$0xf] %v595_v1  ;;  %v597_v2 = vld [vmem:[%s19556_s7 + $0x42c] sm:$0xf]  ;;  %v599_v3 = vld [vmem:[%s19556_s7 + $0x458] sm:$0xf] }
  0xaa   :  { %v601_v4 = vld [vmem:[%s19556_s7 + $0x430] sm:$0xf]  ;;  %598 = vst [vmem:[#allocation2 + $0x438] sm:$0xf] %v597_v2  ;;  %600 = vst [vmem:[#allocation2 + $0x43c] sm:$0xf] %v599_v3 }
  0xab   :  { %602 = vst [vmem:[#allocation2 + $0x440] sm:$0xf] %v601_v4  ;;  %v603_v5 = vld [vmem:[%s19556_s7 + $0x45c] sm:$0xf]  ;;  %v605_v6 = vld [vmem:[%s19556_s7 + $0x434] sm:$0xf] }
  0xac   :  { %v607_v7 = vld [vmem:[%s19556_s7 + $0x460] sm:$0xf]  ;;  %604 = vst [vmem:[#allocation2 + $0x444] sm:$0xf] %v603_v5  ;;  %606 = vst [vmem:[#allocation2 + $0x448] sm:$0xf] %v605_v6 }
  0xad   :  { %608 = vst [vmem:[#allocation2 + $0x44c] sm:$0xf] %v607_v7  ;;  %v609_v8 = vld [vmem:[%s19556_s7 + $0x438] sm:$0xf]  ;;  %v611_v9 = vld [vmem:[%s19556_s7 + $0x464] sm:$0xf] }
  0xae   :  { %v613_v10 = vld [vmem:[%s19556_s7 + $0x43c] sm:$0xf]  ;;  %610 = vst [vmem:[#allocation2 + $0x450] sm:$0xf] %v609_v8  ;;  %612 = vst [vmem:[#allocation2 + $0x454] sm:$0xf] %v611_v9 }
  0xaf   :  { %614 = vst [vmem:[#allocation2 + $0x458] sm:$0xf] %v613_v10  ;;  %v615_v11 = vld [vmem:[%s19556_s7 + $0x468] sm:$0xf]  ;;  %v617_v12 = vld [vmem:[%s19556_s7 + $0x440] sm:$0xf] }
  0xb0   :  { %v619_v13 = vld [vmem:[%s19556_s7 + $0x46c] sm:$0xf]  ;;  %616 = vst [vmem:[#allocation2 + $0x45c] sm:$0xf] %v615_v11  ;;  %618 = vst [vmem:[#allocation2 + $0x460] sm:$0xf] %v617_v12 }
  0xb1   :  { %620 = vst [vmem:[#allocation2 + $0x464] sm:$0xf] %v619_v13  ;;  %v621_v14 = vld [vmem:[%s19556_s7 + $0x444] sm:$0xf]  ;;  %v623_v15 = vld [vmem:[%s19556_s7 + $0x470] sm:$0xf] }
  0xb2   :  { %v625_v16 = vld [vmem:[%s19556_s7 + $0x448] sm:$0xf]  ;;  %622 = vst [vmem:[#allocation2 + $0x468] sm:$0xf] %v621_v14  ;;  %624 = vst [vmem:[#allocation2 + $0x46c] sm:$0xf] %v623_v15 }
  0xb3   :  { %626 = vst [vmem:[#allocation2 + $0x470] sm:$0xf] %v625_v16  ;;  %v631_v18 = vld [vmem:[%s19556_s7 + $0x4a4] sm:$0xf]  ;;  %v633_v19 = vld [vmem:[%s19556_s7 + $0x47c] sm:$0xf] }
  0xb4   :  { %628 = vst [vmem:[#allocation2 + $0x474] sm:$0xff] %v627_v17   ;;  %632 = vst [vmem:[#allocation2 + $0x47c] sm:$0xf] %v631_v18  ;;  %v635_v20 = vld [vmem:[%s19556_s7 + $0x4a8] sm:$0xf]  ;;  %v759_v16 = vld [vmem:[%s19556_s7 + $0x57c] sm:$0xff]  }
  0xb5   :  { %634 = vst [vmem:[#allocation2 + $0x480] sm:$0xf] %v633_v19  ;;  %v637_v21 = vld [vmem:[%s19556_s7 + $0x480] sm:$0xf]  ;;  %v639_v22 = vld [vmem:[%s19556_s7 + $0x4ac] sm:$0xf] }
  0xb6   :  { %636 = vst [vmem:[#allocation2 + $0x484] sm:$0xf] %v635_v20  ;;  %638 = vst [vmem:[#allocation2 + $0x488] sm:$0xf] %v637_v21  ;;  %v641_v23 = vld [vmem:[%s19556_s7 + $0x484] sm:$0xf] }
  0xb7   :  { %640 = vst [vmem:[#allocation2 + $0x48c] sm:$0xf] %v639_v22  ;;  %v643_v24 = vld [vmem:[%s19556_s7 + $0x4b0] sm:$0xf]  ;;  %v645_v25 = vld [vmem:[%s19556_s7 + $0x488] sm:$0xf] }
  0xb8   :  { %642 = vst [vmem:[#allocation2 + $0x490] sm:$0xf] %v641_v23  ;;  %644 = vst [vmem:[#allocation2 + $0x494] sm:$0xf] %v643_v24  ;;  %v647_v26 = vld [vmem:[%s19556_s7 + $0x4b4] sm:$0xf] }
  0xb9   :  { %646 = vst [vmem:[#allocation2 + $0x498] sm:$0xf] %v645_v25  ;;  %v649_v27 = vld [vmem:[%s19556_s7 + $0x48c] sm:$0xf]  ;;  %v651_v28 = vld [vmem:[%s19556_s7 + $0x4b8] sm:$0xf] }
  0xba   :  { %648 = vst [vmem:[#allocation2 + $0x49c] sm:$0xf] %v647_v26  ;;  %650 = vst [vmem:[#allocation2 + $0x4a0] sm:$0xf] %v649_v27  ;;  %v653_v29 = vld [vmem:[%s19556_s7 + $0x490] sm:$0xf] }
  0xbb   :  { %652 = vst [vmem:[#allocation2 + $0x4a4] sm:$0xf] %v651_v28  ;;  %v655_v30 = vld [vmem:[%s19556_s7 + $0x4bc] sm:$0xf]  ;;  %v657_v31 = vld [vmem:[%s19556_s7 + $0x494] sm:$0xf] }
  0xbc   :  { %654 = vst [vmem:[#allocation2 + $0x4a8] sm:$0xf] %v653_v29  ;;  %656 = vst [vmem:[#allocation2 + $0x4ac] sm:$0xf] %v655_v30  ;;  %v659_v32 = vld [vmem:[%s19556_s7 + $0x4c0] sm:$0xf] }
  0xbd   :  { %658 = vst [vmem:[#allocation2 + $0x4b0] sm:$0xf] %v657_v31  ;;  %v661_v33 = vld [vmem:[%s19556_s7 + $0x498] sm:$0xf]  ;;  %v663_v34 = vld [vmem:[%s19556_s7 + $0x4c4] sm:$0xf] }
  0xbe   :  { %660 = vst [vmem:[#allocation2 + $0x4b4] sm:$0xf] %v659_v32  ;;  %662 = vst [vmem:[#allocation2 + $0x4b8] sm:$0xf] %v661_v33  ;;  %v665_v35 = vld [vmem:[%s19556_s7 + $0x49c] sm:$0xf] }
  0xbf   :  { %664 = vst [vmem:[#allocation2 + $0x4bc] sm:$0xf] %v663_v34  ;;  %v667_v36 = vld [vmem:[%s19556_s7 + $0x4c8] sm:$0xf]  ;;  %v669_v37 = vld [vmem:[%s19556_s7 + $0x4a0] sm:$0xf] }
  0xc0   :  { %666 = vst [vmem:[#allocation2 + $0x4c0] sm:$0xf] %v665_v35  ;;  %668 = vst [vmem:[#allocation2 + $0x4c4] sm:$0xf] %v667_v36  ;;  %v675_v39 = vld [vmem:[%s19556_s7 + $0x4fc] sm:$0xf] }
  0xc1   :  { %670 = vst [vmem:[#allocation2 + $0x4c8] sm:$0xf] %v669_v37  ;;  %v677_v40 = vld [vmem:[%s19556_s7 + $0x4d4] sm:$0xf]  ;;  %672 = vst [vmem:[#allocation2 + $0x4cc] sm:$0xff] %v671_v38   ;;  %v715_v59 = vld [vmem:[%s19556_s7 + $0x524] sm:$0xff]  }
  0xc2   :  { %676 = vst [vmem:[#allocation2 + $0x4d4] sm:$0xf] %v675_v39  ;;  %678 = vst [vmem:[#allocation2 + $0x4d8] sm:$0xf] %v677_v40  ;;  %v679_v41 = vld [vmem:[%s19556_s7 + $0x500] sm:$0xf] }
  0xc3   :  { %v681_v42 = vld [vmem:[%s19556_s7 + $0x4d8] sm:$0xf]  ;;  %v683_v43 = vld [vmem:[%s19556_s7 + $0x504] sm:$0xf]  ;;  %680 = vst [vmem:[#allocation2 + $0x4dc] sm:$0xf] %v679_v41 }
  0xc4   :  { %682 = vst [vmem:[#allocation2 + $0x4e0] sm:$0xf] %v681_v42  ;;  %684 = vst [vmem:[#allocation2 + $0x4e4] sm:$0xf] %v683_v43  ;;  %v685_v44 = vld [vmem:[%s19556_s7 + $0x4dc] sm:$0xf] }
  0xc5   :  { %v687_v45 = vld [vmem:[%s19556_s7 + $0x508] sm:$0xf]  ;;  %v689_v46 = vld [vmem:[%s19556_s7 + $0x4e0] sm:$0xf]  ;;  %686 = vst [vmem:[#allocation2 + $0x4e8] sm:$0xf] %v685_v44 }
  0xc6   :  { %688 = vst [vmem:[#allocation2 + $0x4ec] sm:$0xf] %v687_v45  ;;  %690 = vst [vmem:[#allocation2 + $0x4f0] sm:$0xf] %v689_v46  ;;  %v691_v47 = vld [vmem:[%s19556_s7 + $0x50c] sm:$0xf] }
  0xc7   :  { %v693_v48 = vld [vmem:[%s19556_s7 + $0x4e4] sm:$0xf]  ;;  %v695_v49 = vld [vmem:[%s19556_s7 + $0x510] sm:$0xf]  ;;  %692 = vst [vmem:[#allocation2 + $0x4f4] sm:$0xf] %v691_v47 }
  0xc8   :  { %694 = vst [vmem:[#allocation2 + $0x4f8] sm:$0xf] %v693_v48  ;;  %696 = vst [vmem:[#allocation2 + $0x4fc] sm:$0xf] %v695_v49  ;;  %v697_v50 = vld [vmem:[%s19556_s7 + $0x4e8] sm:$0xf] }
  0xc9   :  { %v699_v51 = vld [vmem:[%s19556_s7 + $0x514] sm:$0xf]  ;;  %v701_v52 = vld [vmem:[%s19556_s7 + $0x4ec] sm:$0xf]  ;;  %698 = vst [vmem:[#allocation2 + $0x500] sm:$0xf] %v697_v50 }
  0xca   :  { %700 = vst [vmem:[#allocation2 + $0x504] sm:$0xf] %v699_v51  ;;  %702 = vst [vmem:[#allocation2 + $0x508] sm:$0xf] %v701_v52  ;;  %v703_v53 = vld [vmem:[%s19556_s7 + $0x518] sm:$0xf] }
  0xcb   :  { %v705_v54 = vld [vmem:[%s19556_s7 + $0x4f0] sm:$0xf]  ;;  %v707_v55 = vld [vmem:[%s19556_s7 + $0x51c] sm:$0xf]  ;;  %704 = vst [vmem:[#allocation2 + $0x50c] sm:$0xf] %v703_v53 }
  0xcc   :  { %706 = vst [vmem:[#allocation2 + $0x510] sm:$0xf] %v705_v54  ;;  %708 = vst [vmem:[#allocation2 + $0x514] sm:$0xf] %v707_v55  ;;  %v709_v56 = vld [vmem:[%s19556_s7 + $0x4f4] sm:$0xf] }
  0xcd   :  { %v711_v57 = vld [vmem:[%s19556_s7 + $0x520] sm:$0xf]  ;;  %v713_v58 = vld [vmem:[%s19556_s7 + $0x4f8] sm:$0xf]  ;;  %710 = vst [vmem:[#allocation2 + $0x518] sm:$0xf] %v709_v56 }
  0xce   :  { %712 = vst [vmem:[#allocation2 + $0x51c] sm:$0xf] %v711_v57  ;;  %714 = vst [vmem:[#allocation2 + $0x520] sm:$0xf] %v713_v58  ;;  %v719_v60 = vld [vmem:[%s19556_s7 + $0x554] sm:$0xf] }
  0xcf   :  { %v721_v61 = vld [vmem:[%s19556_s7 + $0x52c] sm:$0xf]  ;;  %716 = vst [vmem:[#allocation2 + $0x524] sm:$0xff] %v715_v59   ;;  %720 = vst [vmem:[#allocation2 + $0x52c] sm:$0xf] %v719_v60  ;;  %v803_v37 = vld [vmem:[%s19556_s7 + $0x5d4] sm:$0xff]  }
  0xd0   :  { %722 = vst [vmem:[#allocation2 + $0x530] sm:$0xf] %v721_v61  ;;  %v723_v62 = vld [vmem:[%s19556_s7 + $0x558] sm:$0xf]  ;;  %v725_v63 = vld [vmem:[%s19556_s7 + $0x530] sm:$0xf] }
  0xd1   :  { %v727_v0 = vld [vmem:[%s19556_s7 + $0x55c] sm:$0xf]  ;;  %724 = vst [vmem:[#allocation2 + $0x534] sm:$0xf] %v723_v62  ;;  %726 = vst [vmem:[#allocation2 + $0x538] sm:$0xf] %v725_v63 }
  0xd2   :  { %728 = vst [vmem:[#allocation2 + $0x53c] sm:$0xf] %v727_v0  ;;  %v729_v1 = vld [vmem:[%s19556_s7 + $0x534] sm:$0xf]  ;;  %v731_v2 = vld [vmem:[%s19556_s7 + $0x560] sm:$0xf] }
  0xd3   :  { %v733_v3 = vld [vmem:[%s19556_s7 + $0x538] sm:$0xf]  ;;  %730 = vst [vmem:[#allocation2 + $0x540] sm:$0xf] %v729_v1  ;;  %732 = vst [vmem:[#allocation2 + $0x544] sm:$0xf] %v731_v2 }
  0xd4   :  { %734 = vst [vmem:[#allocation2 + $0x548] sm:$0xf] %v733_v3  ;;  %v735_v4 = vld [vmem:[%s19556_s7 + $0x564] sm:$0xf]  ;;  %v737_v5 = vld [vmem:[%s19556_s7 + $0x53c] sm:$0xf] }
  0xd5   :  { %v739_v6 = vld [vmem:[%s19556_s7 + $0x568] sm:$0xf]  ;;  %736 = vst [vmem:[#allocation2 + $0x54c] sm:$0xf] %v735_v4  ;;  %738 = vst [vmem:[#allocation2 + $0x550] sm:$0xf] %v737_v5 }
  0xd6   :  { %740 = vst [vmem:[#allocation2 + $0x554] sm:$0xf] %v739_v6  ;;  %v741_v7 = vld [vmem:[%s19556_s7 + $0x540] sm:$0xf]  ;;  %v743_v8 = vld [vmem:[%s19556_s7 + $0x56c] sm:$0xf] }
  0xd7   :  { %v745_v9 = vld [vmem:[%s19556_s7 + $0x544] sm:$0xf]  ;;  %742 = vst [vmem:[#allocation2 + $0x558] sm:$0xf] %v741_v7  ;;  %744 = vst [vmem:[#allocation2 + $0x55c] sm:$0xf] %v743_v8 }
  0xd8   :  { %746 = vst [vmem:[#allocation2 + $0x560] sm:$0xf] %v745_v9  ;;  %v747_v10 = vld [vmem:[%s19556_s7 + $0x570] sm:$0xf]  ;;  %v749_v11 = vld [vmem:[%s19556_s7 + $0x548] sm:$0xf] }
  0xd9   :  { %v751_v12 = vld [vmem:[%s19556_s7 + $0x574] sm:$0xf]  ;;  %748 = vst [vmem:[#allocation2 + $0x564] sm:$0xf] %v747_v10  ;;  %750 = vst [vmem:[#allocation2 + $0x568] sm:$0xf] %v749_v11 }
  0xda   :  { %752 = vst [vmem:[#allocation2 + $0x56c] sm:$0xf] %v751_v12  ;;  %v753_v13 = vld [vmem:[%s19556_s7 + $0x54c] sm:$0xf]  ;;  %v755_v14 = vld [vmem:[%s19556_s7 + $0x578] sm:$0xf] }
  0xdb   :  { %v757_v15 = vld [vmem:[%s19556_s7 + $0x550] sm:$0xf]  ;;  %754 = vst [vmem:[#allocation2 + $0x570] sm:$0xf] %v753_v13  ;;  %756 = vst [vmem:[#allocation2 + $0x574] sm:$0xf] %v755_v14 }
  0xdc   :  { %758 = vst [vmem:[#allocation2 + $0x578] sm:$0xf] %v757_v15  ;;  %v763_v17 = vld [vmem:[%s19556_s7 + $0x5ac] sm:$0xf]  ;;  %v765_v18 = vld [vmem:[%s19556_s7 + $0x584] sm:$0xf] }
  0xdd   :  { %760 = vst [vmem:[#allocation2 + $0x57c] sm:$0xff] %v759_v16   ;;  %764 = vst [vmem:[#allocation2 + $0x584] sm:$0xf] %v763_v17  ;;  %v767_v19 = vld [vmem:[%s19556_s7 + $0x5b0] sm:$0xf]  ;;  %v891_v15 = vld [vmem:[%s19556_s7 + $0x684] sm:$0xff]  }
  0xde   :  { %766 = vst [vmem:[#allocation2 + $0x588] sm:$0xf] %v765_v18  ;;  %v769_v20 = vld [vmem:[%s19556_s7 + $0x588] sm:$0xf]  ;;  %v771_v21 = vld [vmem:[%s19556_s7 + $0x5b4] sm:$0xf] }
  0xdf   :  { %768 = vst [vmem:[#allocation2 + $0x58c] sm:$0xf] %v767_v19  ;;  %770 = vst [vmem:[#allocation2 + $0x590] sm:$0xf] %v769_v20  ;;  %v773_v22 = vld [vmem:[%s19556_s7 + $0x58c] sm:$0xf] }
  0xe0   :  { %772 = vst [vmem:[#allocation2 + $0x594] sm:$0xf] %v771_v21  ;;  %v775_v23 = vld [vmem:[%s19556_s7 + $0x5b8] sm:$0xf]  ;;  %v777_v24 = vld [vmem:[%s19556_s7 + $0x590] sm:$0xf] }
  0xe1   :  { %774 = vst [vmem:[#allocation2 + $0x598] sm:$0xf] %v773_v22  ;;  %776 = vst [vmem:[#allocation2 + $0x59c] sm:$0xf] %v775_v23  ;;  %v779_v25 = vld [vmem:[%s19556_s7 + $0x5bc] sm:$0xf] }
  0xe2   :  { %778 = vst [vmem:[#allocation2 + $0x5a0] sm:$0xf] %v777_v24  ;;  %v781_v26 = vld [vmem:[%s19556_s7 + $0x594] sm:$0xf]  ;;  %v783_v27 = vld [vmem:[%s19556_s7 + $0x5c0] sm:$0xf] }
  0xe3   :  { %780 = vst [vmem:[#allocation2 + $0x5a4] sm:$0xf] %v779_v25  ;;  %782 = vst [vmem:[#allocation2 + $0x5a8] sm:$0xf] %v781_v26  ;;  %v785_v28 = vld [vmem:[%s19556_s7 + $0x598] sm:$0xf] }
  0xe4   :  { %784 = vst [vmem:[#allocation2 + $0x5ac] sm:$0xf] %v783_v27  ;;  %v787_v29 = vld [vmem:[%s19556_s7 + $0x5c4] sm:$0xf]  ;;  %v789_v30 = vld [vmem:[%s19556_s7 + $0x59c] sm:$0xf] }
  0xe5   :  { %786 = vst [vmem:[#allocation2 + $0x5b0] sm:$0xf] %v785_v28  ;;  %788 = vst [vmem:[#allocation2 + $0x5b4] sm:$0xf] %v787_v29  ;;  %v791_v31 = vld [vmem:[%s19556_s7 + $0x5c8] sm:$0xf] }
  0xe6   :  { %790 = vst [vmem:[#allocation2 + $0x5b8] sm:$0xf] %v789_v30  ;;  %v793_v32 = vld [vmem:[%s19556_s7 + $0x5a0] sm:$0xf]  ;;  %v795_v33 = vld [vmem:[%s19556_s7 + $0x5cc] sm:$0xf] }
  0xe7   :  { %792 = vst [vmem:[#allocation2 + $0x5bc] sm:$0xf] %v791_v31  ;;  %794 = vst [vmem:[#allocation2 + $0x5c0] sm:$0xf] %v793_v32  ;;  %v797_v34 = vld [vmem:[%s19556_s7 + $0x5a4] sm:$0xf] }
  0xe8   :  { %796 = vst [vmem:[#allocation2 + $0x5c4] sm:$0xf] %v795_v33  ;;  %v799_v35 = vld [vmem:[%s19556_s7 + $0x5d0] sm:$0xf]  ;;  %v801_v36 = vld [vmem:[%s19556_s7 + $0x5a8] sm:$0xf] }
  0xe9   :  { %798 = vst [vmem:[#allocation2 + $0x5c8] sm:$0xf] %v797_v34  ;;  %800 = vst [vmem:[#allocation2 + $0x5cc] sm:$0xf] %v799_v35  ;;  %v807_v38 = vld [vmem:[%s19556_s7 + $0x604] sm:$0xf] }
  0xea   :  { %802 = vst [vmem:[#allocation2 + $0x5d0] sm:$0xf] %v801_v36  ;;  %v809_v39 = vld [vmem:[%s19556_s7 + $0x5dc] sm:$0xf]  ;;  %804 = vst [vmem:[#allocation2 + $0x5d4] sm:$0xff] %v803_v37   ;;  %v847_v58 = vld [vmem:[%s19556_s7 + $0x62c] sm:$0xff]  }
  0xeb   :  { %808 = vst [vmem:[#allocation2 + $0x5dc] sm:$0xf] %v807_v38  ;;  %810 = vst [vmem:[#allocation2 + $0x5e0] sm:$0xf] %v809_v39  ;;  %v811_v40 = vld [vmem:[%s19556_s7 + $0x608] sm:$0xf] }
  0xec   :  { %v813_v41 = vld [vmem:[%s19556_s7 + $0x5e0] sm:$0xf]  ;;  %v815_v42 = vld [vmem:[%s19556_s7 + $0x60c] sm:$0xf]  ;;  %812 = vst [vmem:[#allocation2 + $0x5e4] sm:$0xf] %v811_v40 }
  0xed   :  { %814 = vst [vmem:[#allocation2 + $0x5e8] sm:$0xf] %v813_v41  ;;  %816 = vst [vmem:[#allocation2 + $0x5ec] sm:$0xf] %v815_v42  ;;  %v817_v43 = vld [vmem:[%s19556_s7 + $0x5e4] sm:$0xf] }
  0xee   :  { %v819_v44 = vld [vmem:[%s19556_s7 + $0x610] sm:$0xf]  ;;  %v821_v45 = vld [vmem:[%s19556_s7 + $0x5e8] sm:$0xf]  ;;  %818 = vst [vmem:[#allocation2 + $0x5f0] sm:$0xf] %v817_v43 }
  0xef   :  { %820 = vst [vmem:[#allocation2 + $0x5f4] sm:$0xf] %v819_v44  ;;  %822 = vst [vmem:[#allocation2 + $0x5f8] sm:$0xf] %v821_v45  ;;  %v823_v46 = vld [vmem:[%s19556_s7 + $0x614] sm:$0xf] }
  0xf0   :  { %v825_v47 = vld [vmem:[%s19556_s7 + $0x5ec] sm:$0xf]  ;;  %v827_v48 = vld [vmem:[%s19556_s7 + $0x618] sm:$0xf]  ;;  %824 = vst [vmem:[#allocation2 + $0x5fc] sm:$0xf] %v823_v46 }
  0xf1   :  { %826 = vst [vmem:[#allocation2 + $0x600] sm:$0xf] %v825_v47  ;;  %828 = vst [vmem:[#allocation2 + $0x604] sm:$0xf] %v827_v48  ;;  %v829_v49 = vld [vmem:[%s19556_s7 + $0x5f0] sm:$0xf] }
  0xf2   :  { %v831_v50 = vld [vmem:[%s19556_s7 + $0x61c] sm:$0xf]  ;;  %v833_v51 = vld [vmem:[%s19556_s7 + $0x5f4] sm:$0xf]  ;;  %830 = vst [vmem:[#allocation2 + $0x608] sm:$0xf] %v829_v49 }
  0xf3   :  { %832 = vst [vmem:[#allocation2 + $0x60c] sm:$0xf] %v831_v50  ;;  %834 = vst [vmem:[#allocation2 + $0x610] sm:$0xf] %v833_v51  ;;  %v835_v52 = vld [vmem:[%s19556_s7 + $0x620] sm:$0xf] }
  0xf4   :  { %v837_v53 = vld [vmem:[%s19556_s7 + $0x5f8] sm:$0xf]  ;;  %v839_v54 = vld [vmem:[%s19556_s7 + $0x624] sm:$0xf]  ;;  %836 = vst [vmem:[#allocation2 + $0x614] sm:$0xf] %v835_v52 }
  0xf5   :  { %838 = vst [vmem:[#allocation2 + $0x618] sm:$0xf] %v837_v53  ;;  %840 = vst [vmem:[#allocation2 + $0x61c] sm:$0xf] %v839_v54  ;;  %v841_v55 = vld [vmem:[%s19556_s7 + $0x5fc] sm:$0xf] }
  0xf6   :  { %v843_v56 = vld [vmem:[%s19556_s7 + $0x628] sm:$0xf]  ;;  %v845_v57 = vld [vmem:[%s19556_s7 + $0x600] sm:$0xf]  ;;  %842 = vst [vmem:[#allocation2 + $0x620] sm:$0xf] %v841_v55 }
  0xf7   :  { %844 = vst [vmem:[#allocation2 + $0x624] sm:$0xf] %v843_v56  ;;  %846 = vst [vmem:[#allocation2 + $0x628] sm:$0xf] %v845_v57  ;;  %v851_v59 = vld [vmem:[%s19556_s7 + $0x65c] sm:$0xf] }
  0xf8   :  { %v853_v60 = vld [vmem:[%s19556_s7 + $0x634] sm:$0xf]  ;;  %848 = vst [vmem:[#allocation2 + $0x62c] sm:$0xff] %v847_v58   ;;  %852 = vst [vmem:[#allocation2 + $0x634] sm:$0xf] %v851_v59  ;;  %v935_v36 = vld [vmem:[%s19556_s7 + $0x6dc] sm:$0xff]  }
  0xf9   :  { %854 = vst [vmem:[#allocation2 + $0x638] sm:$0xf] %v853_v60  ;;  %v855_v61 = vld [vmem:[%s19556_s7 + $0x660] sm:$0xf]  ;;  %v857_v62 = vld [vmem:[%s19556_s7 + $0x638] sm:$0xf] }
  0xfa   :  { %v859_v63 = vld [vmem:[%s19556_s7 + $0x664] sm:$0xf]  ;;  %856 = vst [vmem:[#allocation2 + $0x63c] sm:$0xf] %v855_v61  ;;  %858 = vst [vmem:[#allocation2 + $0x640] sm:$0xf] %v857_v62 }
  0xfb   :  { %860 = vst [vmem:[#allocation2 + $0x644] sm:$0xf] %v859_v63  ;;  %v861_v0 = vld [vmem:[%s19556_s7 + $0x63c] sm:$0xf]  ;;  %v863_v1 = vld [vmem:[%s19556_s7 + $0x668] sm:$0xf] }
  0xfc   :  { %v865_v2 = vld [vmem:[%s19556_s7 + $0x640] sm:$0xf]  ;;  %862 = vst [vmem:[#allocation2 + $0x648] sm:$0xf] %v861_v0  ;;  %864 = vst [vmem:[#allocation2 + $0x64c] sm:$0xf] %v863_v1 }
  0xfd   :  { %866 = vst [vmem:[#allocation2 + $0x650] sm:$0xf] %v865_v2  ;;  %v867_v3 = vld [vmem:[%s19556_s7 + $0x66c] sm:$0xf]  ;;  %v869_v4 = vld [vmem:[%s19556_s7 + $0x644] sm:$0xf] }
  0xfe   :  { %v871_v5 = vld [vmem:[%s19556_s7 + $0x670] sm:$0xf]  ;;  %868 = vst [vmem:[#allocation2 + $0x654] sm:$0xf] %v867_v3  ;;  %870 = vst [vmem:[#allocation2 + $0x658] sm:$0xf] %v869_v4 }
  0xff   :  { %872 = vst [vmem:[#allocation2 + $0x65c] sm:$0xf] %v871_v5  ;;  %v873_v6 = vld [vmem:[%s19556_s7 + $0x648] sm:$0xf]  ;;  %v875_v7 = vld [vmem:[%s19556_s7 + $0x674] sm:$0xf] }
 0x100   :  { %v877_v8 = vld [vmem:[%s19556_s7 + $0x64c] sm:$0xf]  ;;  %874 = vst [vmem:[#allocation2 + $0x660] sm:$0xf] %v873_v6  ;;  %876 = vst [vmem:[#allocation2 + $0x664] sm:$0xf] %v875_v7 }
 0x101   :  { %878 = vst [vmem:[#allocation2 + $0x668] sm:$0xf] %v877_v8  ;;  %v879_v9 = vld [vmem:[%s19556_s7 + $0x678] sm:$0xf]  ;;  %v881_v10 = vld [vmem:[%s19556_s7 + $0x650] sm:$0xf] }
 0x102   :  { %v883_v11 = vld [vmem:[%s19556_s7 + $0x67c] sm:$0xf]  ;;  %880 = vst [vmem:[#allocation2 + $0x66c] sm:$0xf] %v879_v9  ;;  %882 = vst [vmem:[#allocation2 + $0x670] sm:$0xf] %v881_v10 }
 0x103   :  { %884 = vst [vmem:[#allocation2 + $0x674] sm:$0xf] %v883_v11  ;;  %v885_v12 = vld [vmem:[%s19556_s7 + $0x654] sm:$0xf]  ;;  %v887_v13 = vld [vmem:[%s19556_s7 + $0x680] sm:$0xf] }
 0x104   :  { %v889_v14 = vld [vmem:[%s19556_s7 + $0x658] sm:$0xf]  ;;  %886 = vst [vmem:[#allocation2 + $0x678] sm:$0xf] %v885_v12  ;;  %888 = vst [vmem:[#allocation2 + $0x67c] sm:$0xf] %v887_v13 }
 0x105   :  { %890 = vst [vmem:[#allocation2 + $0x680] sm:$0xf] %v889_v14  ;;  %v895_v16 = vld [vmem:[%s19556_s7 + $0x6b4] sm:$0xf]  ;;  %v897_v17 = vld [vmem:[%s19556_s7 + $0x68c] sm:$0xf] }
 0x106   :  { %892 = vst [vmem:[#allocation2 + $0x684] sm:$0xff] %v891_v15   ;;  %896 = vst [vmem:[#allocation2 + $0x68c] sm:$0xf] %v895_v16  ;;  %v899_v18 = vld [vmem:[%s19556_s7 + $0x6b8] sm:$0xf]  ;;  %v1023_v14 = vld [vmem:[%s19556_s7 + $0x78c] sm:$0xff]  }
 0x107   :  { %898 = vst [vmem:[#allocation2 + $0x690] sm:$0xf] %v897_v17  ;;  %v901_v19 = vld [vmem:[%s19556_s7 + $0x690] sm:$0xf]  ;;  %v903_v20 = vld [vmem:[%s19556_s7 + $0x6bc] sm:$0xf] }
 0x108   :  { %900 = vst [vmem:[#allocation2 + $0x694] sm:$0xf] %v899_v18  ;;  %902 = vst [vmem:[#allocation2 + $0x698] sm:$0xf] %v901_v19  ;;  %v905_v21 = vld [vmem:[%s19556_s7 + $0x694] sm:$0xf] }
 0x109   :  { %904 = vst [vmem:[#allocation2 + $0x69c] sm:$0xf] %v903_v20  ;;  %v907_v22 = vld [vmem:[%s19556_s7 + $0x6c0] sm:$0xf]  ;;  %v909_v23 = vld [vmem:[%s19556_s7 + $0x698] sm:$0xf] }
 0x10a   :  { %906 = vst [vmem:[#allocation2 + $0x6a0] sm:$0xf] %v905_v21  ;;  %908 = vst [vmem:[#allocation2 + $0x6a4] sm:$0xf] %v907_v22  ;;  %v911_v24 = vld [vmem:[%s19556_s7 + $0x6c4] sm:$0xf] }
 0x10b   :  { %910 = vst [vmem:[#allocation2 + $0x6a8] sm:$0xf] %v909_v23  ;;  %v913_v25 = vld [vmem:[%s19556_s7 + $0x69c] sm:$0xf]  ;;  %v915_v26 = vld [vmem:[%s19556_s7 + $0x6c8] sm:$0xf] }
 0x10c   :  { %912 = vst [vmem:[#allocation2 + $0x6ac] sm:$0xf] %v911_v24  ;;  %914 = vst [vmem:[#allocation2 + $0x6b0] sm:$0xf] %v913_v25  ;;  %v917_v27 = vld [vmem:[%s19556_s7 + $0x6a0] sm:$0xf] }
 0x10d   :  { %916 = vst [vmem:[#allocation2 + $0x6b4] sm:$0xf] %v915_v26  ;;  %v919_v28 = vld [vmem:[%s19556_s7 + $0x6cc] sm:$0xf]  ;;  %v921_v29 = vld [vmem:[%s19556_s7 + $0x6a4] sm:$0xf] }
 0x10e   :  { %918 = vst [vmem:[#allocation2 + $0x6b8] sm:$0xf] %v917_v27  ;;  %920 = vst [vmem:[#allocation2 + $0x6bc] sm:$0xf] %v919_v28  ;;  %v923_v30 = vld [vmem:[%s19556_s7 + $0x6d0] sm:$0xf] }
 0x10f   :  { %922 = vst [vmem:[#allocation2 + $0x6c0] sm:$0xf] %v921_v29  ;;  %v925_v31 = vld [vmem:[%s19556_s7 + $0x6a8] sm:$0xf]  ;;  %v927_v32 = vld [vmem:[%s19556_s7 + $0x6d4] sm:$0xf] }
 0x110   :  { %924 = vst [vmem:[#allocation2 + $0x6c4] sm:$0xf] %v923_v30  ;;  %926 = vst [vmem:[#allocation2 + $0x6c8] sm:$0xf] %v925_v31  ;;  %v929_v33 = vld [vmem:[%s19556_s7 + $0x6ac] sm:$0xf] }
 0x111   :  { %928 = vst [vmem:[#allocation2 + $0x6cc] sm:$0xf] %v927_v32  ;;  %v931_v34 = vld [vmem:[%s19556_s7 + $0x6d8] sm:$0xf]  ;;  %v933_v35 = vld [vmem:[%s19556_s7 + $0x6b0] sm:$0xf] }
 0x112   :  { %930 = vst [vmem:[#allocation2 + $0x6d0] sm:$0xf] %v929_v33  ;;  %932 = vst [vmem:[#allocation2 + $0x6d4] sm:$0xf] %v931_v34  ;;  %v939_v37 = vld [vmem:[%s19556_s7 + $0x70c] sm:$0xf] }
 0x113   :  { %934 = vst [vmem:[#allocation2 + $0x6d8] sm:$0xf] %v933_v35  ;;  %v941_v38 = vld [vmem:[%s19556_s7 + $0x6e4] sm:$0xf]  ;;  %936 = vst [vmem:[#allocation2 + $0x6dc] sm:$0xff] %v935_v36   ;;  %v979_v57 = vld [vmem:[%s19556_s7 + $0x734] sm:$0xff]  }
 0x114   :  { %940 = vst [vmem:[#allocation2 + $0x6e4] sm:$0xf] %v939_v37  ;;  %942 = vst [vmem:[#allocation2 + $0x6e8] sm:$0xf] %v941_v38  ;;  %v943_v39 = vld [vmem:[%s19556_s7 + $0x710] sm:$0xf] }
 0x115   :  { %v945_v40 = vld [vmem:[%s19556_s7 + $0x6e8] sm:$0xf]  ;;  %v947_v41 = vld [vmem:[%s19556_s7 + $0x714] sm:$0xf]  ;;  %944 = vst [vmem:[#allocation2 + $0x6ec] sm:$0xf] %v943_v39 }
 0x116   :  { %946 = vst [vmem:[#allocation2 + $0x6f0] sm:$0xf] %v945_v40  ;;  %948 = vst [vmem:[#allocation2 + $0x6f4] sm:$0xf] %v947_v41  ;;  %v949_v42 = vld [vmem:[%s19556_s7 + $0x6ec] sm:$0xf] }
 0x117   :  { %v951_v43 = vld [vmem:[%s19556_s7 + $0x718] sm:$0xf]  ;;  %v953_v44 = vld [vmem:[%s19556_s7 + $0x6f0] sm:$0xf]  ;;  %950 = vst [vmem:[#allocation2 + $0x6f8] sm:$0xf] %v949_v42 }
 0x118   :  { %952 = vst [vmem:[#allocation2 + $0x6fc] sm:$0xf] %v951_v43  ;;  %954 = vst [vmem:[#allocation2 + $0x700] sm:$0xf] %v953_v44  ;;  %v955_v45 = vld [vmem:[%s19556_s7 + $0x71c] sm:$0xf] }
 0x119   :  { %v957_v46 = vld [vmem:[%s19556_s7 + $0x6f4] sm:$0xf]  ;;  %v959_v47 = vld [vmem:[%s19556_s7 + $0x720] sm:$0xf]  ;;  %956 = vst [vmem:[#allocation2 + $0x704] sm:$0xf] %v955_v45 }
 0x11a   :  { %958 = vst [vmem:[#allocation2 + $0x708] sm:$0xf] %v957_v46  ;;  %960 = vst [vmem:[#allocation2 + $0x70c] sm:$0xf] %v959_v47  ;;  %v961_v48 = vld [vmem:[%s19556_s7 + $0x6f8] sm:$0xf] }
 0x11b   :  { %v963_v49 = vld [vmem:[%s19556_s7 + $0x724] sm:$0xf]  ;;  %v965_v50 = vld [vmem:[%s19556_s7 + $0x6fc] sm:$0xf]  ;;  %962 = vst [vmem:[#allocation2 + $0x710] sm:$0xf] %v961_v48 }
 0x11c   :  { %964 = vst [vmem:[#allocation2 + $0x714] sm:$0xf] %v963_v49  ;;  %966 = vst [vmem:[#allocation2 + $0x718] sm:$0xf] %v965_v50  ;;  %v967_v51 = vld [vmem:[%s19556_s7 + $0x728] sm:$0xf] }
 0x11d   :  { %v969_v52 = vld [vmem:[%s19556_s7 + $0x700] sm:$0xf]  ;;  %v971_v53 = vld [vmem:[%s19556_s7 + $0x72c] sm:$0xf]  ;;  %968 = vst [vmem:[#allocation2 + $0x71c] sm:$0xf] %v967_v51 }
 0x11e   :  { %970 = vst [vmem:[#allocation2 + $0x720] sm:$0xf] %v969_v52  ;;  %972 = vst [vmem:[#allocation2 + $0x724] sm:$0xf] %v971_v53  ;;  %v973_v54 = vld [vmem:[%s19556_s7 + $0x704] sm:$0xf] }
 0x11f   :  { %v975_v55 = vld [vmem:[%s19556_s7 + $0x730] sm:$0xf]  ;;  %v977_v56 = vld [vmem:[%s19556_s7 + $0x708] sm:$0xf]  ;;  %974 = vst [vmem:[#allocation2 + $0x728] sm:$0xf] %v973_v54 }
 0x120   :  { %976 = vst [vmem:[#allocation2 + $0x72c] sm:$0xf] %v975_v55  ;;  %978 = vst [vmem:[#allocation2 + $0x730] sm:$0xf] %v977_v56  ;;  %v983_v58 = vld [vmem:[%s19556_s7 + $0x764] sm:$0xf] }
 0x121   :  { %v985_v59 = vld [vmem:[%s19556_s7 + $0x73c] sm:$0xf]  ;;  %980 = vst [vmem:[#allocation2 + $0x734] sm:$0xff] %v979_v57   ;;  %984 = vst [vmem:[#allocation2 + $0x73c] sm:$0xf] %v983_v58  ;;  %v1067_v35 = vld [vmem:[%s19556_s7 + $0x7e4] sm:$0xff]  }
 0x122   :  { %986 = vst [vmem:[#allocation2 + $0x740] sm:$0xf] %v985_v59  ;;  %v987_v60 = vld [vmem:[%s19556_s7 + $0x768] sm:$0xf]  ;;  %v989_v61 = vld [vmem:[%s19556_s7 + $0x740] sm:$0xf] }
 0x123   :  { %v991_v62 = vld [vmem:[%s19556_s7 + $0x76c] sm:$0xf]  ;;  %988 = vst [vmem:[#allocation2 + $0x744] sm:$0xf] %v987_v60  ;;  %990 = vst [vmem:[#allocation2 + $0x748] sm:$0xf] %v989_v61 }
 0x124   :  { %992 = vst [vmem:[#allocation2 + $0x74c] sm:$0xf] %v991_v62  ;;  %v993_v63 = vld [vmem:[%s19556_s7 + $0x744] sm:$0xf]  ;;  %v995_v0 = vld [vmem:[%s19556_s7 + $0x770] sm:$0xf] }
 0x125   :  { %v997_v1 = vld [vmem:[%s19556_s7 + $0x748] sm:$0xf]  ;;  %994 = vst [vmem:[#allocation2 + $0x750] sm:$0xf] %v993_v63  ;;  %996 = vst [vmem:[#allocation2 + $0x754] sm:$0xf] %v995_v0 }
 0x126   :  { %998 = vst [vmem:[#allocation2 + $0x758] sm:$0xf] %v997_v1  ;;  %v999_v2 = vld [vmem:[%s19556_s7 + $0x774] sm:$0xf]  ;;  %v1001_v3 = vld [vmem:[%s19556_s7 + $0x74c] sm:$0xf] }
 0x127   :  { %v1003_v4 = vld [vmem:[%s19556_s7 + $0x778] sm:$0xf]  ;;  %1000 = vst [vmem:[#allocation2 + $0x75c] sm:$0xf] %v999_v2  ;;  %1002 = vst [vmem:[#allocation2 + $0x760] sm:$0xf] %v1001_v3 }
 0x128   :  { %1004 = vst [vmem:[#allocation2 + $0x764] sm:$0xf] %v1003_v4  ;;  %v1005_v5 = vld [vmem:[%s19556_s7 + $0x750] sm:$0xf]  ;;  %v1007_v6 = vld [vmem:[%s19556_s7 + $0x77c] sm:$0xf] }
 0x129   :  { %v1009_v7 = vld [vmem:[%s19556_s7 + $0x754] sm:$0xf]  ;;  %1006 = vst [vmem:[#allocation2 + $0x768] sm:$0xf] %v1005_v5  ;;  %1008 = vst [vmem:[#allocation2 + $0x76c] sm:$0xf] %v1007_v6 }
 0x12a   :  { %1010 = vst [vmem:[#allocation2 + $0x770] sm:$0xf] %v1009_v7  ;;  %v1011_v8 = vld [vmem:[%s19556_s7 + $0x780] sm:$0xf]  ;;  %v1013_v9 = vld [vmem:[%s19556_s7 + $0x758] sm:$0xf] }
 0x12b   :  { %v1015_v10 = vld [vmem:[%s19556_s7 + $0x784] sm:$0xf]  ;;  %1012 = vst [vmem:[#allocation2 + $0x774] sm:$0xf] %v1011_v8  ;;  %1014 = vst [vmem:[#allocation2 + $0x778] sm:$0xf] %v1013_v9 }
 0x12c   :  { %1016 = vst [vmem:[#allocation2 + $0x77c] sm:$0xf] %v1015_v10  ;;  %v1017_v11 = vld [vmem:[%s19556_s7 + $0x75c] sm:$0xf]  ;;  %v1019_v12 = vld [vmem:[%s19556_s7 + $0x788] sm:$0xf] }
 0x12d   :  { %v1021_v13 = vld [vmem:[%s19556_s7 + $0x760] sm:$0xf]  ;;  %1018 = vst [vmem:[#allocation2 + $0x780] sm:$0xf] %v1017_v11  ;;  %1020 = vst [vmem:[#allocation2 + $0x784] sm:$0xf] %v1019_v12 }
 0x12e   :  { %1022 = vst [vmem:[#allocation2 + $0x788] sm:$0xf] %v1021_v13  ;;  %v1027_v15 = vld [vmem:[%s19556_s7 + $0x7bc] sm:$0xf]  ;;  %v1029_v16 = vld [vmem:[%s19556_s7 + $0x794] sm:$0xf] }
 0x12f   :  { %1024 = vst [vmem:[#allocation2 + $0x78c] sm:$0xff] %v1023_v14   ;;  %1028 = vst [vmem:[#allocation2 + $0x794] sm:$0xf] %v1027_v15  ;;  %v1031_v17 = vld [vmem:[%s19556_s7 + $0x7c0] sm:$0xf]  ;;  %v1155_v13 = vld [vmem:[%s19556_s7 + $0x894] sm:$0xff]  }
 0x130   :  { %1030 = vst [vmem:[#allocation2 + $0x798] sm:$0xf] %v1029_v16  ;;  %v1033_v18 = vld [vmem:[%s19556_s7 + $0x798] sm:$0xf]  ;;  %v1035_v19 = vld [vmem:[%s19556_s7 + $0x7c4] sm:$0xf] }
 0x131   :  { %1032 = vst [vmem:[#allocation2 + $0x79c] sm:$0xf] %v1031_v17  ;;  %1034 = vst [vmem:[#allocation2 + $0x7a0] sm:$0xf] %v1033_v18  ;;  %v1037_v20 = vld [vmem:[%s19556_s7 + $0x79c] sm:$0xf] }
 0x132   :  { %1036 = vst [vmem:[#allocation2 + $0x7a4] sm:$0xf] %v1035_v19  ;;  %v1039_v21 = vld [vmem:[%s19556_s7 + $0x7c8] sm:$0xf]  ;;  %v1041_v22 = vld [vmem:[%s19556_s7 + $0x7a0] sm:$0xf] }
 0x133   :  { %1038 = vst [vmem:[#allocation2 + $0x7a8] sm:$0xf] %v1037_v20  ;;  %1040 = vst [vmem:[#allocation2 + $0x7ac] sm:$0xf] %v1039_v21  ;;  %v1043_v23 = vld [vmem:[%s19556_s7 + $0x7cc] sm:$0xf] }
 0x134   :  { %1042 = vst [vmem:[#allocation2 + $0x7b0] sm:$0xf] %v1041_v22  ;;  %v1045_v24 = vld [vmem:[%s19556_s7 + $0x7a4] sm:$0xf]  ;;  %v1047_v25 = vld [vmem:[%s19556_s7 + $0x7d0] sm:$0xf] }
 0x135   :  { %1044 = vst [vmem:[#allocation2 + $0x7b4] sm:$0xf] %v1043_v23  ;;  %1046 = vst [vmem:[#allocation2 + $0x7b8] sm:$0xf] %v1045_v24  ;;  %v1049_v26 = vld [vmem:[%s19556_s7 + $0x7a8] sm:$0xf] }
 0x136   :  { %1048 = vst [vmem:[#allocation2 + $0x7bc] sm:$0xf] %v1047_v25  ;;  %v1051_v27 = vld [vmem:[%s19556_s7 + $0x7d4] sm:$0xf]  ;;  %v1053_v28 = vld [vmem:[%s19556_s7 + $0x7ac] sm:$0xf] }
 0x137   :  { %1050 = vst [vmem:[#allocation2 + $0x7c0] sm:$0xf] %v1049_v26  ;;  %1052 = vst [vmem:[#allocation2 + $0x7c4] sm:$0xf] %v1051_v27  ;;  %v1055_v29 = vld [vmem:[%s19556_s7 + $0x7d8] sm:$0xf] }
 0x138   :  { %1054 = vst [vmem:[#allocation2 + $0x7c8] sm:$0xf] %v1053_v28  ;;  %v1057_v30 = vld [vmem:[%s19556_s7 + $0x7b0] sm:$0xf]  ;;  %v1059_v31 = vld [vmem:[%s19556_s7 + $0x7dc] sm:$0xf] }
 0x139   :  { %1056 = vst [vmem:[#allocation2 + $0x7cc] sm:$0xf] %v1055_v29  ;;  %1058 = vst [vmem:[#allocation2 + $0x7d0] sm:$0xf] %v1057_v30  ;;  %v1061_v32 = vld [vmem:[%s19556_s7 + $0x7b4] sm:$0xf] }
 0x13a   :  { %1060 = vst [vmem:[#allocation2 + $0x7d4] sm:$0xf] %v1059_v31  ;;  %v1063_v33 = vld [vmem:[%s19556_s7 + $0x7e0] sm:$0xf]  ;;  %v1065_v34 = vld [vmem:[%s19556_s7 + $0x7b8] sm:$0xf] }
 0x13b   :  { %1062 = vst [vmem:[#allocation2 + $0x7d8] sm:$0xf] %v1061_v32  ;;  %1064 = vst [vmem:[#allocation2 + $0x7dc] sm:$0xf] %v1063_v33  ;;  %v1071_v36 = vld [vmem:[%s19556_s7 + $0x814] sm:$0xf] }
 0x13c   :  { %1066 = vst [vmem:[#allocation2 + $0x7e0] sm:$0xf] %v1065_v34  ;;  %v1073_v37 = vld [vmem:[%s19556_s7 + $0x7ec] sm:$0xf]  ;;  %1068 = vst [vmem:[#allocation2 + $0x7e4] sm:$0xff] %v1067_v35   ;;  %v1111_v56 = vld [vmem:[%s19556_s7 + $0x83c] sm:$0xff]  }
 0x13d   :  { %1072 = vst [vmem:[#allocation2 + $0x7ec] sm:$0xf] %v1071_v36  ;;  %1074 = vst [vmem:[#allocation2 + $0x7f0] sm:$0xf] %v1073_v37  ;;  %v1075_v38 = vld [vmem:[%s19556_s7 + $0x818] sm:$0xf] }
 0x13e   :  { %v1077_v39 = vld [vmem:[%s19556_s7 + $0x7f0] sm:$0xf]  ;;  %v1079_v40 = vld [vmem:[%s19556_s7 + $0x81c] sm:$0xf]  ;;  %1076 = vst [vmem:[#allocation2 + $0x7f4] sm:$0xf] %v1075_v38 }
 0x13f   :  { %1078 = vst [vmem:[#allocation2 + $0x7f8] sm:$0xf] %v1077_v39  ;;  %1080 = vst [vmem:[#allocation2 + $0x7fc] sm:$0xf] %v1079_v40  ;;  %v1081_v41 = vld [vmem:[%s19556_s7 + $0x7f4] sm:$0xf] }
 0x140   :  { %v1083_v42 = vld [vmem:[%s19556_s7 + $0x820] sm:$0xf]  ;;  %v1085_v43 = vld [vmem:[%s19556_s7 + $0x7f8] sm:$0xf]  ;;  %1082 = vst [vmem:[#allocation2 + $0x800] sm:$0xf] %v1081_v41 }
 0x141   :  { %1084 = vst [vmem:[#allocation2 + $0x804] sm:$0xf] %v1083_v42  ;;  %1086 = vst [vmem:[#allocation2 + $0x808] sm:$0xf] %v1085_v43  ;;  %v1087_v44 = vld [vmem:[%s19556_s7 + $0x824] sm:$0xf] }
 0x142   :  { %v1089_v45 = vld [vmem:[%s19556_s7 + $0x7fc] sm:$0xf]  ;;  %v1091_v46 = vld [vmem:[%s19556_s7 + $0x828] sm:$0xf]  ;;  %1088 = vst [vmem:[#allocation2 + $0x80c] sm:$0xf] %v1087_v44 }
 0x143   :  { %1090 = vst [vmem:[#allocation2 + $0x810] sm:$0xf] %v1089_v45  ;;  %1092 = vst [vmem:[#allocation2 + $0x814] sm:$0xf] %v1091_v46  ;;  %v1093_v47 = vld [vmem:[%s19556_s7 + $0x800] sm:$0xf] }
 0x144   :  { %v1095_v48 = vld [vmem:[%s19556_s7 + $0x82c] sm:$0xf]  ;;  %v1097_v49 = vld [vmem:[%s19556_s7 + $0x804] sm:$0xf]  ;;  %1094 = vst [vmem:[#allocation2 + $0x818] sm:$0xf] %v1093_v47 }
 0x145   :  { %1096 = vst [vmem:[#allocation2 + $0x81c] sm:$0xf] %v1095_v48  ;;  %1098 = vst [vmem:[#allocation2 + $0x820] sm:$0xf] %v1097_v49  ;;  %v1099_v50 = vld [vmem:[%s19556_s7 + $0x830] sm:$0xf] }
 0x146   :  { %v1101_v51 = vld [vmem:[%s19556_s7 + $0x808] sm:$0xf]  ;;  %v1103_v52 = vld [vmem:[%s19556_s7 + $0x834] sm:$0xf]  ;;  %1100 = vst [vmem:[#allocation2 + $0x824] sm:$0xf] %v1099_v50 }
 0x147   :  { %1102 = vst [vmem:[#allocation2 + $0x828] sm:$0xf] %v1101_v51  ;;  %1104 = vst [vmem:[#allocation2 + $0x82c] sm:$0xf] %v1103_v52  ;;  %v1105_v53 = vld [vmem:[%s19556_s7 + $0x80c] sm:$0xf] }
 0x148   :  { %v1107_v54 = vld [vmem:[%s19556_s7 + $0x838] sm:$0xf]  ;;  %v1109_v55 = vld [vmem:[%s19556_s7 + $0x810] sm:$0xf]  ;;  %1106 = vst [vmem:[#allocation2 + $0x830] sm:$0xf] %v1105_v53 }
 0x149   :  { %1108 = vst [vmem:[#allocation2 + $0x834] sm:$0xf] %v1107_v54  ;;  %1110 = vst [vmem:[#allocation2 + $0x838] sm:$0xf] %v1109_v55  ;;  %v1115_v57 = vld [vmem:[%s19556_s7 + $0x86c] sm:$0xf] }
 0x14a   :  { %v1117_v58 = vld [vmem:[%s19556_s7 + $0x844] sm:$0xf]  ;;  %1112 = vst [vmem:[#allocation2 + $0x83c] sm:$0xff] %v1111_v56   ;;  %1116 = vst [vmem:[#allocation2 + $0x844] sm:$0xf] %v1115_v57  ;;  %v1199_v34 = vld [vmem:[%s19556_s7 + $0x8ec] sm:$0xff]  }
 0x14b   :  { %1118 = vst [vmem:[#allocation2 + $0x848] sm:$0xf] %v1117_v58  ;;  %v1119_v59 = vld [vmem:[%s19556_s7 + $0x870] sm:$0xf]  ;;  %v1121_v60 = vld [vmem:[%s19556_s7 + $0x848] sm:$0xf] }
 0x14c   :  { %v1123_v61 = vld [vmem:[%s19556_s7 + $0x874] sm:$0xf]  ;;  %1120 = vst [vmem:[#allocation2 + $0x84c] sm:$0xf] %v1119_v59  ;;  %1122 = vst [vmem:[#allocation2 + $0x850] sm:$0xf] %v1121_v60 }
 0x14d   :  { %1124 = vst [vmem:[#allocation2 + $0x854] sm:$0xf] %v1123_v61  ;;  %v1125_v62 = vld [vmem:[%s19556_s7 + $0x84c] sm:$0xf]  ;;  %v1127_v63 = vld [vmem:[%s19556_s7 + $0x878] sm:$0xf] }
 0x14e   :  { %v1129_v0 = vld [vmem:[%s19556_s7 + $0x850] sm:$0xf]  ;;  %1126 = vst [vmem:[#allocation2 + $0x858] sm:$0xf] %v1125_v62  ;;  %1128 = vst [vmem:[#allocation2 + $0x85c] sm:$0xf] %v1127_v63 }
 0x14f   :  { %1130 = vst [vmem:[#allocation2 + $0x860] sm:$0xf] %v1129_v0  ;;  %v1131_v1 = vld [vmem:[%s19556_s7 + $0x87c] sm:$0xf]  ;;  %v1133_v2 = vld [vmem:[%s19556_s7 + $0x854] sm:$0xf] }
 0x150   :  { %v1135_v3 = vld [vmem:[%s19556_s7 + $0x880] sm:$0xf]  ;;  %1132 = vst [vmem:[#allocation2 + $0x864] sm:$0xf] %v1131_v1  ;;  %1134 = vst [vmem:[#allocation2 + $0x868] sm:$0xf] %v1133_v2 }
 0x151   :  { %1136 = vst [vmem:[#allocation2 + $0x86c] sm:$0xf] %v1135_v3  ;;  %v1137_v4 = vld [vmem:[%s19556_s7 + $0x858] sm:$0xf]  ;;  %v1139_v5 = vld [vmem:[%s19556_s7 + $0x884] sm:$0xf] }
 0x152   :  { %v1141_v6 = vld [vmem:[%s19556_s7 + $0x85c] sm:$0xf]  ;;  %1138 = vst [vmem:[#allocation2 + $0x870] sm:$0xf] %v1137_v4  ;;  %1140 = vst [vmem:[#allocation2 + $0x874] sm:$0xf] %v1139_v5 }
 0x153   :  { %1142 = vst [vmem:[#allocation2 + $0x878] sm:$0xf] %v1141_v6  ;;  %v1143_v7 = vld [vmem:[%s19556_s7 + $0x888] sm:$0xf]  ;;  %v1145_v8 = vld [vmem:[%s19556_s7 + $0x860] sm:$0xf] }
 0x154   :  { %v1147_v9 = vld [vmem:[%s19556_s7 + $0x88c] sm:$0xf]  ;;  %1144 = vst [vmem:[#allocation2 + $0x87c] sm:$0xf] %v1143_v7  ;;  %1146 = vst [vmem:[#allocation2 + $0x880] sm:$0xf] %v1145_v8 }
 0x155   :  { %1148 = vst [vmem:[#allocation2 + $0x884] sm:$0xf] %v1147_v9  ;;  %v1149_v10 = vld [vmem:[%s19556_s7 + $0x864] sm:$0xf]  ;;  %v1151_v11 = vld [vmem:[%s19556_s7 + $0x890] sm:$0xf] }
 0x156   :  { %v1153_v12 = vld [vmem:[%s19556_s7 + $0x868] sm:$0xf]  ;;  %1150 = vst [vmem:[#allocation2 + $0x888] sm:$0xf] %v1149_v10  ;;  %1152 = vst [vmem:[#allocation2 + $0x88c] sm:$0xf] %v1151_v11 }
 0x157   :  { %1154 = vst [vmem:[#allocation2 + $0x890] sm:$0xf] %v1153_v12  ;;  %v1159_v14 = vld [vmem:[%s19556_s7 + $0x8c4] sm:$0xf]  ;;  %v1161_v15 = vld [vmem:[%s19556_s7 + $0x89c] sm:$0xf] }
 0x158   :  { %1156 = vst [vmem:[#allocation2 + $0x894] sm:$0xff] %v1155_v13   ;;  %1160 = vst [vmem:[#allocation2 + $0x89c] sm:$0xf] %v1159_v14  ;;  %v1163_v16 = vld [vmem:[%s19556_s7 + $0x8c8] sm:$0xf] }
 0x159   :  { %1162 = vst [vmem:[#allocation2 + $0x8a0] sm:$0xf] %v1161_v15  ;;  %v1165_v17 = vld [vmem:[%s19556_s7 + $0x8a0] sm:$0xf]  ;;  %v1167_v18 = vld [vmem:[%s19556_s7 + $0x8cc] sm:$0xf] }
 0x15a   :  { %1164 = vst [vmem:[#allocation2 + $0x8a4] sm:$0xf] %v1163_v16  ;;  %1166 = vst [vmem:[#allocation2 + $0x8a8] sm:$0xf] %v1165_v17  ;;  %v1169_v19 = vld [vmem:[%s19556_s7 + $0x8a4] sm:$0xf] }
 0x15b   :  { %1168 = vst [vmem:[#allocation2 + $0x8ac] sm:$0xf] %v1167_v18  ;;  %v1171_v20 = vld [vmem:[%s19556_s7 + $0x8d0] sm:$0xf]  ;;  %v1173_v21 = vld [vmem:[%s19556_s7 + $0x8a8] sm:$0xf] }
 0x15c   :  { %1170 = vst [vmem:[#allocation2 + $0x8b0] sm:$0xf] %v1169_v19  ;;  %1172 = vst [vmem:[#allocation2 + $0x8b4] sm:$0xf] %v1171_v20  ;;  %v1175_v22 = vld [vmem:[%s19556_s7 + $0x8d4] sm:$0xf] }
 0x15d   :  { %1174 = vst [vmem:[#allocation2 + $0x8b8] sm:$0xf] %v1173_v21  ;;  %v1177_v23 = vld [vmem:[%s19556_s7 + $0x8ac] sm:$0xf]  ;;  %v1179_v24 = vld [vmem:[%s19556_s7 + $0x8d8] sm:$0xf] }
 0x15e   :  { %1176 = vst [vmem:[#allocation2 + $0x8bc] sm:$0xf] %v1175_v22  ;;  %1178 = vst [vmem:[#allocation2 + $0x8c0] sm:$0xf] %v1177_v23  ;;  %v1181_v25 = vld [vmem:[%s19556_s7 + $0x8b0] sm:$0xf] }
 0x15f   :  { %1180 = vst [vmem:[#allocation2 + $0x8c4] sm:$0xf] %v1179_v24  ;;  %v1183_v26 = vld [vmem:[%s19556_s7 + $0x8dc] sm:$0xf]  ;;  %v1185_v27 = vld [vmem:[%s19556_s7 + $0x8b4] sm:$0xf] }
 0x160   :  { %1182 = vst [vmem:[#allocation2 + $0x8c8] sm:$0xf] %v1181_v25  ;;  %1184 = vst [vmem:[#allocation2 + $0x8cc] sm:$0xf] %v1183_v26  ;;  %v1187_v28 = vld [vmem:[%s19556_s7 + $0x8e0] sm:$0xf] }
 0x161   :  { %1186 = vst [vmem:[#allocation2 + $0x8d0] sm:$0xf] %v1185_v27  ;;  %v1189_v29 = vld [vmem:[%s19556_s7 + $0x8b8] sm:$0xf]  ;;  %v1191_v30 = vld [vmem:[%s19556_s7 + $0x8e4] sm:$0xf] }
 0x162   :  { %1188 = vst [vmem:[#allocation2 + $0x8d4] sm:$0xf] %v1187_v28  ;;  %1190 = vst [vmem:[#allocation2 + $0x8d8] sm:$0xf] %v1189_v29  ;;  %v1193_v31 = vld [vmem:[%s19556_s7 + $0x8bc] sm:$0xf] }
 0x163   :  { %1192 = vst [vmem:[#allocation2 + $0x8dc] sm:$0xf] %v1191_v30  ;;  %v1195_v32 = vld [vmem:[%s19556_s7 + $0x8e8] sm:$0xf]  ;;  %v1197_v33 = vld [vmem:[%s19556_s7 + $0x8c0] sm:$0xf] }
 0x164   :  { %1194 = vst [vmem:[#allocation2 + $0x8e0] sm:$0xf] %v1193_v31  ;;  %1196 = vst [vmem:[#allocation2 + $0x8e4] sm:$0xf] %v1195_v32  ;;  %v1203_v35 = vld [vmem:[%s19556_s7 + $0x91c] sm:$0xf] }
 0x165   :  { %1198 = vst [vmem:[#allocation2 + $0x8e8] sm:$0xf] %v1197_v33  ;;  %v1205_v36 = vld [vmem:[%s19556_s7 + $0x8f4] sm:$0xf]  ;;  %1200 = vst [vmem:[#allocation2 + $0x8ec] sm:$0xff] %v1199_v34  }
 0x166   :  { %1204 = vst [vmem:[#allocation2 + $0x8f4] sm:$0xf] %v1203_v35  ;;  %1206 = vst [vmem:[#allocation2 + $0x8f8] sm:$0xf] %v1205_v36  ;;  %v1207_v37 = vld [vmem:[%s19556_s7 + $0x920] sm:$0xf] }
 0x167   :  { %v1209_v38 = vld [vmem:[%s19556_s7 + $0x8f8] sm:$0xf]  ;;  %v1211_v39 = vld [vmem:[%s19556_s7 + $0x924] sm:$0xf]  ;;  %1208 = vst [vmem:[#allocation2 + $0x8fc] sm:$0xf] %v1207_v37 }
 0x168   :  { %1210 = vst [vmem:[#allocation2 + $0x900] sm:$0xf] %v1209_v38  ;;  %1212 = vst [vmem:[#allocation2 + $0x904] sm:$0xf] %v1211_v39  ;;  %v1213_v40 = vld [vmem:[%s19556_s7 + $0x8fc] sm:$0xf] }
 0x169   :  { %v1215_v41 = vld [vmem:[%s19556_s7 + $0x928] sm:$0xf]  ;;  %v1217_v42 = vld [vmem:[%s19556_s7 + $0x900] sm:$0xf]  ;;  %1214 = vst [vmem:[#allocation2 + $0x908] sm:$0xf] %v1213_v40 }
 0x16a   :  { %1216 = vst [vmem:[#allocation2 + $0x90c] sm:$0xf] %v1215_v41  ;;  %1218 = vst [vmem:[#allocation2 + $0x910] sm:$0xf] %v1217_v42  ;;  %v1219_v43 = vld [vmem:[%s19556_s7 + $0x92c] sm:$0xf] }
 0x16b   :  { %v1221_v44 = vld [vmem:[%s19556_s7 + $0x904] sm:$0xf]  ;;  %v1223_v45 = vld [vmem:[%s19556_s7 + $0x930] sm:$0xf]  ;;  %1220 = vst [vmem:[#allocation2 + $0x914] sm:$0xf] %v1219_v43 }
 0x16c   :  { %1222 = vst [vmem:[#allocation2 + $0x918] sm:$0xf] %v1221_v44  ;;  %1224 = vst [vmem:[#allocation2 + $0x91c] sm:$0xf] %v1223_v45  ;;  %v1225_v46 = vld [vmem:[%s19556_s7 + $0x908] sm:$0xf] }
 0x16d   :  { %v1227_v47 = vld [vmem:[%s19556_s7 + $0x934] sm:$0xf]  ;;  %v1229_v48 = vld [vmem:[%s19556_s7 + $0x90c] sm:$0xf]  ;;  %1226 = vst [vmem:[#allocation2 + $0x920] sm:$0xf] %v1225_v46 }
 0x16e   :  { %1228 = vst [vmem:[#allocation2 + $0x924] sm:$0xf] %v1227_v47  ;;  %1230 = vst [vmem:[#allocation2 + $0x928] sm:$0xf] %v1229_v48  ;;  %v1231_v49 = vld [vmem:[%s19556_s7 + $0x938] sm:$0xf] }
 0x16f   :  { %v1233_v50 = vld [vmem:[%s19556_s7 + $0x910] sm:$0xf]  ;;  %v1235_v51 = vld [vmem:[%s19556_s7 + $0x93c] sm:$0xf]  ;;  %1232 = vst [vmem:[#allocation2 + $0x92c] sm:$0xf] %v1231_v49 }
 0x170   :  { %1234 = vst [vmem:[#allocation2 + $0x930] sm:$0xf] %v1233_v50  ;;  %1236 = vst [vmem:[#allocation2 + $0x934] sm:$0xf] %v1235_v51  ;;  %v1237_v52 = vld [vmem:[%s19556_s7 + $0x914] sm:$0xf] }
 0x171   :  { %v1239_v53 = vld [vmem:[%s19556_s7 + $0x940] sm:$0xf]  ;;  %v1241_v54 = vld [vmem:[%s19556_s7 + $0x918] sm:$0xf]  ;;  %1238 = vst [vmem:[#allocation2 + $0x938] sm:$0xf] %v1237_v52 }
 0x172   :  { %1240 = vst [vmem:[#allocation2 + $0x93c] sm:$0xf] %v1239_v53  ;;  %1242 = vst [vmem:[#allocation2 + $0x940] sm:$0xf] %v1241_v54  ;;  %v1243_v55 = vld [vmem:[%s19556_s7 + $0x944] sm:$0xf] }
 0x173   :  { %1244 = vst [vmem:[#allocation2 + $0x944] sm:$0xf] %v1243_v55 }
 0x174   :  { %4872 = vsyncadd [#allocation4], 38016  ;;  %v16033_v56 = vld [vmem:[%s19559_s10] sm:$0xff]  ;;  %v16038_v57 = vld [vmem:[%s19559_s10 + $0x8] sm:$0xff]  ;;  %vm14254_vm0 = vmmov 0  }
 0x175   :  { %v16043_v58 = vld [vmem:[%s19559_s10 + $0x10] sm:$0xff]  ;;  %v16048_v59 = vld [vmem:[%s19559_s10 + $0x18] sm:$0xff]  ;;  %v16053_v60 = vld [vmem:[%s19559_s10 + $0x20] sm:$0xff] }
 0x176   :  { %v16058_v61 = vld [vmem:[%s19559_s10 + $0x28] sm:$0xff]  ;;  %v16063_v62 = vld [vmem:[%s19559_s10 + $0x30] sm:$0xff]  ;;  %v16068_v63 = vld [vmem:[%s19559_s10 + $0x38] sm:$0xff] }
 0x177   :  { %19573 = vst [vmem:[#allocation9_spill] sm:$0xff] %v16068_v63  ;;  %v16073_v0 = vld [vmem:[%s19559_s10 + $0x40] sm:$0xff]  ;;  %v16078_v1 = vld [vmem:[%s19559_s10 + $0x48] sm:$0xff]  ;;  %v16083_v2 = vld [vmem:[%s19559_s10 + $0x50] sm:$0xff] }
 0x178   :  { %v16088_v3 = vld [vmem:[%s19559_s10 + $0x58] sm:$0xff]  ;;  %v16093_v4 = vld [vmem:[%s19559_s10 + $0x60] sm:$0xff]  ;;  %v16098_v5 = vld [vmem:[%s19559_s10 + $0x68] sm:$0xff] }
 0x179   :  { %v16103_v6 = vld [vmem:[%s19559_s10 + $0x70] sm:$0xff]  ;;  %v16108_v7 = vld [vmem:[%s19559_s10 + $0x78] sm:$0xff]  ;;  %v16113_v8 = vld [vmem:[%s19559_s10 + $0x80] sm:$0xff] }
 0x17a   :  { %v16118_v9 = vld [vmem:[%s19559_s10 + $0x88] sm:$0xff]  ;;  %v16123_v10 = vld [vmem:[%s19559_s10 + $0x90] sm:$0xff]  ;;  %v16128_v11 = vld [vmem:[%s19559_s10 + $0x98] sm:$0xff] }
 0x17b   :  { %v16133_v12 = vld [vmem:[%s19559_s10 + $0xa0] sm:$0xff]  ;;  %v16138_v13 = vld [vmem:[%s19559_s10 + $0xa8] sm:$0xff]  ;;  %v16143_v14 = vld [vmem:[%s19559_s10 + $0xb0] sm:$0xff] }
 0x17c   :  { %v16148_v15 = vld [vmem:[%s19559_s10 + $0xb8] sm:$0xff]  ;;  %v16153_v16 = vld [vmem:[%s19559_s10 + $0xc0] sm:$0xff]  ;;  %v16158_v17 = vld [vmem:[%s19559_s10 + $0xc8] sm:$0xff] }
 0x17d   :  { %v16163_v18 = vld [vmem:[%s19559_s10 + $0xd0] sm:$0xff]  ;;  %v16168_v19 = vld [vmem:[%s19559_s10 + $0xd8] sm:$0xff]  ;;  %v16173_v20 = vld [vmem:[%s19559_s10 + $0xe0] sm:$0xff] }
 0x17e   :  { %v16178_v21 = vld [vmem:[%s19559_s10 + $0xe8] sm:$0xff]  ;;  %v16183_v22 = vld [vmem:[%s19559_s10 + $0xf0] sm:$0xff]  ;;  %v16188_v23 = vld [vmem:[%s19559_s10 + $0xf8] sm:$0xff] }
 0x17f   :  { %v16193_v24 = vld [vmem:[%s19559_s10 + $0x100] sm:$0xff]  ;;  %v16198_v25 = vld [vmem:[%s19559_s10 + $0x108] sm:$0xff]  ;;  %v16203_v26 = vld [vmem:[%s19559_s10 + $0x110] sm:$0xff] }
 0x180   :  { %19574 = vst [vmem:[#allocation10_spill] sm:$0xff] %v16193_v24  ;;  %19575 = vst [vmem:[#allocation11_spill] sm:$0xff] %v16198_v25  ;;  %v16208_v27 = vld [vmem:[%s19559_s10 + $0x118] sm:$0xff]  ;;  %v16213_v28 = vld [vmem:[%s19559_s10 + $0x120] sm:$0xff] }
 0x181   :  { %19576 = vst [vmem:[#allocation12_spill] sm:$0xff] %v16203_v26  ;;  %19577 = vst [vmem:[#allocation13_spill] sm:$0xff] %v16208_v27  ;;  %v16218_v29 = vld [vmem:[%s19559_s10 + $0x128] sm:$0xff]  ;;  %v16223_v30 = vld [vmem:[%s19559_s10 + $0x130] sm:$0xff] }
 0x182   :  { %19578 = vst [vmem:[#allocation14_spill] sm:$0xff] %v16213_v28  ;;  %19579 = vst [vmem:[#allocation15_spill] sm:$0xff] %v16218_v29  ;;  %v16228_v31 = vld [vmem:[%s19559_s10 + $0x138] sm:$0xff]  ;;  %v16233_v32 = vld [vmem:[%s19559_s10 + $0x140] sm:$0xff] }
 0x183   :  { %19580 = vst [vmem:[#allocation16_spill] sm:$0xff] %v16223_v30  ;;  %19581 = vst [vmem:[#allocation17_spill] sm:$0xff] %v16228_v31  ;;  %v16238_v33 = vld [vmem:[%s19559_s10 + $0x148] sm:$0xff]  ;;  %v16243_v34 = vld [vmem:[%s19559_s10 + $0x150] sm:$0xff] }
 0x184   :  { %19582 = vst [vmem:[#allocation18_spill] sm:$0xff] %v16233_v32  ;;  %19583 = vst [vmem:[#allocation19_spill] sm:$0xff] %v16238_v33  ;;  %v16248_v35 = vld [vmem:[%s19559_s10 + $0x158] sm:$0xff]  ;;  %v16253_v36 = vld [vmem:[%s19559_s10 + $0x160] sm:$0xff] }
 0x185   :  { %19584 = vst [vmem:[#allocation20_spill] sm:$0xff] %v16243_v34  ;;  %19585 = vst [vmem:[#allocation21_spill] sm:$0xff] %v16248_v35  ;;  %v16258_v37 = vld [vmem:[%s19559_s10 + $0x168] sm:$0xff]  ;;  %v16263_v38 = vld [vmem:[%s19559_s10 + $0x170] sm:$0xff] }
 0x186   :  { %19586 = vst [vmem:[#allocation22_spill] sm:$0xff] %v16253_v36  ;;  %19587 = vst [vmem:[#allocation23_spill] sm:$0xff] %v16258_v37  ;;  %v16268_v39 = vld [vmem:[%s19559_s10 + $0x178] sm:$0xff]  ;;  %v16273_v40 = vld [vmem:[%s19559_s10 + $0x180] sm:$0xff] }
 0x187   :  { %19588 = vst [vmem:[#allocation24_spill] sm:$0xff] %v16263_v38  ;;  %19589 = vst [vmem:[#allocation25_spill] sm:$0xff] %v16268_v39  ;;  %v16278_v41 = vld [vmem:[%s19559_s10 + $0x188] sm:$0xff]  ;;  %v16283_v42 = vld [vmem:[%s19559_s10 + $0x190] sm:$0xff] }
 0x188   :  { %19590 = vst [vmem:[#allocation26_spill] sm:$0xff] %v16273_v40  ;;  %19591 = vst [vmem:[#allocation27_spill] sm:$0xff] %v16278_v41  ;;  %v16288_v43 = vld [vmem:[%s19559_s10 + $0x198] sm:$0xff]  ;;  %v16293_v44 = vld [vmem:[%s19559_s10 + $0x1a0] sm:$0xff] }
 0x189   :  { %19592 = vst [vmem:[#allocation28_spill] sm:$0xff] %v16283_v42  ;;  %19593 = vst [vmem:[#allocation29_spill] sm:$0xff] %v16288_v43  ;;  %v16298_v45 = vld [vmem:[%s19559_s10 + $0x1a8] sm:$0xff]  ;;  %v16303_v46 = vld [vmem:[%s19559_s10 + $0x1b0] sm:$0xff] }
 0x18a   :  { %19594 = vst [vmem:[#allocation30_spill] sm:$0xff] %v16293_v44  ;;  %19595 = vst [vmem:[#allocation31_spill] sm:$0xff] %v16298_v45  ;;  %v16308_v47 = vld [vmem:[%s19559_s10 + $0x1b8] sm:$0xff]  ;;  %v16313_v48 = vld [vmem:[%s19559_s10 + $0x1c0] sm:$0xff] }
 0x18b   :  { %19596 = vst [vmem:[#allocation32_spill] sm:$0xff] %v16303_v46  ;;  %19597 = vst [vmem:[#allocation33_spill] sm:$0xff] %v16308_v47  ;;  %v16318_v49 = vld [vmem:[%s19559_s10 + $0x1c8] sm:$0xff]  ;;  %v16323_v50 = vld [vmem:[%s19559_s10 + $0x1d0] sm:$0xff] }
 0x18c   :  { %19598 = vst [vmem:[#allocation34_spill] sm:$0xff] %v16318_v49  ;;  %19599 = vst [vmem:[#allocation35_spill] sm:$0xff] %v16323_v50  ;;  %v16328_v51 = vld [vmem:[%s19559_s10 + $0x1d8] sm:$0xff]  ;;  %v16333_v52 = vld [vmem:[%s19559_s10 + $0x1e0] sm:$0xff] }
 0x18d   :  { %19600 = vst [vmem:[#allocation36_spill] sm:$0xff] %v16328_v51  ;;  %19601 = vst [vmem:[#allocation37_spill] sm:$0xff] %v16333_v52  ;;  %v16338_v53 = vld [vmem:[%s19559_s10 + $0x1e8] sm:$0xff]  ;;  %v16343_v54 = vld [vmem:[%s19559_s10 + $0x1f0] sm:$0xff] }
 0x18e   :  { %19602 = vst [vmem:[#allocation38_spill] sm:$0xff] %v16338_v53  ;;  %19603 = vst [vmem:[#allocation39_spill] sm:$0xff] %v16343_v54  ;;  %v16348_v55 = vld [vmem:[%s19559_s10 + $0x1f8] sm:$0xff]  ;;  %v16353_v47 = vld [vmem:[%s19559_s10 + $0x200] sm:$0xff] }
 0x18f   :  { %19604 = vst [vmem:[#allocation40_spill] sm:$0xff] %v16348_v55  ;;  %19605 = vst [vmem:[#allocation41_spill] sm:$0xff] %v16353_v47  ;;  %v16358_v46 = vld [vmem:[%s19559_s10 + $0x208] sm:$0xff]  ;;  %v16363_v45 = vld [vmem:[%s19559_s10 + $0x210] sm:$0xff] }
 0x190   :  { %19606 = vst [vmem:[#allocation42_spill] sm:$0xff] %v16358_v46  ;;  %19607 = vst [vmem:[#allocation43_spill] sm:$0xff] %v16363_v45  ;;  %v16368_v54 = vld [vmem:[%s19559_s10 + $0x218] sm:$0xff]  ;;  %v16373_v55 = vld [vmem:[%s19559_s10 + $0x220] sm:$0xff] }
 0x191   :  { %19608 = vst [vmem:[#allocation44_spill] sm:$0xff] %v16368_v54  ;;  %19609 = vst [vmem:[#allocation45_spill] sm:$0xff] %v16373_v55  ;;  %v16378_v53 = vld [vmem:[%s19559_s10 + $0x228] sm:$0xff]  ;;  %v16383_v44 = vld [vmem:[%s19559_s10 + $0x230] sm:$0xff] }
 0x192   :  { %19610 = vst [vmem:[#allocation46_spill] sm:$0xff] %v16378_v53  ;;  %19611 = vst [vmem:[#allocation47_spill] sm:$0xff] %v16383_v44  ;;  %v16388_v52 = vld [vmem:[%s19559_s10 + $0x238] sm:$0xff]  ;;  %v16393_v43 = vld [vmem:[%s19559_s10 + $0x240] sm:$0xff] }
 0x193   :  { %19612 = vst [vmem:[#allocation48_spill] sm:$0xff] %v16388_v52  ;;  %19613 = vst [vmem:[#allocation49_spill] sm:$0xff] %v16393_v43  ;;  %v16398_v51 = vld [vmem:[%s19559_s10 + $0x248] sm:$0xff]  ;;  %v16403_v42 = vld [vmem:[%s19559_s10 + $0x250] sm:$0xff] }
 0x194   :  { %19614 = vst [vmem:[#allocation50_spill] sm:$0xff] %v16398_v51  ;;  %19615 = vst [vmem:[#allocation51_spill] sm:$0xff] %v16403_v42  ;;  %v16408_v50 = vld [vmem:[%s19559_s10 + $0x258] sm:$0xff]  ;;  %v16413_v41 = vld [vmem:[%s19559_s10 + $0x260] sm:$0xff] }
 0x195   :  { %19616 = vst [vmem:[#allocation52_spill] sm:$0xff] %v16408_v50  ;;  %19617 = vst [vmem:[#allocation53_spill] sm:$0xff] %v16413_v41  ;;  %v16418_v49 = vld [vmem:[%s19559_s10 + $0x268] sm:$0xff]  ;;  %v16423_v40 = vld [vmem:[%s19559_s10 + $0x270] sm:$0xff] }
 0x196   :  { %19618 = vst [vmem:[#allocation54_spill] sm:$0xff] %v16418_v49  ;;  %19619 = vst [vmem:[#allocation55_spill] sm:$0xff] %v16423_v40  ;;  %v16428_v52 = vld [vmem:[%s19559_s10 + $0x278] sm:$0xff]  ;;  %v16433_v44 = vld [vmem:[%s19559_s10 + $0x280] sm:$0xff] }
 0x197   :  { %19620 = vst [vmem:[#allocation56_spill] sm:$0xff] %v16428_v52  ;;  %19621 = vst [vmem:[#allocation57_spill] sm:$0xff] %v16433_v44  ;;  %v16438_v53 = vld [vmem:[%s19559_s10 + $0x288] sm:$0xff]  ;;  %v16443_v49 = vld [vmem:[%s19559_s10 + $0x290] sm:$0xff] }
 0x198   :  { %19622 = vst [vmem:[#allocation58_spill] sm:$0xff] %v16438_v53  ;;  %19623 = vst [vmem:[#allocation59_spill] sm:$0xff] %v16443_v49  ;;  %v16448_v40 = vld [vmem:[%s19559_s10 + $0x298] sm:$0xff]  ;;  %v16453_v52 = vld [vmem:[%s19559_s10 + $0x2a0] sm:$0xff] }
 0x199   :  { %19624 = vst [vmem:[#allocation60_spill] sm:$0xff] %v16448_v40  ;;  %19625 = vst [vmem:[#allocation61_spill] sm:$0xff] %v16453_v52  ;;  %v16458_v44 = vld [vmem:[%s19559_s10 + $0x2a8] sm:$0xff]  ;;  %v16463_v53 = vld [vmem:[%s19559_s10 + $0x2b0] sm:$0xff] }
 0x19a   :  { %19626 = vst [vmem:[#allocation62_spill] sm:$0xff] %v16458_v44  ;;  %19627 = vst [vmem:[#allocation63_spill] sm:$0xff] %v16463_v53  ;;  %v16468_v49 = vld [vmem:[%s19559_s10 + $0x2b8] sm:$0xff]  ;;  %v16473_v40 = vld [vmem:[%s19559_s10 + $0x2c0] sm:$0xff] }
 0x19b   :  { %19628 = vst [vmem:[#allocation64_spill] sm:$0xff] %v16468_v49  ;;  %19629 = vst [vmem:[#allocation65_spill] sm:$0xff] %v16473_v40  ;;  %v16478_v52 = vld [vmem:[%s19559_s10 + $0x2c8] sm:$0xff]  ;;  %v16483_v44 = vld [vmem:[%s19559_s10 + $0x2d0] sm:$0xff] }
 0x19c   :  { %19630 = vst [vmem:[#allocation66_spill] sm:$0xff] %v16478_v52  ;;  %19631 = vst [vmem:[#allocation67_spill] sm:$0xff] %v16483_v44  ;;  %v16488_v53 = vld [vmem:[%s19559_s10 + $0x2d8] sm:$0xff]  ;;  %v16493_v49 = vld [vmem:[%s19559_s10 + $0x2e0] sm:$0xff] }
 0x19d   :  { %19632 = vst [vmem:[#allocation68_spill] sm:$0xff] %v16488_v53  ;;  %19633 = vst [vmem:[#allocation69_spill] sm:$0xff] %v16493_v49  ;;  %v16498_v40 = vld [vmem:[%s19559_s10 + $0x2e8] sm:$0xff]  ;;  %v16503_v52 = vld [vmem:[%s19559_s10 + $0x2f0] sm:$0xff] }
 0x19e   :  { %19634 = vst [vmem:[#allocation70_spill] sm:$0xff] %v16498_v40  ;;  %19635 = vst [vmem:[#allocation71_spill] sm:$0xff] %v16503_v52  ;;  %v16508_v44 = vld [vmem:[%s19559_s10 + $0x2f8] sm:$0xff]  ;;  %v16513_v53 = vld [vmem:[%s19559_s10 + $0x300] sm:$0xff] }
 0x19f   :  { %19636 = vst [vmem:[#allocation72_spill] sm:$0xff] %v16508_v44  ;;  %19637 = vst [vmem:[#allocation73_spill] sm:$0xff] %v16513_v53  ;;  %v16518_v49 = vld [vmem:[%s19559_s10 + $0x308] sm:$0xff]  ;;  %v16523_v40 = vld [vmem:[%s19559_s10 + $0x310] sm:$0xff] }
 0x1a0   :  { %19638 = vst [vmem:[#allocation74_spill] sm:$0xff] %v16518_v49  ;;  %19639 = vst [vmem:[#allocation75_spill] sm:$0xff] %v16523_v40  ;;  %v16528_v52 = vld [vmem:[%s19559_s10 + $0x318] sm:$0xff]  ;;  %v16533_v44 = vld [vmem:[%s19559_s10 + $0x320] sm:$0xff] }
 0x1a1   :  { %19640 = vst [vmem:[#allocation76_spill] sm:$0xff] %v16528_v52  ;;  %19641 = vst [vmem:[#allocation77_spill] sm:$0xff] %v16533_v44  ;;  %v16538_v53 = vld [vmem:[%s19559_s10 + $0x328] sm:$0xff]  ;;  %v16543_v49 = vld [vmem:[%s19559_s10 + $0x330] sm:$0xff] }
 0x1a2   :  { %19642 = vst [vmem:[#allocation78_spill] sm:$0xff] %v16538_v53  ;;  %19643 = vst [vmem:[#allocation79_spill] sm:$0xff] %v16543_v49  ;;  %v16548_v40 = vld [vmem:[%s19559_s10 + $0x338] sm:$0xff]  ;;  %v16553_v52 = vld [vmem:[%s19559_s10 + $0x340] sm:$0xff] }
 0x1a3   :  { %19644 = vst [vmem:[#allocation80_spill] sm:$0xff] %v16548_v40  ;;  %19645 = vst [vmem:[#allocation81_spill] sm:$0xff] %v16553_v52  ;;  %v16558_v44 = vld [vmem:[%s19559_s10 + $0x348] sm:$0xff]  ;;  %v16563_v53 = vld [vmem:[%s19559_s10 + $0x350] sm:$0xff] }
 0x1a4   :  { %19646 = vst [vmem:[#allocation82_spill] sm:$0xff] %v16558_v44  ;;  %19647 = vst [vmem:[#allocation83_spill] sm:$0xff] %v16563_v53  ;;  %v16568_v49 = vld [vmem:[%s19559_s10 + $0x358] sm:$0xff]  ;;  %v16573_v40 = vld [vmem:[%s19559_s10 + $0x360] sm:$0xff] }
 0x1a5   :  { %19648 = vst [vmem:[#allocation84_spill] sm:$0xff] %v16568_v49  ;;  %19649 = vst [vmem:[#allocation85_spill] sm:$0xff] %v16573_v40  ;;  %v16578_v52 = vld [vmem:[%s19559_s10 + $0x368] sm:$0xff]  ;;  %v16583_v44 = vld [vmem:[%s19559_s10 + $0x370] sm:$0xff] }
 0x1a6   :  { %19650 = vst [vmem:[#allocation86_spill] sm:$0xff] %v16578_v52  ;;  %19651 = vst [vmem:[#allocation87_spill] sm:$0xff] %v16583_v44  ;;  %v16588_v53 = vld [vmem:[%s19559_s10 + $0x378] sm:$0xff]  ;;  %v16593_v49 = vld [vmem:[%s19559_s10 + $0x380] sm:$0xff] }
 0x1a7   :  { %19652 = vst [vmem:[#allocation88_spill] sm:$0xff] %v16588_v53  ;;  %19653 = vst [vmem:[#allocation89_spill] sm:$0xff] %v16593_v49  ;;  %v16598_v40 = vld [vmem:[%s19559_s10 + $0x388] sm:$0xff]  ;;  %v16603_v52 = vld [vmem:[%s19559_s10 + $0x390] sm:$0xff] }
 0x1a8   :  { %19654 = vst [vmem:[#allocation90_spill] sm:$0xff] %v16598_v40  ;;  %19655 = vst [vmem:[#allocation91_spill] sm:$0xff] %v16603_v52  ;;  %v16608_v44 = vld [vmem:[%s19559_s10 + $0x398] sm:$0xff]  ;;  %v16613_v53 = vld [vmem:[%s19559_s10 + $0x3a0] sm:$0xff] }
 0x1a9   :  { %19656 = vst [vmem:[#allocation92_spill] sm:$0xff] %v16608_v44  ;;  %19657 = vst [vmem:[#allocation93_spill] sm:$0xff] %v16613_v53  ;;  %v16618_v49 = vld [vmem:[%s19559_s10 + $0x3a8] sm:$0xff]  ;;  %v16623_v40 = vld [vmem:[%s19559_s10 + $0x3b0] sm:$0xff] }
 0x1aa   :  { %19658 = vst [vmem:[#allocation94_spill] sm:$0xff] %v16618_v49  ;;  %19659 = vst [vmem:[#allocation95_spill] sm:$0xff] %v16623_v40  ;;  %v16628_v52 = vld [vmem:[%s19559_s10 + $0x3b8] sm:$0xff]  ;;  %v16633_v44 = vld [vmem:[%s19559_s10 + $0x3c0] sm:$0xff] }
 0x1ab   :  { %19660 = vst [vmem:[#allocation96_spill] sm:$0xff] %v16628_v52  ;;  %19661 = vst [vmem:[#allocation97_spill] sm:$0xff] %v16633_v44  ;;  %v16638_v53 = vld [vmem:[%s19559_s10 + $0x3c8] sm:$0xff]  ;;  %v16643_v49 = vld [vmem:[%s19559_s10 + $0x3d0] sm:$0xff] }
 0x1ac   :  { %19662 = vst [vmem:[#allocation98_spill] sm:$0xff] %v16638_v53  ;;  %19663 = vst [vmem:[#allocation99_spill] sm:$0xff] %v16643_v49  ;;  %v16648_v40 = vld [vmem:[%s19559_s10 + $0x3d8] sm:$0xff]  ;;  %v16653_v52 = vld [vmem:[%s19559_s10 + $0x3e0] sm:$0xff] }
 0x1ad   :  { %19664 = vst [vmem:[#allocation100_spill] sm:$0xff] %v16648_v40  ;;  %19665 = vst [vmem:[#allocation101_spill] sm:$0xff] %v16653_v52  ;;  %v16658_v44 = vld [vmem:[%s19559_s10 + $0x3e8] sm:$0xff]  ;;  %v16663_v53 = vld [vmem:[%s19559_s10 + $0x3f0] sm:$0xff] }
 0x1ae   :  { %19666 = vst [vmem:[#allocation102_spill] sm:$0xff] %v16658_v44  ;;  %19667 = vst [vmem:[#allocation103_spill] sm:$0xff] %v16663_v53  ;;  %v16668_v49 = vld [vmem:[%s19559_s10 + $0x3f8] sm:$0xff]  ;;  %v16673_v40 = vld [vmem:[%s19559_s10 + $0x400] sm:$0xff] }
 0x1af   :  { %19668 = vst [vmem:[#allocation104_spill] sm:$0xff] %v16668_v49  ;;  %19669 = vst [vmem:[#allocation105_spill] sm:$0xff] %v16673_v40  ;;  %v16678_v52 = vld [vmem:[%s19559_s10 + $0x408] sm:$0xff]  ;;  %v16683_v44 = vld [vmem:[%s19559_s10 + $0x410] sm:$0xff] }
 0x1b0   :  { %19670 = vst [vmem:[#allocation106_spill] sm:$0xff] %v16678_v52  ;;  %19671 = vst [vmem:[#allocation107_spill] sm:$0xff] %v16683_v44  ;;  %v16688_v53 = vld [vmem:[%s19559_s10 + $0x418] sm:$0xff]  ;;  %v16693_v49 = vld [vmem:[%s19559_s10 + $0x420] sm:$0xff] }
 0x1b1   :  { %19672 = vst [vmem:[#allocation108_spill] sm:$0xff] %v16688_v53  ;;  %19673 = vst [vmem:[#allocation109_spill] sm:$0xff] %v16693_v49  ;;  %v16698_v40 = vld [vmem:[%s19559_s10 + $0x428] sm:$0xff]  ;;  %v16703_v52 = vld [vmem:[%s19559_s10 + $0x430] sm:$0xff] }
 0x1b2   :  { %19674 = vst [vmem:[#allocation110_spill] sm:$0xff] %v16698_v40  ;;  %19675 = vst [vmem:[#allocation111_spill] sm:$0xff] %v16703_v52  ;;  %v16708_v44 = vld [vmem:[%s19559_s10 + $0x438] sm:$0xff]  ;;  %v16713_v53 = vld [vmem:[%s19559_s10 + $0x440] sm:$0xff] }
 0x1b3   :  { %19676 = vst [vmem:[#allocation112_spill] sm:$0xff] %v16708_v44  ;;  %19677 = vst [vmem:[#allocation113_spill] sm:$0xff] %v16713_v53  ;;  %v16718_v49 = vld [vmem:[%s19559_s10 + $0x448] sm:$0xff]  ;;  %v16723_v40 = vld [vmem:[%s19559_s10 + $0x450] sm:$0xff] }
 0x1b4   :  { %19678 = vst [vmem:[#allocation114_spill] sm:$0xff] %v16718_v49  ;;  %19679 = vst [vmem:[#allocation115_spill] sm:$0xff] %v16723_v40  ;;  %v16728_v52 = vld [vmem:[%s19559_s10 + $0x458] sm:$0xff]  ;;  %v16733_v44 = vld [vmem:[%s19559_s10 + $0x460] sm:$0xff] }
 0x1b5   :  { %19680 = vst [vmem:[#allocation116_spill] sm:$0xff] %v16728_v52  ;;  %19681 = vst [vmem:[#allocation117_spill] sm:$0xff] %v16733_v44  ;;  %v16738_v53 = vld [vmem:[%s19559_s10 + $0x468] sm:$0xff]  ;;  %v16743_v49 = vld [vmem:[%s19559_s10 + $0x470] sm:$0xff] }
 0x1b6   :  { %19682 = vst [vmem:[#allocation118_spill] sm:$0xff] %v16738_v53  ;;  %19683 = vst [vmem:[#allocation119_spill] sm:$0xff] %v16743_v49  ;;  %v16748_v40 = vld [vmem:[%s19559_s10 + $0x478] sm:$0xff]  ;;  %v16753_v52 = vld [vmem:[%s19559_s10 + $0x480] sm:$0xff] }
 0x1b7   :  { %19684 = vst [vmem:[#allocation120_spill] sm:$0xff] %v16748_v40  ;;  %19685 = vst [vmem:[#allocation121_spill] sm:$0xff] %v16753_v52  ;;  %v16758_v44 = vld [vmem:[%s19559_s10 + $0x488] sm:$0xff]  ;;  %v16763_v53 = vld [vmem:[%s19559_s10 + $0x490] sm:$0xff] }
 0x1b8   :  { %19686 = vst [vmem:[#allocation122_spill] sm:$0xff] %v16758_v44  ;;  %19687 = vst [vmem:[#allocation123_spill] sm:$0xff] %v16763_v53  ;;  %v16768_v49 = vld [vmem:[%s19559_s10 + $0x498] sm:$0xff]  ;;  %v16773_v40 = vld [vmem:[%s19559_s10 + $0x4a0] sm:$0xff] }
 0x1b9   :  { %19688 = vst [vmem:[#allocation124_spill] sm:$0xff] %v16768_v49  ;;  %19689 = vst [vmem:[#allocation125_spill] sm:$0xff] %v16773_v40  ;;  %v16778_v52 = vld [vmem:[%s19559_s10 + $0x4a8] sm:$0xff]  ;;  %v16783_v44 = vld [vmem:[%s19559_s10 + $0x4b0] sm:$0xff] }
 0x1ba   :  { %19690 = vst [vmem:[#allocation126_spill] sm:$0xff] %v16778_v52  ;;  %19691 = vst [vmem:[#allocation127_spill] sm:$0xff] %v16783_v44  ;;  %v16788_v53 = vld [vmem:[%s19559_s10 + $0x4b8] sm:$0xff]  ;;  %v16793_v49 = vld [vmem:[%s19559_s10 + $0x4c0] sm:$0xff] }
 0x1bb   :  { %19692 = vst [vmem:[#allocation128_spill] sm:$0xff] %v16788_v53  ;;  %19693 = vst [vmem:[#allocation129_spill] sm:$0xff] %v16793_v49  ;;  %v16798_v40 = vld [vmem:[%s19559_s10 + $0x4c8] sm:$0xff]  ;;  %v16803_v52 = vld [vmem:[%s19559_s10 + $0x4d0] sm:$0xff] }
 0x1bc   :  { %19694 = vst [vmem:[#allocation130_spill] sm:$0xff] %v16798_v40  ;;  %19695 = vst [vmem:[#allocation131_spill] sm:$0xff] %v16803_v52  ;;  %v16808_v44 = vld [vmem:[%s19559_s10 + $0x4d8] sm:$0xff]  ;;  %v16813_v53 = vld [vmem:[%s19559_s10 + $0x4e0] sm:$0xff] }
 0x1bd   :  { %19696 = vst [vmem:[#allocation132_spill] sm:$0xff] %v16808_v44  ;;  %19697 = vst [vmem:[#allocation133_spill] sm:$0xff] %v16813_v53  ;;  %v16818_v49 = vld [vmem:[%s19559_s10 + $0x4e8] sm:$0xff]  ;;  %v16823_v40 = vld [vmem:[%s19559_s10 + $0x4f0] sm:$0xff] }
 0x1be   :  { %19698 = vst [vmem:[#allocation134_spill] sm:$0xff] %v16818_v49  ;;  %19699 = vst [vmem:[#allocation135_spill] sm:$0xff] %v16823_v40  ;;  %v16828_v52 = vld [vmem:[%s19559_s10 + $0x4f8] sm:$0xff]  ;;  %v16833_v44 = vld [vmem:[%s19559_s10 + $0x500] sm:$0xff] }
 0x1bf   :  { %19700 = vst [vmem:[#allocation136_spill] sm:$0xff] %v16828_v52  ;;  %19701 = vst [vmem:[#allocation137_spill] sm:$0xff] %v16833_v44  ;;  %v16838_v53 = vld [vmem:[%s19559_s10 + $0x508] sm:$0xff]  ;;  %v16843_v49 = vld [vmem:[%s19559_s10 + $0x510] sm:$0xff] }
 0x1c0   :  { %19702 = vst [vmem:[#allocation138_spill] sm:$0xff] %v16838_v53  ;;  %19703 = vst [vmem:[#allocation139_spill] sm:$0xff] %v16843_v49  ;;  %v16848_v40 = vld [vmem:[%s19559_s10 + $0x518] sm:$0xff]  ;;  %v16853_v52 = vld [vmem:[%s19559_s10 + $0x520] sm:$0xff] }
 0x1c1   :  { %19704 = vst [vmem:[#allocation140_spill] sm:$0xff] %v16848_v40  ;;  %19705 = vst [vmem:[#allocation141_spill] sm:$0xff] %v16853_v52  ;;  %v16858_v44 = vld [vmem:[%s19559_s10 + $0x528] sm:$0xff]  ;;  %v16863_v53 = vld [vmem:[%s19559_s10 + $0x530] sm:$0xff] }
 0x1c2   :  { %19706 = vst [vmem:[#allocation142_spill] sm:$0xff] %v16858_v44  ;;  %19707 = vst [vmem:[#allocation143_spill] sm:$0xff] %v16863_v53  ;;  %v16868_v49 = vld [vmem:[%s19559_s10 + $0x538] sm:$0xff]  ;;  %v16873_v40 = vld [vmem:[%s19559_s10 + $0x540] sm:$0xff] }
 0x1c3   :  { %19708 = vst [vmem:[#allocation144_spill] sm:$0xff] %v16868_v49  ;;  %19709 = vst [vmem:[#allocation145_spill] sm:$0xff] %v16873_v40  ;;  %v16878_v52 = vld [vmem:[%s19559_s10 + $0x548] sm:$0xff]  ;;  %v16883_v44 = vld [vmem:[%s19559_s10 + $0x550] sm:$0xff] }
 0x1c4   :  { %19710 = vst [vmem:[#allocation146_spill] sm:$0xff] %v16878_v52  ;;  %19711 = vst [vmem:[#allocation147_spill] sm:$0xff] %v16883_v44  ;;  %v16888_v53 = vld [vmem:[%s19559_s10 + $0x558] sm:$0xff]  ;;  %v16893_v49 = vld [vmem:[%s19559_s10 + $0x560] sm:$0xff] }
 0x1c5   :  { %19712 = vst [vmem:[#allocation148_spill] sm:$0xff] %v16888_v53  ;;  %19713 = vst [vmem:[#allocation149_spill] sm:$0xff] %v16893_v49  ;;  %v16898_v40 = vld [vmem:[%s19559_s10 + $0x568] sm:$0xff]  ;;  %v16903_v52 = vld [vmem:[%s19559_s10 + $0x570] sm:$0xff] }
 0x1c6   :  { %19714 = vst [vmem:[#allocation150_spill] sm:$0xff] %v16898_v40  ;;  %19715 = vst [vmem:[#allocation151_spill] sm:$0xff] %v16903_v52  ;;  %v16908_v44 = vld [vmem:[%s19559_s10 + $0x578] sm:$0xff]  ;;  %v16913_v53 = vld [vmem:[%s19559_s10 + $0x580] sm:$0xff] }
 0x1c7   :  { %19716 = vst [vmem:[#allocation152_spill] sm:$0xff] %v16908_v44  ;;  %19717 = vst [vmem:[#allocation153_spill] sm:$0xff] %v16913_v53  ;;  %v16918_v49 = vld [vmem:[%s19559_s10 + $0x588] sm:$0xff]  ;;  %v16923_v40 = vld [vmem:[%s19559_s10 + $0x590] sm:$0xff] }
 0x1c8   :  { %19718 = vst [vmem:[#allocation154_spill] sm:$0xff] %v16918_v49  ;;  %19719 = vst [vmem:[#allocation155_spill] sm:$0xff] %v16923_v40  ;;  %v16928_v52 = vld [vmem:[%s19559_s10 + $0x598] sm:$0xff]  ;;  %v16933_v44 = vld [vmem:[%s19559_s10 + $0x5a0] sm:$0xff] }
 0x1c9   :  { %19720 = vst [vmem:[#allocation156_spill] sm:$0xff] %v16928_v52  ;;  %19721 = vst [vmem:[#allocation157_spill] sm:$0xff] %v16933_v44  ;;  %v16938_v53 = vld [vmem:[%s19559_s10 + $0x5a8] sm:$0xff]  ;;  %v16943_v49 = vld [vmem:[%s19559_s10 + $0x5b0] sm:$0xff] }
 0x1ca   :  { %19722 = vst [vmem:[#allocation158_spill] sm:$0xff] %v16938_v53  ;;  %19723 = vst [vmem:[#allocation159_spill] sm:$0xff] %v16943_v49  ;;  %v16948_v40 = vld [vmem:[%s19559_s10 + $0x5b8] sm:$0xff]  ;;  %v16953_v52 = vld [vmem:[%s19559_s10 + $0x5c0] sm:$0xff] }
 0x1cb   :  { %19724 = vst [vmem:[#allocation160_spill] sm:$0xff] %v16948_v40  ;;  %19725 = vst [vmem:[#allocation161_spill] sm:$0xff] %v16953_v52  ;;  %v16958_v44 = vld [vmem:[%s19559_s10 + $0x5c8] sm:$0xff]  ;;  %v16963_v53 = vld [vmem:[%s19559_s10 + $0x5d0] sm:$0xff] }
 0x1cc   :  { %19726 = vst [vmem:[#allocation162_spill] sm:$0xff] %v16958_v44  ;;  %19727 = vst [vmem:[#allocation163_spill] sm:$0xff] %v16963_v53  ;;  %v16968_v49 = vld [vmem:[%s19559_s10 + $0x5d8] sm:$0xff]  ;;  %v16973_v40 = vld [vmem:[%s19559_s10 + $0x5e0] sm:$0xff] }
 0x1cd   :  { %19728 = vst [vmem:[#allocation164_spill] sm:$0xff] %v16968_v49  ;;  %19729 = vst [vmem:[#allocation165_spill] sm:$0xff] %v16973_v40  ;;  %v16978_v52 = vld [vmem:[%s19559_s10 + $0x5e8] sm:$0xff]  ;;  %v16983_v44 = vld [vmem:[%s19559_s10 + $0x5f0] sm:$0xff] }
 0x1ce   :  { %19730 = vst [vmem:[#allocation166_spill] sm:$0xff] %v16978_v52  ;;  %19731 = vst [vmem:[#allocation167_spill] sm:$0xff] %v16983_v44  ;;  %v16988_v53 = vld [vmem:[%s19559_s10 + $0x5f8] sm:$0xff]  ;;  %v16993_v49 = vld [vmem:[%s19559_s10 + $0x600] sm:$0xff] }
 0x1cf   :  { %19732 = vst [vmem:[#allocation168_spill] sm:$0xff] %v16988_v53  ;;  %19733 = vst [vmem:[#allocation169_spill] sm:$0xff] %v16993_v49  ;;  %v16998_v40 = vld [vmem:[%s19559_s10 + $0x608] sm:$0xff]  ;;  %v17003_v52 = vld [vmem:[%s19559_s10 + $0x610] sm:$0xff] }
 0x1d0   :  { %19734 = vst [vmem:[#allocation170_spill] sm:$0xff] %v16998_v40  ;;  %19735 = vst [vmem:[#allocation171_spill] sm:$0xff] %v17003_v52  ;;  %v17008_v44 = vld [vmem:[%s19559_s10 + $0x618] sm:$0xff]  ;;  %v17013_v53 = vld [vmem:[%s19559_s10 + $0x620] sm:$0xff] }
 0x1d1   :  { %19736 = vst [vmem:[#allocation172_spill] sm:$0xff] %v17008_v44  ;;  %19737 = vst [vmem:[#allocation173_spill] sm:$0xff] %v17013_v53  ;;  %v17018_v49 = vld [vmem:[%s19559_s10 + $0x628] sm:$0xff]  ;;  %v17023_v40 = vld [vmem:[%s19559_s10 + $0x630] sm:$0xff] }
 0x1d2   :  { %19738 = vst [vmem:[#allocation174_spill] sm:$0xff] %v17018_v49  ;;  %19739 = vst [vmem:[#allocation175_spill] sm:$0xff] %v17023_v40  ;;  %v17028_v52 = vld [vmem:[%s19559_s10 + $0x638] sm:$0xff]  ;;  %v17033_v44 = vld [vmem:[%s19559_s10 + $0x640] sm:$0xff] }
 0x1d3   :  { %19740 = vst [vmem:[#allocation176_spill] sm:$0xff] %v17028_v52  ;;  %19741 = vst [vmem:[#allocation177_spill] sm:$0xff] %v17033_v44  ;;  %v17038_v53 = vld [vmem:[%s19559_s10 + $0x648] sm:$0xff]  ;;  %v17043_v49 = vld [vmem:[%s19559_s10 + $0x650] sm:$0xff] }
 0x1d4   :  { %19742 = vst [vmem:[#allocation178_spill] sm:$0xff] %v17038_v53  ;;  %19743 = vst [vmem:[#allocation179_spill] sm:$0xff] %v17043_v49  ;;  %v17048_v40 = vld [vmem:[%s19559_s10 + $0x658] sm:$0xff]  ;;  %v17053_v52 = vld [vmem:[%s19559_s10 + $0x660] sm:$0xff] }
 0x1d5   :  { %19744 = vst [vmem:[#allocation180_spill] sm:$0xff] %v17048_v40  ;;  %19745 = vst [vmem:[#allocation181_spill] sm:$0xff] %v17053_v52  ;;  %v17058_v44 = vld [vmem:[%s19559_s10 + $0x668] sm:$0xff]  ;;  %v17063_v53 = vld [vmem:[%s19559_s10 + $0x670] sm:$0xff] }
 0x1d6   :  { %19746 = vst [vmem:[#allocation182_spill] sm:$0xff] %v17058_v44  ;;  %19747 = vst [vmem:[#allocation183_spill] sm:$0xff] %v17063_v53  ;;  %v17068_v49 = vld [vmem:[%s19559_s10 + $0x678] sm:$0xff]  ;;  %v17073_v40 = vld [vmem:[%s19559_s10 + $0x680] sm:$0xff] }
 0x1d7   :  { %19748 = vst [vmem:[#allocation184_spill] sm:$0xff] %v17068_v49  ;;  %19749 = vst [vmem:[#allocation185_spill] sm:$0xff] %v17073_v40  ;;  %v17078_v52 = vld [vmem:[%s19559_s10 + $0x688] sm:$0xff]  ;;  %v17083_v44 = vld [vmem:[%s19559_s10 + $0x690] sm:$0xff] }
 0x1d8   :  { %19750 = vst [vmem:[#allocation186_spill] sm:$0xff] %v17078_v52  ;;  %19751 = vst [vmem:[#allocation187_spill] sm:$0xff] %v17083_v44  ;;  %v17088_v53 = vld [vmem:[%s19559_s10 + $0x698] sm:$0xff]  ;;  %v17093_v49 = vld [vmem:[%s19559_s10 + $0x6a0] sm:$0xff] }
 0x1d9   :  { %19752 = vst [vmem:[#allocation188_spill] sm:$0xff] %v17088_v53  ;;  %19753 = vst [vmem:[#allocation189_spill] sm:$0xff] %v17093_v49  ;;  %v17098_v40 = vld [vmem:[%s19559_s10 + $0x6a8] sm:$0xff]  ;;  %v17103_v52 = vld [vmem:[%s19559_s10 + $0x6b0] sm:$0xff] }
 0x1da   :  { %19754 = vst [vmem:[#allocation190_spill] sm:$0xff] %v17098_v40  ;;  %19755 = vst [vmem:[#allocation191_spill] sm:$0xff] %v17103_v52  ;;  %v17108_v44 = vld [vmem:[%s19559_s10 + $0x6b8] sm:$0xff]  ;;  %v17113_v53 = vld [vmem:[%s19559_s10 + $0x6c0] sm:$0xff] }
 0x1db   :  { %19756 = vst [vmem:[#allocation192_spill] sm:$0xff] %v17108_v44  ;;  %19757 = vst [vmem:[#allocation193_spill] sm:$0xff] %v17113_v53  ;;  %v17118_v49 = vld [vmem:[%s19559_s10 + $0x6c8] sm:$0xff]  ;;  %v17123_v40 = vld [vmem:[%s19559_s10 + $0x6d0] sm:$0xff] }
 0x1dc   :  { %19758 = vst [vmem:[#allocation194_spill] sm:$0xff] %v17118_v49  ;;  %19759 = vst [vmem:[#allocation195_spill] sm:$0xff] %v17123_v40  ;;  %v17128_v52 = vld [vmem:[%s19559_s10 + $0x6d8] sm:$0xff]  ;;  %v17133_v44 = vld [vmem:[%s19559_s10 + $0x6e0] sm:$0xff] }
 0x1dd   :  { %19760 = vst [vmem:[#allocation196_spill] sm:$0xff] %v17128_v52  ;;  %19761 = vst [vmem:[#allocation197_spill] sm:$0xff] %v17133_v44  ;;  %v17138_v53 = vld [vmem:[%s19559_s10 + $0x6e8] sm:$0xff]  ;;  %v17143_v49 = vld [vmem:[%s19559_s10 + $0x6f0] sm:$0xff] }
 0x1de   :  { %19762 = vst [vmem:[#allocation198_spill] sm:$0xff] %v17138_v53  ;;  %19763 = vst [vmem:[#allocation199_spill] sm:$0xff] %v17143_v49  ;;  %v17148_v40 = vld [vmem:[%s19559_s10 + $0x6f8] sm:$0xff]  ;;  %v17153_v52 = vld [vmem:[%s19559_s10 + $0x700] sm:$0xff] }
 0x1df   :  { %19764 = vst [vmem:[#allocation200_spill] sm:$0xff] %v17148_v40  ;;  %19765 = vst [vmem:[#allocation201_spill] sm:$0xff] %v17153_v52  ;;  %v17158_v44 = vld [vmem:[%s19559_s10 + $0x708] sm:$0xff]  ;;  %v17163_v53 = vld [vmem:[%s19559_s10 + $0x710] sm:$0xff] }
 0x1e0   :  { %19766 = vst [vmem:[#allocation202_spill] sm:$0xff] %v17158_v44  ;;  %19767 = vst [vmem:[#allocation203_spill] sm:$0xff] %v17163_v53  ;;  %v17168_v49 = vld [vmem:[%s19559_s10 + $0x718] sm:$0xff]  ;;  %v17173_v40 = vld [vmem:[%s19559_s10 + $0x720] sm:$0xff] }
 0x1e1   :  { %19768 = vst [vmem:[#allocation204_spill] sm:$0xff] %v17168_v49  ;;  %19769 = vst [vmem:[#allocation205_spill] sm:$0xff] %v17173_v40  ;;  %v17178_v52 = vld [vmem:[%s19559_s10 + $0x728] sm:$0xff]  ;;  %v17183_v44 = vld [vmem:[%s19559_s10 + $0x730] sm:$0xff] }
 0x1e2   :  { %19770 = vst [vmem:[#allocation206_spill] sm:$0xff] %v17178_v52  ;;  %19771 = vst [vmem:[#allocation207_spill] sm:$0xff] %v17183_v44  ;;  %v17188_v53 = vld [vmem:[%s19559_s10 + $0x738] sm:$0xff]  ;;  %v17193_v49 = vld [vmem:[%s19559_s10 + $0x740] sm:$0xff] }
 0x1e3   :  { %19772 = vst [vmem:[#allocation208_spill] sm:$0xff] %v17188_v53  ;;  %19773 = vst [vmem:[#allocation209_spill] sm:$0xff] %v17193_v49  ;;  %v17198_v40 = vld [vmem:[%s19559_s10 + $0x748] sm:$0xff]  ;;  %v17203_v52 = vld [vmem:[%s19559_s10 + $0x750] sm:$0xff] }
 0x1e4   :  { %19774 = vst [vmem:[#allocation210_spill] sm:$0xff] %v17198_v40  ;;  %19775 = vst [vmem:[#allocation211_spill] sm:$0xff] %v17203_v52  ;;  %v17208_v44 = vld [vmem:[%s19559_s10 + $0x758] sm:$0xff]  ;;  %v17213_v53 = vld [vmem:[%s19559_s10 + $0x760] sm:$0xff] }
 0x1e5   :  { %19776 = vst [vmem:[#allocation212_spill] sm:$0xff] %v17208_v44  ;;  %19777 = vst [vmem:[#allocation213_spill] sm:$0xff] %v17213_v53  ;;  %v17218_v49 = vld [vmem:[%s19559_s10 + $0x768] sm:$0xff]  ;;  %v17223_v40 = vld [vmem:[%s19559_s10 + $0x770] sm:$0xff] }
 0x1e6   :  { %19778 = vst [vmem:[#allocation214_spill] sm:$0xff] %v17218_v49  ;;  %19779 = vst [vmem:[#allocation215_spill] sm:$0xff] %v17223_v40  ;;  %v17228_v52 = vld [vmem:[%s19559_s10 + $0x778] sm:$0xff]  ;;  %v17233_v44 = vld [vmem:[%s19559_s10 + $0x780] sm:$0xff] }
 0x1e7   :  { %19780 = vst [vmem:[#allocation216_spill] sm:$0xff] %v17228_v52  ;;  %19781 = vst [vmem:[#allocation217_spill] sm:$0xff] %v17233_v44  ;;  %v17238_v53 = vld [vmem:[%s19559_s10 + $0x788] sm:$0xff]  ;;  %v17243_v49 = vld [vmem:[%s19559_s10 + $0x790] sm:$0xff] }
 0x1e8   :  { %19782 = vst [vmem:[#allocation218_spill] sm:$0xff] %v17238_v53  ;;  %19783 = vst [vmem:[#allocation219_spill] sm:$0xff] %v17243_v49  ;;  %v17248_v40 = vld [vmem:[%s19559_s10 + $0x798] sm:$0xff]  ;;  %v17253_v52 = vld [vmem:[%s19559_s10 + $0x7a0] sm:$0xff] }
 0x1e9   :  { %19784 = vst [vmem:[#allocation220_spill] sm:$0xff] %v17248_v40  ;;  %19785 = vst [vmem:[#allocation221_spill] sm:$0xff] %v17253_v52  ;;  %v17258_v44 = vld [vmem:[%s19559_s10 + $0x7a8] sm:$0xff]  ;;  %v17263_v53 = vld [vmem:[%s19559_s10 + $0x7b0] sm:$0xff] }
 0x1ea   :  { %19786 = vst [vmem:[#allocation222_spill] sm:$0xff] %v17258_v44  ;;  %19787 = vst [vmem:[#allocation223_spill] sm:$0xff] %v17263_v53  ;;  %v17268_v49 = vld [vmem:[%s19559_s10 + $0x7b8] sm:$0xff]  ;;  %v17273_v40 = vld [vmem:[%s19559_s10 + $0x7c0] sm:$0xff] }
 0x1eb   :  { %19788 = vst [vmem:[#allocation224_spill] sm:$0xff] %v17268_v49  ;;  %19789 = vst [vmem:[#allocation225_spill] sm:$0xff] %v17273_v40  ;;  %v17278_v52 = vld [vmem:[%s19559_s10 + $0x7c8] sm:$0xff]  ;;  %v17283_v44 = vld [vmem:[%s19559_s10 + $0x7d0] sm:$0xff] }
 0x1ec   :  { %19790 = vst [vmem:[#allocation226_spill] sm:$0xff] %v17278_v52  ;;  %19791 = vst [vmem:[#allocation227_spill] sm:$0xff] %v17283_v44  ;;  %v17288_v53 = vld [vmem:[%s19559_s10 + $0x7d8] sm:$0xff]  ;;  %v17293_v49 = vld [vmem:[%s19559_s10 + $0x7e0] sm:$0xff] }
 0x1ed   :  { %19792 = vst [vmem:[#allocation228_spill] sm:$0xff] %v17288_v53  ;;  %19793 = vst [vmem:[#allocation229_spill] sm:$0xff] %v17293_v49  ;;  %v17298_v40 = vld [vmem:[%s19559_s10 + $0x7e8] sm:$0xff]  ;;  %v17303_v52 = vld [vmem:[%s19559_s10 + $0x7f0] sm:$0xff] }
 0x1ee   :  { %19794 = vst [vmem:[#allocation230_spill] sm:$0xff] %v17298_v40  ;;  %19795 = vst [vmem:[#allocation231_spill] sm:$0xff] %v17303_v52  ;;  %v17308_v44 = vld [vmem:[%s19559_s10 + $0x7f8] sm:$0xff]  ;;  %v17313_v53 = vld [vmem:[%s19559_s10 + $0x800] sm:$0xff] }
 0x1ef   :  { %19796 = vst [vmem:[#allocation232_spill] sm:$0xff] %v17308_v44  ;;  %19797 = vst [vmem:[#allocation233_spill] sm:$0xff] %v17313_v53  ;;  %v17318_v49 = vld [vmem:[%s19559_s10 + $0x808] sm:$0xff]  ;;  %v17323_v40 = vld [vmem:[%s19559_s10 + $0x810] sm:$0xff] }
 0x1f0   :  { %19798 = vst [vmem:[#allocation234_spill] sm:$0xff] %v17318_v49  ;;  %19799 = vst [vmem:[#allocation235_spill] sm:$0xff] %v17323_v40  ;;  %v17328_v52 = vld [vmem:[%s19559_s10 + $0x818] sm:$0xff]  ;;  %v17333_v44 = vld [vmem:[%s19559_s10 + $0x820] sm:$0xff] }
 0x1f1   :  { %19800 = vst [vmem:[#allocation236_spill] sm:$0xff] %v17328_v52  ;;  %19801 = vst [vmem:[#allocation237_spill] sm:$0xff] %v17333_v44  ;;  %v17338_v53 = vld [vmem:[%s19559_s10 + $0x828] sm:$0xff]  ;;  %v17343_v49 = vld [vmem:[%s19559_s10 + $0x830] sm:$0xff] }
 0x1f2   :  { %19802 = vst [vmem:[#allocation238_spill] sm:$0xff] %v17338_v53  ;;  %19803 = vst [vmem:[#allocation239_spill] sm:$0xff] %v17343_v49  ;;  %v17348_v40 = vld [vmem:[%s19559_s10 + $0x838] sm:$0xff]  ;;  %v17353_v52 = vld [vmem:[%s19559_s10 + $0x840] sm:$0xff] }
 0x1f3   :  { %19804 = vst [vmem:[#allocation240_spill] sm:$0xff] %v17348_v40  ;;  %19805 = vst [vmem:[#allocation241_spill] sm:$0xff] %v17353_v52  ;;  %v17358_v44 = vld [vmem:[%s19559_s10 + $0x848] sm:$0xff]  ;;  %v17363_v53 = vld [vmem:[%s19559_s10 + $0x850] sm:$0xff] }
 0x1f4   :  { %19806 = vst [vmem:[#allocation242_spill] sm:$0xff] %v17358_v44  ;;  %19807 = vst [vmem:[#allocation243_spill] sm:$0xff] %v17363_v53  ;;  %v17368_v49 = vld [vmem:[%s19559_s10 + $0x858] sm:$0xff]  ;;  %v17373_v40 = vld [vmem:[%s19559_s10 + $0x860] sm:$0xff] }
 0x1f5   :  { %19808 = vst [vmem:[#allocation244_spill] sm:$0xff] %v17368_v49  ;;  %19809 = vst [vmem:[#allocation245_spill] sm:$0xff] %v17373_v40  ;;  %v17378_v52 = vld [vmem:[%s19559_s10 + $0x868] sm:$0xff]  ;;  %v17383_v44 = vld [vmem:[%s19559_s10 + $0x870] sm:$0xff] }
 0x1f6   :  { %19810 = vst [vmem:[#allocation246_spill] sm:$0xff] %v17378_v52  ;;  %19811 = vst [vmem:[#allocation247_spill] sm:$0xff] %v17383_v44  ;;  %v17388_v53 = vld [vmem:[%s19559_s10 + $0x878] sm:$0xff]  ;;  %v17393_v49 = vld [vmem:[%s19559_s10 + $0x880] sm:$0xff] }
 0x1f7   :  { %19812 = vst [vmem:[#allocation248_spill] sm:$0xff] %v17388_v53  ;;  %19813 = vst [vmem:[#allocation249_spill] sm:$0xff] %v17393_v49  ;;  %v17398_v40 = vld [vmem:[%s19559_s10 + $0x888] sm:$0xff]  ;;  %v17403_v52 = vld [vmem:[%s19559_s10 + $0x890] sm:$0xff] }
 0x1f8   :  { %19814 = vst [vmem:[#allocation250_spill] sm:$0xff] %v17398_v40  ;;  %19815 = vst [vmem:[#allocation251_spill] sm:$0xff] %v17403_v52  ;;  %v17408_v44 = vld [vmem:[%s19559_s10 + $0x898] sm:$0xff]  ;;  %v17413_v53 = vld [vmem:[%s19559_s10 + $0x8a0] sm:$0xff] }
 0x1f9   :  { %19816 = vst [vmem:[#allocation252_spill] sm:$0xff] %v17408_v44  ;;  %19817 = vst [vmem:[#allocation253_spill] sm:$0xff] %v17413_v53  ;;  %v17418_v49 = vld [vmem:[%s19559_s10 + $0x8a8] sm:$0xff]  ;;  %v17423_v40 = vld [vmem:[%s19559_s10 + $0x8b0] sm:$0xff] }
 0x1fa   :  { %19818 = vst [vmem:[#allocation254_spill] sm:$0xff] %v17418_v49  ;;  %19819 = vst [vmem:[#allocation255_spill] sm:$0xff] %v17423_v40  ;;  %v17428_v52 = vld [vmem:[%s19559_s10 + $0x8b8] sm:$0xff]  ;;  %v17433_v44 = vld [vmem:[%s19559_s10 + $0x8c0] sm:$0xff] }
 0x1fb   :  { %19820 = vst [vmem:[#allocation256_spill] sm:$0xff] %v17428_v52  ;;  %19821 = vst [vmem:[#allocation257_spill] sm:$0xff] %v17433_v44  ;;  %v17438_v53 = vld [vmem:[%s19559_s10 + $0x8c8] sm:$0xff]  ;;  %v17443_v49 = vld [vmem:[%s19559_s10 + $0x8d0] sm:$0xff] }
 0x1fc   :  { %19822 = vst [vmem:[#allocation258_spill] sm:$0xff] %v17438_v53  ;;  %19823 = vst [vmem:[#allocation259_spill] sm:$0xff] %v17443_v49  ;;  %v17448_v40 = vld [vmem:[%s19559_s10 + $0x8d8] sm:$0xff]  ;;  %v17453_v52 = vld [vmem:[%s19559_s10 + $0x8e0] sm:$0xff] }
 0x1fd   :  { %19824 = vst [vmem:[#allocation260_spill] sm:$0xff] %v17448_v40  ;;  %19825 = vst [vmem:[#allocation261_spill] sm:$0xff] %v17453_v52  ;;  %v17458_v44 = vld [vmem:[%s19559_s10 + $0x8e8] sm:$0xff]  ;;  %v17463_v53 = vld [vmem:[%s19559_s10 + $0x8f0] sm:$0xff] }
 0x1fe   :  { %19826 = vst [vmem:[#allocation262_spill] sm:$0xff] %v17458_v44  ;;  %19827 = vst [vmem:[#allocation263_spill] sm:$0xff] %v17463_v53  ;;  %v17468_v49 = vld [vmem:[%s19559_s10 + $0x8f8] sm:$0xff]  ;;  %v17473_v40 = vld [vmem:[%s19559_s10 + $0x900] sm:$0xff] }
 0x1ff   :  { %19828 = vst [vmem:[#allocation264_spill] sm:$0xff] %v17468_v49  ;;  %19829 = vst [vmem:[#allocation265_spill] sm:$0xff] %v17473_v40  ;;  %v17478_v52 = vld [vmem:[%s19559_s10 + $0x908] sm:$0xff]  ;;  %v17483_v44 = vld [vmem:[%s19559_s10 + $0x910] sm:$0xff] }
 0x200   :  { %19830 = vst [vmem:[#allocation266_spill] sm:$0xff] %v17478_v52  ;;  %19831 = vst [vmem:[#allocation267_spill] sm:$0xff] %v17483_v44  ;;  %v17488_v53 = vld [vmem:[%s19559_s10 + $0x918] sm:$0xff]  ;;  %v17493_v49 = vld [vmem:[%s19559_s10 + $0x920] sm:$0xff] }
 0x201   :  { %19832 = vst [vmem:[#allocation268_spill] sm:$0xff] %v17488_v53  ;;  %19833 = vst [vmem:[#allocation269_spill] sm:$0xff] %v17493_v49  ;;  %v17498_v40 = vld [vmem:[%s19559_s10 + $0x928] sm:$0xff]  ;;  %v17503_v52 = vld [vmem:[%s19559_s10 + $0x930] sm:$0xff] }
 0x202   :  { %19834 = vst [vmem:[#allocation270_spill] sm:$0xff] %v17498_v40  ;;  %19835 = vst [vmem:[#allocation271_spill] sm:$0xff] %v17503_v52  ;;  %v17508_v44 = vld [vmem:[%s19559_s10 + $0x938] sm:$0xff]  ;;  %v17513_v53 = vld [vmem:[%s19559_s10 + $0x940] sm:$0xff] }
 0x203   :  { %19836 = vst [vmem:[#allocation272_spill] sm:$0xff] %v17508_v44  ;;  %19837 = vst [vmem:[#allocation273_spill] sm:$0xff] %v17513_v53  ;;  %v17518_v49 = vld [vmem:[%s19559_s10 + $0x948] sm:$0xff]  ;;  %v17523_v40 = vld [vmem:[%s19559_s10 + $0x950] sm:$0xff] }
 0x204   :  { %19838 = vst [vmem:[#allocation274_spill] sm:$0xff] %v17518_v49  ;;  %19839 = vst [vmem:[#allocation275_spill] sm:$0xff] %v17523_v40  ;;  %v17528_v52 = vld [vmem:[%s19559_s10 + $0x958] sm:$0xff]  ;;  %v17533_v44 = vld [vmem:[%s19559_s10 + $0x960] sm:$0xff] }
 0x205   :  { %19840 = vst [vmem:[#allocation276_spill] sm:$0xff] %v17528_v52  ;;  %19841 = vst [vmem:[#allocation277_spill] sm:$0xff] %v17533_v44  ;;  %v17538_v53 = vld [vmem:[%s19559_s10 + $0x968] sm:$0xff]  ;;  %v17543_v49 = vld [vmem:[%s19559_s10 + $0x970] sm:$0xff] }
 0x206   :  { %19842 = vst [vmem:[#allocation278_spill] sm:$0xff] %v17538_v53  ;;  %19843 = vst [vmem:[#allocation279_spill] sm:$0xff] %v17543_v49  ;;  %v17548_v40 = vld [vmem:[%s19559_s10 + $0x978] sm:$0xff]  ;;  %v17553_v52 = vld [vmem:[%s19559_s10 + $0x980] sm:$0xff] }
 0x207   :  { %19844 = vst [vmem:[#allocation280_spill] sm:$0xff] %v17548_v40  ;;  %19845 = vst [vmem:[#allocation281_spill] sm:$0xff] %v17553_v52  ;;  %v17558_v44 = vld [vmem:[%s19559_s10 + $0x988] sm:$0xff]  ;;  %v17563_v53 = vld [vmem:[%s19559_s10 + $0x990] sm:$0xff] }
 0x208   :  { %19846 = vst [vmem:[#allocation282_spill] sm:$0xff] %v17558_v44  ;;  %19847 = vst [vmem:[#allocation283_spill] sm:$0xff] %v17563_v53  ;;  %v17568_v49 = vld [vmem:[%s19559_s10 + $0x998] sm:$0xff]  ;;  %v17573_v40 = vld [vmem:[%s19559_s10 + $0x9a0] sm:$0xff] }
 0x209   :  { %19848 = vst [vmem:[#allocation284_spill] sm:$0xff] %v17568_v49  ;;  %19849 = vst [vmem:[#allocation285_spill] sm:$0xff] %v17573_v40  ;;  %v17578_v52 = vld [vmem:[%s19559_s10 + $0x9a8] sm:$0xff]  ;;  %v17583_v44 = vld [vmem:[%s19559_s10 + $0x9b0] sm:$0xff] }
 0x20a   :  { %19850 = vst [vmem:[#allocation286_spill] sm:$0xff] %v17578_v52  ;;  %19851 = vst [vmem:[#allocation287_spill] sm:$0xff] %v17583_v44  ;;  %v17588_v53 = vld [vmem:[%s19559_s10 + $0x9b8] sm:$0xff]  ;;  %v17593_v49 = vld [vmem:[%s19559_s10 + $0x9c0] sm:$0xff] }
 0x20b   :  { %19852 = vst [vmem:[#allocation288_spill] sm:$0xff] %v17588_v53  ;;  %19853 = vst [vmem:[#allocation289_spill] sm:$0xff] %v17593_v49  ;;  %v17598_v40 = vld [vmem:[%s19559_s10 + $0x9c8] sm:$0xff]  ;;  %v17603_v52 = vld [vmem:[%s19559_s10 + $0x9d0] sm:$0xff] }
 0x20c   :  { %19854 = vst [vmem:[#allocation290_spill] sm:$0xff] %v17598_v40  ;;  %19855 = vst [vmem:[#allocation291_spill] sm:$0xff] %v17603_v52  ;;  %v17608_v44 = vld [vmem:[%s19559_s10 + $0x9d8] sm:$0xff]  ;;  %v17613_v53 = vld [vmem:[%s19559_s10 + $0x9e0] sm:$0xff] }
 0x20d   :  { %19856 = vst [vmem:[#allocation292_spill] sm:$0xff] %v17608_v44  ;;  %19857 = vst [vmem:[#allocation293_spill] sm:$0xff] %v17613_v53  ;;  %v17618_v49 = vld [vmem:[%s19559_s10 + $0x9e8] sm:$0xff]  ;;  %v17623_v40 = vld [vmem:[%s19559_s10 + $0x9f0] sm:$0xff] }
 0x20e   :  { %19858 = vst [vmem:[#allocation294_spill] sm:$0xff] %v17618_v49  ;;  %19859 = vst [vmem:[#allocation295_spill] sm:$0xff] %v17623_v40  ;;  %v17628_v52 = vld [vmem:[%s19559_s10 + $0x9f8] sm:$0xff]  ;;  %v17633_v44 = vld [vmem:[%s19559_s10 + $0xa00] sm:$0xff] }
 0x20f   :  { %19860 = vst [vmem:[#allocation296_spill] sm:$0xff] %v17628_v52  ;;  %19861 = vst [vmem:[#allocation297_spill] sm:$0xff] %v17633_v44  ;;  %v17638_v53 = vld [vmem:[%s19559_s10 + $0xa08] sm:$0xff]  ;;  %v17643_v49 = vld [vmem:[%s19559_s10 + $0xa10] sm:$0xff] }
 0x210   :  { %19862 = vst [vmem:[#allocation298_spill] sm:$0xff] %v17638_v53  ;;  %19863 = vst [vmem:[#allocation299_spill] sm:$0xff] %v17643_v49  ;;  %v17648_v40 = vld [vmem:[%s19559_s10 + $0xa18] sm:$0xff]  ;;  %v17653_v52 = vld [vmem:[%s19559_s10 + $0xa20] sm:$0xff] }
 0x211   :  { %19864 = vst [vmem:[#allocation300_spill] sm:$0xff] %v17648_v40  ;;  %19865 = vst [vmem:[#allocation301_spill] sm:$0xff] %v17653_v52  ;;  %v17658_v44 = vld [vmem:[%s19559_s10 + $0xa28] sm:$0xff]  ;;  %v17663_v53 = vld [vmem:[%s19559_s10 + $0xa30] sm:$0xff] }
 0x212   :  { %19866 = vst [vmem:[#allocation302_spill] sm:$0xff] %v17658_v44  ;;  %19867 = vst [vmem:[#allocation303_spill] sm:$0xff] %v17663_v53  ;;  %v17668_v49 = vld [vmem:[%s19559_s10 + $0xa38] sm:$0xff]  ;;  %v17673_v40 = vld [vmem:[%s19559_s10 + $0xa40] sm:$0xff] }
 0x213   :  { %19868 = vst [vmem:[#allocation304_spill] sm:$0xff] %v17668_v49  ;;  %19869 = vst [vmem:[#allocation305_spill] sm:$0xff] %v17673_v40  ;;  %v17678_v52 = vld [vmem:[%s19559_s10 + $0xa48] sm:$0xff]  ;;  %v17683_v44 = vld [vmem:[%s19559_s10 + $0xa50] sm:$0xff] }
 0x214   :  { %19870 = vst [vmem:[#allocation306_spill] sm:$0xff] %v17678_v52  ;;  %19871 = vst [vmem:[#allocation307_spill] sm:$0xff] %v17683_v44  ;;  %v17688_v53 = vld [vmem:[%s19559_s10 + $0xa58] sm:$0xff]  ;;  %v17693_v49 = vld [vmem:[%s19559_s10 + $0xa60] sm:$0xff] }
 0x215   :  { %19872 = vst [vmem:[#allocation308_spill] sm:$0xff] %v17688_v53  ;;  %19873 = vst [vmem:[#allocation309_spill] sm:$0xff] %v17693_v49  ;;  %v17698_v40 = vld [vmem:[%s19559_s10 + $0xa68] sm:$0xff]  ;;  %v17703_v52 = vld [vmem:[%s19559_s10 + $0xa70] sm:$0xff]  ;;  %v19563_v49 = vmov 0.0  }
 0x216   :  { %19874 = vst [vmem:[#allocation310_spill] sm:$0xff] %v17698_v40  ;;  %19875 = vst [vmem:[#allocation311_spill] sm:$0xff] %v17703_v52  ;;  %v17708_v44 = vld [vmem:[%s19559_s10 + $0xa78] sm:$0xff]  ;;  %v17713_v53 = vld [vmem:[%s19549_s0] sm:$0xff]   ;;  %13583 = vmatprep.subr.bf16.mxu1 %v19563_v49  ;;  %13575 = vmatprep.subr.bf16.mxu0 %v19563_v49 }
 0x217   :  { %19876 = vst [vmem:[#allocation312_spill] sm:$0xff] %v17708_v44  ;;  %13584 = vmatpush3.bf16.msra.mxu1 %v17713_v53  ;;  %v17721_v52 = vld [vmem:[%s19549_s0 + $0x8] sm:$0xff]   ;;  %13587 = vmatprep.mubr.msk.bf16.mxu1 %vm14254_vm0, %v19563_v49 }
 0x218   :  { %5585 = vsyncadd [#allocation4 + $0x1], 43008  ;;  %13585 = vmatprep.subr.bf16.mxu1 %v19563_v49  ;;  %13576 = vmatpush3.bf16.msra.mxu0 %v17713_v53  ;;  %v12501_v44 = vld [vmem:[%s19550_s1 + $0x4] sm:$0x7]  ;;  %v5590_v55 = vld [vmem:[%s19550_s1] sm:$0x7] }
 0x219   :  { %13577 = vmatprep.subr.bf16.mxu0 %v19563_v49  ;;  %13579 = vmatprep.mubr.msk.bf16.mxu0 %vm14254_vm0, %v19563_v49  ;;  %v13898_v40 = vld [vmem:[%s19551_s2 + $0xa4] ss:$20 sps:$4 sm:$0xff]   ;;  %v13901_v41 = vld [vmem:[%s19551_s2 + $0xac] ss:$20 sps:$4 sm:$0xff]   ;;  %vm5603_vm1 = vcmask 261120   ;;  %vm5847_vm2 = vcmask 523264  }
 0x21a   :  { %v13896_v54 = vld [vmem:[%s19551_s2 + $0xa0] ss:$20 sps:$4 sm:$0xff]   ;;  %v13899_v49 = vld [vmem:[%s19551_s2 + $0xa8] ss:$20 sps:$4 sm:$0xff]   ;;  %v13914_v46 = vld [vmem:[%s19551_s2 + $0x118] ss:$20 sps:$4 sm:$0xff]  }
 0x21b   :  { %13586 = vmatpush3.bf16.msra.mxu1 %v17721_v52  ;;  %v13904_v50 = vld [vmem:[%s19551_s2 + $0xcc] ss:$20 sps:$4 sm:$0xff]   ;;  %v13907_v45 = vld [vmem:[%s19551_s2 + $0xd4] ss:$20 sps:$4 sm:$0xff]   ;;  %vm8647_vm3 = vcmask 128000  }
 0x21c   :  { %13578 = vmatpush3.bf16.msra.mxu0 %v17721_v52  ;;  %5892 = vmatprep.subr.bf16.mxu1 %v13901_v41  ;;  %v13902_v42 = vld [vmem:[%s19551_s2 + $0xc8] ss:$20 sps:$4 sm:$0xff]   ;;  %v13905_v41 = vld [vmem:[%s19551_s2 + $0xd0] ss:$20 sps:$4 sm:$0xff]  }
 0x21d   :  { %5851 = vmatprep.subr.bf16.mxu0 %v13898_v40  ;;  %v13913_v40 = vld [vmem:[%s19551_s2 + $0xfc] ss:$20 sps:$4 sm:$0xff]  }
 0x21e   :  { %13588 = vmatmul.mubr.msk.bf16.vlgmr.msra.gmra.mrb[0].mxu1 %vm5603_vm1, %v12501_v44  ;;  %v13910_v44 = vld [vmem:[%s19551_s2 + $0xf4] ss:$20 sps:$4 sm:$0xff]  }
 0x21f   :  { %13580 = vmatmul.mubr.msk.bf16.vlgmr.msra.gmra.mrb[0].mxu0 %vm5603_vm1, %v5590_v55  ;;  %5893 = vmatpush1.bf16.msra.mxu1 %v13899_v49  ;;  %v13908_v49 = vld [vmem:[%s19551_s2 + $0xf0] ss:$20 sps:$4 sm:$0xff]   ;;  %v13911_v55 = vld [vmem:[%s19551_s2 + $0xf8] ss:$20 sps:$4 sm:$0xff]  }
 0x220   :  { %5852 = vmatpush1.bf16.msra.mxu0 %v13896_v54  ;;  %5894 = vmatprep.subr.bf16.mxu1 %v13907_v45  ;;  %v13919_v45 = vld [vmem:[%s19551_s2 + $0x124] ss:$20 sps:$4 sm:$0xff]   ;;  %v13917_v54 = vld [vmem:[%s19551_s2 + $0x120] ss:$20 sps:$4 sm:$0xff]  }
 0x221   :  { %5853 = vmatprep.subr.bf16.mxu0 %v13904_v50  ;;  %v13916_v50 = vld [vmem:[%s19551_s2 + $0x11c] ss:$20 sps:$4 sm:$0xff]  }
 0x223   :  { %5895 = vmatpush1.bf16.msra.mxu1 %v13905_v41  ;;  %v19877_v41 = vmov 0.0  }
 0x224   :  { %5854 = vmatpush1.bf16.msra.mxu0 %v13902_v42  ;;  %5896 = vmatprep.subr.bf16.mxu1 %v13913_v40  ;;  %v13922_v42 = vld [vmem:[%s19551_s2 + $0x4] ss:$20 sps:$4 sm:$0xff]   ;;  %v19565_v40 = vmov 0  }
 0x225   :  { %5855 = vmatprep.subr.bf16.mxu0 %v13910_v44  ;;  %5883 = vmatprep.mubr.bf16.mxu0 %v19565_v40 }
 0x226   :  { %5924 = vmatprep.mubr.bf16.mxu1 %v19565_v40 }
 0x227   :  { %5897 = vmatpush1.bf16.msra.mxu1 %v13911_v55 }
 0x228   :  { %5856 = vmatpush1.bf16.msra.mxu0 %v13908_v49  ;;  %5898 = vmatprep.subr.bf16.mxu1 %v13919_v45  ;;  %v13920_v49 = vld [vmem:[%s19551_s2] ss:$20 sps:$4 sm:$0xff]  }
 0x229   :  { %5857 = vmatprep.subr.bf16.mxu0 %v13916_v50  ;;  %v13926_v50 = vld [vmem:[%s19551_s2 + $0x2c] ss:$20 sps:$4 sm:$0xff]  }
 0x22b   :  { %5899 = vmatpush1.bf16.msra.mxu1 %v13917_v54 }
 0x22c   :  { %5858 = vmatpush1.bf16.msra.mxu0 %v13914_v46  ;;  %6080 = vmatprep.subr.bf16.mxu1 %v13922_v42  ;;  %v13923_v46 = vld [vmem:[%s19551_s2 + $0xb0] ss:$20 sps:$4 sm:$0xff]  }
 0x22d   :  { %13591 = vmatprep.subr.bf16.mxu0 %v19877_v41 }
 0x2f1   :  { %v5711_v44 = vpop.f32.mrb[0].mxu1 }
 0x2f2   :  { %v5717_v55 = vpack.c.bf16 %v5711_v44, %v5711_v44  ;;  %v13589_v45 = vpop.f32.mrb[1].mxu1  ;;  %v5641_v54 = vpop.f32.mrb[0].mxu0  ;;  %v13924_v44 = vld [vmem:[%s19551_s2 + $0x28] ss:$20 sps:$4 sm:$0xff]  }
 0x2f3   :  { %v5714_v51 = vpop.f32.mrb[2].mxu1  ;;  %v13581_v40 = vpop.f32.mrb[1].mxu0  ;;  %v13927_v45 = vld [vmem:[%s19551_s2 + $0xd8] ss:$20 sps:$4 sm:$0xff]  }
 0x2f4   :  { %v13590_v42 = vpop.f32.mrb[3].mxu1  ;;  %12547 = vmatmul.mubr.msk.bf16.vlgmr.msra.gmra.mrb[4].mxu0 %vm5847_vm2, %v5717_v55  ;;  %12548 = vmatmul.mubr.msk.bf16.vlgmr.msra.gmra.mrb[4].mxu1 %vm5847_vm2, %v5717_v55  ;;  %v5644_v47 = vpop.f32.mrb[2].mxu0  ;;  %v13930_v51 = vld [vmem:[%s19551_s2 + $0x54] ss:$20 sps:$4 sm:$0xff]   ;;  %v13928_v40 = vld [vmem:[%s19551_s2 + $0x50] ss:$20 sps:$4 sm:$0xff]  }
 0x2f5   :  { %13592 = vmatpush3.bf16.msra.mxu0 %v13923_v46  ;;  %6081 = vmatpush1.bf16.msra.mxu1 %v13920_v49  ;;  %v13582_v43 = vpop.f32.mrb[3].mxu0  ;;  %v19878_v47 = vmov 0   ;;  %v13934_v49 = vld [vmem:[%s19551_s2 + $0x7c] ss:$20 sps:$4 sm:$0xff]   ;;  %v13932_v46 = vld [vmem:[%s19551_s2 + $0x78] ss:$20 sps:$4 sm:$0xff]  }
 0x2f6   :  { %13593 = vmatprep.subr.bf16.mxu0 %v19877_v41  ;;  %6082 = vmatprep.subr.bf16.mxu1 %v13926_v50  ;;  %v13931_v43 = vld [vmem:[%s19551_s2 + $0x100] ss:$20 sps:$4 sm:$0xff]   ;;  %v13935_v50 = vld [vmem:[%s19551_s2 + $0x128] ss:$20 sps:$4 sm:$0xff]  }
 0x2f7   :  { %13599 = vmatprep.mubr.msk.bf16.mxu0 %vm14254_vm0, %v19877_v41  ;;  %6112 = vmatprep.mubr.bf16.mxu1 %v19878_v47  ;;  %v13938_v42 = vld [vmem:[%s19551_s2 + $0xc] ss:$20 sps:$4 sm:$0xff]  }
 0x2f9   :  { %13594 = vmatpush3.bf16.msra.mxu0 %v13927_v45  ;;  %6083 = vmatpush1.bf16.msra.mxu1 %v13924_v44  ;;  %v5647_v44 = vpack.c.bf16 %v5641_v54, %v5641_v54  ;;  %v13936_v45 = vld [vmem:[%s19551_s2 + $0x8] ss:$20 sps:$4 sm:$0xff]   ;;  %v13940_v54 = vld [vmem:[%s19551_s2 + $0x30] ss:$20 sps:$4 sm:$0xff]  }
 0x2fa   :  { %13595 = vmatprep.subr.bf16.mxu0 %v19877_v41  ;;  %6084 = vmatprep.subr.bf16.mxu1 %v13930_v51  ;;  %v13939_v51 = vld [vmem:[%s19551_s2 + $0x10] ss:$20 sps:$4 sm:$0xff]  }
 0x2fd   :  { %13596 = vmatpush3.bf16.msra.mxu0 %v13931_v43  ;;  %6085 = vmatpush1.bf16.msra.mxu1 %v13928_v40  ;;  %v13942_v40 = vld [vmem:[%s19551_s2 + $0x34] ss:$20 sps:$4 sm:$0xff]   ;;  %v13943_v43 = vld [vmem:[%s19551_s2 + $0x38] ss:$20 sps:$4 sm:$0xff]  }
 0x2fe   :  { %13597 = vmatprep.subr.bf16.mxu0 %v19877_v41  ;;  %6086 = vmatprep.subr.bf16.mxu1 %v13934_v49  ;;  %v13946_v49 = vld [vmem:[%s19551_s2 + $0x5c] ss:$20 sps:$4 sm:$0xff]  }
 0x301   :  { %13598 = vmatpush3.bf16.msra.mxu0 %v13935_v50  ;;  %6087 = vmatpush1.bf16.msra.mxu1 %v13932_v46  ;;  %v13947_v46 = vld [vmem:[%s19551_s2 + $0x60] ss:$20 sps:$4 sm:$0xff]   ;;  %v13950_v50 = vld [vmem:[%s19551_s2 + $0x84] ss:$20 sps:$4 sm:$0xff]  }
 0x302   :  { %6121 = vmatprep.subr.bf16.mxu0 %v13938_v42  ;;  %13603 = vmatprep.subr.bf16.mxu1 %v19877_v41  ;;  %v13948_v42 = vld [vmem:[%s19551_s2 + $0x80] ss:$20 sps:$4 sm:$0xff]  }
 0x304   :  { %13600 = vmatmul.mubr.msk.bf16.vlgmr.msra.gmra.mrb[8].mxu0 %vm5847_vm2, %v5717_v55  ;;  %12570 = vmatmul.mubr.msk.bf16.vlgmr.msra.gmra.mrb[8].mxu1 %vm5847_vm2, %v5647_v44  ;;  %v13944_v55 = vld [vmem:[%s19551_s2 + $0x58] ss:$20 sps:$4 sm:$0xff]  }
 0x305   :  { %6122 = vmatpush1.bf16.msra.mxu0 %v13936_v45  ;;  %13604 = vmatpush3.bf16.msra.mxu1 %v13939_v51  ;;  %v13951_v45 = vld [vmem:[%s19551_s2 + $0x88] ss:$20 sps:$4 sm:$0xff]  }
 0x306   :  { %6123 = vmatprep.subr.bf16.mxu0 %v13942_v40  ;;  %13605 = vmatprep.subr.bf16.mxu1 %v19877_v41  ;;  %v12573_v51 = vld [vmem:[%s19550_s1 + $0x8] sm:$0x7]  ;;  %v13954_v40 = vld [vmem:[%s19551_s2 + $0x144] ss:$20 sps:$4 sm:$0xff]  }
 0x307   :  { %6153 = vmatprep.mubr.bf16.mxu0 %v19878_v47  ;;  %13611 = vmatprep.mubr.msk.bf16.mxu1 %vm14254_vm0, %v19877_v41 }
 0x309   :  { %6124 = vmatpush1.bf16.msra.mxu0 %v13940_v54  ;;  %13606 = vmatpush3.bf16.msra.mxu1 %v13943_v43  ;;  %v13955_v54 = vld [vmem:[%s19551_s2 + $0x148] ss:$20 sps:$4 sm:$0xff]   ;;  %v13957_v43 = vld [vmem:[%s19551_s2 + $0x14c] ss:$20 sps:$4 sm:$0xff]  }
 0x30a   :  { %6125 = vmatprep.subr.bf16.mxu0 %v13946_v49  ;;  %13607 = vmatprep.subr.bf16.mxu1 %v19877_v41  ;;  %v13960_v49 = vld [vmem:[%s19551_s2 + $0x16c] ss:$20 sps:$4 sm:$0xff]  }
 0x30d   :  { %6126 = vmatpush1.bf16.msra.mxu0 %v13944_v55  ;;  %13608 = vmatpush3.bf16.msra.mxu1 %v13947_v46  ;;  %v13963_v55 = vld [vmem:[%s19551_s2 + $0x174] ss:$20 sps:$4 sm:$0xff]  }
 0x30e   :  { %6127 = vmatprep.subr.bf16.mxu0 %v13950_v50  ;;  %13609 = vmatprep.subr.bf16.mxu1 %v19877_v41  ;;  %v13958_v46 = vld [vmem:[%s19551_s2 + $0x168] ss:$20 sps:$4 sm:$0xff]   ;;  %v13961_v50 = vld [vmem:[%s19551_s2 + $0x170] ss:$20 sps:$4 sm:$0xff]  }
 0x311   :  { %6128 = vmatpush1.bf16.msra.mxu0 %v13948_v42  ;;  %13610 = vmatpush3.bf16.msra.mxu1 %v13951_v45  ;;  %v13966_v42 = vld [vmem:[%s19551_s2 + $0x194] ss:$20 sps:$4 sm:$0xff]   ;;  %v13964_v45 = vld [vmem:[%s19551_s2 + $0x190] ss:$20 sps:$4 sm:$0xff]  }
 0x312   :  { %13615 = vmatprep.subr.bf16.mxu0 %v19877_v41  ;;  %6380 = vmatprep.subr.bf16.mxu1 %v13954_v40  ;;  %v13970_v40 = vld [vmem:[%s19551_s2 + $0x1b8] ss:$20 sps:$4 sm:$0xff]  }
 0x314   :  { %12571 = vmatmul.mubr.msk.bf16.vlgmr.msra.gmra.mrb[12].mxu0 %vm5847_vm2, %v5647_v44  ;;  %13612 = vmatmul.mubr.msk.bf16.vlgmr.msra.gmra.mrb[12].mxu1 %vm5847_vm2, %v5647_v44  ;;  %v13952_v44 = vld [vmem:[%s19551_s2 + $0x140] ss:$20 sps:$4 sm:$0xff]  }
 0x315   :  { %13616 = vmatpush3.bf16.msra.mxu0 %v17713_v53  ;;  %13619 = vmatprep.mubr.msk.bf16.mxu0 %vm14254_vm0, %v19877_v41 }
 0x316   :  { %13617 = vmatprep.subr.bf16.mxu0 %v19877_v41  ;;  %6412 = vmatprep.mubr.bf16.mxu1 %v19878_v47 }
 0x317   :  { %6381 = vmatpush1.bf16.msra.mxu1 %v13952_v44  ;;  %v13967_v44 = vld [vmem:[%s19551_s2 + $0x198] ss:$20 sps:$4 sm:$0xff]  }
 0x318   :  { %6382 = vmatprep.subr.bf16.mxu1 %v13960_v49  ;;  %v13975_v49 = vld [vmem:[%s19551_s2 + $0x1c4] ss:$20 sps:$4 sm:$0xff]  }
 0x319   :  { %13618 = vmatpush3.bf16.msra.mxu0 %v17721_v52 }
 0x31a   :  { %6421 = vmatprep.subr.bf16.mxu0 %v13957_v43  ;;  %v13973_v43 = vld [vmem:[%s19551_s2 + $0x1c0] ss:$20 sps:$4 sm:$0xff]  }
 0x31b   :  { %6383 = vmatpush1.bf16.msra.mxu1 %v13958_v46 }
 0x31c   :  { %13620 = vmatmul.mubr.msk.bf16.vlgmr.msra.gmra.mrb[16].mxu0 %vm5603_vm1, %v12573_v51  ;;  %v13969_v51 = vld [vmem:[%s19551_s2 + $0x19c] ss:$20 sps:$4 sm:$0xff]   ;;  %6384 = vmatprep.subr.bf16.mxu1 %v13966_v42 }
 0x31d   :  { %6453 = vmatprep.mubr.bf16.mxu0 %v19878_v47  ;;  %6422 = vmatpush1.bf16.msra.mxu0 %v13955_v54  ;;  %v13972_v54 = vld [vmem:[%s19551_s2 + $0x1bc] ss:$20 sps:$4 sm:$0xff]  }
 0x31e   :  { %6423 = vmatprep.subr.bf16.mxu0 %v13963_v55 }
 0x31f   :  { %6385 = vmatpush1.bf16.msra.mxu1 %v13964_v45 }
 0x320   :  { %6386 = vmatprep.subr.bf16.mxu1 %v13972_v54 }
 0x321   :  { %6424 = vmatpush1.bf16.msra.mxu0 %v13961_v50 }
 0x322   :  { %6425 = vmatprep.subr.bf16.mxu0 %v13969_v51 }
 0x323   :  { %6387 = vmatpush1.bf16.msra.mxu1 %v13970_v40 }
 0x324   :  { %13623 = vmatprep.subr.bf16.mxu1 %v19877_v41 }
 0x325   :  { %6426 = vmatpush1.bf16.msra.mxu0 %v13967_v44 }
 0x326   :  { %6427 = vmatprep.subr.bf16.mxu0 %v13975_v49 }
 0x329   :  { %6428 = vmatpush1.bf16.msra.mxu0 %v13973_v43 }
 0x32a   :  { %13635 = vmatprep.subr.bf16.mxu0 %v19877_v41 }
 0x3c7   :  { %v5885_v55 = vpop.f32.mrb[4].mxu0  ;;  %v5926_v46 = vpop.f32.mrb[4].mxu1 }
 0x3c8   :  { %v5887_v50 = vpop.f32.mrb[5].mxu0  ;;  %v5928_v42 = vpop.f32.mrb[5].mxu1 }
 0x3c9   :  { %v5889_v45 = vpop.f32.mrb[6].mxu0  ;;  %v5930_v51 = vpop.f32.mrb[6].mxu1 }
 0x3ca   :  { %v5890_v44 = vpop.f32.mrb[7].mxu0  ;;  %v5931_v31 = vpop.f32.mrb[7].mxu1 }
 0x3d7   :  { %v5967_v39 = vpop.f32.mrb[8].mxu0  ;;  %v6114_v30 = vpop.f32.mrb[8].mxu1 }
 0x3d8   :  { %v17944_v38 = vadd.f32 %v6114_v30, %v5885_v55  ;;  %v13601_v54 = vpop.f32.mrb[9].mxu0  ;;  %v6116_v49 = vpop.f32.mrb[9].mxu1 }
 0x3d9   :  { %v17946_v40 = vadd.f32 %v6116_v49, %v5887_v50  ;;  %v5970_v43 = vpop.f32.mrb[10].mxu0  ;;  %v6118_v29 = vpop.f32.mrb[10].mxu1 }
 0x3da   :  { %v13602_v37 = vpop.f32.mrb[11].mxu0  ;;  %v6119_v28 = vpop.f32.mrb[11].mxu1  ;;  %v13976_v29 = vld [vmem:[%s19551_s2 + $0x150] ss:$20 sps:$4 sm:$0xff]   ;;  %v13986_v43 = vld [vmem:[%s19551_s2 + $0x208] ss:$20 sps:$4 sm:$0xff]  }
 0x3e7   :  { %v6155_v36 = vpop.f32.mrb[12].mxu0  ;;  %v6196_v27 = vpop.f32.mrb[12].mxu1 }
 0x3e8   :  { %v17948_v35 = vadd.f32 %v6155_v36, %v5926_v46  ;;  %v17950_v45 = vadd.f32 %v6196_v27, %v5967_v39  ;;  %v6157_v51 = vpop.f32.mrb[13].mxu0  ;;  %v13613_v31 = vpop.f32.mrb[13].mxu1  ;;  %v13982_v27 = vld [vmem:[%s19551_s2 + $0x1e4] ss:$20 sps:$4 sm:$0xff]   ;;  %v13978_v39 = vld [vmem:[%s19551_s2 + $0x1a0] ss:$20 sps:$4 sm:$0xff]  }
 0x3e9   :  { %v17952_v44 = vadd.f32 %v6157_v51, %v5928_v42  ;;  %v6159_v30 = vpop.f32.mrb[14].mxu0  ;;  %v6199_v55 = vpop.f32.mrb[14].mxu1  ;;  %v13980_v46 = vld [vmem:[%s19551_s2 + $0x1e0] ss:$20 sps:$4 sm:$0xff]   ;;  %v13983_v31 = vld [vmem:[%s19551_s2 + $0x1e8] ss:$20 sps:$4 sm:$0xff]  }
 0x3ea   :  { %v6160_v54 = vpop.f32.mrb[15].mxu0  ;;  %v13614_v26 = vpop.f32.mrb[15].mxu1  ;;  %v13988_v42 = vld [vmem:[%s19551_s2 + $0x20c] ss:$20 sps:$4 sm:$0xff]   ;;  %v13991_v30 = vld [vmem:[%s19551_s2 + $0x214] ss:$20 sps:$4 sm:$0xff]  }
 0x3eb   :  { %v13977_v26 = vld [vmem:[%s19551_s2 + $0x178] ss:$20 sps:$4 sm:$0xff]   ;;  %v13989_v55 = vld [vmem:[%s19551_s2 + $0x210] ss:$20 sps:$4 sm:$0xff]   ;;  %v13994_v54 = vld [vmem:[%s19551_s2 + $0x234] ss:$20 sps:$4 sm:$0xff]  }
 0x3ec   :  { %v13985_v51 = vld [vmem:[%s19551_s2 + $0x1ec] ss:$20 sps:$4 sm:$0xff]  }
 0x3ef   :  { %v6241_v50 = vpop.f32.mrb[16].mxu0 }
 0x3f0   :  { %v6247_v28 = vpack.c.bf16 %v6241_v50, %v6241_v50  ;;  %v13621_v37 = vpop.f32.mrb[17].mxu0  ;;  %v13992_v50 = vld [vmem:[%s19551_s2 + $0x230] ss:$20 sps:$4 sm:$0xff]  }
 0x3f1   :  { %v6244_v49 = vpop.f32.mrb[18].mxu0  ;;  %v14000_v37 = vld [vmem:[%s19551_s2 + $0x25c] ss:$20 sps:$4 sm:$0xff]  }
 0x3f2   :  { %v13622_v36 = vpop.f32.mrb[19].mxu0  ;;  %12619 = vmatmul.mubr.msk.bf16.vlgmr.msra.gmra.mrb[16].mxu1 %vm5847_vm2, %v6247_v28  ;;  %12620 = vmatmul.mubr.msk.bf16.vlgmr.msra.gmra.mrb[20].mxu0 %vm5847_vm2, %v6247_v28  ;;  %v13998_v49 = vld [vmem:[%s19551_s2 + $0x258] ss:$20 sps:$4 sm:$0xff]  }
 0x3f3   :  { %13624 = vmatpush3.bf16.msra.mxu1 %v13976_v29  ;;  %13636 = vmatpush3.bf16.msra.mxu0 %v17713_v53  ;;  %v12622_v53 = vld [vmem:[%s19550_s1 + $0xc] sm:$0x7]  ;;  %v13997_v29 = vld [vmem:[%s19551_s2 + $0x23c] ss:$20 sps:$4 sm:$0xff]   ;;  %v14003_v36 = vld [vmem:[%s19551_s2 + $0x264] ss:$20 sps:$4 sm:$0xff]  }
 0x3f4   :  { %13625 = vmatprep.subr.bf16.mxu1 %v19877_v41  ;;  %13637 = vmatprep.subr.bf16.mxu0 %v19877_v41 }
 0x3f5   :  { %13639 = vmatprep.mubr.msk.bf16.mxu0 %vm14254_vm0, %v19877_v41  ;;  %13631 = vmatprep.mubr.msk.bf16.mxu1 %vm14254_vm0, %v19877_v41 }
 0x3f7   :  { %13626 = vmatpush3.bf16.msra.mxu1 %v13977_v26  ;;  %13638 = vmatpush3.bf16.msra.mxu0 %v17721_v52  ;;  %v13979_v52 = vld [vmem:[%s19551_s2 + $0x1c8] ss:$20 sps:$4 sm:$0xff]   ;;  %v14001_v26 = vld [vmem:[%s19551_s2 + $0x260] ss:$20 sps:$4 sm:$0xff]  }
 0x3f8   :  { %13627 = vmatprep.subr.bf16.mxu1 %v19877_v41  ;;  %6685 = vmatprep.subr.bf16.mxu0 %v13982_v27 }
 0x3fa   :  { %13640 = vmatmul.mubr.msk.bf16.vlgmr.msra.gmra.mrb[24].mxu0 %vm5603_vm1, %v12622_v53 }
 0x3fb   :  { %13628 = vmatpush3.bf16.msra.mxu1 %v13978_v39  ;;  %6686 = vmatpush1.bf16.msra.mxu0 %v13980_v46 }
 0x3fc   :  { %13629 = vmatprep.subr.bf16.mxu1 %v19877_v41  ;;  %6687 = vmatprep.subr.bf16.mxu0 %v13988_v42 }
 0x3fd   :  { %6717 = vmatprep.mubr.bf16.mxu0 %v19878_v47 }
 0x3ff   :  { %13630 = vmatpush3.bf16.msra.mxu1 %v13979_v52  ;;  %6688 = vmatpush1.bf16.msra.mxu0 %v13986_v43 }
 0x400   :  { %6726 = vmatprep.subr.bf16.mxu1 %v13985_v51  ;;  %6689 = vmatprep.subr.bf16.mxu0 %v13994_v54 }
 0x402   :  { %13632 = vmatmul.mubr.msk.bf16.vlgmr.msra.gmra.mrb[20].mxu1 %vm5847_vm2, %v6247_v28  ;;  %v13995_v28 = vld [vmem:[%s19551_s2 + $0x238] ss:$20 sps:$4 sm:$0xff]  }
 0x403   :  { %6727 = vmatpush1.bf16.msra.mxu1 %v13983_v31  ;;  %6758 = vmatprep.mubr.bf16.mxu1 %v19878_v47 }
 0x404   :  { %6728 = vmatprep.subr.bf16.mxu1 %v13991_v30  ;;  %6690 = vmatpush1.bf16.msra.mxu0 %v13992_v50 }
 0x405   :  { %6691 = vmatprep.subr.bf16.mxu0 %v14000_v37 }
 0x407   :  { %6729 = vmatpush1.bf16.msra.mxu1 %v13989_v55 }
 0x408   :  { %6730 = vmatprep.subr.bf16.mxu1 %v13997_v29  ;;  %6692 = vmatpush1.bf16.msra.mxu0 %v13998_v49  ;;  %v14010_v49 = vld [vmem:[%s19551_s2 + $0x284] ss:$20 sps:$4 sm:$0xff]  }
 0x409   :  { %13643 = vmatprep.subr.bf16.mxu0 %v19877_v41 }
 0x40b   :  { %6731 = vmatpush1.bf16.msra.mxu1 %v13995_v28 }
 0x40c   :  { %6732 = vmatprep.subr.bf16.mxu1 %v14003_v36  ;;  %v14006_v36 = vld [vmem:[%s19551_s2 + $0x240] ss:$20 sps:$4 sm:$0xff]  }
 0x40f   :  { %6733 = vmatpush1.bf16.msra.mxu1 %v14001_v26 }
 0x410   :  { %13655 = vmatprep.subr.bf16.mxu1 %v19877_v41 }
 0x4c5   :  { %v6414_v27 = vpop.f32.mrb[16].mxu1  ;;  %v6455_v39 = vpop.f32.mrb[20].mxu0 }
 0x4c6   :  { %v18036_v53 = vadd.f32 %v6414_v27, %v17944_v38  ;;  %v18039_v46 = vadd.f32 %v6455_v39, %v17948_v35  ;;  %v6416_v42 = vpop.f32.mrb[17].mxu1  ;;  %v6457_v52 = vpop.f32.mrb[21].mxu0  ;;  %v14004_v38 = vld [vmem:[%s19551_s2 + $0x1f0] ss:$20 sps:$4 sm:$0xff]   ;;  %v18076_v27 = vld [vmem:[%s19549_s0 + $0x8] sm:$0xff]  }
 0x4c7   :  { %v18042_v43 = vadd.f32 %v6416_v42, %v17946_v40  ;;  %v18045_v51 = vadd.f32 %v6457_v52, %v17952_v44  ;;  %v6418_v31 = vpop.f32.mrb[18].mxu1  ;;  %v6459_v30 = vpop.f32.mrb[22].mxu0  ;;  %v18055_v40 = vld [vmem:[%s19549_s0] sm:$0xff]   ;;  %v14005_v44 = vld [vmem:[%s19551_s2 + $0x218] ss:$20 sps:$4 sm:$0xff]  }
 0x4c8   :  { %v6419_v55 = vpop.f32.mrb[19].mxu1  ;;  %v6460_v54 = vpop.f32.mrb[23].mxu0  ;;  %v12671_v39 = vld [vmem:[%s19550_s1 + $0x10] sm:$0x7]  ;;  %v14008_v42 = vld [vmem:[%s19551_s2 + $0x280] ss:$20 sps:$4 sm:$0xff]  }
 0x4c9   :  { %v14016_v30 = vld [vmem:[%s19551_s2 + $0x2ac] ss:$20 sps:$4 sm:$0xff]  }
 0x4cd   :  { %v6546_v50 = vpop.f32.mrb[24].mxu0 }
 0x4ce   :  { %v6552_v29 = vpack.c.bf16 %v6546_v50, %v6546_v50  ;;  %v13641_v35 = vpop.f32.mrb[25].mxu0  ;;  %v14007_v50 = vld [vmem:[%s19551_s2 + $0x268] ss:$20 sps:$4 sm:$0xff]  }
 0x4cf   :  { %v6549_v28 = vpop.f32.mrb[26].mxu0  ;;  %v14011_v35 = vld [vmem:[%s19551_s2 + $0x288] ss:$20 sps:$4 sm:$0xff]  }
 0x4d0   :  { %v13642_v37 = vpop.f32.mrb[27].mxu0  ;;  %12668 = vmatmul.mubr.msk.bf16.vlgmr.msra.gmra.mrb[28].mxu0 %vm5847_vm2, %v6552_v29  ;;  %12669 = vmatmul.mubr.msk.bf16.vlgmr.msra.gmra.mrb[24].mxu1 %vm5847_vm2, %v6552_v29  ;;  %v14019_v28 = vld [vmem:[%s19551_s2 + $0x2b4] ss:$20 sps:$4 sm:$0xff]  }
 0x4d1   :  { %13644 = vmatpush3.bf16.msra.mxu0 %v14004_v38  ;;  %13656 = vmatpush3.bf16.msra.mxu1 %v18055_v40  ;;  %v14013_v38 = vld [vmem:[%s19551_s2 + $0x28c] ss:$20 sps:$4 sm:$0xff]   ;;  %v14017_v37 = vld [vmem:[%s19551_s2 + $0x2b0] ss:$20 sps:$4 sm:$0xff]  }
 0x4d2   :  { %13645 = vmatprep.subr.bf16.mxu0 %v19877_v41  ;;  %13657 = vmatprep.subr.bf16.mxu1 %v19877_v41 }
 0x4d3   :  { %13659 = vmatprep.mubr.msk.bf16.mxu1 %vm14254_vm0, %v19877_v41  ;;  %13651 = vmatprep.mubr.msk.bf16.mxu0 %vm14254_vm0, %v19877_v41 }
 0x4d5   :  { %v6496_v26 = vpop.f32.mrb[20].mxu1  ;;  %13646 = vmatpush3.bf16.msra.mxu0 %v14005_v44  ;;  %13658 = vmatpush3.bf16.msra.mxu1 %v18076_v27  ;;  %v14022_v44 = vld [vmem:[%s19551_s2 + $0x2d4] ss:$20 sps:$4 sm:$0xff]  }
 0x4d6   :  { %v18086_v52 = vadd.f32 %v6496_v26, %v17950_v45  ;;  %v13633_v31 = vpop.f32.mrb[21].mxu1  ;;  %13647 = vmatprep.subr.bf16.mxu0 %v19877_v41  ;;  %6990 = vmatprep.subr.bf16.mxu1 %v14010_v49  ;;  %v14014_v45 = vld [vmem:[%s19551_s2 + $0x2a8] ss:$20 sps:$4 sm:$0xff]   ;;  %v14020_v49 = vld [vmem:[%s19551_s2 + $0x2d0] ss:$20 sps:$4 sm:$0xff]  }
 0x4d7   :  { %v6499_v55 = vpop.f32.mrb[22].mxu1  ;;  %v14028_v26 = vld [vmem:[%s19551_s2 + $0x2fc] ss:$20 sps:$4 sm:$0xff]   ;;  %v14029_v31 = vld [vmem:[%s19551_s2 + $0x300] ss:$20 sps:$4 sm:$0xff]  }
 0x4d8   :  { %v13634_v54 = vpop.f32.mrb[23].mxu1  ;;  %13660 = vmatmul.mubr.msk.bf16.vlgmr.msra.gmra.mrb[28].mxu1 %vm5603_vm1, %v12671_v39  ;;  %v14026_v39 = vld [vmem:[%s19551_s2 + $0x2f8] ss:$20 sps:$4 sm:$0xff]  }
 0x4d9   :  { %13648 = vmatpush3.bf16.msra.mxu0 %v14006_v36  ;;  %6991 = vmatpush1.bf16.msra.mxu1 %v14008_v42  ;;  %v14023_v36 = vld [vmem:[%s19551_s2 + $0x2d8] ss:$20 sps:$4 sm:$0xff]  }
 0x4da   :  { %13649 = vmatprep.subr.bf16.mxu0 %v19877_v41  ;;  %6992 = vmatprep.subr.bf16.mxu1 %v14016_v30  ;;  %v14031_v42 = vld [vmem:[%s19551_s2 + $0x304] ss:$20 sps:$4 sm:$0xff]  }
 0x4db   :  { %7022 = vmatprep.mubr.bf16.mxu1 %v19878_v47 }
 0x4dd   :  { %13650 = vmatpush3.bf16.msra.mxu0 %v14007_v50  ;;  %6993 = vmatpush1.bf16.msra.mxu1 %v14014_v45 }
 0x4de   :  { %7031 = vmatprep.subr.bf16.mxu0 %v14013_v38  ;;  %6994 = vmatprep.subr.bf16.mxu1 %v14022_v44 }
 0x4e0   :  { %13652 = vmatmul.mubr.msk.bf16.vlgmr.msra.gmra.mrb[32].mxu0 %vm5847_vm2, %v6552_v29  ;;  %v14025_v29 = vld [vmem:[%s19551_s2 + $0x2dc] ss:$20 sps:$4 sm:$0xff]  }
 0x4e1   :  { %7032 = vmatpush1.bf16.msra.mxu0 %v14011_v35  ;;  %7063 = vmatprep.mubr.bf16.mxu0 %v19878_v47 }
 0x4e2   :  { %7033 = vmatprep.subr.bf16.mxu0 %v14019_v28  ;;  %6995 = vmatpush1.bf16.msra.mxu1 %v14020_v49 }
 0x4e3   :  { %6996 = vmatprep.subr.bf16.mxu1 %v14028_v26 }
 0x4e5   :  { %7034 = vmatpush1.bf16.msra.mxu0 %v14017_v37 }
 0x4e6   :  { %7035 = vmatprep.subr.bf16.mxu0 %v14025_v29  ;;  %6997 = vmatpush1.bf16.msra.mxu1 %v14026_v39 }
 0x4e7   :  { %13663 = vmatprep.subr.bf16.mxu1 %v19877_v41 }
 0x4e9   :  { %7036 = vmatpush1.bf16.msra.mxu0 %v14023_v36 }
 0x4ea   :  { %7037 = vmatprep.subr.bf16.mxu0 %v14031_v42 }
 0x4ed   :  { %7038 = vmatpush1.bf16.msra.mxu0 %v14029_v31  ;;  %v14034_v31 = vld [vmem:[%s19551_s2 + $0x2e0] ss:$20 sps:$4 sm:$0xff]  }
 0x4ee   :  { %13675 = vmatprep.subr.bf16.mxu0 %v19877_v41 }
 0x5a3   :  { %v6719_v30 = vpop.f32.mrb[28].mxu0  ;;  %v6760_v55 = vpop.f32.mrb[24].mxu1 }
 0x5a4   :  { %v18142_v54 = vadd.f32 %v6719_v30, %v18036_v53  ;;  %v18145_v50 = vadd.f32 %v6760_v55, %v18039_v46  ;;  %v6721_v45 = vpop.f32.mrb[29].mxu0  ;;  %v6762_v38 = vpop.f32.mrb[25].mxu1  ;;  %v14032_v53 = vld [vmem:[%s19551_s2 + $0x290] ss:$20 sps:$4 sm:$0xff]   ;;  %v12720_v55 = vld [vmem:[%s19550_s1 + $0x14] sm:$0x7] }
 0x5a5   :  { %v18148_v35 = vadd.f32 %v6721_v45, %v18042_v43  ;;  %v18151_v28 = vadd.f32 %v6762_v38, %v18045_v51  ;;  %v6723_v37 = vpop.f32.mrb[30].mxu0  ;;  %v6764_v44 = vpop.f32.mrb[26].mxu1  ;;  %v14033_v43 = vld [vmem:[%s19551_s2 + $0x2b8] ss:$20 sps:$4 sm:$0xff]   ;;  %v14036_v45 = vld [vmem:[%s19551_s2 + $0x320] ss:$20 sps:$4 sm:$0xff]  }
 0x5a6   :  { %v6724_v49 = vpop.f32.mrb[31].mxu0  ;;  %v6765_v29 = vpop.f32.mrb[27].mxu1  ;;  %v14038_v51 = vld [vmem:[%s19551_s2 + $0x324] ss:$20 sps:$4 sm:$0xff]   ;;  %v14044_v44 = vld [vmem:[%s19551_s2 + $0x34c] ss:$20 sps:$4 sm:$0xff]  }
 0x5ab   :  { %v6851_v36 = vpop.f32.mrb[28].mxu1 }
 0x5ac   :  { %v6857_v26 = vpack.c.bf16 %v6851_v36, %v6851_v36  ;;  %v13661_v46 = vpop.f32.mrb[29].mxu1  ;;  %v14035_v36 = vld [vmem:[%s19551_s2 + $0x308] ss:$20 sps:$4 sm:$0xff]  }
 0x5ad   :  { %v6854_v39 = vpop.f32.mrb[30].mxu1  ;;  %v14039_v46 = vld [vmem:[%s19551_s2 + $0x328] ss:$20 sps:$4 sm:$0xff]  }
 0x5ae   :  { %v13662_v42 = vpop.f32.mrb[31].mxu1  ;;  %12717 = vmatmul.mubr.msk.bf16.vlgmr.msra.gmra.mrb[32].mxu1 %vm5847_vm2, %v6857_v26  ;;  %12718 = vmatmul.mubr.msk.bf16.vlgmr.msra.gmra.mrb[36].mxu0 %vm5847_vm2, %v6857_v26  ;;  %v14047_v39 = vld [vmem:[%s19551_s2 + $0x354] ss:$20 sps:$4 sm:$0xff]  }
 0x5af   :  { %13664 = vmatpush3.bf16.msra.mxu1 %v14032_v53  ;;  %13676 = vmatpush3.bf16.msra.mxu0 %v18055_v40  ;;  %v14041_v53 = vld [vmem:[%s19551_s2 + $0x32c] ss:$20 sps:$4 sm:$0xff]   ;;  %v14045_v42 = vld [vmem:[%s19551_s2 + $0x350] ss:$20 sps:$4 sm:$0xff]  }
 0x5b0   :  { %13665 = vmatprep.subr.bf16.mxu1 %v19877_v41  ;;  %13677 = vmatprep.subr.bf16.mxu0 %v19877_v41 }
 0x5b1   :  { %13679 = vmatprep.mubr.msk.bf16.mxu0 %vm14254_vm0, %v19877_v41  ;;  %13671 = vmatprep.mubr.msk.bf16.mxu1 %vm14254_vm0, %v19877_v41 }
 0x5b3   :  { %v6801_v30 = vpop.f32.mrb[32].mxu0  ;;  %13666 = vmatpush3.bf16.msra.mxu1 %v14033_v43  ;;  %13678 = vmatpush3.bf16.msra.mxu0 %v18076_v27  ;;  %v14050_v43 = vld [vmem:[%s19551_s2 + $0x374] ss:$20 sps:$4 sm:$0xff]  }
 0x5b4   :  { %v18182_v38 = vadd.f32 %v6801_v30, %v18086_v52  ;;  %v13653_v37 = vpop.f32.mrb[33].mxu0  ;;  %13667 = vmatprep.subr.bf16.mxu1 %v19877_v41  ;;  %7295 = vmatprep.subr.bf16.mxu0 %v14038_v51  ;;  %v14042_v52 = vld [vmem:[%s19551_s2 + $0x348] ss:$20 sps:$4 sm:$0xff]   ;;  %v14048_v51 = vld [vmem:[%s19551_s2 + $0x370] ss:$20 sps:$4 sm:$0xff]  }
 0x5b5   :  { %v6804_v49 = vpop.f32.mrb[34].mxu0  ;;  %v14056_v30 = vld [vmem:[%s19551_s2 + $0x39c] ss:$20 sps:$4 sm:$0xff]   ;;  %v14057_v37 = vld [vmem:[%s19551_s2 + $0x3a0] ss:$20 sps:$4 sm:$0xff]  }
 0x5b6   :  { %v13654_v29 = vpop.f32.mrb[35].mxu0  ;;  %13680 = vmatmul.mubr.msk.bf16.vlgmr.msra.gmra.mrb[40].mxu0 %vm5603_vm1, %v12720_v55  ;;  %v14054_v55 = vld [vmem:[%s19551_s2 + $0x398] ss:$20 sps:$4 sm:$0xff]  }
 0x5b7   :  { %13668 = vmatpush3.bf16.msra.mxu1 %v14034_v31  ;;  %7296 = vmatpush1.bf16.msra.mxu0 %v14036_v45  ;;  %v14051_v31 = vld [vmem:[%s19551_s2 + $0x378] ss:$20 sps:$4 sm:$0xff]  }
 0x5b8   :  { %13669 = vmatprep.subr.bf16.mxu1 %v19877_v41  ;;  %7297 = vmatprep.subr.bf16.mxu0 %v14044_v44  ;;  %v14059_v45 = vld [vmem:[%s19551_s2 + $0x3a4] ss:$20 sps:$4 sm:$0xff]  }
 0x5b9   :  { %7327 = vmatprep.mubr.bf16.mxu0 %v19878_v47 }
 0x5bb   :  { %13670 = vmatpush3.bf16.msra.mxu1 %v14035_v36  ;;  %7298 = vmatpush1.bf16.msra.mxu0 %v14042_v52 }
 0x5bc   :  { %7336 = vmatprep.subr.bf16.mxu1 %v14041_v53  ;;  %7299 = vmatprep.subr.bf16.mxu0 %v14050_v43 }
 0x5be   :  { %13672 = vmatmul.mubr.msk.bf16.vlgmr.msra.gmra.mrb[36].mxu1 %vm5847_vm2, %v6857_v26  ;;  %v14053_v26 = vld [vmem:[%s19551_s2 + $0x37c] ss:$20 sps:$4 sm:$0xff]  }
 0x5bf   :  { %7337 = vmatpush1.bf16.msra.mxu1 %v14039_v46  ;;  %7368 = vmatprep.mubr.bf16.mxu1 %v19878_v47 }
 0x5c0   :  { %7338 = vmatprep.subr.bf16.mxu1 %v14047_v39  ;;  %7300 = vmatpush1.bf16.msra.mxu0 %v14048_v51 }
 0x5c1   :  { %7301 = vmatprep.subr.bf16.mxu0 %v14056_v30 }
 0x5c3   :  { %7339 = vmatpush1.bf16.msra.mxu1 %v14045_v42 }
 0x5c4   :  { %7340 = vmatprep.subr.bf16.mxu1 %v14053_v26  ;;  %7302 = vmatpush1.bf16.msra.mxu0 %v14054_v55 }
 0x5c5   :  { %13683 = vmatprep.subr.bf16.mxu0 %v19877_v41 }
 0x5c7   :  { %7341 = vmatpush1.bf16.msra.mxu1 %v14051_v31 }
 0x5c8   :  { %7342 = vmatprep.subr.bf16.mxu1 %v14059_v45 }
 0x5cb   :  { %7343 = vmatpush1.bf16.msra.mxu1 %v14057_v37  ;;  %v14062_v37 = vld [vmem:[%s19551_s2 + $0x380] ss:$20 sps:$4 sm:$0xff]  }
 0x5cc   :  { %13695 = vmatprep.subr.bf16.mxu1 %v19877_v41 }
 0x681   :  { %v7024_v44 = vpop.f32.mrb[32].mxu1  ;;  %v7065_v49 = vpop.f32.mrb[36].mxu0 }
 0x682   :  { %v18238_v29 = vadd.f32 %v7024_v44, %v18142_v54  ;;  %v18241_v36 = vadd.f32 %v7065_v49, %v18145_v50  ;;  %v7026_v52 = vpop.f32.mrb[33].mxu1  ;;  %v7067_v53 = vpop.f32.mrb[37].mxu0  ;;  %v14060_v54 = vld [vmem:[%s19551_s2 + $0x330] ss:$20 sps:$4 sm:$0xff]   ;;  %v12769_v49 = vld [vmem:[%s19550_s1 + $0x18] sm:$0x7] }
 0x683   :  { %v18244_v46 = vadd.f32 %v7026_v52, %v18148_v35  ;;  %v18247_v39 = vadd.f32 %v7067_v53, %v18151_v28  ;;  %v7028_v42 = vpop.f32.mrb[34].mxu1  ;;  %v7069_v43 = vpop.f32.mrb[38].mxu0  ;;  %v14061_v35 = vld [vmem:[%s19551_s2 + $0x358] ss:$20 sps:$4 sm:$0xff]   ;;  %v14064_v52 = vld [vmem:[%s19551_s2 + $0x3c0] ss:$20 sps:$4 sm:$0xff]  }
 0x684   :  { %v7029_v51 = vpop.f32.mrb[35].mxu1  ;;  %v7070_v26 = vpop.f32.mrb[39].mxu0  ;;  %v14066_v28 = vld [vmem:[%s19551_s2 + $0x3c4] ss:$20 sps:$4 sm:$0xff]   ;;  %v14072_v43 = vld [vmem:[%s19551_s2 + $0x3ec] ss:$20 sps:$4 sm:$0xff]  }
 0x689   :  { %v7156_v31 = vpop.f32.mrb[40].mxu0 }
 0x68a   :  { %v7162_v30 = vpack.c.bf16 %v7156_v31, %v7156_v31  ;;  %v13681_v50 = vpop.f32.mrb[41].mxu0  ;;  %v14063_v31 = vld [vmem:[%s19551_s2 + $0x3a8] ss:$20 sps:$4 sm:$0xff]  }
 0x68b   :  { %v7159_v55 = vpop.f32.mrb[42].mxu0  ;;  %v14067_v50 = vld [vmem:[%s19551_s2 + $0x3c8] ss:$20 sps:$4 sm:$0xff]  }
 0x68c   :  { %v13682_v45 = vpop.f32.mrb[43].mxu0  ;;  %12766 = vmatmul.mubr.msk.bf16.vlgmr.msra.gmra.mrb[44].mxu0 %vm5847_vm2, %v7162_v30  ;;  %12767 = vmatmul.mubr.msk.bf16.vlgmr.msra.gmra.mrb[40].mxu1 %vm5847_vm2, %v7162_v30  ;;  %v14075_v55 = vld [vmem:[%s19551_s2 + $0x3f4] ss:$20 sps:$4 sm:$0xff]  }
 0x68d   :  { %13684 = vmatpush3.bf16.msra.mxu0 %v14060_v54  ;;  %13696 = vmatpush3.bf16.msra.mxu1 %v18055_v40  ;;  %v14069_v54 = vld [vmem:[%s19551_s2 + $0x3cc] ss:$20 sps:$4 sm:$0xff]   ;;  %v14073_v45 = vld [vmem:[%s19551_s2 + $0x3f0] ss:$20 sps:$4 sm:$0xff]  }
 0x68e   :  { %13685 = vmatprep.subr.bf16.mxu0 %v19877_v41  ;;  %13697 = vmatprep.subr.bf16.mxu1 %v19877_v41 }
 0x68f   :  { %13699 = vmatprep.mubr.msk.bf16.mxu1 %vm14254_vm0, %v19877_v41  ;;  %13691 = vmatprep.mubr.msk.bf16.mxu0 %vm14254_vm0, %v19877_v41 }
 0x691   :  { %v7106_v44 = vpop.f32.mrb[36].mxu1  ;;  %13686 = vmatpush3.bf16.msra.mxu0 %v14061_v35  ;;  %13698 = vmatpush3.bf16.msra.mxu1 %v18076_v27  ;;  %v14078_v35 = vld [vmem:[%s19551_s2 + $0x414] ss:$20 sps:$4 sm:$0xff]  }
 0x692   :  { %v18278_v53 = vadd.f32 %v7106_v44, %v18182_v38  ;;  %v13673_v42 = vpop.f32.mrb[37].mxu1  ;;  %13687 = vmatprep.subr.bf16.mxu0 %v19877_v41  ;;  %7600 = vmatprep.subr.bf16.mxu1 %v14066_v28  ;;  %v14070_v38 = vld [vmem:[%s19551_s2 + $0x3e8] ss:$20 sps:$4 sm:$0xff]   ;;  %v14076_v28 = vld [vmem:[%s19551_s2 + $0x410] ss:$20 sps:$4 sm:$0xff]  }
 0x693   :  { %v7109_v51 = vpop.f32.mrb[38].mxu1  ;;  %v14084_v44 = vld [vmem:[%s19551_s2 + $0x43c] ss:$20 sps:$4 sm:$0xff]   ;;  %v14085_v42 = vld [vmem:[%s19551_s2 + $0x440] ss:$20 sps:$4 sm:$0xff]  }
 0x694   :  { %v13674_v26 = vpop.f32.mrb[39].mxu1  ;;  %13700 = vmatmul.mubr.msk.bf16.vlgmr.msra.gmra.mrb[44].mxu1 %vm5603_vm1, %v12769_v49  ;;  %v14082_v49 = vld [vmem:[%s19551_s2 + $0x438] ss:$20 sps:$4 sm:$0xff]  }
 0x695   :  { %13688 = vmatpush3.bf16.msra.mxu0 %v14062_v37  ;;  %7601 = vmatpush1.bf16.msra.mxu1 %v14064_v52  ;;  %v14079_v37 = vld [vmem:[%s19551_s2 + $0x418] ss:$20 sps:$4 sm:$0xff]  }
 0x696   :  { %13689 = vmatprep.subr.bf16.mxu0 %v19877_v41  ;;  %7602 = vmatprep.subr.bf16.mxu1 %v14072_v43  ;;  %v14087_v52 = vld [vmem:[%s19551_s2 + $0x444] ss:$20 sps:$4 sm:$0xff]  }
 0x697   :  { %7632 = vmatprep.mubr.bf16.mxu1 %v19878_v47 }
 0x699   :  { %13690 = vmatpush3.bf16.msra.mxu0 %v14063_v31  ;;  %7603 = vmatpush1.bf16.msra.mxu1 %v14070_v38 }
 0x69a   :  { %7641 = vmatprep.subr.bf16.mxu0 %v14069_v54  ;;  %7604 = vmatprep.subr.bf16.mxu1 %v14078_v35 }
 0x69c   :  { %13692 = vmatmul.mubr.msk.bf16.vlgmr.msra.gmra.mrb[48].mxu0 %vm5847_vm2, %v7162_v30  ;;  %v14081_v30 = vld [vmem:[%s19551_s2 + $0x41c] ss:$20 sps:$4 sm:$0xff]  }
 0x69d   :  { %7642 = vmatpush1.bf16.msra.mxu0 %v14067_v50  ;;  %7673 = vmatprep.mubr.bf16.mxu0 %v19878_v47 }
 0x69e   :  { %7643 = vmatprep.subr.bf16.mxu0 %v14075_v55  ;;  %7605 = vmatpush1.bf16.msra.mxu1 %v14076_v28 }
 0x69f   :  { %7606 = vmatprep.subr.bf16.mxu1 %v14084_v44 }
 0x6a1   :  { %7644 = vmatpush1.bf16.msra.mxu0 %v14073_v45 }
 0x6a2   :  { %7645 = vmatprep.subr.bf16.mxu0 %v14081_v30  ;;  %7607 = vmatpush1.bf16.msra.mxu1 %v14082_v49 }
 0x6a3   :  { %13703 = vmatprep.subr.bf16.mxu1 %v19877_v41 }
 0x6a5   :  { %7646 = vmatpush1.bf16.msra.mxu0 %v14079_v37 }
 0x6a6   :  { %7647 = vmatprep.subr.bf16.mxu0 %v14087_v52 }
 0x6a9   :  { %7648 = vmatpush1.bf16.msra.mxu0 %v14085_v42 }
 0x6aa   :  { %13715 = vmatprep.subr.bf16.mxu0 %v19877_v41 }
 0x75f   :  { %v7329_v43 = vpop.f32.mrb[44].mxu0  ;;  %v7370_v51 = vpop.f32.mrb[40].mxu1 }
 0x760   :  { %v18334_v26 = vadd.f32 %v7329_v43, %v18238_v29  ;;  %v18337_v31 = vadd.f32 %v7370_v51, %v18241_v36  ;;  %v7331_v38 = vpop.f32.mrb[45].mxu0  ;;  %v7372_v54 = vpop.f32.mrb[41].mxu1  ;;  %v14088_v29 = vld [vmem:[%s19551_s2 + $0x3d0] ss:$20 sps:$4 sm:$0xff]   ;;  %v12818_v43 = vld [vmem:[%s19550_s1 + $0x1c] sm:$0x7] }
 0x761   :  { %v18340_v50 = vadd.f32 %v7331_v38, %v18244_v46  ;;  %v18343_v55 = vadd.f32 %v7372_v54, %v18247_v39  ;;  %v7333_v45 = vpop.f32.mrb[46].mxu0  ;;  %v7374_v35 = vpop.f32.mrb[42].mxu1  ;;  %v14089_v46 = vld [vmem:[%s19551_s2 + $0x3f8] ss:$20 sps:$4 sm:$0xff]   ;;  %v14092_v51 = vld [vmem:[%s19551_s2 + $0x460] ss:$20 sps:$4 sm:$0xff]  }
 0x762   :  { %v7334_v28 = vpop.f32.mrb[47].mxu0  ;;  %v7375_v30 = vpop.f32.mrb[43].mxu1  ;;  %v14094_v39 = vld [vmem:[%s19551_s2 + $0x464] ss:$20 sps:$4 sm:$0xff]   ;;  %v14100_v45 = vld [vmem:[%s19551_s2 + $0x48c] ss:$20 sps:$4 sm:$0xff]  }
 0x763   :  { %v14091_v28 = vld [vmem:[%s19551_s2 + $0x448] ss:$20 sps:$4 sm:$0xff]   ;;  %v14097_v30 = vld [vmem:[%s19551_s2 + $0x46c] ss:$20 sps:$4 sm:$0xff]  }
 0x767   :  { %v7461_v37 = vpop.f32.mrb[44].mxu1 }
 0x768   :  { %v7467_v44 = vpack.c.bf16 %v7461_v37, %v7461_v37  ;;  %v13701_v36 = vpop.f32.mrb[45].mxu1  ;;  %v14095_v37 = vld [vmem:[%s19551_s2 + $0x468] ss:$20 sps:$4 sm:$0xff]  }
 0x769   :  { %v7464_v49 = vpop.f32.mrb[46].mxu1  ;;  %v14101_v36 = vld [vmem:[%s19551_s2 + $0x490] ss:$20 sps:$4 sm:$0xff]  }
 0x76a   :  { %v13702_v52 = vpop.f32.mrb[47].mxu1  ;;  %12815 = vmatmul.mubr.msk.bf16.vlgmr.msra.gmra.mrb[48].mxu1 %vm5847_vm2, %v7467_v44  ;;  %12816 = vmatmul.mubr.msk.bf16.vlgmr.msra.gmra.mrb[52].mxu0 %vm5847_vm2, %v7467_v44  ;;  %v14106_v49 = vld [vmem:[%s19551_s2 + $0x4b4] ss:$20 sps:$4 sm:$0xff]  }
 0x76b   :  { %13704 = vmatpush3.bf16.msra.mxu1 %v14088_v29  ;;  %13716 = vmatpush3.bf16.msra.mxu0 %v18055_v40  ;;  %v14090_v40 = vld [vmem:[%s19551_s2 + $0x420] ss:$20 sps:$4 sm:$0xff]   ;;  %v14104_v52 = vld [vmem:[%s19551_s2 + $0x4b0] ss:$20 sps:$4 sm:$0xff]  }
 0x76c   :  { %13705 = vmatprep.subr.bf16.mxu1 %v19877_v41  ;;  %13717 = vmatprep.subr.bf16.mxu0 %v19877_v41  ;;  %v14103_v29 = vld [vmem:[%s19551_s2 + $0x494] ss:$20 sps:$4 sm:$0xff]  }
 0x76d   :  { %13719 = vmatprep.mubr.msk.bf16.mxu0 %vm14254_vm0, %v19877_v41  ;;  %13711 = vmatprep.mubr.msk.bf16.mxu1 %vm14254_vm0, %v19877_v41 }
 0x76f   :  { %v7411_v42 = vpop.f32.mrb[48].mxu0  ;;  %13706 = vmatpush3.bf16.msra.mxu1 %v14089_v46  ;;  %13718 = vmatpush3.bf16.msra.mxu0 %v18076_v27  ;;  %v14107_v46 = vld [vmem:[%s19551_s2 + $0x4b8] ss:$20 sps:$4 sm:$0xff]  }
 0x770   :  { %v18374_v38 = vadd.f32 %v7411_v42, %v18278_v53  ;;  %v13693_v54 = vpop.f32.mrb[49].mxu0  ;;  %13707 = vmatprep.subr.bf16.mxu1 %v19877_v41  ;;  %7905 = vmatprep.subr.bf16.mxu0 %v14094_v39  ;;  %v14098_v53 = vld [vmem:[%s19551_s2 + $0x488] ss:$20 sps:$4 sm:$0xff]   ;;  %v14115_v42 = vld [vmem:[%s19551_s2 + $0x4e4] ss:$20 sps:$4 sm:$0xff]  }
 0x771   :  { %v7414_v27 = vpop.f32.mrb[50].mxu0  ;;  %v14112_v39 = vld [vmem:[%s19551_s2 + $0x4dc] ss:$20 sps:$4 sm:$0xff]  }
 0x772   :  { %v13694_v35 = vpop.f32.mrb[51].mxu0  ;;  %13720 = vmatmul.mubr.msk.bf16.vlgmr.msra.gmra.mrb[56].mxu0 %vm5603_vm1, %v12818_v43  ;;  %v14113_v43 = vld [vmem:[%s19551_s2 + $0x4e0] ss:$20 sps:$4 sm:$0xff]  }
 0x773   :  { %13708 = vmatpush3.bf16.msra.mxu1 %v14090_v40  ;;  %7906 = vmatpush1.bf16.msra.mxu0 %v14092_v51  ;;  %v14110_v40 = vld [vmem:[%s19551_s2 + $0x4d8] ss:$20 sps:$4 sm:$0xff]  }
 0x774   :  { %13709 = vmatprep.subr.bf16.mxu1 %v19877_v41  ;;  %7907 = vmatprep.subr.bf16.mxu0 %v14100_v45  ;;  %v14122_v51 = vld [vmem:[%s19553_s4 + $0x4] ss:$8 sps:$4 sm:$0xff]  }
 0x775   :  { %7937 = vmatprep.mubr.bf16.mxu0 %v19878_v47 }
 0x777   :  { %13710 = vmatpush3.bf16.msra.mxu1 %v14091_v28  ;;  %7908 = vmatpush1.bf16.msra.mxu0 %v14098_v53 }
 0x778   :  { %7946 = vmatprep.subr.bf16.mxu1 %v14097_v30  ;;  %7909 = vmatprep.subr.bf16.mxu0 %v14106_v49 }
 0x77a   :  { %13712 = vmatmul.mubr.msk.bf16.vlgmr.msra.gmra.mrb[52].mxu1 %vm5847_vm2, %v7467_v44  ;;  %v14109_v44 = vld [vmem:[%s19551_s2 + $0x4bc] ss:$20 sps:$4 sm:$0xff]  }
 0x77b   :  { %7947 = vmatpush1.bf16.msra.mxu1 %v14095_v37  ;;  %7978 = vmatprep.mubr.bf16.mxu1 %v19878_v47 }
 0x77c   :  { %7948 = vmatprep.subr.bf16.mxu1 %v14103_v29  ;;  %7910 = vmatpush1.bf16.msra.mxu0 %v14104_v52 }
 0x77d   :  { %7911 = vmatprep.subr.bf16.mxu0 %v14112_v39  ;;  %v14120_v39 = vld [vmem:[%s19553_s4] ss:$8 sps:$4 sm:$0xff]  }
 0x77f   :  { %7949 = vmatpush1.bf16.msra.mxu1 %v14101_v36 }
 0x780   :  { %7950 = vmatprep.subr.bf16.mxu1 %v14109_v44  ;;  %7912 = vmatpush1.bf16.msra.mxu0 %v14110_v40 }
 0x781   :  { %13723 = vmatprep.subr.bf16.mxu0 %v19877_v41 }
 0x783   :  { %7951 = vmatpush1.bf16.msra.mxu1 %v14107_v46 }
 0x784   :  { %7952 = vmatprep.subr.bf16.mxu1 %v14115_v42  ;;  %v14117_v42 = vld [vmem:[%s19551_s2 + $0x498] ss:$20 sps:$4 sm:$0xff]  }
 0x787   :  { %7953 = vmatpush1.bf16.msra.mxu1 %v14113_v43  ;;  %v14123_v43 = vld [vmem:[%s19553_s4 + $0x10] ss:$8 sps:$4 sm:$0xff]  }
 0x788   :  { %8521 = vmatprep.subr.bf16.mxu1 %v14122_v51  ;;  %v14128_v51 = vld [vmem:[%s19553_s4 + $0x24] ss:$8 sps:$4 sm:$0xff]  }
 0x83d   :  { %v7634_v54 = vpop.f32.mrb[48].mxu1  ;;  %v7675_v45 = vpop.f32.mrb[52].mxu0 }
 0x83e   :  { %v18432_v27 = vadd.f32 %v7634_v54, %v18334_v26  ;;  %v18435_v35 = vadd.f32 %v7675_v45, %v18337_v31  ;;  %v7636_v28 = vpop.f32.mrb[49].mxu1  ;;  %v7677_v53 = vpop.f32.mrb[53].mxu0  ;;  %v14116_v26 = vld [vmem:[%s19551_s2 + $0x470] ss:$20 sps:$4 sm:$0xff]   ;;  %v14118_v45 = vld [vmem:[%s19551_s2 + $0x4c0] ss:$20 sps:$4 sm:$0xff]  }
 0x83f   :  { %v18438_v30 = vadd.f32 %v7636_v28, %v18340_v50  ;;  %v18441_v37 = vadd.f32 %v7677_v53, %v18343_v55  ;;  %v7638_v29 = vpop.f32.mrb[50].mxu1  ;;  %v7679_v36 = vpop.f32.mrb[54].mxu0  ;;  %v14125_v55 = vld [vmem:[%s19553_s4 + $0x14] ss:$8 sps:$4 sm:$0xff]  }
 0x840   :  { %v7639_v49 = vpop.f32.mrb[51].mxu1  ;;  %v7680_v52 = vpop.f32.mrb[55].mxu0  ;;  %v14126_v29 = vld [vmem:[%s19553_s4 + $0x20] ss:$8 sps:$4 sm:$0xff]  }
 0x841   :  { %v14131_v49 = vld [vmem:[%s19553_s4 + $0x34] ss:$8 sps:$4 sm:$0xff]  }
 0x845   :  { %v7766_v44 = vpop.f32.mrb[56].mxu0 }
 0x846   :  { %v7772_v46 = vpack.c.bf16 %v7766_v44, %v7766_v44  ;;  %v13721_v31 = vpop.f32.mrb[57].mxu0  ;;  %v14129_v44 = vld [vmem:[%s19553_s4 + $0x30] ss:$8 sps:$4 sm:$0xff]  }
 0x847   :  { %v7769_v50 = vpop.f32.mrb[58].mxu0  ;;  %v14132_v31 = vld [vmem:[%s19553_s4 + $0x40] ss:$8 sps:$4 sm:$0xff]  }
 0x848   :  { %v13722_v40 = vpop.f32.mrb[59].mxu0  ;;  %12864 = vmatmul.mubr.msk.bf16.vlgmr.msra.gmra.mrb[60].mxu0 %vm5847_vm2, %v7772_v46  ;;  %12865 = vmatmul.mubr.msk.bf16.vlgmr.msra.gmra.mrb[56].mxu1 %vm5847_vm2, %v7772_v46  ;;  %v14135_v50 = vld [vmem:[%s19553_s4 + $0x50] ss:$8 sps:$4 sm:$0xff]  }
 0x849   :  { %13724 = vmatpush3.bf16.msra.mxu0 %v14116_v26  ;;  %13731 = vmatprep.mubr.msk.bf16.mxu0 %vm14254_vm0, %v19877_v41  ;;  %v14134_v26 = vld [vmem:[%s19553_s4 + $0x44] ss:$8 sps:$4 sm:$0xff]   ;;  %v14138_v40 = vld [vmem:[%s19553_s4 + $0x60] ss:$8 sps:$4 sm:$0xff]  }
 0x84a   :  { %13725 = vmatprep.subr.bf16.mxu0 %v19877_v41  ;;  %8522 = vmatpush1.bf16.msra.mxu1 %v14120_v39  ;;  %v14137_v39 = vld [vmem:[%s19553_s4 + $0x54] ss:$8 sps:$4 sm:$0xff]  }
 0x84b   :  { %8523 = vmatprep.subr.bf16.mxu1 %v14125_v55  ;;  %v14140_v55 = vld [vmem:[%s19553_s4 + $0x64] ss:$8 sps:$4 sm:$0xff]  }
 0x84d   :  { %v7716_v54 = vpop.f32.mrb[52].mxu1  ;;  %13726 = vmatpush3.bf16.msra.mxu0 %v14117_v42  ;;  %v14141_v42 = vld [vmem:[%s19553_s4 + $0x70] ss:$8 sps:$4 sm:$0xff]  }
 0x84e   :  { %v18470_v28 = vadd.f32 %v7716_v54, %v18374_v38  ;;  %v13713_v53 = vpop.f32.mrb[53].mxu1  ;;  %13727 = vmatprep.subr.bf16.mxu0 %v19877_v41  ;;  %8524 = vmatpush1.bf16.msra.mxu1 %v14123_v43  ;;  %v14119_v38 = vld [vmem:[%s19551_s2 + $0x4e8] ss:$20 sps:$4 sm:$0xff]   ;;  %v14146_v43 = vld [vmem:[%s19553_s4 + $0x84] ss:$8 sps:$4 sm:$0xff]  }
 0x84f   :  { %v7719_v36 = vpop.f32.mrb[54].mxu1  ;;  %8525 = vmatprep.subr.bf16.mxu1 %v14128_v51  ;;  %v14144_v51 = vld [vmem:[%s19553_s4 + $0x80] ss:$8 sps:$4 sm:$0xff]   ;;  %v14149_v54 = vld [vmem:[%s19553_s4 + $0x94] ss:$8 sps:$4 sm:$0xff]  }
 0x850   :  { %v13714_v52 = vpop.f32.mrb[55].mxu1  ;;  %v14152_v53 = vld [vmem:[%s19553_s4 + $0xa4] ss:$8 sps:$4 sm:$0xff]   ;;  %v14155_v36 = vld [vmem:[%s19553_s4 + $0xb4] ss:$8 sps:$4 sm:$0xff]  }
 0x851   :  { %13728 = vmatpush3.bf16.msra.mxu0 %v14118_v45  ;;  %v14147_v45 = vld [vmem:[%s19553_s4 + $0x90] ss:$8 sps:$4 sm:$0xff]   ;;  %v14158_v52 = vld [vmem:[%s19553_s4 + $0xc4] ss:$8 sps:$4 sm:$0xff]  }
 0x852   :  { %13729 = vmatprep.subr.bf16.mxu0 %v19877_v41  ;;  %8526 = vmatpush1.bf16.msra.mxu1 %v14126_v29  ;;  %v14150_v29 = vld [vmem:[%s19553_s4 + $0xa0] ss:$8 sps:$4 sm:$0xff]  }
 0x853   :  { %8527 = vmatprep.subr.bf16.mxu1 %v14131_v49  ;;  %v14153_v49 = vld [vmem:[%s19553_s4 + $0xb0] ss:$8 sps:$4 sm:$0xff]  }
 0x855   :  { %13730 = vmatpush3.bf16.msra.mxu0 %v14119_v38  ;;  %v14156_v38 = vld [vmem:[%s19553_s4 + $0xc0] ss:$8 sps:$4 sm:$0xff]  }
 0x856   :  { %8528 = vmatpush1.bf16.msra.mxu1 %v14129_v44  ;;  %v14161_v44 = vld [vmem:[%s19553_s4 + $0xd4] ss:$8 sps:$4 sm:$0xff]  }
 0x857   :  { %8529 = vmatprep.subr.bf16.mxu1 %v14134_v26  ;;  %v14159_v26 = vld [vmem:[%s19553_s4 + $0xd0] ss:$8 sps:$4 sm:$0xff]  }
 0x858   :  { %13732 = vmatmul.mubr.msk.bf16.vlgmr.msra.gmra.mrb[64].mxu0 %vm5847_vm2, %v7772_v46  ;;  %v14143_v46 = vld [vmem:[%s19553_s4 + $0x74] ss:$8 sps:$4 sm:$0xff]  }
 0x85a   :  { %8530 = vmatpush1.bf16.msra.mxu1 %v14132_v31  ;;  %v8034_v31 = vlaneseq }
 0x85b   :  { %8531 = vmatprep.subr.bf16.mxu1 %v14137_v39 }
 0x85c   :  { %v18547_v39 = vshrl.u32 %v8034_v31, 7 }
 0x85e   :  { %8532 = vmatpush1.bf16.msra.mxu1 %v14135_v50  ;;  %19879 = vst [vmem:[#allocation313_spill] sm:$0xff] %v18547_v39  ;;  %v18550_v50 = vsub.s32 2, %v18547_v39 }
 0x85f   :  { %8533 = vmatprep.subr.bf16.mxu1 %v14140_v55  ;;  %v8032_v55 = vld [vmem:[%s19552_s3] sm:$0x1f] }
 0x860   :  { %19880 = vst [vmem:[#allocation314_spill] sm:$0xff] %v18550_v50 }
 0x862   :  { %8534 = vmatpush1.bf16.msra.mxu1 %v14138_v40  ;;  %v14164_v40 = vld [vmem:[%s19553_s4 + $0xe4] ss:$8 sps:$4 sm:$0xff]  }
 0x863   :  { %8535 = vmatprep.subr.bf16.mxu1 %v14143_v46  ;;  %v8045_v46 = vrot.slane %v8032_v55, %v18550_v50 }
 0x866   :  { %8536 = vmatpush1.bf16.msra.mxu1 %v14141_v42  ;;  %v14162_v42 = vld [vmem:[%s19553_s4 + $0xe0] ss:$8 sps:$4 sm:$0xff]  }
 0x867   :  { %8537 = vmatprep.subr.bf16.mxu1 %v14146_v43  ;;  %v14167_v43 = vld [vmem:[%s19553_s4 + $0xf4] ss:$8 sps:$4 sm:$0xff]  }
 0x86a   :  { %8538 = vmatpush1.bf16.msra.mxu1 %v14144_v51  ;;  %v14165_v51 = vld [vmem:[%s19553_s4 + $0xf0] ss:$8 sps:$4 sm:$0xff]  }
 0x86b   :  { %8539 = vmatprep.subr.bf16.mxu1 %v14149_v54  ;;  %v14170_v54 = vld [vmem:[%s19553_s4 + $0x104] ss:$8 sps:$4 sm:$0xff]  }
 0x86e   :  { %8540 = vmatpush1.bf16.msra.mxu1 %v14147_v45  ;;  %v19567_v45 = vsub.s32 4, %v18547_v39 }
 0x86f   :  { %8541 = vmatprep.subr.bf16.mxu1 %v14152_v53 }
 0x870   :  { %v8053_v53 = vrot.slane %v8032_v55, %v19567_v45 }
 0x872   :  { %8542 = vmatpush1.bf16.msra.mxu1 %v14150_v29  ;;  %v18575_v29 = vsub.s32 0, %v18547_v39 }
 0x873   :  { %8543 = vmatprep.subr.bf16.mxu1 %v14155_v36  ;;  %v18578_v36 = vsub.s32 1, %v18547_v39 }
 0x876   :  { %8544 = vmatpush1.bf16.msra.mxu1 %v14153_v49  ;;  %v19572_v49 = vsub.s32 3, %v18547_v39 }
 0x877   :  { %8545 = vmatprep.subr.bf16.mxu1 %v14158_v52  ;;  %v8037_v52 = vrot.slane %v8032_v55, %v18575_v29 }
 0x878   :  { %v8049_v31 = vrot.slane %v8032_v55, %v19572_v49 }
 0x87a   :  { %8546 = vmatpush1.bf16.msra.mxu1 %v14156_v38 }
 0x87b   :  { %8547 = vmatprep.subr.bf16.mxu1 %v14161_v44 }
 0x87e   :  { %8548 = vmatpush1.bf16.msra.mxu1 %v14159_v26  ;;  %v8041_v26 = vrot.slane %v8032_v55, %v18578_v36 }
 0x87f   :  { %8549 = vmatprep.subr.bf16.mxu1 %v14164_v40 }
 0x882   :  { %8550 = vmatpush1.bf16.msra.mxu1 %v14162_v42 }
 0x883   :  { %8551 = vmatprep.subr.bf16.mxu1 %v14167_v43 }
 0x886   :  { %8552 = vmatpush1.bf16.msra.mxu1 %v14165_v51 }
 0x887   :  { %8562 = vmatprep.subr.bf16.mxu1 %v14170_v54 }
 0x91b   :  { %v7939_v38 = vpop.f32.mrb[60].mxu0  ;;  %v7980_v44 = vpop.f32.mrb[56].mxu1 }
 0x91c   :  { %v8027_v40 = vadd.f32 %v7939_v38, %v18432_v27  ;;  %v8029_v42 = vadd.f32 %v7980_v44, %v18435_v35  ;;  %v7941_v43 = vpop.f32.mrb[61].mxu0  ;;  %v7982_v51 = vpop.f32.mrb[57].mxu1  ;;  %v14168_v35 = vld [vmem:[%s19553_s4 + $0x100] ss:$8 sps:$4 sm:$0xff]   ;;  %v14177_v44 = vld [vmem:[%s19553_s4 + $0x130] ss:$8 sps:$4 sm:$0xff]  }
 0x91d   :  { %v8028_v54 = vadd.f32 %v7941_v43, %v18438_v30  ;;  %v8030_v45 = vadd.f32 %v7982_v51, %v18441_v37  ;;  %v7943_v50 = vpop.f32.mrb[62].mxu0  ;;  %v7984_v34 = vpop.f32.mrb[58].mxu1  ;;  %v14191_v43 = vld [vmem:[%s19553_s4 + $0x174] ss:$8 sps:$4 sm:$0xff]   ;;  %v14189_v51 = vld [vmem:[%s19553_s4 + $0x170] ss:$8 sps:$4 sm:$0xff]  }
 0x91e   :  { %v8059_v25 = vadd.f32 %v8037_v52, %v8027_v40  ;;  %v18589_v33 = vadd.f32 %v8045_v46, %v8029_v42  ;;  %v7944_v24 = vpop.f32.mrb[63].mxu0  ;;  %v7985_v32 = vpop.f32.mrb[59].mxu1  ;;  %v14173_v34 = vld [vmem:[%s19553_s4 + $0x114] ss:$8 sps:$4 sm:$0xff]   ;;  %v14188_v40 = vld [vmem:[%s19553_s4 + $0x164] ss:$8 sps:$4 sm:$0xff]  }
 0x91f   :  { %v8060_v63 = vadd.f32 %v8041_v26, %v8028_v54  ;;  %v8062_v39 = vadd.f32 %v8049_v31, %v8030_v45  ;;  %v14176_v24 = vld [vmem:[%s19553_s4 + $0x124] ss:$8 sps:$4 sm:$0xff]   ;;  %v14174_v32 = vld [vmem:[%s19553_s4 + $0x120] ss:$8 sps:$4 sm:$0xff]   ;;  %v14179_v46 = vld [vmem:[%s19553_s4 + $0x134] ss:$8 sps:$4 sm:$0xff]  }
 0x920   :  { %v8064_v55 = vmax.f32 %v8059_v25, 0.0  ;;  %v14180_v26 = vld [vmem:[%s19553_s4 + $0x140] ss:$8 sps:$4 sm:$0xff]   ;;  %v14183_v31 = vld [vmem:[%s19553_s4 + $0x150] ss:$8 sps:$4 sm:$0xff]  }
 0x921   :  { %v8065_v49 = vmax.f32 %v8060_v63, 0.0  ;;  %v8067_v27 = vmax.f32 %v8062_v39, 0.0  ;;  %v14171_v63 = vld [vmem:[%s19553_s4 + $0x110] ss:$8 sps:$4 sm:$0xff]   ;;  %v14186_v42 = vld [vmem:[%s19553_s4 + $0x160] ss:$8 sps:$4 sm:$0xff]  }
 0x922   :  { %v8069_v30 = vpack.c.bf16 %v8064_v55, %v8064_v55  ;;  %v14194_v54 = vld [vmem:[%s19553_s4 + $0x184] ss:$8 sps:$4 sm:$0xff]   ;;  %v14192_v55 = vld [vmem:[%s19553_s4 + $0x180] ss:$8 sps:$4 sm:$0xff]  }
 0x923   :  { %v8070_v38 = vpack.c.bf16 %v8065_v49, %v8065_v49  ;;  %v8072_v37 = vpack.c.bf16 %v8067_v27, %v8067_v27  ;;  %v14197_v27 = vld [vmem:[%s19553_s4 + $0x194] ss:$8 sps:$4 sm:$0xff]  }
 0x925   :  { %8553 = vmatprep.mubr.bf16.mxu1 %v8070_v38  ;;  %v14195_v38 = vld [vmem:[%s19553_s4 + $0x190] ss:$8 sps:$4 sm:$0xff]  }
 0x926   :  { %8554 = vmatmul.mubr.bf16.vlgmr.msra.gmra.mrb[60].mxu1 %v8069_v30  ;;  %v14198_v30 = vld [vmem:[%s19553_s4 + $0x1a0] ss:$8 sps:$4 sm:$0xff]  }
 0x927   :  { %8563 = vmatpush1.bf16.msra.mxu1 %v14168_v35  ;;  %8594 = vmatprep.mubr.bf16.mxu1 %v8072_v37  ;;  %v14200_v35 = vld [vmem:[%s19553_s4 + $0x1a4] ss:$8 sps:$4 sm:$0xff]   ;;  %v14201_v37 = vld [vmem:[%s19553_s4 + $0x1b0] ss:$8 sps:$4 sm:$0xff]  }
 0x928   :  { %8564 = vmatprep.subr.bf16.mxu1 %v14173_v34  ;;  %v14203_v34 = vld [vmem:[%s19553_s4 + $0x1b4] ss:$8 sps:$4 sm:$0xff]  }
 0x92b   :  { %v8021_v25 = vpop.f32.mrb[64].mxu0  ;;  %8565 = vmatpush1.bf16.msra.mxu1 %v14171_v63  ;;  %v14206_v63 = vld [vmem:[%s19553_s4 + $0x1c4] ss:$8 sps:$4 sm:$0xff]  }
 0x92c   :  { %v8031_v39 = vadd.f32 %v8021_v25, %v18470_v28  ;;  %v13733_v50 = vpop.f32.mrb[65].mxu0  ;;  %8566 = vmatprep.subr.bf16.mxu1 %v14176_v24  ;;  %v14182_v28 = vld [vmem:[%s19553_s4 + $0x144] ss:$8 sps:$4 sm:$0xff]   ;;  %v14204_v24 = vld [vmem:[%s19553_s4 + $0x1c0] ss:$8 sps:$4 sm:$0xff]  }
 0x92d   :  { %v8024_v45 = vpop.f32.mrb[66].mxu0  ;;  %v14209_v25 = vld [vmem:[%s19553_s4 + $0x1d4] ss:$8 sps:$4 sm:$0xff]   ;;  %v14210_v50 = vld [vmem:[%s19553_s4 + $0x1e0] ss:$8 sps:$4 sm:$0xff]  }
 0x92e   :  { %v18610_v49 = vadd.f32 %v8053_v53, %v8031_v39  ;;  %v13734_v52 = vpop.f32.mrb[67].mxu0  ;;  %v14185_v53 = vld [vmem:[%s19553_s4 + $0x154] ss:$8 sps:$4 sm:$0xff]   ;;  %v14212_v39 = vld [vmem:[%s19553_s4 + $0x1e4] ss:$8 sps:$4 sm:$0xff]  }
 0x92f   :  { %8567 = vmatpush1.bf16.msra.mxu1 %v14174_v32  ;;  %v14207_v32 = vld [vmem:[%s19553_s4 + $0x1d0] ss:$8 sps:$4 sm:$0xff]   ;;  %v8066_v52 = vmax.f32 %v18589_v33, 0.0 }
 0x930   :  { %8568 = vmatprep.subr.bf16.mxu1 %v14179_v46  ;;  %v14215_v46 = vld [vmem:[%s19553_s4 + $0x1f4] ss:$8 sps:$4 sm:$0xff]   ;;  %v14213_v45 = vld [vmem:[%s19553_s4 + $0x1f0] ss:$8 sps:$4 sm:$0xff]  }
 0x931   :  { %v14219_v33 = vld [vmem:[%s19553_s4 + $0x210] ss:$8 sps:$4 sm:$0xff]  }
 0x933   :  { %8569 = vmatpush1.bf16.msra.mxu1 %v14177_v44  ;;  %v14218_v44 = vld [vmem:[%s19553_s4 + $0x204] ss:$8 sps:$4 sm:$0xff]  }
 0x934   :  { %8570 = vmatprep.subr.bf16.mxu1 %v14182_v28  ;;  %v14216_v28 = vld [vmem:[%s19553_s4 + $0x200] ss:$8 sps:$4 sm:$0xff]  }
 0x937   :  { %8571 = vmatpush1.bf16.msra.mxu1 %v14180_v26  ;;  %v8071_v26 = vpack.c.bf16 %v8066_v52, %v8066_v52 }
 0x938   :  { %8572 = vmatprep.subr.bf16.mxu1 %v14185_v53  ;;  %v14221_v53 = vld [vmem:[%s19553_s4 + $0x214] ss:$8 sps:$4 sm:$0xff]  }
 0x93b   :  { %8573 = vmatpush1.bf16.msra.mxu1 %v14183_v31  ;;  %v14224_v31 = vld [vmem:[%s19553_s4 + $0x224] ss:$8 sps:$4 sm:$0xff]  }
 0x93c   :  { %8574 = vmatprep.subr.bf16.mxu1 %v14188_v40  ;;  %v14222_v40 = vld [vmem:[%s19553_s4 + $0x220] ss:$8 sps:$4 sm:$0xff]  }
 0x93f   :  { %8575 = vmatpush1.bf16.msra.mxu1 %v14186_v42  ;;  %v14227_v42 = vld [vmem:[%s19553_s4 + $0x234] ss:$8 sps:$4 sm:$0xff]  }
 0x940   :  { %8576 = vmatprep.subr.bf16.mxu1 %v14191_v43  ;;  %v14225_v43 = vld [vmem:[%s19553_s4 + $0x230] ss:$8 sps:$4 sm:$0xff]  }
 0x943   :  { %8577 = vmatpush1.bf16.msra.mxu1 %v14189_v51  ;;  %v8068_v51 = vmax.f32 %v18610_v49, 0.0 }
 0x944   :  { %8578 = vmatprep.subr.bf16.mxu1 %v14194_v54 }
 0x945   :  { %v8073_v54 = vpack.c.bf16 %v8068_v51, %v8068_v51 }
 0x947   :  { %8579 = vmatpush1.bf16.msra.mxu1 %v14192_v55  ;;  %v8146_v55 = vld [vmem:[%s19554_s5] sm:$0x3] }
 0x948   :  { %8580 = vmatprep.subr.bf16.mxu1 %v14197_v27  ;;  %v8151_v27 = vrot.slane %v8146_v55, %v18575_v29 }
 0x94b   :  { %8581 = vmatpush1.bf16.msra.mxu1 %v14195_v38  ;;  %v8155_v38 = vrot.slane %v8146_v55, %v18578_v36 }
 0x94c   :  { %8582 = vmatprep.subr.bf16.mxu1 %v14200_v35 }
 0x94f   :  { %8583 = vmatpush1.bf16.msra.mxu1 %v14198_v30 }
 0x950   :  { %8584 = vmatprep.subr.bf16.mxu1 %v14203_v34 }
 0x953   :  { %8585 = vmatpush1.bf16.msra.mxu1 %v14201_v37 }
 0x954   :  { %8586 = vmatprep.subr.bf16.mxu1 %v14206_v63 }
 0x957   :  { %8587 = vmatpush1.bf16.msra.mxu1 %v14204_v24 }
 0x958   :  { %8588 = vmatprep.subr.bf16.mxu1 %v14209_v25 }
 0x95b   :  { %8589 = vmatpush1.bf16.msra.mxu1 %v14207_v32 }
 0x95c   :  { %8590 = vmatprep.subr.bf16.mxu1 %v14212_v39 }
 0x95f   :  { %8591 = vmatpush1.bf16.msra.mxu1 %v14210_v50 }
 0x960   :  { %8592 = vmatprep.subr.bf16.mxu1 %v14215_v46 }
 0x963   :  { %8593 = vmatpush1.bf16.msra.mxu1 %v14213_v45 }
 0x964   :  { %8603 = vmatprep.subr.bf16.mxu1 %v14218_v44 }
 0x966   :  { %8595 = vmatmul.mubr.bf16.vlgmr.msra.gmra.mrb[60].mxu1 %v8071_v26 }
 0x967   :  { %8604 = vmatpush1.bf16.msra.mxu1 %v14216_v28  ;;  %8635 = vmatprep.mubr.bf16.mxu1 %v19878_v47 }
 0x968   :  { %8605 = vmatprep.subr.bf16.mxu1 %v14221_v53 }
 0x96b   :  { %8606 = vmatpush1.bf16.msra.mxu1 %v14219_v33 }
 0x96c   :  { %8607 = vmatprep.subr.bf16.mxu1 %v14224_v31 }
 0x96f   :  { %8608 = vmatpush1.bf16.msra.mxu1 %v14222_v40 }
 0x970   :  { %8609 = vmatprep.subr.bf16.mxu1 %v14227_v42 }
 0x973   :  { %8610 = vmatpush1.bf16.msra.mxu1 %v14225_v43 }
 0x976   :  { %12939 = vmatmul.mubr.msk.bf16.vlgmr.msra.gmra.mrb[60].mxu1 %vm5847_vm2, %v8073_v54 }
 0xa49   :  { %v8637_v35 = vpop.f32.mrb[60].mxu1 }
 0xa4a   :  { %v13825_v30 = vadd.f32 %v8637_v35, %v8151_v27  ;;  %v8639_v34 = vpop.f32.mrb[61].mxu1 }
 0xa4b   :  { %v13826_v37 = vadd.f32 %v8639_v34, %v8155_v38  ;;  %v8641_v63 = vpop.f32.mrb[62].mxu1 }
 0xa4c   :  { %v18720_v24 = vmax.f32 %v13825_v30, 0.0  ;;  %v8642_v49 = vpop.f32.mrb[63].mxu1 }
 0xa4d   :  { %v8645_v25 = vmax.f32 %v13826_v37, 0.0 }
 0xa4e   :  { %8646 = vst [vmem:[%s19561_s12] sm:$0x3f] %v18720_v24 }
 0xa4f   :  { %8648 = vst.msk [vmem:[%s19561_s12 + $0x8] sm:$0x3f] %vm8647_vm3, %v8645_v25 }
 0xa50   :  { %14249 = dma.done.wait [#allocation4], 38016 }
 0xa51   :  { %14250 = vsyncadd [#allocation4], 4294929280 }
 0xa52   :  { %14251 = dma.done.wait [#allocation4 + $0x1], 43008 }
 0xa53   :  { %14252 = vsyncadd [#allocation4 + $0x1], 4294924288  ;;  %v18729_v32 = vpack.c.bf16 %v8645_v25, %v8645_v25  ;;  %vm8760_vm4 = vcmask 130048   ;;  %v8662_v39 = vld [vmem:[#allocation2 + $0x8] sm:$0xff]  ;;  %v8661_v46 = vld [vmem:[#allocation2] sm:$0xff]  ;;  %vm9390_vm5 = vcmask 1042432  }
 0xa54   :  { %v8670_v50 = vld [vmem:[#allocation2 + $0x48] sm:$0xff]  ;;  %8764 = vmatprep.subr.bf16.mxu0 %v8662_v39  ;;  %v8669_v45 = vld [vmem:[#allocation2 + $0x40] sm:$0xff]  ;;  %v8672_v28 = vld [vmem:[#allocation2 + $0x58] sm:$0xff]  ;;  %vm9386_vm6 = vcmask 48128   ;;  %vm11454_vm7 = vcmask 113664   ;;  %vm11461_vm8 = vcmask 1046528  }
 0xa55   :  { %12940 = vmatprep.mubr.msk.bf16.mxu0 %vm8760_vm4, %v18729_v32  ;;  %12944 = vmatprep.mubr.msk.bf16.mxu1 %vm8760_vm4, %v18729_v32  ;;  %v8673_v52 = vld [vmem:[#allocation2 + $0x60] sm:$0xff]  ;;  %v8680_v26 = vld [vmem:[#allocation2 + $0x98] sm:$0xff]  ;;  %v8683_v31 = vld [vmem:[#allocation2 + $0xb0] sm:$0xff] }
 0xa56   :  { %8928 = vmatprep.subr.bf16.mxu1 %v8670_v50  ;;  %v8681_v44 = vld [vmem:[#allocation2 + $0xa0] sm:$0xff]  ;;  %8765 = vmatpush1.bf16.msra.mxu0 %v8661_v46  ;;  %v8684_v53 = vld [vmem:[#allocation2 + $0xb8] sm:$0xff]  ;;  %v8691_v40 = vld [vmem:[#allocation2 + $0xf0] sm:$0xff] }
 0xa57   :  { %8929 = vmatpush1.bf16.msra.mxu1 %v8669_v45  ;;  %8766 = vmatprep.subr.bf16.mxu0 %v8673_v52  ;;  %v8692_v33 = vld [vmem:[#allocation2 + $0xf8] sm:$0xff]  ;;  %v8695_v42 = vld [vmem:[#allocation2 + $0x110] sm:$0xff]  ;;  %v8694_v51 = vld [vmem:[#allocation2 + $0x108] sm:$0xff] }
 0xa58   :  { %8930 = vmatprep.subr.bf16.mxu1 %v8681_v44  ;;  %v8703_v43 = vld [vmem:[#allocation2 + $0x150] sm:$0xff]  ;;  %v8702_v54 = vld [vmem:[#allocation2 + $0x148] sm:$0xff]  ;;  %v8705_v38 = vld [vmem:[#allocation2 + $0x160] sm:$0xff] }
 0xa59   :  { %v8706_v55 = vld [vmem:[#allocation2 + $0x168] sm:$0xff]  ;;  %v8713_v35 = vld [vmem:[#allocation2 + $0x1a0] sm:$0xff]  ;;  %v8716_v37 = vld [vmem:[#allocation2 + $0x1b8] sm:$0xff] }
 0xa5a   :  { %8767 = vmatpush1.bf16.msra.mxu0 %v8672_v28  ;;  %v8714_v27 = vld [vmem:[#allocation2 + $0x1a8] sm:$0xff]  ;;  %v8717_v30 = vld [vmem:[#allocation2 + $0x1c0] sm:$0xff]  ;;  %v8724_v63 = vld [vmem:[#allocation2 + $0x1f8] sm:$0xff] }
 0xa5b   :  { %8931 = vmatpush1.bf16.msra.mxu1 %v8680_v26  ;;  %8768 = vmatprep.subr.bf16.mxu0 %v8684_v53  ;;  %v8725_v34 = vld [vmem:[#allocation2 + $0x200] sm:$0xff]  ;;  %v8728_v49 = vld [vmem:[#allocation2 + $0x218] sm:$0xff]  ;;  %v8727_v39 = vld [vmem:[#allocation2 + $0x210] sm:$0xff] }
 0xa5c   :  { %8932 = vmatprep.subr.bf16.mxu1 %v8692_v33  ;;  %v8736_v25 = vld [vmem:[#allocation2 + $0x258] sm:$0xff]  ;;  %v8735_v50 = vld [vmem:[#allocation2 + $0x250] sm:$0xff]  ;;  %v8738_v52 = vld [vmem:[#allocation2 + $0x268] sm:$0xff] }
 0xa5d   :  { %v8739_v46 = vld [vmem:[#allocation2 + $0x270] sm:$0xff]  ;;  %v8746_v44 = vld [vmem:[#allocation2 + $0x2a8] sm:$0xff]  ;;  %v8749_v53 = vld [vmem:[#allocation2 + $0x2c0] sm:$0xff] }
 0xa5e   :  { %8769 = vmatpush1.bf16.msra.mxu0 %v8683_v31  ;;  %v8747_v45 = vld [vmem:[#allocation2 + $0x2b0] sm:$0xff]  ;;  %v8750_v28 = vld [vmem:[#allocation2 + $0x2c8] sm:$0xff]  ;;  %v8757_v33 = vld [vmem:[#allocation2 + $0x300] sm:$0xff] }
 0xa5f   :  { %8933 = vmatpush1.bf16.msra.mxu1 %v8691_v40  ;;  %8770 = vmatprep.subr.bf16.mxu0 %v8695_v42  ;;  %v8758_v26 = vld [vmem:[#allocation2 + $0x308] sm:$0xff]  ;;  %v8664_v31 = vld [vmem:[#allocation2 + $0x18] sm:$0xff]  ;;  %v9024_v40 = vld [vmem:[#allocation2 + $0x320] sm:$0xff]  ;;  %v18737_v42 = vpack.c.bf16 %v18720_v24, %v18720_v24 }
 0xa60   :  { %8934 = vmatprep.subr.bf16.mxu1 %v8703_v43  ;;  %v8663_v43 = vld [vmem:[#allocation2 + $0x10] sm:$0xff]  ;;  %v8686_v24 = vld [vmem:[#allocation2 + $0xc8] sm:$0xff] }
 0xa62   :  { %8771 = vmatpush1.bf16.msra.mxu0 %v8694_v51  ;;  %v9023_v51 = vld [vmem:[#allocation2 + $0x318] sm:$0xff] }
 0xa63   :  { %8935 = vmatpush1.bf16.msra.mxu1 %v8702_v54  ;;  %8772 = vmatprep.subr.bf16.mxu0 %v8706_v55  ;;  %v8675_v54 = vld [vmem:[#allocation2 + $0x70] sm:$0xff]  ;;  %v9035_v55 = vld [vmem:[#allocation2 + $0x378] sm:$0xff] }
 0xa64   :  { %8936 = vmatprep.subr.bf16.mxu1 %v8714_v27  ;;  %v8674_v27 = vld [vmem:[#allocation2 + $0x68] sm:$0xff] }
 0xa66   :  { %8773 = vmatpush1.bf16.msra.mxu0 %v8705_v38  ;;  %v9034_v38 = vld [vmem:[#allocation2 + $0x370] sm:$0xff] }
 0xa67   :  { %8937 = vmatpush1.bf16.msra.mxu1 %v8713_v35  ;;  %8774 = vmatprep.subr.bf16.mxu0 %v8717_v30  ;;  %v9046_v35 = vld [vmem:[#allocation2 + $0x3d0] sm:$0xff]  ;;  %v8685_v30 = vld [vmem:[#allocation2 + $0xc0] sm:$0xff] }
 0xa68   :  { %8938 = vmatprep.subr.bf16.mxu1 %v8725_v34  ;;  %v9045_v34 = vld [vmem:[#allocation2 + $0x3c8] sm:$0xff] }
 0xa6a   :  { %8775 = vmatpush1.bf16.msra.mxu0 %v8716_v37  ;;  %v8697_v37 = vld [vmem:[#allocation2 + $0x120] sm:$0xff] }
 0xa6b   :  { %8939 = vmatpush1.bf16.msra.mxu1 %v8724_v63  ;;  %8776 = vmatprep.subr.bf16.mxu0 %v8728_v49  ;;  %v9057_v63 = vld [vmem:[#allocation2 + $0x428] sm:$0xff]  ;;  %v8696_v49 = vld [vmem:[#allocation2 + $0x118] sm:$0xff] }
 0xa6c   :  { %8940 = vmatprep.subr.bf16.mxu1 %v8736_v25  ;;  %v9056_v25 = vld [vmem:[#allocation2 + $0x420] sm:$0xff] }
 0xa6e   :  { %8777 = vmatpush1.bf16.msra.mxu0 %v8727_v39  ;;  %v8708_v39 = vld [vmem:[#allocation2 + $0x178] sm:$0xff] }
 0xa6f   :  { %8941 = vmatpush1.bf16.msra.mxu1 %v8735_v50  ;;  %8778 = vmatprep.subr.bf16.mxu0 %v8739_v46  ;;  %v9068_v50 = vld [vmem:[#allocation2 + $0x480] sm:$0xff]  ;;  %v8707_v46 = vld [vmem:[#allocation2 + $0x170] sm:$0xff] }
 0xa70   :  { %8942 = vmatprep.subr.bf16.mxu1 %v8747_v45  ;;  %v9067_v45 = vld [vmem:[#allocation2 + $0x478] sm:$0xff] }
 0xa72   :  { %8779 = vmatpush1.bf16.msra.mxu0 %v8738_v52  ;;  %v8719_v52 = vld [vmem:[#allocation2 + $0x1d0] sm:$0xff] }
 0xa73   :  { %8943 = vmatpush1.bf16.msra.mxu1 %v8746_v44  ;;  %8780 = vmatprep.subr.bf16.mxu0 %v8750_v28  ;;  %v9079_v44 = vld [vmem:[#allocation2 + $0x4d8] sm:$0xff]  ;;  %v8718_v28 = vld [vmem:[#allocation2 + $0x1c8] sm:$0xff] }
 0xa74   :  { %8944 = vmatprep.subr.bf16.mxu1 %v8758_v26  ;;  %v9078_v26 = vld [vmem:[#allocation2 + $0x4d0] sm:$0xff] }
 0xa76   :  { %8781 = vmatpush1.bf16.msra.mxu0 %v8749_v53  ;;  %v8730_v53 = vld [vmem:[#allocation2 + $0x228] sm:$0xff] }
 0xa77   :  { %8945 = vmatpush1.bf16.msra.mxu1 %v8757_v33  ;;  %8805 = vmatprep.subr.bf16.mxu0 %v8664_v31  ;;  %v9090_v33 = vld [vmem:[#allocation2 + $0x530] sm:$0xff]  ;;  %v8729_v31 = vld [vmem:[#allocation2 + $0x220] sm:$0xff] }
 0xa78   :  { %9122 = vmatprep.subr.bf16.mxu1 %v9024_v40  ;;  %v9089_v40 = vld [vmem:[#allocation2 + $0x528] sm:$0xff] }
 0xa79   :  { %8797 = vmatmul.mubr.bf16.vlgmr.msra.gmra.mrb[68].mxu0 %v18737_v42 }
 0xa7a   :  { %8961 = vmatmul.mubr.bf16.vlgmr.msra.gmra.mrb[64].mxu1 %v18737_v42  ;;  %8806 = vmatpush1.bf16.msra.mxu0 %v8663_v43  ;;  %v8741_v43 = vld [vmem:[#allocation2 + $0x280] sm:$0xff] }
 0xa7b   :  { %9123 = vmatpush1.bf16.msra.mxu1 %v9023_v51  ;;  %8807 = vmatprep.subr.bf16.mxu0 %v8675_v54  ;;  %v9101_v51 = vld [vmem:[#allocation2 + $0x588] sm:$0xff]  ;;  %v8740_v54 = vld [vmem:[#allocation2 + $0x278] sm:$0xff] }
 0xa7c   :  { %9124 = vmatprep.subr.bf16.mxu1 %v9035_v55  ;;  %12941 = vmatprep.mubr.msk.bf16.mxu0 %vm8760_vm4, %v18729_v32  ;;  %v9100_v55 = vld [vmem:[#allocation2 + $0x580] sm:$0xff] }
 0xa7d   :  { %12946 = vmatprep.mubr.msk.bf16.mxu1 %vm8760_vm4, %v18729_v32 }
 0xa7e   :  { %8808 = vmatpush1.bf16.msra.mxu0 %v8674_v27  ;;  %v8752_v27 = vld [vmem:[#allocation2 + $0x2d8] sm:$0xff] }
 0xa7f   :  { %9125 = vmatpush1.bf16.msra.mxu1 %v9034_v38  ;;  %8809 = vmatprep.subr.bf16.mxu0 %v8686_v24  ;;  %v9112_v38 = vld [vmem:[#allocation2 + $0x5e0] sm:$0xff]  ;;  %v8751_v24 = vld [vmem:[#allocation2 + $0x2d0] sm:$0xff] }
 0xa80   :  { %9126 = vmatprep.subr.bf16.mxu1 %v9046_v35  ;;  %v9111_v35 = vld [vmem:[#allocation2 + $0x5d8] sm:$0xff] }
 0xa82   :  { %8810 = vmatpush1.bf16.msra.mxu0 %v8685_v30  ;;  %v8666_v30 = vld [vmem:[#allocation2 + $0x28] sm:$0xff] }
 0xa83   :  { %9127 = vmatpush1.bf16.msra.mxu1 %v9045_v34  ;;  %8811 = vmatprep.subr.bf16.mxu0 %v8697_v37  ;;  %v9028_v34 = vld [vmem:[#allocation2 + $0x340] sm:$0xff] }
 0xa84   :  { %9128 = vmatprep.subr.bf16.mxu1 %v9057_v63  ;;  %v8665_v37 = vld [vmem:[#allocation2 + $0x20] sm:$0xff]  ;;  %v9027_v63 = vld [vmem:[#allocation2 + $0x338] sm:$0xff] }
 0xa86   :  { %8812 = vmatpush1.bf16.msra.mxu0 %v8696_v49  ;;  %v8677_v49 = vld [vmem:[#allocation2 + $0x80] sm:$0xff] }
 0xa87   :  { %9129 = vmatpush1.bf16.msra.mxu1 %v9056_v25  ;;  %8813 = vmatprep.subr.bf16.mxu0 %v8708_v39  ;;  %v9039_v25 = vld [vmem:[#allocation2 + $0x398] sm:$0xff] }
 0xa88   :  { %9130 = vmatprep.subr.bf16.mxu1 %v9068_v50  ;;  %v8676_v39 = vld [vmem:[#allocation2 + $0x78] sm:$0xff]  ;;  %v9038_v50 = vld [vmem:[#allocation2 + $0x390] sm:$0xff] }
 0xa8a   :  { %8814 = vmatpush1.bf16.msra.mxu0 %v8707_v46  ;;  %v8688_v46 = vld [vmem:[#allocation2 + $0xd8] sm:$0xff] }
 0xa8b   :  { %9131 = vmatpush1.bf16.msra.mxu1 %v9067_v45  ;;  %8815 = vmatprep.subr.bf16.mxu0 %v8719_v52  ;;  %v9050_v45 = vld [vmem:[#allocation2 + $0x3f0] sm:$0xff] }
 0xa8c   :  { %9132 = vmatprep.subr.bf16.mxu1 %v9079_v44  ;;  %v8687_v52 = vld [vmem:[#allocation2 + $0xd0] sm:$0xff]  ;;  %v9049_v44 = vld [vmem:[#allocation2 + $0x3e8] sm:$0xff] }
 0xa8e   :  { %8816 = vmatpush1.bf16.msra.mxu0 %v8718_v28  ;;  %v8699_v28 = vld [vmem:[#allocation2 + $0x130] sm:$0xff] }
 0xa8f   :  { %9133 = vmatpush1.bf16.msra.mxu1 %v9078_v26  ;;  %8817 = vmatprep.subr.bf16.mxu0 %v8730_v53  ;;  %v9061_v26 = vld [vmem:[#allocation2 + $0x448] sm:$0xff] }
 0xa90   :  { %9134 = vmatprep.subr.bf16.mxu1 %v9090_v33  ;;  %v8698_v53 = vld [vmem:[#allocation2 + $0x128] sm:$0xff]  ;;  %v9060_v33 = vld [vmem:[#allocation2 + $0x440] sm:$0xff] }
 0xa92   :  { %8818 = vmatpush1.bf16.msra.mxu0 %v8729_v31  ;;  %v8710_v31 = vld [vmem:[#allocation2 + $0x188] sm:$0xff] }
 0xa93   :  { %9135 = vmatpush1.bf16.msra.mxu1 %v9089_v40  ;;  %8819 = vmatprep.subr.bf16.mxu0 %v8741_v43  ;;  %v9072_v40 = vld [vmem:[#allocation2 + $0x4a0] sm:$0xff] }
 0xa94   :  { %9136 = vmatprep.subr.bf16.mxu1 %v9101_v51  ;;  %v8709_v43 = vld [vmem:[#allocation2 + $0x180] sm:$0xff]  ;;  %v9071_v51 = vld [vmem:[#allocation2 + $0x498] sm:$0xff] }
 0xa96   :  { %8820 = vmatpush1.bf16.msra.mxu0 %v8740_v54  ;;  %v8721_v54 = vld [vmem:[#allocation2 + $0x1e0] sm:$0xff] }
 0xa97   :  { %9137 = vmatpush1.bf16.msra.mxu1 %v9100_v55  ;;  %8821 = vmatprep.subr.bf16.mxu0 %v8752_v27  ;;  %v9083_v55 = vld [vmem:[#allocation2 + $0x4f8] sm:$0xff] }
 0xa98   :  { %9138 = vmatprep.subr.bf16.mxu1 %v9112_v38  ;;  %v8720_v27 = vld [vmem:[#allocation2 + $0x1d8] sm:$0xff]  ;;  %v9082_v38 = vld [vmem:[#allocation2 + $0x4f0] sm:$0xff] }
 0xa9a   :  { %8822 = vmatpush1.bf16.msra.mxu0 %v8751_v24  ;;  %v8732_v24 = vld [vmem:[#allocation2 + $0x238] sm:$0xff] }
 0xa9b   :  { %9139 = vmatpush1.bf16.msra.mxu1 %v9111_v35  ;;  %8846 = vmatprep.subr.bf16.mxu0 %v8666_v30  ;;  %v9094_v35 = vld [vmem:[#allocation2 + $0x550] sm:$0xff] }
 0xa9c   :  { %9204 = vmatprep.subr.bf16.mxu1 %v9028_v34  ;;  %v8731_v30 = vld [vmem:[#allocation2 + $0x230] sm:$0xff]  ;;  %v9093_v34 = vld [vmem:[#allocation2 + $0x548] sm:$0xff] }
 0xa9d   :  { %8838 = vmatmul.mubr.bf16.vlgmr.msra.gmra.mrb[72].mxu0 %v18737_v42 }
 0xa9e   :  { %9155 = vmatmul.mubr.bf16.vlgmr.msra.gmra.mrb[68].mxu1 %v18737_v42  ;;  %8847 = vmatpush1.bf16.msra.mxu0 %v8665_v37  ;;  %v8743_v37 = vld [vmem:[#allocation2 + $0x290] sm:$0xff] }
 0xa9f   :  { %9205 = vmatpush1.bf16.msra.mxu1 %v9027_v63  ;;  %8848 = vmatprep.subr.bf16.mxu0 %v8677_v49  ;;  %v9105_v63 = vld [vmem:[#allocation2 + $0x5a8] sm:$0xff] }
 0xaa0   :  { %9206 = vmatprep.subr.bf16.mxu1 %v9039_v25  ;;  %12942 = vmatprep.mubr.msk.bf16.mxu0 %vm8760_vm4, %v18729_v32  ;;  %v8742_v49 = vld [vmem:[#allocation2 + $0x288] sm:$0xff]  ;;  %v9104_v25 = vld [vmem:[#allocation2 + $0x5a0] sm:$0xff] }
 0xaa1   :  { %12948 = vmatprep.mubr.msk.bf16.mxu1 %vm8760_vm4, %v18729_v32 }
 0xaa2   :  { %8849 = vmatpush1.bf16.msra.mxu0 %v8676_v39  ;;  %v8754_v39 = vld [vmem:[#allocation2 + $0x2e8] sm:$0xff] }
 0xaa3   :  { %9207 = vmatpush1.bf16.msra.mxu1 %v9038_v50  ;;  %8850 = vmatprep.subr.bf16.mxu0 %v8688_v46  ;;  %v9116_v50 = vld [vmem:[#allocation2 + $0x600] sm:$0xff] }
 0xaa4   :  { %9208 = vmatprep.subr.bf16.mxu1 %v9050_v45  ;;  %v8753_v46 = vld [vmem:[#allocation2 + $0x2e0] sm:$0xff]  ;;  %v9115_v45 = vld [vmem:[#allocation2 + $0x5f8] sm:$0xff] }
 0xaa6   :  { %8851 = vmatpush1.bf16.msra.mxu0 %v8687_v52  ;;  %v8668_v52 = vld [vmem:[#allocation2 + $0x38] sm:$0xff] }
 0xaa7   :  { %9209 = vmatpush1.bf16.msra.mxu1 %v9049_v44  ;;  %8852 = vmatprep.subr.bf16.mxu0 %v8699_v28  ;;  %v9032_v44 = vld [vmem:[#allocation2 + $0x360] sm:$0xff]  ;;  %v8667_v28 = vld [vmem:[#allocation2 + $0x30] sm:$0xff] }
 0xaa8   :  { %9210 = vmatprep.subr.bf16.mxu1 %v9061_v26  ;;  %v9031_v26 = vld [vmem:[#allocation2 + $0x358] sm:$0xff] }
 0xaaa   :  { %8853 = vmatpush1.bf16.msra.mxu0 %v8698_v53  ;;  %v8679_v53 = vld [vmem:[#allocation2 + $0x90] sm:$0xff] }
 0xaab   :  { %9211 = vmatpush1.bf16.msra.mxu1 %v9060_v33  ;;  %8854 = vmatprep.subr.bf16.mxu0 %v8710_v31  ;;  %v9043_v33 = vld [vmem:[#allocation2 + $0x3b8] sm:$0xff]  ;;  %v8678_v31 = vld [vmem:[#allocation2 + $0x88] sm:$0xff] }
 0xaac   :  { %9212 = vmatprep.subr.bf16.mxu1 %v9072_v40  ;;  %v9042_v40 = vld [vmem:[#allocation2 + $0x3b0] sm:$0xff] }
 0xaae   :  { %8855 = vmatpush1.bf16.msra.mxu0 %v8709_v43  ;;  %v8690_v43 = vld [vmem:[#allocation2 + $0xe8] sm:$0xff] }
 0xaaf   :  { %9213 = vmatpush1.bf16.msra.mxu1 %v9071_v51  ;;  %8856 = vmatprep.subr.bf16.mxu0 %v8721_v54  ;;  %v9054_v51 = vld [vmem:[#allocation2 + $0x410] sm:$0xff]  ;;  %v8689_v54 = vld [vmem:[#allocation2 + $0xe0] sm:$0xff] }
 0xab0   :  { %9214 = vmatprep.subr.bf16.mxu1 %v9083_v55  ;;  %v9053_v55 = vld [vmem:[#allocation2 + $0x408] sm:$0xff] }
 0xab2   :  { %8857 = vmatpush1.bf16.msra.mxu0 %v8720_v27  ;;  %v8701_v27 = vld [vmem:[#allocation2 + $0x140] sm:$0xff] }
 0xab3   :  { %9215 = vmatpush1.bf16.msra.mxu1 %v9082_v38  ;;  %8858 = vmatprep.subr.bf16.mxu0 %v8732_v24  ;;  %v9065_v38 = vld [vmem:[#allocation2 + $0x468] sm:$0xff]  ;;  %v8700_v24 = vld [vmem:[#allocation2 + $0x138] sm:$0xff] }
 0xab4   :  { %9216 = vmatprep.subr.bf16.mxu1 %v9094_v35  ;;  %v9064_v35 = vld [vmem:[#allocation2 + $0x460] sm:$0xff] }
 0xab6   :  { %8859 = vmatpush1.bf16.msra.mxu0 %v8731_v30  ;;  %v8712_v30 = vld [vmem:[#allocation2 + $0x198] sm:$0xff] }
 0xab7   :  { %9217 = vmatpush1.bf16.msra.mxu1 %v9093_v34  ;;  %8860 = vmatprep.subr.bf16.mxu0 %v8743_v37  ;;  %v9076_v34 = vld [vmem:[#allocation2 + $0x4c0] sm:$0xff]  ;;  %v8711_v37 = vld [vmem:[#allocation2 + $0x190] sm:$0xff] }
 0xab8   :  { %9218 = vmatprep.subr.bf16.mxu1 %v9105_v63  ;;  %v9075_v63 = vld [vmem:[#allocation2 + $0x4b8] sm:$0xff] }
 0xaba   :  { %8861 = vmatpush1.bf16.msra.mxu0 %v8742_v49  ;;  %v8723_v49 = vld [vmem:[#allocation2 + $0x1f0] sm:$0xff] }
 0xabb   :  { %9219 = vmatpush1.bf16.msra.mxu1 %v9104_v25  ;;  %8862 = vmatprep.subr.bf16.mxu0 %v8754_v39  ;;  %v9087_v25 = vld [vmem:[#allocation2 + $0x518] sm:$0xff]  ;;  %v8722_v39 = vld [vmem:[#allocation2 + $0x1e8] sm:$0xff] }
 0xabc   :  { %9220 = vmatprep.subr.bf16.mxu1 %v9116_v50  ;;  %v9086_v50 = vld [vmem:[#allocation2 + $0x510] sm:$0xff] }
 0xabe   :  { %8863 = vmatpush1.bf16.msra.mxu0 %v8753_v46  ;;  %v8734_v46 = vld [vmem:[#allocation2 + $0x248] sm:$0xff] }
 0xabf   :  { %9221 = vmatpush1.bf16.msra.mxu1 %v9115_v45  ;;  %8887 = vmatprep.subr.bf16.mxu0 %v8668_v52  ;;  %v9098_v45 = vld [vmem:[#allocation2 + $0x570] sm:$0xff]  ;;  %v8733_v52 = vld [vmem:[#allocation2 + $0x240] sm:$0xff] }
 0xac0   :  { %9286 = vmatprep.subr.bf16.mxu1 %v9032_v44  ;;  %v9097_v44 = vld [vmem:[#allocation2 + $0x568] sm:$0xff] }
 0xac1   :  { %8879 = vmatmul.mubr.bf16.vlgmr.msra.gmra.mrb[76].mxu0 %v18737_v42 }
 0xac2   :  { %9237 = vmatmul.mubr.bf16.vlgmr.msra.gmra.mrb[72].mxu1 %v18737_v42  ;;  %8888 = vmatpush1.bf16.msra.mxu0 %v8667_v28  ;;  %v8745_v28 = vld [vmem:[#allocation2 + $0x2a0] sm:$0xff] }
 0xac3   :  { %9287 = vmatpush1.bf16.msra.mxu1 %v9031_v26  ;;  %8889 = vmatprep.subr.bf16.mxu0 %v8679_v53  ;;  %v9109_v26 = vld [vmem:[#allocation2 + $0x5c8] sm:$0xff]  ;;  %v8744_v53 = vld [vmem:[#allocation2 + $0x298] sm:$0xff] }
 0xac4   :  { %9288 = vmatprep.subr.bf16.mxu1 %v9043_v33  ;;  %12943 = vmatprep.mubr.msk.bf16.mxu0 %vm8760_vm4, %v18729_v32  ;;  %v9108_v33 = vld [vmem:[#allocation2 + $0x5c0] sm:$0xff] }
 0xac5   :  { %12950 = vmatprep.mubr.msk.bf16.mxu1 %vm8760_vm4, %v18729_v32 }
 0xac6   :  { %8890 = vmatpush1.bf16.msra.mxu0 %v8678_v31  ;;  %v8756_v31 = vld [vmem:[#allocation2 + $0x2f8] sm:$0xff] }
 0xac7   :  { %9289 = vmatpush1.bf16.msra.mxu1 %v9042_v40  ;;  %8891 = vmatprep.subr.bf16.mxu0 %v8690_v43  ;;  %v9120_v40 = vld [vmem:[#allocation2 + $0x620] sm:$0xff]  ;;  %v8755_v43 = vld [vmem:[#allocation2 + $0x2f0] sm:$0xff] }
 0xac8   :  { %9290 = vmatprep.subr.bf16.mxu1 %v9054_v51  ;;  %v9119_v51 = vld [vmem:[#allocation2 + $0x618] sm:$0xff] }
 0xaca   :  { %8892 = vmatpush1.bf16.msra.mxu0 %v8689_v54  ;;  %v8671_v54 = vld [vmem:[#allocation2 + $0x50] sm:$0xff] }
 0xacb   :  { %9291 = vmatpush1.bf16.msra.mxu1 %v9053_v55  ;;  %8893 = vmatprep.subr.bf16.mxu0 %v8701_v27  ;;  %v8682_v55 = vld [vmem:[#allocation2 + $0xa8] sm:$0xff]  ;;  %v8693_v27 = vld [vmem:[#allocation2 + $0x100] sm:$0xff] }
 0xacc   :  { %9292 = vmatprep.subr.bf16.mxu1 %v9065_v38  ;;  %v8704_v38 = vld [vmem:[#allocation2 + $0x158] sm:$0xff] }
 0xace   :  { %8894 = vmatpush1.bf16.msra.mxu0 %v8700_v24  ;;  %v8715_v24 = vld [vmem:[#allocation2 + $0x1b0] sm:$0xff] }
 0xacf   :  { %9293 = vmatpush1.bf16.msra.mxu1 %v9064_v35  ;;  %8895 = vmatprep.subr.bf16.mxu0 %v8712_v30  ;;  %v8726_v35 = vld [vmem:[#allocation2 + $0x208] sm:$0xff]  ;;  %v8737_v30 = vld [vmem:[#allocation2 + $0x260] sm:$0xff] }
 0xad0   :  { %9294 = vmatprep.subr.bf16.mxu1 %v9076_v34  ;;  %v8748_v34 = vld [vmem:[#allocation2 + $0x2b8] sm:$0xff] }
 0xad2   :  { %8896 = vmatpush1.bf16.msra.mxu0 %v8711_v37  ;;  %v8759_v37 = vld [vmem:[#allocation2 + $0x310] sm:$0xff] }
 0xad3   :  { %9295 = vmatpush1.bf16.msra.mxu1 %v9075_v63  ;;  %8897 = vmatprep.subr.bf16.mxu0 %v8723_v49  ;;  %v9026_v63 = vld [vmem:[#allocation2 + $0x330] sm:$0xff]  ;;  %v9025_v49 = vld [vmem:[#allocation2 + $0x328] sm:$0xff] }
 0xad4   :  { %9296 = vmatprep.subr.bf16.mxu1 %v9087_v25  ;;  %v9037_v25 = vld [vmem:[#allocation2 + $0x388] sm:$0xff] }
 0xad6   :  { %8898 = vmatpush1.bf16.msra.mxu0 %v8722_v39  ;;  %v9036_v39 = vld [vmem:[#allocation2 + $0x380] sm:$0xff] }
 0xad7   :  { %9297 = vmatpush1.bf16.msra.mxu1 %v9086_v50  ;;  %8899 = vmatprep.subr.bf16.mxu0 %v8734_v46  ;;  %v9048_v50 = vld [vmem:[#allocation2 + $0x3e0] sm:$0xff]  ;;  %v9047_v46 = vld [vmem:[#allocation2 + $0x3d8] sm:$0xff] }
 0xad8   :  { %9298 = vmatprep.subr.bf16.mxu1 %v9098_v45  ;;  %v9059_v45 = vld [vmem:[#allocation2 + $0x438] sm:$0xff] }
 0xada   :  { %8900 = vmatpush1.bf16.msra.mxu0 %v8733_v52  ;;  %v9058_v52 = vld [vmem:[#allocation2 + $0x430] sm:$0xff] }
 0xadb   :  { %9299 = vmatpush1.bf16.msra.mxu1 %v9097_v44  ;;  %8901 = vmatprep.subr.bf16.mxu0 %v8745_v28  ;;  %v9070_v44 = vld [vmem:[#allocation2 + $0x490] sm:$0xff]  ;;  %v9069_v28 = vld [vmem:[#allocation2 + $0x488] sm:$0xff] }
 0xadc   :  { %9300 = vmatprep.subr.bf16.mxu1 %v9109_v26  ;;  %v9081_v26 = vld [vmem:[#allocation2 + $0x4e8] sm:$0xff] }
 0xade   :  { %8902 = vmatpush1.bf16.msra.mxu0 %v8744_v53  ;;  %v9080_v53 = vld [vmem:[#allocation2 + $0x4e0] sm:$0xff] }
 0xadf   :  { %9301 = vmatpush1.bf16.msra.mxu1 %v9108_v33  ;;  %8903 = vmatprep.subr.bf16.mxu0 %v8756_v31  ;;  %v9092_v33 = vld [vmem:[#allocation2 + $0x540] sm:$0xff]  ;;  %v9091_v31 = vld [vmem:[#allocation2 + $0x538] sm:$0xff] }
 0xae0   :  { %9302 = vmatprep.subr.bf16.mxu1 %v9120_v40  ;;  %v9103_v40 = vld [vmem:[#allocation2 + $0x598] sm:$0xff] }
 0xae2   :  { %8904 = vmatpush1.bf16.msra.mxu0 %v8755_v43  ;;  %v9102_v43 = vld [vmem:[#allocation2 + $0x590] sm:$0xff] }
 0xae3   :  { %9303 = vmatpush1.bf16.msra.mxu1 %v9119_v51  ;;  %8969 = vmatprep.subr.bf16.mxu0 %v19878_v47  ;;  %v9114_v51 = vld [vmem:[#allocation2 + $0x5f0] sm:$0xff] }
 0xae5   :  { %8920 = vmatmul.mubr.bf16.vlgmr.msra.gmra.mrb[80].mxu0 %v18737_v42 }
 0xae6   :  { %9319 = vmatmul.mubr.bf16.vlgmr.msra.gmra.mrb[76].mxu1 %v18737_v42  ;;  %8970 = vmatpush1.bf16.msra.mxu0 %v8671_v54  ;;  %v9113_v54 = vld [vmem:[#allocation2 + $0x5e8] sm:$0xff] }
 0xae7   :  { %12945 = vmatprep.mubr.msk.bf16.mxu0 %vm8760_vm4, %v18729_v32  ;;  %8971 = vmatprep.subr.bf16.mxu0 %v19878_v47 }
 0xae8   :  { %9456 = vmatprep.mubr.bf16.mxu1 %v19878_v47 }
 0xaea   :  { %8972 = vmatpush1.bf16.msra.mxu0 %v8682_v55  ;;  %v9030_v55 = vld [vmem:[#allocation2 + $0x350] sm:$0xff] }
 0xaeb   :  { %8973 = vmatprep.subr.bf16.mxu0 %v19878_v47 }
 0xaee   :  { %8974 = vmatpush1.bf16.msra.mxu0 %v8693_v27  ;;  %v9029_v27 = vld [vmem:[#allocation2 + $0x348] sm:$0xff] }
 0xaef   :  { %8975 = vmatprep.subr.bf16.mxu0 %v19878_v47 }
 0xaf2   :  { %8976 = vmatpush1.bf16.msra.mxu0 %v8704_v38  ;;  %v9041_v38 = vld [vmem:[#allocation2 + $0x3a8] sm:$0xff] }
 0xaf3   :  { %8977 = vmatprep.subr.bf16.mxu0 %v19878_v47 }
 0xaf6   :  { %8978 = vmatpush1.bf16.msra.mxu0 %v8715_v24  ;;  %v9040_v24 = vld [vmem:[#allocation2 + $0x3a0] sm:$0xff] }
 0xaf7   :  { %8979 = vmatprep.subr.bf16.mxu0 %v19878_v47 }
 0xafa   :  { %8980 = vmatpush1.bf16.msra.mxu0 %v8726_v35  ;;  %v9052_v35 = vld [vmem:[#allocation2 + $0x400] sm:$0xff] }
 0xafb   :  { %8981 = vmatprep.subr.bf16.mxu0 %v19878_v47 }
 0xafe   :  { %8982 = vmatpush1.bf16.msra.mxu0 %v8737_v30  ;;  %v9051_v30 = vld [vmem:[#allocation2 + $0x3f8] sm:$0xff] }
 0xaff   :  { %8983 = vmatprep.subr.bf16.mxu0 %v19878_v47 }
 0xb02   :  { %8984 = vmatpush1.bf16.msra.mxu0 %v8748_v34  ;;  %v9063_v34 = vld [vmem:[#allocation2 + $0x458] sm:$0xff] }
 0xb03   :  { %8985 = vmatprep.subr.bf16.mxu0 %v19878_v47 }
 0xb06   :  { %8986 = vmatpush1.bf16.msra.mxu0 %v8759_v37  ;;  %v9062_v37 = vld [vmem:[#allocation2 + $0x450] sm:$0xff] }
 0xb07   :  { %9163 = vmatprep.subr.bf16.mxu0 %v9026_v63  ;;  %v9074_v63 = vld [vmem:[#allocation2 + $0x4b0] sm:$0xff] }
 0xb09   :  { %9002 = vmatmul.mubr.bf16.vlgmr.msra.gmra.mrb[84].mxu0 %v18737_v42 }
 0xb0a   :  { %9164 = vmatpush1.bf16.msra.mxu0 %v9025_v49  ;;  %12947 = vmatprep.mubr.msk.bf16.mxu0 %vm8760_vm4, %v18729_v32  ;;  %v9073_v49 = vld [vmem:[#allocation2 + $0x4a8] sm:$0xff] }
 0xb0b   :  { %9165 = vmatprep.subr.bf16.mxu0 %v9037_v25  ;;  %v9085_v25 = vld [vmem:[#allocation2 + $0x508] sm:$0xff] }
 0xb0e   :  { %9166 = vmatpush1.bf16.msra.mxu0 %v9036_v39  ;;  %v9084_v39 = vld [vmem:[#allocation2 + $0x500] sm:$0xff] }
 0xb0f   :  { %9167 = vmatprep.subr.bf16.mxu0 %v9048_v50  ;;  %v9096_v50 = vld [vmem:[#allocation2 + $0x560] sm:$0xff] }
 0xb12   :  { %9168 = vmatpush1.bf16.msra.mxu0 %v9047_v46  ;;  %v9095_v46 = vld [vmem:[#allocation2 + $0x558] sm:$0xff] }
 0xb13   :  { %9169 = vmatprep.subr.bf16.mxu0 %v9059_v45  ;;  %v9107_v45 = vld [vmem:[#allocation2 + $0x5b8] sm:$0xff] }
 0xb16   :  { %9170 = vmatpush1.bf16.msra.mxu0 %v9058_v52  ;;  %v9106_v52 = vld [vmem:[#allocation2 + $0x5b0] sm:$0xff] }
 0xb17   :  { %9171 = vmatprep.subr.bf16.mxu0 %v9070_v44  ;;  %v9118_v44 = vld [vmem:[#allocation2 + $0x610] sm:$0xff] }
 0xb1a   :  { %9172 = vmatpush1.bf16.msra.mxu0 %v9069_v28  ;;  %v9117_v28 = vld [vmem:[#allocation2 + $0x608] sm:$0xff] }
 0xb1b   :  { %9173 = vmatprep.subr.bf16.mxu0 %v9081_v26 }
 0xb1e   :  { %9174 = vmatpush1.bf16.msra.mxu0 %v9080_v53 }
 0xb1f   :  { %9175 = vmatprep.subr.bf16.mxu0 %v9092_v33 }
 0xb22   :  { %9176 = vmatpush1.bf16.msra.mxu0 %v9091_v31 }
 0xb23   :  { %9177 = vmatprep.subr.bf16.mxu0 %v9103_v40 }
 0xb26   :  { %9178 = vmatpush1.bf16.msra.mxu0 %v9102_v43 }
 0xb27   :  { %9179 = vmatprep.subr.bf16.mxu0 %v9114_v51 }
 0xb2a   :  { %9180 = vmatpush1.bf16.msra.mxu0 %v9113_v54  ;;  %v9033_v54 = vld [vmem:[#allocation2 + $0x368] sm:$0xff] }
 0xb2b   :  { %9245 = vmatprep.subr.bf16.mxu0 %v9030_v55 }
 0xb2d   :  { %9196 = vmatmul.mubr.bf16.vlgmr.msra.gmra.mrb[88].mxu0 %v18737_v42 }
 0xb2e   :  { %9246 = vmatpush1.bf16.msra.mxu0 %v9029_v27  ;;  %12949 = vmatprep.mubr.msk.bf16.mxu0 %vm8760_vm4, %v18729_v32  ;;  %v9044_v27 = vld [vmem:[#allocation2 + $0x3c0] sm:$0xff] }
 0xb2f   :  { %9247 = vmatprep.subr.bf16.mxu0 %v9041_v38  ;;  %v9055_v38 = vld [vmem:[#allocation2 + $0x418] sm:$0xff] }
 0xb32   :  { %9248 = vmatpush1.bf16.msra.mxu0 %v9040_v24  ;;  %v9066_v24 = vld [vmem:[#allocation2 + $0x470] sm:$0xff] }
 0xb33   :  { %9249 = vmatprep.subr.bf16.mxu0 %v9052_v35  ;;  %v9077_v35 = vld [vmem:[#allocation2 + $0x4c8] sm:$0xff] }
 0xb36   :  { %9250 = vmatpush1.bf16.msra.mxu0 %v9051_v30  ;;  %v9088_v30 = vld [vmem:[#allocation2 + $0x520] sm:$0xff] }
 0xb37   :  { %9251 = vmatprep.subr.bf16.mxu0 %v9063_v34  ;;  %v9099_v34 = vld [vmem:[#allocation2 + $0x578] sm:$0xff] }
 0xb3a   :  { %9252 = vmatpush1.bf16.msra.mxu0 %v9062_v37  ;;  %v9110_v37 = vld [vmem:[#allocation2 + $0x5d0] sm:$0xff] }
 0xb3b   :  { %9253 = vmatprep.subr.bf16.mxu0 %v9074_v63  ;;  %v9121_v63 = vld [vmem:[#allocation2 + $0x628] sm:$0xff] }
 0xb3e   :  { %9254 = vmatpush1.bf16.msra.mxu0 %v9073_v49 }
 0xb3f   :  { %9255 = vmatprep.subr.bf16.mxu0 %v9085_v25 }
 0xb42   :  { %9256 = vmatpush1.bf16.msra.mxu0 %v9084_v39 }
 0xb43   :  { %9257 = vmatprep.subr.bf16.mxu0 %v9096_v50 }
 0xb46   :  { %9258 = vmatpush1.bf16.msra.mxu0 %v9095_v46 }
 0xb47   :  { %9259 = vmatprep.subr.bf16.mxu0 %v9107_v45 }
 0xb4a   :  { %9260 = vmatpush1.bf16.msra.mxu0 %v9106_v52 }
 0xb4b   :  { %9261 = vmatprep.subr.bf16.mxu0 %v9118_v44 }
 0xb4c   :  { %v18777_v26 = vpop.f32.mrb[68].mxu0 }
 0xb4d   :  { %v18779_v53 = vpop.f32.mrb[64].mxu1  ;;  %v18781_v33 = vpop.f32.mrb[69].mxu0 }
 0xb4e   :  { %v18783_v31 = vpop.f32.mrb[65].mxu1  ;;  %v8802_v40 = vpop.f32.mrb[70].mxu0  ;;  %9262 = vmatpush1.bf16.msra.mxu0 %v9117_v28 }
 0xb4f   :  { %v8966_v43 = vpop.f32.mrb[66].mxu1  ;;  %v8803_v51 = vpop.f32.mrb[71].mxu0  ;;  %9327 = vmatprep.subr.bf16.mxu0 %v19878_v47 }
 0xb50   :  { %v8967_v55 = vpop.f32.mrb[67].mxu1  ;;  %v18808_v51 = vld [vmem:[%s19555_s6 + $0x8] sm:$0x7f]  }
 0xb51   :  { %9278 = vmatmul.mubr.bf16.vlgmr.msra.gmra.mrb[92].mxu0 %v18737_v42 }
 0xb52   :  { %9328 = vmatpush1.bf16.msra.mxu0 %v9033_v54  ;;  %12951 = vmatprep.mubr.msk.bf16.mxu0 %vm8760_vm4, %v18729_v32 }
 0xb53   :  { %9329 = vmatprep.subr.bf16.mxu0 %v19878_v47 }
 0xb56   :  { %9330 = vmatpush1.bf16.msra.mxu0 %v9044_v27 }
 0xb57   :  { %9331 = vmatprep.subr.bf16.mxu0 %v19878_v47 }
 0xb5a   :  { %9332 = vmatpush1.bf16.msra.mxu0 %v9055_v38 }
 0xb5b   :  { %9333 = vmatprep.subr.bf16.mxu0 %v19878_v47 }
 0xb5e   :  { %9334 = vmatpush1.bf16.msra.mxu0 %v9066_v24 }
 0xb5f   :  { %9335 = vmatprep.subr.bf16.mxu0 %v19878_v47 }
 0xb62   :  { %9336 = vmatpush1.bf16.msra.mxu0 %v9077_v35 }
 0xb63   :  { %9337 = vmatprep.subr.bf16.mxu0 %v19878_v47 }
 0xb66   :  { %9338 = vmatpush1.bf16.msra.mxu0 %v9088_v30 }
 0xb67   :  { %9339 = vmatprep.subr.bf16.mxu0 %v19878_v47 }
 0xb6a   :  { %9340 = vmatpush1.bf16.msra.mxu0 %v9099_v34 }
 0xb6b   :  { %9341 = vmatprep.subr.bf16.mxu0 %v19878_v47 }
 0xb6e   :  { %9342 = vmatpush1.bf16.msra.mxu0 %v9110_v37 }
 0xb6f   :  { %9343 = vmatprep.subr.bf16.mxu0 %v19878_v47 }
 0xb70   :  { %v18797_v49 = vpop.f32.mrb[72].mxu0 }
 0xb71   :  { %v9156_v25 = vpop.f32.mrb[68].mxu1  ;;  %v18799_v39 = vpop.f32.mrb[73].mxu0 }
 0xb72   :  { %v9370_v50 = vpack.c.bf16 %v9156_v25, %v9156_v25  ;;  %v9158_v46 = vpop.f32.mrb[69].mxu1  ;;  %v8843_v45 = vpop.f32.mrb[74].mxu0  ;;  %9344 = vmatpush1.bf16.msra.mxu0 %v9121_v63 }
 0xb73   :  { %v9371_v52 = vpack.c.bf16 %v9158_v46, %v9158_v46  ;;  %v9160_v44 = vpop.f32.mrb[70].mxu1  ;;  %v8844_v28 = vpop.f32.mrb[75].mxu0 }
 0xb74   :  { %v9392_v40 = vsel %vm9390_vm5, %v9370_v50, 0  ;;  %v9161_v43 = vpop.f32.mrb[71].mxu1 }
 0xb75   :  { %12955 = vmatprep.subr.msk.bf16.mxu1 %vm9390_vm5, %v9371_v52  ;;  %9360 = vmatmul.mubr.bf16.vlgmr.msra.gmra.mrb[96].mxu0 %v18737_v42 }
 0xb76   :  { %9425 = vmatpush1.bf16.msra.mxu1 %v9392_v40  ;;  %9542 = vmatprep.mubr.bf16.mxu0 %v19878_v47 }
 0xb79   :  { %12956 = vmatmul.mubr.msk.bf16.vlgmr.msra.gmra.mrb[80].mxu1 %vm9386_vm6, %v18808_v51 }
 0xb7a   :  { %9499 = vmatprep.mubr.bf16.mxu1 %v19878_v47 }
 0xb94   :  { %v8880_v54 = vpop.f32.mrb[76].mxu0 }
 0xb95   :  { %v9238_v55 = vpop.f32.mrb[72].mxu1  ;;  %v8882_v27 = vpop.f32.mrb[77].mxu0 }
 0xb96   :  { %v9374_v38 = vpack.c.bf16 %v9238_v55, %v9238_v55  ;;  %v9240_v24 = vpop.f32.mrb[73].mxu1  ;;  %v8884_v35 = vpop.f32.mrb[78].mxu0 }
 0xb97   :  { %v9375_v30 = vpack.c.bf16 %v9240_v24, %v9240_v24  ;;  %v9242_v34 = vpop.f32.mrb[74].mxu1  ;;  %v8885_v37 = vpop.f32.mrb[79].mxu0  ;;  %v9015_v35 = vpack.c.bf16 %v8880_v54, %v8880_v54  ;;  %v9019_v54 = vpack.c.bf16 %v18779_v53, %v18779_v53 }
 0xb98   :  { %v9404_v63 = vsel %vm9390_vm5, %v9374_v38, 0  ;;  %v9243_v25 = vpop.f32.mrb[75].mxu1  ;;  %v9020_v34 = vpack.c.bf16 %v18783_v31, %v18783_v31 }
 0xb99   :  { %12959 = vmatprep.subr.msk.bf16.mxu0 %vm9390_vm5, %v9375_v30  ;;  %v9016_v30 = vpack.c.bf16 %v8882_v27, %v8882_v27  ;;  %v9701_v37 = vsel %vm9390_vm5, %v9015_v35, 0  ;;  %v18837_v27 = vld [vmem:[%s19555_s6] sm:$0x7f]   ;;  %v9713_v31 = vsel %vm9390_vm5, %v9019_v54, 0  ;;  %v10034_v54 = vld [vmem:[#allocation2 + $0x7f0] sm:$0xff] }
 0xb9a   :  { %9511 = vmatpush1.bf16.msra.mxu0 %v9404_v63  ;;  %v10012_v35 = vld [vmem:[#allocation2 + $0x740] sm:$0xff] }
 0xb9d   :  { %12960 = vmatmul.mubr.msk.bf16.vlgmr.msra.gmra.mrb[100].mxu0 %vm9386_vm6, %v18808_v51 }
 0xb9e   :  { %9628 = vmatprep.mubr.bf16.mxu0 %v19878_v47 }
 0xbb8   :  { %v18818_v50 = vpop.f32.mrb[80].mxu0 }
 0xbb9   :  { %v9320_v46 = vpop.f32.mrb[76].mxu1  ;;  %v18820_v52 = vpop.f32.mrb[81].mxu0 }
 0xbba   :  { %v9378_v45 = vpack.c.bf16 %v9320_v46, %v9320_v46  ;;  %v9322_v44 = vpop.f32.mrb[77].mxu1  ;;  %v8925_v40 = vpop.f32.mrb[82].mxu0 }
 0xbbb   :  { %v9379_v28 = vpack.c.bf16 %v9322_v44, %v9322_v44  ;;  %v9324_v43 = vpop.f32.mrb[78].mxu1  ;;  %v8926_v38 = vpop.f32.mrb[83].mxu0  ;;  %v9978_v40 = vld [vmem:[#allocation2 + $0x630] sm:$0xff] }
 0xbbc   :  { %v9416_v55 = vsel %vm9390_vm5, %v9378_v45, 0  ;;  %v9325_v24 = vpop.f32.mrb[79].mxu1  ;;  %v9979_v45 = vld [vmem:[#allocation2 + $0x638] sm:$0xff]  ;;  %v9990_v43 = vld [vmem:[#allocation2 + $0x690] sm:$0xff]  ;;  %v10001_v38 = vld [vmem:[#allocation2 + $0x6e8] sm:$0xff] }
 0xbbd   :  { %12963 = vmatprep.subr.msk.bf16.mxu0 %vm9390_vm5, %v9379_v28  ;;  %v10000_v24 = vld [vmem:[#allocation2 + $0x6e0] sm:$0xff] }
 0xbbe   :  { %9597 = vmatpush1.bf16.msra.mxu0 %v9416_v55  ;;  %v9989_v55 = vld [vmem:[#allocation2 + $0x688] sm:$0xff] }
 0xbbf   :  { %12971 = vmatprep.subr.msk.bf16.mxu0 %vm9390_vm5, %v9016_v30  ;;  %v10011_v30 = vld [vmem:[#allocation2 + $0x738] sm:$0xff] }
 0xbc1   :  { %12964 = vmatmul.mubr.msk.bf16.vlgmr.msra.gmra.mrb[104].mxu0 %vm9386_vm6, %v18808_v51 }
 0xbc2   :  { %9808 = vmatpush1.bf16.msra.mxu0 %v9701_v37  ;;  %9839 = vmatprep.mubr.bf16.mxu0 %v19878_v47  ;;  %v10022_v37 = vld [vmem:[#allocation2 + $0x790] sm:$0xff] }
 0xbc3   :  { %12975 = vmatprep.subr.msk.bf16.mxu0 %vm9390_vm5, %v9020_v34  ;;  %v10023_v34 = vld [vmem:[#allocation2 + $0x798] sm:$0xff] }
 0xbc9   :  { %12972 = vmatmul.mubr.msk.bf16.vlgmr.msra.gmra.mrb[100].mxu0 %vm9386_vm6, %v18837_v27 }
 0xbca   :  { %9894 = vmatpush1.bf16.msra.mxu0 %v9713_v31  ;;  %9925 = vmatprep.mubr.bf16.mxu0 %v19878_v47  ;;  %v10033_v31 = vld [vmem:[#allocation2 + $0x7e8] sm:$0xff] }
 0xbcb   :  { %13741 = vmatprep.subr.bf16.mxu0 %v19877_v41 }
 0xbd1   :  { %12976 = vmatmul.mubr.msk.bf16.vlgmr.msra.gmra.mrb[104].mxu0 %vm9386_vm6, %v18837_v27 }
 0xbd2   :  { %13743 = vmatprep.mubr.msk.bf16.mxu0 %vm14254_vm0, %v19877_v41 }
 0xbdc   :  { %v9003_v53 = vpop.f32.mrb[84].mxu0 }
 0xbdd   :  { %v9021_v63 = vpack.c.bf16 %v9003_v53, %v9003_v53  ;;  %v9005_v25 = vpop.f32.mrb[85].mxu0  ;;  %v10045_v53 = vld [vmem:[#allocation2 + $0x848] sm:$0xff] }
 0xbde   :  { %v9006_v46 = vpop.f32.mrb[86].mxu0  ;;  %v10056_v25 = vld [vmem:[#allocation2 + $0x8a0] sm:$0xff] }
 0xbdf   :  { %v9719_v44 = vsel %vm9390_vm5, %v9021_v63, 0  ;;  %v9007_v28 = vpop.f32.mrb[87].mxu0  ;;  %v10044_v63 = vld [vmem:[#allocation2 + $0x840] sm:$0xff]  ;;  %v10055_v46 = vld [vmem:[#allocation2 + $0x898] sm:$0xff] }
 0xbe0   :  { %13742 = vmatpush3.bf16.msra.mxu0 %v9719_v44 }
 0xbe1   :  { %10077 = vmatprep.subr.bf16.mxu0 %v9979_v45  ;;  %v10067_v45 = vld [vmem:[#allocation2 + $0x8f8] sm:$0xff] }
 0xbe3   :  { %13744 = vmatmul.mubr.msk.bf16.vlgmr.msra.gmra.mrb[108].mxu0 %vm9386_vm6, %v18837_v27 }
 0xbe4   :  { %10078 = vmatpush1.bf16.msra.mxu0 %v9978_v40  ;;  %12978 = vmatprep.mubr.msk.bf16.mxu0 %vm8760_vm4, %v18729_v32 }
 0xbe5   :  { %10079 = vmatprep.subr.bf16.mxu0 %v9990_v43  ;;  %v10066_v43 = vld [vmem:[#allocation2 + $0x8f0] sm:$0xff] }
 0xbe8   :  { %10080 = vmatpush1.bf16.msra.mxu0 %v9989_v55 }
 0xbe9   :  { %10081 = vmatprep.subr.bf16.mxu0 %v10001_v38 }
 0xbec   :  { %10082 = vmatpush1.bf16.msra.mxu0 %v10000_v24  ;;  %v9983_v24 = vld [vmem:[#allocation2 + $0x658] sm:$0xff] }
 0xbed   :  { %10083 = vmatprep.subr.bf16.mxu0 %v10012_v35 }
 0xbf0   :  { %10084 = vmatpush1.bf16.msra.mxu0 %v10011_v30 }
 0xbf1   :  { %10085 = vmatprep.subr.bf16.mxu0 %v10023_v34  ;;  %v9982_v34 = vld [vmem:[#allocation2 + $0x650] sm:$0xff] }
 0xbf4   :  { %10086 = vmatpush1.bf16.msra.mxu0 %v10022_v37  ;;  %v9994_v37 = vld [vmem:[#allocation2 + $0x6b0] sm:$0xff] }
 0xbf5   :  { %10087 = vmatprep.subr.bf16.mxu0 %v10034_v54  ;;  %v9993_v54 = vld [vmem:[#allocation2 + $0x6a8] sm:$0xff] }
 0xbf8   :  { %10088 = vmatpush1.bf16.msra.mxu0 %v10033_v31  ;;  %v10005_v31 = vld [vmem:[#allocation2 + $0x708] sm:$0xff] }
 0xbf9   :  { %10089 = vmatprep.subr.bf16.mxu0 %v10045_v53  ;;  %v10004_v53 = vld [vmem:[#allocation2 + $0x700] sm:$0xff] }
 0xbfc   :  { %10090 = vmatpush1.bf16.msra.mxu0 %v10044_v63  ;;  %v10016_v63 = vld [vmem:[#allocation2 + $0x760] sm:$0xff] }
 0xbfd   :  { %10091 = vmatprep.subr.bf16.mxu0 %v10056_v25  ;;  %v10015_v25 = vld [vmem:[#allocation2 + $0x758] sm:$0xff] }
 0xc00   :  { %v9197_v44 = vpop.f32.mrb[88].mxu0  ;;  %10092 = vmatpush1.bf16.msra.mxu0 %v10055_v46  ;;  %v10027_v46 = vld [vmem:[#allocation2 + $0x7b8] sm:$0xff] }
 0xc01   :  { %v9372_v28 = vpack.c.bf16 %v9197_v44, %v9197_v44  ;;  %v9199_v40 = vpop.f32.mrb[89].mxu0  ;;  %10093 = vmatprep.subr.bf16.mxu0 %v10067_v45  ;;  %v10026_v45 = vld [vmem:[#allocation2 + $0x7b0] sm:$0xff] }
 0xc02   :  { %v9373_v55 = vpack.c.bf16 %v9199_v40, %v9199_v40  ;;  %v9201_v38 = vpop.f32.mrb[90].mxu0  ;;  %v10038_v44 = vld [vmem:[#allocation2 + $0x810] sm:$0xff]  ;;  %v10049_v40 = vld [vmem:[#allocation2 + $0x868] sm:$0xff] }
 0xc03   :  { %v9398_v35 = vsel %vm9390_vm5, %v9372_v28, 0  ;;  %v9202_v30 = vpop.f32.mrb[91].mxu0  ;;  %v10037_v28 = vld [vmem:[#allocation2 + $0x808] sm:$0xff]  ;;  %v10059_v38 = vld [vmem:[#allocation2 + $0x8b8] sm:$0xff] }
 0xc04   :  { %12957 = vmatprep.subr.msk.bf16.mxu1 %vm9390_vm5, %v9373_v55  ;;  %10094 = vmatpush1.bf16.msra.mxu0 %v10066_v43  ;;  %v10048_v43 = vld [vmem:[#allocation2 + $0x860] sm:$0xff] }
 0xc05   :  { %9468 = vmatpush1.bf16.msra.mxu1 %v9398_v35  ;;  %10159 = vmatprep.subr.bf16.mxu0 %v9983_v24  ;;  %v10060_v55 = vld [vmem:[#allocation2 + $0x8c0] sm:$0xff]  ;;  %v10071_v24 = vld [vmem:[#allocation2 + $0x918] sm:$0xff] }
 0xc07   :  { %10110 = vmatmul.mubr.bf16.vlgmr.msra.gmra.mrb[112].mxu0 %v18737_v42 }
 0xc08   :  { %10160 = vmatpush1.bf16.msra.mxu0 %v9982_v34  ;;  %12958 = vmatmul.mubr.msk.bf16.vlgmr.msra.gmra.mrb[84].mxu1 %vm9386_vm6, %v18808_v51 }
 0xc09   :  { %10161 = vmatprep.subr.bf16.mxu0 %v9994_v37  ;;  %12980 = vmatprep.mubr.msk.bf16.mxu0 %vm8760_vm4, %v18729_v32  ;;  %v10070_v37 = vld [vmem:[#allocation2 + $0x910] sm:$0xff] }
 0xc0a   :  { %9585 = vmatprep.mubr.bf16.mxu1 %v19878_v47 }
 0xc0c   :  { %10162 = vmatpush1.bf16.msra.mxu0 %v9993_v54 }
 0xc0d   :  { %10163 = vmatprep.subr.bf16.mxu0 %v10005_v31 }
 0xc10   :  { %10164 = vmatpush1.bf16.msra.mxu0 %v10004_v53  ;;  %v9987_v53 = vld [vmem:[#allocation2 + $0x678] sm:$0xff] }
 0xc11   :  { %10165 = vmatprep.subr.bf16.mxu0 %v10016_v63 }
 0xc14   :  { %10166 = vmatpush1.bf16.msra.mxu0 %v10015_v25 }
 0xc15   :  { %10167 = vmatprep.subr.bf16.mxu0 %v10027_v46  ;;  %v9986_v46 = vld [vmem:[#allocation2 + $0x670] sm:$0xff] }
 0xc18   :  { %10168 = vmatpush1.bf16.msra.mxu0 %v10026_v45  ;;  %v9998_v45 = vld [vmem:[#allocation2 + $0x6d0] sm:$0xff] }
 0xc19   :  { %10169 = vmatprep.subr.bf16.mxu0 %v10038_v44  ;;  %v9997_v44 = vld [vmem:[#allocation2 + $0x6c8] sm:$0xff] }
 0xc1c   :  { %10170 = vmatpush1.bf16.msra.mxu0 %v10037_v28  ;;  %v10009_v28 = vld [vmem:[#allocation2 + $0x728] sm:$0xff] }
 0xc1d   :  { %10171 = vmatprep.subr.bf16.mxu0 %v10049_v40  ;;  %v10008_v40 = vld [vmem:[#allocation2 + $0x720] sm:$0xff] }
 0xc20   :  { %10172 = vmatpush1.bf16.msra.mxu0 %v10048_v43  ;;  %v10020_v43 = vld [vmem:[#allocation2 + $0x780] sm:$0xff] }
 0xc21   :  { %10173 = vmatprep.subr.bf16.mxu0 %v10060_v55  ;;  %v10019_v55 = vld [vmem:[#allocation2 + $0x778] sm:$0xff] }
 0xc24   :  { %v9279_v35 = vpop.f32.mrb[92].mxu0  ;;  %10174 = vmatpush1.bf16.msra.mxu0 %v10059_v38  ;;  %v10031_v38 = vld [vmem:[#allocation2 + $0x7d8] sm:$0xff] }
 0xc25   :  { %v9376_v30 = vpack.c.bf16 %v9279_v35, %v9279_v35  ;;  %v9281_v34 = vpop.f32.mrb[93].mxu0  ;;  %10175 = vmatprep.subr.bf16.mxu0 %v10071_v24  ;;  %v10030_v24 = vld [vmem:[#allocation2 + $0x7d0] sm:$0xff] }
 0xc26   :  { %v9377_v54 = vpack.c.bf16 %v9281_v34, %v9281_v34  ;;  %v9283_v31 = vpop.f32.mrb[94].mxu0  ;;  %v10042_v35 = vld [vmem:[#allocation2 + $0x830] sm:$0xff]  ;;  %v10053_v34 = vld [vmem:[#allocation2 + $0x888] sm:$0xff] }
 0xc27   :  { %v9410_v63 = vsel %vm9390_vm5, %v9376_v30, 0  ;;  %v9284_v25 = vpop.f32.mrb[95].mxu0  ;;  %v10041_v30 = vld [vmem:[#allocation2 + $0x828] sm:$0xff]  ;;  %v10063_v31 = vld [vmem:[#allocation2 + $0x8d8] sm:$0xff] }
 0xc28   :  { %12961 = vmatprep.subr.msk.bf16.mxu1 %vm9390_vm5, %v9377_v54  ;;  %10176 = vmatpush1.bf16.msra.mxu0 %v10070_v37  ;;  %v10052_v37 = vld [vmem:[#allocation2 + $0x880] sm:$0xff] }
 0xc29   :  { %9554 = vmatpush1.bf16.msra.mxu1 %v9410_v63  ;;  %10241 = vmatprep.subr.bf16.mxu0 %v9987_v53  ;;  %v10064_v54 = vld [vmem:[#allocation2 + $0x8e0] sm:$0xff]  ;;  %v10075_v53 = vld [vmem:[#allocation2 + $0x938] sm:$0xff] }
 0xc2a   :  { %13735 = vmatprep.subr.bf16.mxu1 %v19877_v41 }
 0xc2b   :  { %10192 = vmatmul.mubr.bf16.vlgmr.msra.gmra.mrb[116].mxu0 %v18737_v42 }
 0xc2c   :  { %10242 = vmatpush1.bf16.msra.mxu0 %v9986_v46  ;;  %12962 = vmatmul.mubr.msk.bf16.vlgmr.msra.gmra.mrb[88].mxu1 %vm9386_vm6, %v18808_v51 }
 0xc2d   :  { %10243 = vmatprep.subr.bf16.mxu0 %v9998_v45  ;;  %13737 = vmatprep.mubr.msk.bf16.mxu1 %vm14254_vm0, %v19877_v41  ;;  %v10074_v45 = vld [vmem:[#allocation2 + $0x930] sm:$0xff] }
 0xc2e   :  { %12982 = vmatprep.mubr.msk.bf16.mxu0 %vm8760_vm4, %v18729_v32 }
 0xc30   :  { %10244 = vmatpush1.bf16.msra.mxu0 %v9997_v44 }
 0xc31   :  { %10245 = vmatprep.subr.bf16.mxu0 %v10009_v28  ;;  %v9011_v28 = vpack.c.bf16 %v18777_v26, %v18777_v26  ;;  %v9013_v26 = vpack.c.bf16 %v18797_v49, %v18797_v49  ;;  %v9980_v49 = vld [vmem:[#allocation2 + $0x640] sm:$0xff] }
 0xc34   :  { %10246 = vmatpush1.bf16.msra.mxu0 %v10008_v40  ;;  %v9012_v40 = vpack.c.bf16 %v18781_v33, %v18781_v33  ;;  %v9695_v33 = vsel %vm9390_vm5, %v9013_v26, 0  ;;  %v9995_v26 = vld [vmem:[#allocation2 + $0x6b8] sm:$0xff] }
 0xc35   :  { %10247 = vmatprep.subr.bf16.mxu0 %v10020_v43 }
 0xc38   :  { %10248 = vmatpush1.bf16.msra.mxu0 %v10019_v55 }
 0xc39   :  { %10249 = vmatprep.subr.bf16.mxu0 %v10031_v38  ;;  %v9689_v38 = vsel %vm9390_vm5, %v9011_v28, 0  ;;  %v10057_v28 = vld [vmem:[#allocation2 + $0x8a8] sm:$0xff] }
 0xc3c   :  { %10250 = vmatpush1.bf16.msra.mxu0 %v10030_v24  ;;  %v9014_v24 = vpack.c.bf16 %v18799_v39, %v18799_v39  ;;  %v9018_v39 = vpack.c.bf16 %v18820_v52, %v18820_v52  ;;  %v9992_v52 = vld [vmem:[#allocation2 + $0x6a0] sm:$0xff] }
 0xc3d   :  { %10251 = vmatprep.subr.bf16.mxu0 %v10042_v35  ;;  %v9981_v35 = vld [vmem:[#allocation2 + $0x648] sm:$0xff] }
 0xc40   :  { %10252 = vmatpush1.bf16.msra.mxu0 %v10041_v30 }
 0xc41   :  { %10253 = vmatprep.subr.bf16.mxu0 %v10053_v34  ;;  %v10003_v34 = vld [vmem:[#allocation2 + $0x6f8] sm:$0xff] }
 0xc44   :  { %10254 = vmatpush1.bf16.msra.mxu0 %v10052_v37  ;;  %v10002_v37 = vld [vmem:[#allocation2 + $0x6f0] sm:$0xff] }
 0xc45   :  { %10255 = vmatprep.subr.bf16.mxu0 %v10064_v54  ;;  %v10014_v54 = vld [vmem:[#allocation2 + $0x750] sm:$0xff] }
 0xc48   :  { %v9361_v63 = vpop.f32.mrb[96].mxu0  ;;  %10256 = vmatpush1.bf16.msra.mxu0 %v10063_v31  ;;  %v10013_v31 = vld [vmem:[#allocation2 + $0x748] sm:$0xff] }
 0xc49   :  { %v9380_v25 = vpack.c.bf16 %v9361_v63, %v9361_v63  ;;  %v9363_v46 = vpop.f32.mrb[97].mxu0  ;;  %10257 = vmatprep.subr.bf16.mxu0 %v10075_v53  ;;  %v10025_v53 = vld [vmem:[#allocation2 + $0x7a8] sm:$0xff]  ;;  %v10024_v63 = vld [vmem:[#allocation2 + $0x7a0] sm:$0xff] }
 0xc4a   :  { %v9364_v44 = vpop.f32.mrb[98].mxu0  ;;  %v10047_v46 = vld [vmem:[#allocation2 + $0x858] sm:$0xff] }
 0xc4b   :  { %v9422_v43 = vsel %vm9390_vm5, %v9380_v25, 0  ;;  %v9365_v55 = vpop.f32.mrb[99].mxu0  ;;  %v10036_v25 = vld [vmem:[#allocation2 + $0x800] sm:$0xff]  ;;  %v10058_v44 = vld [vmem:[#allocation2 + $0x8b0] sm:$0xff] }
 0xc4c   :  { %13736 = vmatpush3.bf16.msra.mxu1 %v9422_v43  ;;  %10258 = vmatpush1.bf16.msra.mxu0 %v10074_v45  ;;  %v10046_v45 = vld [vmem:[#allocation2 + $0x850] sm:$0xff]  ;;  %v10068_v43 = vld [vmem:[#allocation2 + $0x900] sm:$0xff]  ;;  %v9985_v55 = vld [vmem:[#allocation2 + $0x668] sm:$0xff] }
 0xc4d   :  { %12967 = vmatprep.subr.msk.bf16.mxu1 %vm9390_vm5, %v9012_v40  ;;  %v10069_v40 = vld [vmem:[#allocation2 + $0x908] sm:$0xff] }
 0xc4f   :  { %13738 = vmatmul.mubr.msk.bf16.vlgmr.msra.gmra.mrb[92].mxu1 %vm9386_vm6, %v18808_v51  ;;  %10274 = vmatmul.mubr.bf16.vlgmr.msra.gmra.mrb[120].mxu0 %v18737_v42  ;;  %v9017_v51 = vpack.c.bf16 %v18818_v50, %v18818_v50  ;;  %v9991_v50 = vld [vmem:[#allocation2 + $0x698] sm:$0xff] }
 0xc50   :  { %9722 = vmatpush1.bf16.msra.mxu1 %v9689_v38  ;;  %9753 = vmatprep.mubr.bf16.mxu1 %v19878_v47  ;;  %v9984_v38 = vld [vmem:[#allocation2 + $0x660] sm:$0xff] }
 0xc51   :  { %12969 = vmatprep.subr.msk.bf16.mxu1 %vm9390_vm5, %v9014_v24  ;;  %10495 = vmatprep.mubr.bf16.mxu0 %v19878_v47  ;;  %v9707_v30 = vsel %vm9390_vm5, %v9017_v51, 0  ;;  %v9996_v24 = vld [vmem:[#allocation2 + $0x6c0] sm:$0xff]  ;;  %v10018_v51 = vld [vmem:[#allocation2 + $0x770] sm:$0xff] }
 0xc57   :  { %12968 = vmatmul.mubr.msk.bf16.vlgmr.msra.gmra.mrb[80].mxu1 %vm9386_vm6, %v18837_v27 }
 0xc58   :  { %9765 = vmatpush1.bf16.msra.mxu1 %v9695_v33  ;;  %9796 = vmatprep.mubr.bf16.mxu1 %v19878_v47  ;;  %v10007_v33 = vld [vmem:[#allocation2 + $0x718] sm:$0xff] }
 0xc59   :  { %12973 = vmatprep.subr.msk.bf16.mxu1 %vm9390_vm5, %v9018_v39  ;;  %v10006_v39 = vld [vmem:[#allocation2 + $0x710] sm:$0xff] }
 0xc5f   :  { %12970 = vmatmul.mubr.msk.bf16.vlgmr.msra.gmra.mrb[84].mxu1 %vm9386_vm6, %v18837_v27 }
 0xc60   :  { %9851 = vmatpush1.bf16.msra.mxu1 %v9707_v30  ;;  %9882 = vmatprep.mubr.bf16.mxu1 %v19878_v47  ;;  %v10029_v30 = vld [vmem:[#allocation2 + $0x7c8] sm:$0xff] }
 0xc61   :  { %10118 = vmatprep.subr.bf16.mxu1 %v9981_v35  ;;  %v10017_v35 = vld [vmem:[#allocation2 + $0x768] sm:$0xff] }
 0xc67   :  { %12974 = vmatmul.mubr.msk.bf16.vlgmr.msra.gmra.mrb[88].mxu1 %vm9386_vm6, %v18837_v27  ;;  %v10035_v27 = vld [vmem:[#allocation2 + $0x7f8] sm:$0xff] }
 0xc68   :  { %10119 = vmatpush1.bf16.msra.mxu1 %v9980_v49  ;;  %12979 = vmatprep.mubr.msk.bf16.mxu1 %vm8760_vm4, %v18729_v32  ;;  %v10028_v49 = vld [vmem:[#allocation2 + $0x7c0] sm:$0xff] }
 0xc69   :  { %10120 = vmatprep.subr.bf16.mxu1 %v9992_v52  ;;  %v10040_v52 = vld [vmem:[#allocation2 + $0x820] sm:$0xff] }
 0xc6c   :  { %10121 = vmatpush1.bf16.msra.mxu1 %v9991_v50  ;;  %v10039_v50 = vld [vmem:[#allocation2 + $0x818] sm:$0xff] }
 0xc6d   :  { %10122 = vmatprep.subr.bf16.mxu1 %v10003_v34  ;;  %v10051_v34 = vld [vmem:[#allocation2 + $0x878] sm:$0xff] }
 0xc70   :  { %10123 = vmatpush1.bf16.msra.mxu1 %v10002_v37  ;;  %v10050_v37 = vld [vmem:[#allocation2 + $0x870] sm:$0xff] }
 0xc71   :  { %10124 = vmatprep.subr.bf16.mxu1 %v10014_v54  ;;  %v10062_v54 = vld [vmem:[#allocation2 + $0x8d0] sm:$0xff] }
 0xc74   :  { %10125 = vmatpush1.bf16.msra.mxu1 %v10013_v31  ;;  %v10061_v31 = vld [vmem:[#allocation2 + $0x8c8] sm:$0xff] }
 0xc75   :  { %10126 = vmatprep.subr.bf16.mxu1 %v10025_v53  ;;  %v10073_v53 = vld [vmem:[#allocation2 + $0x928] sm:$0xff] }
 0xc78   :  { %10127 = vmatpush1.bf16.msra.mxu1 %v10024_v63  ;;  %v10072_v63 = vld [vmem:[#allocation2 + $0x920] sm:$0xff] }
 0xc79   :  { %10128 = vmatprep.subr.bf16.mxu1 %v10036_v25  ;;  %v9988_v25 = vld [vmem:[#allocation2 + $0x680] sm:$0xff] }
 0xc7c   :  { %10129 = vmatpush1.bf16.msra.mxu1 %v10035_v27  ;;  %v9999_v27 = vld [vmem:[#allocation2 + $0x6d8] sm:$0xff] }
 0xc7d   :  { %10130 = vmatprep.subr.bf16.mxu1 %v10047_v46  ;;  %v10010_v46 = vld [vmem:[#allocation2 + $0x730] sm:$0xff] }
 0xc80   :  { %10131 = vmatpush1.bf16.msra.mxu1 %v10046_v45 }
 0xc81   :  { %10132 = vmatprep.subr.bf16.mxu1 %v10058_v44 }
 0xc84   :  { %10133 = vmatpush1.bf16.msra.mxu1 %v10057_v28 }
 0xc85   :  { %10134 = vmatprep.subr.bf16.mxu1 %v10069_v40  ;;  %v10021_v40 = vld [vmem:[#allocation2 + $0x788] sm:$0xff] }
 0xc88   :  { %10135 = vmatpush1.bf16.msra.mxu1 %v10068_v43 }
 0xc89   :  { %10200 = vmatprep.subr.bf16.mxu1 %v9985_v55  ;;  %v10032_v55 = vld [vmem:[#allocation2 + $0x7e0] sm:$0xff] }
 0xc8b   :  { %10151 = vmatmul.mubr.bf16.vlgmr.msra.gmra.mrb[96].mxu1 %v18737_v42 }
 0xc8c   :  { %10201 = vmatpush1.bf16.msra.mxu1 %v9984_v38  ;;  %12981 = vmatprep.mubr.msk.bf16.mxu1 %vm8760_vm4, %v18729_v32  ;;  %v10054_v38 = vld [vmem:[#allocation2 + $0x890] sm:$0xff] }
 0xc8d   :  { %10202 = vmatprep.subr.bf16.mxu1 %v9996_v24  ;;  %v10065_v24 = vld [vmem:[#allocation2 + $0x8e8] sm:$0xff] }
 0xc90   :  { %10203 = vmatpush1.bf16.msra.mxu1 %v9995_v26  ;;  %v10076_v26 = vld [vmem:[#allocation2 + $0x940] sm:$0xff] }
 0xc91   :  { %10204 = vmatprep.subr.bf16.mxu1 %v10007_v33 }
 0xc94   :  { %10205 = vmatpush1.bf16.msra.mxu1 %v10006_v39 }
 0xc95   :  { %10206 = vmatprep.subr.bf16.mxu1 %v10018_v51 }
 0xc98   :  { %10207 = vmatpush1.bf16.msra.mxu1 %v10017_v35 }
 0xc99   :  { %10208 = vmatprep.subr.bf16.mxu1 %v10029_v30 }
 0xc9c   :  { %10209 = vmatpush1.bf16.msra.mxu1 %v10028_v49 }
 0xc9d   :  { %10210 = vmatprep.subr.bf16.mxu1 %v10040_v52 }
 0xca0   :  { %10211 = vmatpush1.bf16.msra.mxu1 %v10039_v50  ;;  %v18927_v50 = vld [vmem:[%s19555_s6 + $0x10] sm:$0x7f]  }
 0xca1   :  { %10212 = vmatprep.subr.bf16.mxu1 %v10051_v34 }
 0xca4   :  { %10213 = vmatpush1.bf16.msra.mxu1 %v10050_v37 }
 0xca5   :  { %10214 = vmatprep.subr.bf16.mxu1 %v10062_v54 }
 0xca8   :  { %10215 = vmatpush1.bf16.msra.mxu1 %v10061_v31 }
 0xca9   :  { %10216 = vmatprep.subr.bf16.mxu1 %v10073_v53 }
 0xcac   :  { %10217 = vmatpush1.bf16.msra.mxu1 %v10072_v63 }
 0xcad   :  { %10282 = vmatprep.subr.bf16.mxu1 %v19878_v47 }
 0xcaf   :  { %10233 = vmatmul.mubr.bf16.vlgmr.msra.gmra.mrb[100].mxu1 %v18737_v42 }
 0xcb0   :  { %10283 = vmatpush1.bf16.msra.mxu1 %v9988_v25  ;;  %12983 = vmatprep.mubr.msk.bf16.mxu1 %vm8760_vm4, %v18729_v32  ;;  %v10043_v32 = vld [vmem:[#allocation2 + $0x838] sm:$0xff] }
 0xcb1   :  { %10284 = vmatprep.subr.bf16.mxu1 %v19878_v47 }
 0xcb4   :  { %10285 = vmatpush1.bf16.msra.mxu1 %v9999_v27 }
 0xcb5   :  { %10286 = vmatprep.subr.bf16.mxu1 %v19878_v47 }
 0xcb6   :  { %v9970_v45 = vpop.f32.mrb[108].mxu0 }
 0xcb7   :  { %v13745_v44 = vpop.f32.mrb[109].mxu0 }
 0xcb8   :  { %10287 = vmatpush1.bf16.msra.mxu1 %v10010_v46  ;;  %v9973_v28 = vpop.f32.mrb[110].mxu0 }
 0xcb9   :  { %10288 = vmatprep.subr.bf16.mxu1 %v19878_v47  ;;  %v13746_v43 = vpop.f32.mrb[111].mxu0 }
 0xcbc   :  { %10289 = vmatpush1.bf16.msra.mxu1 %v10021_v40 }
 0xcbd   :  { %10290 = vmatprep.subr.bf16.mxu1 %v19878_v47 }
 0xcc0   :  { %10291 = vmatpush1.bf16.msra.mxu1 %v10032_v55 }
 0xcc1   :  { %10292 = vmatprep.subr.bf16.mxu1 %v19878_v47 }
 0xcc4   :  { %10293 = vmatpush1.bf16.msra.mxu1 %v10043_v32 }
 0xcc5   :  { %10294 = vmatprep.subr.bf16.mxu1 %v19878_v47 }
 0xcc8   :  { %10295 = vmatpush1.bf16.msra.mxu1 %v10054_v38 }
 0xcc9   :  { %10296 = vmatprep.subr.bf16.mxu1 %v19878_v47 }
 0xccc   :  { %10297 = vmatpush1.bf16.msra.mxu1 %v10065_v24 }
 0xccd   :  { %10298 = vmatprep.subr.bf16.mxu1 %v19878_v47 }
 0xcd0   :  { %10299 = vmatpush1.bf16.msra.mxu1 %v10076_v26 }
 0xcd3   :  { %10315 = vmatmul.mubr.bf16.vlgmr.msra.gmra.mrb[104].mxu1 %v18737_v42 }
 0xcd4   :  { %10409 = vmatprep.mubr.bf16.mxu1 %v19878_v47 }
 0xcda   :  { %v10111_v33 = vpop.f32.mrb[112].mxu0 }
 0xcdb   :  { %v10325_v39 = vpack.c.bf16 %v10111_v33, %v10111_v33  ;;  %v10113_v51 = vpop.f32.mrb[113].mxu0 }
 0xcdc   :  { %v10326_v35 = vpack.c.bf16 %v10113_v51, %v10113_v51  ;;  %v10115_v30 = vpop.f32.mrb[114].mxu0 }
 0xcdd   :  { %v10345_v49 = vsel %vm9390_vm5, %v10325_v39, 0  ;;  %v10116_v52 = vpop.f32.mrb[115].mxu0 }
 0xcde   :  { %12987 = vmatprep.subr.msk.bf16.mxu1 %vm9390_vm5, %v10326_v35 }
 0xcdf   :  { %10378 = vmatpush1.bf16.msra.mxu1 %v10345_v49 }
 0xce2   :  { %12988 = vmatmul.mubr.msk.bf16.vlgmr.msra.gmra.mrb[80].mxu1 %vm9386_vm6, %v18927_v50 }
 0xce3   :  { %10452 = vmatprep.mubr.bf16.mxu1 %v19878_v47 }
 0xcfe   :  { %v10193_v42 = vpop.f32.mrb[116].mxu0 }
 0xcff   :  { %v10329_v34 = vpack.c.bf16 %v10193_v42, %v10193_v42  ;;  %v10195_v37 = vpop.f32.mrb[117].mxu0 }
 0xd00   :  { %v10330_v54 = vpack.c.bf16 %v10195_v37, %v10195_v37  ;;  %v10197_v31 = vpop.f32.mrb[118].mxu0 }
 0xd01   :  { %v10357_v53 = vsel %vm9390_vm5, %v10329_v34, 0  ;;  %v10198_v63 = vpop.f32.mrb[119].mxu0 }
 0xd02   :  { %12991 = vmatprep.subr.msk.bf16.mxu0 %vm9390_vm5, %v10330_v54 }
 0xd03   :  { %10464 = vmatpush1.bf16.msra.mxu0 %v10357_v53 }
 0xd06   :  { %12992 = vmatmul.mubr.msk.bf16.vlgmr.msra.gmra.mrb[100].mxu0 %vm9386_vm6, %v18927_v50 }
 0xd07   :  { %10581 = vmatprep.mubr.bf16.mxu0 %v19878_v47 }
 0xd22   :  { %v9673_v25 = vpop.f32.mrb[92].mxu1  ;;  %v10275_v27 = vpop.f32.mrb[120].mxu0 }
 0xd23   :  { %v18937_v46 = vadd.f32 %v9970_v45, %v9673_v25  ;;  %v10333_v44 = vpack.c.bf16 %v10275_v27, %v10275_v27  ;;  %v13739_v40 = vpop.f32.mrb[93].mxu1  ;;  %v10277_v43 = vpop.f32.mrb[121].mxu0  ;;  %v19890_v25 = vld [vmem:[#allocation21_spill] sm:$0xff] }
 0xd24   :  { %v10334_v55 = vpack.c.bf16 %v10277_v43, %v10277_v43  ;;  %v9676_v32 = vpop.f32.mrb[94].mxu1  ;;  %v10279_v38 = vpop.f32.mrb[122].mxu0  ;;  %v19891_v43 = vld [vmem:[#allocation13_spill] sm:$0xff] }
 0xd25   :  { %v10369_v24 = vsel %vm9390_vm5, %v10333_v44, 0  ;;  %v18940_v26 = vadd.f32 %v9973_v28, %v9676_v32  ;;  %v13740_v33 = vpop.f32.mrb[95].mxu1  ;;  %v10280_v39 = vpop.f32.mrb[123].mxu0 }
 0xd26   :  { %12995 = vmatprep.subr.msk.bf16.mxu0 %vm9390_vm5, %v10334_v55 }
 0xd27   :  { %10550 = vmatpush1.bf16.msra.mxu0 %v10369_v24  ;;  %v19892_v24 = vld [vmem:[#allocation22_spill] sm:$0xff] }
 0xd28   :  { %13747 = vmatprep.subr.bf16.mxu0 %v19877_v41 }
 0xd2a   :  { %12996 = vmatmul.mubr.msk.bf16.vlgmr.msra.gmra.mrb[104].mxu0 %vm9386_vm6, %v18927_v50 }
 0xd2b   :  { %13749 = vmatprep.mubr.msk.bf16.mxu0 %vm14254_vm0, %v19877_v41 }
 0xd5e   :  { %v10152_v45 = vpop.f32.mrb[96].mxu1 }
 0xd5f   :  { %v10327_v51 = vpack.c.bf16 %v10152_v45, %v10152_v45  ;;  %v10154_v35 = vpop.f32.mrb[97].mxu1 }
 0xd60   :  { %v10328_v30 = vpack.c.bf16 %v10154_v35, %v10154_v35  ;;  %v10156_v49 = vpop.f32.mrb[98].mxu1 }
 0xd61   :  { %v10351_v28 = vsel %vm9390_vm5, %v10327_v51, 0  ;;  %v10157_v52 = vpop.f32.mrb[99].mxu1 }
 0xd62   :  { %12989 = vmatprep.subr.msk.bf16.mxu1 %vm9390_vm5, %v10328_v30  ;;  %v19893_v30 = vld [vmem:[#allocation14_spill] sm:$0xff]  ;;  %v19894_v52 = vld [vmem:[#allocation23_spill] sm:$0xff] }
 0xd63   :  { %10421 = vmatpush1.bf16.msra.mxu1 %v10351_v28 }
 0xd66   :  { %12990 = vmatmul.mubr.msk.bf16.vlgmr.msra.gmra.mrb[84].mxu1 %vm9386_vm6, %v18927_v50 }
 0xd67   :  { %10538 = vmatprep.mubr.bf16.mxu1 %v19878_v47 }
 0xd82   :  { %v10234_v42 = vpop.f32.mrb[100].mxu1 }
 0xd83   :  { %v10331_v34 = vpack.c.bf16 %v10234_v42, %v10234_v42  ;;  %v10236_v37 = vpop.f32.mrb[101].mxu1 }
 0xd84   :  { %v10332_v54 = vpack.c.bf16 %v10236_v37, %v10236_v37  ;;  %v10238_v31 = vpop.f32.mrb[102].mxu1  ;;  %v19895_v37 = vld [vmem:[#allocation15_spill] sm:$0xff] }
 0xd85   :  { %v10363_v53 = vsel %vm9390_vm5, %v10331_v34, 0  ;;  %v10239_v63 = vpop.f32.mrb[103].mxu1  ;;  %v19897_v31 = vld [vmem:[#allocation16_spill] sm:$0xff] }
 0xd86   :  { %12993 = vmatprep.subr.msk.bf16.mxu1 %vm9390_vm5, %v10332_v54  ;;  %v19896_v54 = vld [vmem:[#allocation24_spill] sm:$0xff]  ;;  %v19899_v63 = vld [vmem:[#allocation17_spill] sm:$0xff] }
 0xd87   :  { %10507 = vmatpush1.bf16.msra.mxu1 %v10363_v53  ;;  %v19898_v53 = vld [vmem:[#allocation25_spill] sm:$0xff] }
 0xd88   :  { %13125 = vmatprep.subr.bf16.mxu1 %v16153_v16 }
 0xd8a   :  { %12994 = vmatmul.mubr.msk.bf16.vlgmr.msra.gmra.mrb[88].mxu1 %vm9386_vm6, %v18927_v50 }
 0xd8b   :  { %13126 = vmatpush3.bf16.msra.mxu1 %v16113_v8 }
 0xd8c   :  { %13127 = vmatprep.subr.bf16.mxu1 %v16158_v17 }
 0xd8f   :  { %13128 = vmatpush3.bf16.msra.mxu1 %v16118_v9 }
 0xd90   :  { %13129 = vmatprep.subr.bf16.mxu1 %v16163_v18 }
 0xd93   :  { %13130 = vmatpush3.bf16.msra.mxu1 %v16123_v10 }
 0xd94   :  { %13131 = vmatprep.subr.bf16.mxu1 %v16168_v19 }
 0xd97   :  { %13132 = vmatpush3.bf16.msra.mxu1 %v16128_v11 }
 0xd98   :  { %13133 = vmatprep.subr.bf16.mxu1 %v16173_v20 }
 0xd9b   :  { %13134 = vmatpush3.bf16.msra.mxu1 %v16133_v12 }
 0xd9c   :  { %13135 = vmatprep.subr.bf16.mxu1 %v16178_v21 }
 0xd9f   :  { %13136 = vmatpush3.bf16.msra.mxu1 %v16138_v13  ;;  %v18983_v13 = vld [vmem:[%s19557_s8] sm:$0xff] }
 0xda0   :  { %13137 = vmatprep.subr.bf16.mxu1 %v16183_v22 }
 0xda3   :  { %13138 = vmatpush3.bf16.msra.mxu1 %v16143_v14  ;;  %v10662_v14 = vrot.slane %v18983_v13, %v18575_v29 }
 0xda4   :  { %13139 = vmatprep.subr.bf16.mxu1 %v16188_v23 }
 0xda6   :  { %v10316_v8 = vpop.f32.mrb[104].mxu1 }
 0xda7   :  { %v10335_v9 = vpack.c.bf16 %v10316_v8, %v10316_v8  ;;  %v10318_v10 = vpop.f32.mrb[105].mxu1  ;;  %13140 = vmatpush3.bf16.msra.mxu1 %v16148_v15  ;;  %v19900_v8 = vld [vmem:[#allocation49_spill] sm:$0xff] }
 0xda8   :  { %v10319_v11 = vpop.f32.mrb[106].mxu1  ;;  %13169 = vmatprep.subr.bf16.mxu1 %v16313_v48  ;;  %v19902_v10 = vld [vmem:[#allocation50_spill] sm:$0xff] }
 0xda9   :  { %v10375_v12 = vsel %vm9390_vm5, %v10335_v9, 0  ;;  %v10320_v16 = vpop.f32.mrb[107].mxu1  ;;  %v19901_v9 = vld [vmem:[#allocation41_spill] sm:$0xff]  ;;  %v19903_v11 = vld [vmem:[#allocation42_spill] sm:$0xff] }
 0xdaa   :  { %13748 = vmatpush3.bf16.msra.mxu0 %v10375_v12  ;;  %v19904_v12 = vld [vmem:[#allocation51_spill] sm:$0xff] }
 0xdab   :  { %13103 = vmatprep.subr.bf16.mxu0 %v16073_v0  ;;  %v10666_v0 = vrot.slane %v18983_v13, %v18578_v36  ;;  %v19905_v16 = vld [vmem:[#allocation43_spill] sm:$0xff] }
 0xdad   :  { %13750 = vmatmul.mubr.msk.bf16.vlgmr.msra.gmra.mrb[124].mxu0 %vm9386_vm6, %v18927_v50  ;;  %v19888_v50 = vld [vmem:[#allocation12_spill] sm:$0xff] }
 0xdae   :  { %13104 = vmatpush3.bf16.msra.mxu0 %v16033_v56 }
 0xdaf   :  { %13105 = vmatprep.subr.bf16.mxu0 %v16078_v1 }
 0xdb2   :  { %13106 = vmatpush3.bf16.msra.mxu0 %v16038_v57 }
 0xdb3   :  { %13107 = vmatprep.subr.bf16.mxu0 %v16083_v2 }
 0xdb5   :  { %v10411_v15 = vpop.f32.mrb[80].mxu1 }
 0xdb6   :  { %v10714_v17 = vadd.f32 %v10662_v14, %v10411_v15  ;;  %13108 = vmatpush3.bf16.msra.mxu0 %v16043_v58  ;;  %v10413_v56 = vpop.f32.mrb[81].mxu1  ;;  %v19881_v58 = vld [vmem:[#allocation9_spill] sm:$0xff]  ;;  %v19907_v15 = vld [vmem:[#allocation44_spill] sm:$0xff] }
 0xdb7   :  { %v10715_v1 = vadd.f32 %v10666_v0, %v10413_v56  ;;  %v10415_v18 = vpop.f32.mrb[82].mxu1  ;;  %13109 = vmatprep.subr.bf16.mxu0 %v16088_v3  ;;  %v19883_v3 = vld [vmem:[#allocation10_spill] sm:$0xff]  ;;  %v19908_v56 = vld [vmem:[#allocation53_spill] sm:$0xff] }
 0xdb8   :  { %v10725_v19 = vadd.f32 %v10662_v14, %v10415_v18  ;;  %v10417_v20 = vpop.f32.mrb[83].mxu1  ;;  %v10736_v21 = vmax.f32 %v10714_v17, 0.0  ;;  %v19906_v14 = vld [vmem:[#allocation52_spill] sm:$0xff] }
 0xdb9   :  { %v10726_v57 = vadd.f32 %v10666_v0, %v10417_v20  ;;  %v10737_v2 = vmax.f32 %v10715_v1, 0.0  ;;  %v19045_v0 = vld [vmem:[%s19557_s8 + $0x8] sm:$0x7] }
 0xdba   :  { %v10747_v22 = vmax.f32 %v10725_v19, 0.0  ;;  %13110 = vmatpush3.bf16.msra.mxu0 %v16048_v59  ;;  %v19882_v59 = vld [vmem:[#allocation18_spill] sm:$0xff]  ;;  %v10694_v17 = vrot.slane %v19045_v0, %v18575_v29  ;;  %v10698_v1 = vrot.slane %v19045_v0, %v18578_v36  ;;  %v19909_v20 = vld [vmem:[#allocation45_spill] sm:$0xff] }
 0xdbb   :  { %v10748_v23 = vmax.f32 %v10726_v57, 0.0  ;;  %13111 = vmatprep.subr.bf16.mxu0 %v16093_v4  ;;  %v19885_v4 = vld [vmem:[#allocation11_spill] sm:$0xff]  ;;  %v19911_v29 = vld [vmem:[#allocation46_spill] sm:$0xff] }
 0xdbc   :  { %v18995_v48 = vpack.c.bf16 %v10747_v22, %v10736_v21 }
 0xdbd   :  { %v18997_v47 = vpack.c.bf16 %v10748_v23, %v10737_v2  ;;  %v19910_v2 = vld [vmem:[#allocation54_spill] sm:$0xff] }
 0xdbe   :  { %13112 = vmatpush3.bf16.msra.mxu0 %v16053_v60  ;;  %v19884_v60 = vld [vmem:[#allocation19_spill] sm:$0xff] }
 0xdbf   :  { %10888 = vmatprep.mubr.bf16.mxu0 %v18997_v47  ;;  %13113 = vmatprep.subr.bf16.mxu0 %v16098_v5  ;;  %v19886_v5 = vld [vmem:[#allocation20_spill] sm:$0xff] }
 0xdc2   :  { %13114 = vmatpush3.bf16.msra.mxu0 %v16058_v61  ;;  %v19887_v61 = vld [vmem:[#allocation313_spill] sm:$0xff] }
 0xdc3   :  { %13115 = vmatprep.subr.bf16.mxu0 %v16103_v6  ;;  %v10681_v6 = vsub.s32 5, %v19887_v61 }
 0xdc5   :  { %v10682_v27 = vrot.slane %v18983_v13, %v10681_v6  ;;  %v19912_v6 = vld [vmem:[#allocation55_spill] sm:$0xff] }
 0xdc6   :  { %13116 = vmatpush3.bf16.msra.mxu0 %v16063_v62  ;;  %v19889_v62 = vsub.s32 4, %v19887_v61 }
 0xdc7   :  { %13117 = vmatprep.subr.bf16.mxu0 %v16108_v7 }
 0xdc8   :  { %v10678_v7 = vrot.slane %v18983_v13, %v19889_v62  ;;  %v19913_v62 = vld [vmem:[#allocation47_spill] sm:$0xff] }
 0xdca   :  { %13118 = vmatpush3.bf16.msra.mxu0 %v19881_v58 }
 0xdcb   :  { %13147 = vmatprep.subr.bf16.mxu0 %v19882_v59 }
 0xdcd   :  { %10889 = vmatmul.mubr.bf16.vlgmr.msra.gmra.mrb[128].mxu0 %v18995_v48 }
 0xdce   :  { %13148 = vmatpush3.bf16.msra.mxu0 %v19883_v3 }
 0xdcf   :  { %13149 = vmatprep.subr.bf16.mxu0 %v19884_v60 }
 0xdd2   :  { %13150 = vmatpush3.bf16.msra.mxu0 %v19885_v4 }
 0xdd3   :  { %13151 = vmatprep.subr.bf16.mxu0 %v19886_v5 }
 0xdd6   :  { %13152 = vmatpush3.bf16.msra.mxu0 %v19888_v50 }
 0xdd7   :  { %13153 = vmatprep.subr.bf16.mxu0 %v19890_v25  ;;  %v19915_v25 = vld [vmem:[#allocation48_spill] sm:$0xff] }
 0xdd9   :  { %v10497_v44 = vpop.f32.mrb[100].mxu0 }
 0xdda   :  { %v10718_v40 = vadd.f32 %v10678_v7, %v10497_v44  ;;  %13154 = vmatpush3.bf16.msra.mxu0 %v19891_v43  ;;  %v10499_v55 = vpop.f32.mrb[101].mxu0  ;;  %v19917_v44 = vld [vmem:[#allocation77_spill] sm:$0xff]  ;;  %v19919_v43 = vld [vmem:[#allocation78_spill] sm:$0xff] }
 0xddb   :  { %v10719_v32 = vadd.f32 %v10682_v27, %v10499_v55  ;;  %v10501_v38 = vpop.f32.mrb[102].mxu0  ;;  %13155 = vmatprep.subr.bf16.mxu0 %v19892_v24  ;;  %v19920_v55 = vld [vmem:[#allocation87_spill] sm:$0xff]  ;;  %v19923_v24 = vld [vmem:[#allocation80_spill] sm:$0xff] }
 0xddc   :  { %v10729_v33 = vadd.f32 %v10678_v7, %v10501_v38  ;;  %v10503_v39 = vpop.f32.mrb[103].mxu0  ;;  %v10740_v51 = vmax.f32 %v10718_v40, 0.0  ;;  %v19914_v7 = vld [vmem:[#allocation56_spill] sm:$0xff]  ;;  %v19918_v40 = vld [vmem:[#allocation86_spill] sm:$0xff] }
 0xddd   :  { %v10730_v45 = vadd.f32 %v10682_v27, %v10503_v39  ;;  %v10741_v49 = vmax.f32 %v10719_v32, 0.0  ;;  %v19916_v27 = vld [vmem:[#allocation85_spill] sm:$0xff]  ;;  %v19921_v32 = vld [vmem:[#allocation79_spill] sm:$0xff]  ;;  %v19922_v38 = vld [vmem:[#allocation88_spill] sm:$0xff] }
 0xdde   :  { %v10751_v35 = vmax.f32 %v10729_v33, 0.0  ;;  %13156 = vmatpush3.bf16.msra.mxu0 %v19893_v30  ;;  %v19924_v33 = vld [vmem:[#allocation89_spill] sm:$0xff]  ;;  %v19929_v30 = vld [vmem:[#allocation83_spill] sm:$0xff] }
 0xddf   :  { %v10752_v28 = vmax.f32 %v10730_v45, 0.0  ;;  %13157 = vmatprep.subr.bf16.mxu0 %v19894_v52  ;;  %v19925_v39 = vld [vmem:[#allocation81_spill] sm:$0xff]  ;;  %v19926_v45 = vld [vmem:[#allocation90_spill] sm:$0xff] }
 0xde0   :  { %v19024_v42 = vpack.c.bf16 %v10751_v35, %v10740_v51  ;;  %v19927_v51 = vld [vmem:[#allocation82_spill] sm:$0xff]  ;;  %v19928_v35 = vld [vmem:[#allocation91_spill] sm:$0xff]  ;;  %v19932_v52 = vld [vmem:[#allocation117_spill] sm:$0xff] }
 0xde1   :  { %v19026_v34 = vpack.c.bf16 %v10752_v28, %v10741_v49  ;;  %v19930_v49 = vld [vmem:[#allocation92_spill] sm:$0xff] }
 0xde2   :  { %13158 = vmatpush3.bf16.msra.mxu0 %v19895_v37  ;;  %v19931_v28 = vld [vmem:[#allocation84_spill] sm:$0xff]  ;;  %v19933_v37 = vld [vmem:[#allocation314_spill] sm:$0xff] }
 0xde3   :  { %10970 = vmatprep.mubr.bf16.mxu0 %v19026_v34  ;;  %13159 = vmatprep.subr.bf16.mxu0 %v19896_v54  ;;  %v10670_v54 = vrot.slane %v18983_v13, %v19933_v37 }
 0xde6   :  { %13160 = vmatpush3.bf16.msra.mxu0 %v19897_v31  ;;  %v19934_v31 = vsub.s32 3, %v19887_v61 }
 0xde7   :  { %13161 = vmatprep.subr.bf16.mxu0 %v19898_v53 }
 0xde8   :  { %v10674_v53 = vrot.slane %v18983_v13, %v19934_v31 }
 0xdea   :  { %13162 = vmatpush3.bf16.msra.mxu0 %v19899_v63 }
 0xdeb   :  { %13191 = vmatprep.subr.bf16.mxu0 %v19900_v8 }
 0xded   :  { %10971 = vmatmul.mubr.bf16.vlgmr.msra.gmra.mrb[132].mxu0 %v19024_v42 }
 0xdee   :  { %13192 = vmatpush3.bf16.msra.mxu0 %v19901_v9 }
 0xdef   :  { %13193 = vmatprep.subr.bf16.mxu0 %v19902_v10 }
 0xdf2   :  { %13194 = vmatpush3.bf16.msra.mxu0 %v19903_v11 }
 0xdf3   :  { %13195 = vmatprep.subr.bf16.mxu0 %v19904_v12 }
 0xdf6   :  { %13196 = vmatpush3.bf16.msra.mxu0 %v19905_v16 }
 0xdf7   :  { %13197 = vmatprep.subr.bf16.mxu0 %v19906_v14 }
 0xdfa   :  { %13198 = vmatpush3.bf16.msra.mxu0 %v19907_v15 }
 0xdfb   :  { %13199 = vmatprep.subr.bf16.mxu0 %v19908_v56 }
 0xdfd   :  { %v10583_v18 = vpop.f32.mrb[104].mxu0 }
 0xdfe   :  { %v10722_v19 = vadd.f32 %v10694_v17, %v10583_v18  ;;  %13200 = vmatpush3.bf16.msra.mxu0 %v19909_v20  ;;  %v10585_v57 = vpop.f32.mrb[105].mxu0  ;;  %v19935_v20 = vld [vmem:[#allocation26_spill] sm:$0xff] }
 0xdff   :  { %v10723_v21 = vadd.f32 %v10698_v1, %v10585_v57  ;;  %v10587_v22 = vpop.f32.mrb[106].mxu0  ;;  %13201 = vmatprep.subr.bf16.mxu0 %v19910_v2  ;;  %v19936_v57 = vld [vmem:[#allocation109_spill] sm:$0xff]  ;;  %v19939_v2 = vld [vmem:[#allocation27_spill] sm:$0xff] }
 0xe00   :  { %v10733_v23 = vadd.f32 %v10694_v17, %v10587_v22  ;;  %v10589_v58 = vpop.f32.mrb[107].mxu0  ;;  %v10744_v3 = vmax.f32 %v10722_v19, 0.0  ;;  %v19938_v22 = vld [vmem:[#allocation118_spill] sm:$0xff] }
 0xe01   :  { %v10734_v59 = vadd.f32 %v10698_v1, %v10589_v58  ;;  %v10745_v4 = vmax.f32 %v10723_v21, 0.0  ;;  %v19937_v21 = vld [vmem:[#allocation34_spill] sm:$0xff]  ;;  %v19941_v58 = vld [vmem:[#allocation35_spill] sm:$0xff] }
 0xe02   :  { %v10755_v60 = vmax.f32 %v10733_v23, 0.0  ;;  %13202 = vmatpush3.bf16.msra.mxu0 %v19911_v29  ;;  %v19940_v23 = vld [vmem:[#allocation110_spill] sm:$0xff]  ;;  %v19945_v29 = vld [vmem:[#allocation36_spill] sm:$0xff] }
 0xe03   :  { %v10756_v5 = vmax.f32 %v10734_v59, 0.0  ;;  %13203 = vmatprep.subr.bf16.mxu0 %v19912_v6  ;;  %v19942_v59 = vld [vmem:[#allocation119_spill] sm:$0xff]  ;;  %v19948_v6 = vld [vmem:[#allocation112_spill] sm:$0xff] }
 0xe04   :  { %v19057_v36 = vpack.c.bf16 %v10755_v60, %v10744_v3  ;;  %v19943_v3 = vld [vmem:[#allocation28_spill] sm:$0xff]  ;;  %v19944_v60 = vld [vmem:[#allocation111_spill] sm:$0xff] }
 0xe05   :  { %v19059_v50 = vpack.c.bf16 %v10756_v5, %v10745_v4  ;;  %v19946_v4 = vld [vmem:[#allocation120_spill] sm:$0xff]  ;;  %v19947_v5 = vld [vmem:[#allocation29_spill] sm:$0xff] }
 0xe06   :  { %13204 = vmatpush3.bf16.msra.mxu0 %v19913_v62  ;;  %v19949_v62 = vld [vmem:[#allocation37_spill] sm:$0xff] }
 0xe07   :  { %11052 = vmatprep.mubr.bf16.mxu0 %v19059_v50  ;;  %13205 = vmatprep.subr.bf16.mxu0 %v19914_v7  ;;  %v19950_v7 = vld [vmem:[#allocation121_spill] sm:$0xff] }
 0xe0a   :  { %13206 = vmatpush3.bf16.msra.mxu0 %v19915_v25  ;;  %v19951_v25 = vld [vmem:[#allocation30_spill] sm:$0xff] }
 0xe0b   :  { %13240 = vmatprep.subr.bf16.mxu0 %v19916_v27  ;;  %v19952_v27 = vld [vmem:[#allocation113_spill] sm:$0xff] }
 0xe0d   :  { %11053 = vmatmul.mubr.bf16.vlgmr.msra.gmra.mrb[136].mxu0 %v19057_v36 }
 0xe0e   :  { %13241 = vmatpush3.bf16.msra.mxu0 %v19917_v44  ;;  %v19953_v44 = vld [vmem:[#allocation38_spill] sm:$0xff] }
 0xe0f   :  { %13242 = vmatprep.subr.bf16.mxu0 %v19918_v40  ;;  %v19954_v40 = vld [vmem:[#allocation122_spill] sm:$0xff] }
 0xe12   :  { %13243 = vmatpush3.bf16.msra.mxu0 %v19919_v43  ;;  %v10685_v43 = vsub.s32 6, %v19887_v61 }
 0xe13   :  { %13244 = vmatprep.subr.bf16.mxu0 %v19920_v55  ;;  %v10689_v55 = vsub.s32 7, %v19887_v61  ;;  %v19961_v61 = vld [vmem:[#allocation40_spill] sm:$0xff] }
 0xe16   :  { %13245 = vmatpush3.bf16.msra.mxu0 %v19921_v32  ;;  %v19955_v32 = vld [vmem:[#allocation31_spill] sm:$0xff] }
 0xe17   :  { %13246 = vmatprep.subr.bf16.mxu0 %v19922_v38  ;;  %v19956_v38 = vld [vmem:[#allocation114_spill] sm:$0xff] }
 0xe1a   :  { %13247 = vmatpush3.bf16.msra.mxu0 %v19923_v24  ;;  %v10686_v24 = vrot.slane %v18983_v13, %v10685_v43  ;;  %v19980_v43 = vld [vmem:[#allocation64_spill] sm:$0xff] }
 0xe1b   :  { %13248 = vmatprep.subr.bf16.mxu0 %v19924_v33  ;;  %v19957_v33 = vld [vmem:[#allocation39_spill] sm:$0xff] }
 0xe1e   :  { %13249 = vmatpush3.bf16.msra.mxu0 %v19925_v39  ;;  %v19958_v39 = vld [vmem:[#allocation123_spill] sm:$0xff] }
 0xe1f   :  { %13250 = vmatprep.subr.bf16.mxu0 %v19926_v45  ;;  %v10690_v45 = vrot.slane %v18983_v13, %v10689_v55  ;;  %v19981_v55 = vld [vmem:[#allocation73_spill] sm:$0xff] }
 0xe22   :  { %13251 = vmatpush3.bf16.msra.mxu0 %v19927_v51 }
 0xe23   :  { %13252 = vmatprep.subr.bf16.mxu0 %v19928_v35  ;;  %v19959_v35 = vld [vmem:[#allocation32_spill] sm:$0xff] }
 0xe26   :  { %13253 = vmatpush3.bf16.msra.mxu0 %v19929_v30  ;;  %v19960_v30 = vld [vmem:[#allocation115_spill] sm:$0xff] }
 0xe27   :  { %13254 = vmatprep.subr.bf16.mxu0 %v19930_v49 }
 0xe2a   :  { %13255 = vmatpush3.bf16.msra.mxu0 %v19931_v28 }
 0xe2b   :  { %13284 = vmatprep.subr.bf16.mxu0 %v19932_v52  ;;  %v19962_v52 = vld [vmem:[#allocation124_spill] sm:$0xff] }
 0xe39   :  { %v10454_v63 = vpop.f32.mrb[84].mxu1 }
 0xe3a   :  { %v10716_v8 = vadd.f32 %v10670_v54, %v10454_v63  ;;  %v10456_v9 = vpop.f32.mrb[85].mxu1 }
 0xe3b   :  { %v10717_v10 = vadd.f32 %v10674_v53, %v10456_v9  ;;  %v10458_v11 = vpop.f32.mrb[86].mxu1  ;;  %v19963_v9 = vld [vmem:[#allocation33_spill] sm:$0xff] }
 0xe3c   :  { %v10727_v12 = vadd.f32 %v10670_v54, %v10458_v11  ;;  %v10460_v16 = vpop.f32.mrb[87].mxu1  ;;  %v10738_v15 = vmax.f32 %v10716_v8, 0.0 }
 0xe3d   :  { %v10728_v14 = vadd.f32 %v10674_v53, %v10460_v16  ;;  %v10739_v56 = vmax.f32 %v10717_v10, 0.0  ;;  %v19964_v10 = vld [vmem:[#allocation116_spill] sm:$0xff] }
 0xe3e   :  { %v10749_v17 = vmax.f32 %v10727_v12, 0.0 }
 0xe3f   :  { %v10750_v1 = vmax.f32 %v10728_v14, 0.0 }
 0xe40   :  { %v19088_v18 = vpack.c.bf16 %v10749_v17, %v10738_v15  ;;  %v19965_v17 = vld [vmem:[#allocation57_spill] sm:$0xff] }
 0xe41   :  { %v19090_v19 = vpack.c.bf16 %v10750_v1, %v10739_v56  ;;  %v19966_v56 = vld [vmem:[#allocation141_spill] sm:$0xff]  ;;  %v19967_v1 = vld [vmem:[#allocation58_spill] sm:$0xff] }
 0xe43   :  { %10929 = vmatprep.mubr.bf16.mxu1 %v19090_v19  ;;  %11265 = vmatprep.mubr.bf16.mxu0 %v19090_v19 }
 0xe44   :  { %10930 = vmatmul.mubr.bf16.vlgmr.msra.gmra.mrb[108].mxu1 %v19088_v18  ;;  %11266 = vmatmul.mubr.bf16.vlgmr.msra.gmra.mrb[140].mxu0 %v19088_v18 }
 0xe45   :  { %13170 = vmatpush3.bf16.msra.mxu1 %v19935_v20  ;;  %13285 = vmatpush3.bf16.msra.mxu0 %v19936_v57  ;;  %v19968_v20 = vld [vmem:[#allocation142_spill] sm:$0xff]  ;;  %v19969_v57 = vld [vmem:[#allocation59_spill] sm:$0xff] }
 0xe46   :  { %13171 = vmatprep.subr.bf16.mxu1 %v19937_v21  ;;  %13286 = vmatprep.subr.bf16.mxu0 %v19938_v22  ;;  %v19970_v21 = vld [vmem:[#allocation143_spill] sm:$0xff]  ;;  %v19971_v22 = vld [vmem:[#allocation60_spill] sm:$0xff] }
 0xe49   :  { %13172 = vmatpush3.bf16.msra.mxu1 %v19939_v2  ;;  %13287 = vmatpush3.bf16.msra.mxu0 %v19940_v23  ;;  %v19972_v2 = vld [vmem:[#allocation144_spill] sm:$0xff]  ;;  %v19973_v23 = vld [vmem:[#allocation69_spill] sm:$0xff] }
 0xe4a   :  { %13173 = vmatprep.subr.bf16.mxu1 %v19941_v58  ;;  %13288 = vmatprep.subr.bf16.mxu0 %v19942_v59  ;;  %v10702_v58 = vrot.slane %v19045_v0, %v19933_v37  ;;  %v19974_v0 = vld [vmem:[#allocation61_spill] sm:$0xff]  ;;  %v19976_v37 = vld [vmem:[#allocation62_spill] sm:$0xff] }
 0xe4d   :  { %13174 = vmatpush3.bf16.msra.mxu1 %v19943_v3  ;;  %13289 = vmatpush3.bf16.msra.mxu0 %v19944_v60 }
 0xe4e   :  { %13175 = vmatprep.subr.bf16.mxu1 %v19945_v29  ;;  %13290 = vmatprep.subr.bf16.mxu0 %v19946_v4 }
 0xe51   :  { %13176 = vmatpush3.bf16.msra.mxu1 %v19947_v5  ;;  %13291 = vmatpush3.bf16.msra.mxu0 %v19948_v6 }
 0xe52   :  { %13177 = vmatprep.subr.bf16.mxu1 %v19949_v62  ;;  %13292 = vmatprep.subr.bf16.mxu0 %v19950_v7 }
 0xe55   :  { %13178 = vmatpush3.bf16.msra.mxu1 %v19951_v25  ;;  %13293 = vmatpush3.bf16.msra.mxu0 %v19952_v27 }
 0xe56   :  { %13179 = vmatprep.subr.bf16.mxu1 %v19953_v44  ;;  %13294 = vmatprep.subr.bf16.mxu0 %v19954_v40  ;;  %v19978_v44 = vld [vmem:[#allocation63_spill] sm:$0xff]  ;;  %v19979_v40 = vld [vmem:[#allocation72_spill] sm:$0xff] }
 0xe59   :  { %13180 = vmatpush3.bf16.msra.mxu1 %v19955_v32  ;;  %13295 = vmatpush3.bf16.msra.mxu0 %v19956_v38  ;;  %v19982_v32 = vld [vmem:[#allocation65_spill] sm:$0xff]  ;;  %v19983_v38 = vld [vmem:[#allocation74_spill] sm:$0xff] }
 0xe5a   :  { %13181 = vmatprep.subr.bf16.mxu1 %v19957_v33  ;;  %13296 = vmatprep.subr.bf16.mxu0 %v19958_v39 }
 0xe5d   :  { %v10540_v51 = vpop.f32.mrb[88].mxu1  ;;  %13182 = vmatpush3.bf16.msra.mxu1 %v19959_v35  ;;  %13297 = vmatpush3.bf16.msra.mxu0 %v19960_v30 }
 0xe5e   :  { %v10720_v49 = vadd.f32 %v10686_v24, %v10540_v51  ;;  %v10542_v28 = vpop.f32.mrb[89].mxu1  ;;  %13183 = vmatprep.subr.bf16.mxu1 %v19961_v61  ;;  %13298 = vmatprep.subr.bf16.mxu0 %v19962_v52  ;;  %v19987_v61 = vld [vmem:[#allocation76_spill] sm:$0xff] }
 0xe5f   :  { %v10721_v54 = vadd.f32 %v10690_v45, %v10542_v28  ;;  %v10544_v31 = vpop.f32.mrb[90].mxu1  ;;  %v19986_v28 = vld [vmem:[#allocation67_spill] sm:$0xff]  ;;  %v19988_v52 = vld [vmem:[#allocation68_spill] sm:$0xff] }
 0xe60   :  { %v10731_v53 = vadd.f32 %v10686_v24, %v10544_v31  ;;  %v10546_v63 = vpop.f32.mrb[91].mxu1  ;;  %v10742_v13 = vmax.f32 %v10720_v49, 0.0  ;;  %v19984_v24 = vld [vmem:[#allocation66_spill] sm:$0xff]  ;;  %v19990_v31 = vld [vmem:[#allocation93_spill] sm:$0xff] }
 0xe61   :  { %v10732_v8 = vadd.f32 %v10690_v45, %v10546_v63  ;;  %13184 = vmatpush3.bf16.msra.mxu1 %v19963_v9  ;;  %13299 = vmatpush3.bf16.msra.mxu0 %v19964_v10  ;;  %v10743_v12 = vmax.f32 %v10721_v54, 0.0  ;;  %v19985_v45 = vld [vmem:[#allocation75_spill] sm:$0xff]  ;;  %v19989_v54 = vld [vmem:[#allocation101_spill] sm:$0xff]  ;;  %v19992_v63 = vld [vmem:[#allocation94_spill] sm:$0xff] }
 0xe62   :  { %v10753_v11 = vmax.f32 %v10731_v53, 0.0  ;;  %13753 = vmatprep.subr.bf16.mxu1 %v19877_v41  ;;  %13765 = vmatprep.subr.bf16.mxu0 %v19877_v41  ;;  %v19991_v53 = vld [vmem:[#allocation102_spill] sm:$0xff]  ;;  %v19994_v9 = vld [vmem:[#allocation95_spill] sm:$0xff]  ;;  %v19995_v10 = vld [vmem:[#allocation104_spill] sm:$0xff] }
 0xe63   :  { %v10754_v16 = vmax.f32 %v10732_v8, 0.0  ;;  %v19993_v8 = vld [vmem:[#allocation103_spill] sm:$0xff] }
 0xe64   :  { %v19132_v14 = vpack.c.bf16 %v10753_v11, %v10742_v13  ;;  %v19996_v13 = vld [vmem:[#allocation96_spill] sm:$0xff]  ;;  %v19997_v11 = vld [vmem:[#allocation105_spill] sm:$0xff] }
 0xe65   :  { %v19134_v15 = vpack.c.bf16 %v10754_v16, %v10743_v12  ;;  %v19998_v12 = vld [vmem:[#allocation97_spill] sm:$0xff]  ;;  %v19999_v16 = vld [vmem:[#allocation106_spill] sm:$0xff] }
 0xe67   :  { %11011 = vmatprep.mubr.bf16.mxu1 %v19134_v15  ;;  %11347 = vmatprep.mubr.bf16.mxu0 %v19134_v15 }
 0xe68   :  { %11012 = vmatmul.mubr.bf16.vlgmr.msra.gmra.mrb[112].mxu1 %v19132_v14  ;;  %11348 = vmatmul.mubr.bf16.vlgmr.msra.gmra.mrb[144].mxu0 %v19132_v14 }
 0xe69   :  { %13754 = vmatpush3.bf16.msra.mxu1 %v19965_v17  ;;  %13766 = vmatpush3.bf16.msra.mxu0 %v19966_v56  ;;  %v20000_v17 = vld [vmem:[#allocation98_spill] sm:$0xff] }
 0xe6a   :  { %13755 = vmatprep.subr.bf16.mxu1 %v19877_v41  ;;  %13767 = vmatprep.subr.bf16.mxu0 %v19877_v41 }
 0xe6b   :  { %13761 = vmatprep.mubr.msk.bf16.mxu1 %vm14254_vm0, %v19877_v41  ;;  %13773 = vmatprep.mubr.msk.bf16.mxu0 %vm14254_vm0, %v19877_v41 }
 0xe6d   :  { %13756 = vmatpush3.bf16.msra.mxu1 %v19967_v1  ;;  %13768 = vmatpush3.bf16.msra.mxu0 %v19968_v20  ;;  %v20001_v20 = vld [vmem:[#allocation107_spill] sm:$0xff] }
 0xe6e   :  { %13757 = vmatprep.subr.bf16.mxu1 %v19877_v41  ;;  %13769 = vmatprep.subr.bf16.mxu0 %v19877_v41 }
 0xe71   :  { %13758 = vmatpush3.bf16.msra.mxu1 %v19969_v57  ;;  %13770 = vmatpush3.bf16.msra.mxu0 %v19970_v21 }
 0xe72   :  { %13759 = vmatprep.subr.bf16.mxu1 %v19877_v41  ;;  %13771 = vmatprep.subr.bf16.mxu0 %v19877_v41 }
 0xe75   :  { %13760 = vmatpush3.bf16.msra.mxu1 %v19971_v22  ;;  %13772 = vmatpush3.bf16.msra.mxu0 %v19972_v2 }
 0xe76   :  { %13218 = vmatprep.subr.bf16.mxu1 %v19973_v23  ;;  %v20002_v23 = vld [vmem:[#allocation99_spill] sm:$0xff] }
 0xe80   :  { %v10626_v59 = vpop.f32.mrb[124].mxu0 }
 0xe81   :  { %v10643_v3 = vadd.f32 %v10626_v59, %v18937_v46  ;;  %v13751_v60 = vpop.f32.mrb[125].mxu0  ;;  %v19975_v46 = vld [vmem:[#allocation70_spill] sm:$0xff]  ;;  %v20004_v59 = vld [vmem:[#allocation100_spill] sm:$0xff] }
 0xe82   :  { %v10629_v29 = vpop.f32.mrb[126].mxu0  ;;  %v20006_v60 = vld [vmem:[#allocation125_spill] sm:$0xff] }
 0xe83   :  { %v10724_v4 = vadd.f32 %v10702_v58, %v10643_v3  ;;  %v10654_v5 = vadd.f32 %v10629_v29, %v18940_v26  ;;  %v13752_v6 = vpop.f32.mrb[127].mxu0  ;;  %v19977_v26 = vld [vmem:[#allocation71_spill] sm:$0xff]  ;;  %v20005_v3 = vld [vmem:[#allocation133_spill] sm:$0xff]  ;;  %v20007_v29 = vld [vmem:[#allocation134_spill] sm:$0xff] }
 0xe84   :  { %v20010_v6 = vld [vmem:[#allocation127_spill] sm:$0xff] }
 0xe85   :  { %v10735_v62 = vadd.f32 %v10702_v58, %v10654_v5  ;;  %v10746_v7 = vmax.f32 %v10724_v4, 0.0  ;;  %v20003_v58 = vld [vmem:[#allocation108_spill] sm:$0xff]  ;;  %v20008_v4 = vld [vmem:[#allocation126_spill] sm:$0xff]  ;;  %v20009_v5 = vld [vmem:[#allocation135_spill] sm:$0xff] }
 0xe87   :  { %v10757_v25 = vmax.f32 %v10735_v62, 0.0  ;;  %v20011_v62 = vld [vmem:[#allocation136_spill] sm:$0xff] }
 0xe89   :  { %v19163_v27 = vpack.c.bf16 %v10757_v25, %v10746_v7  ;;  %v20012_v7 = vld [vmem:[#allocation128_spill] sm:$0xff]  ;;  %v20013_v25 = vld [vmem:[#allocation137_spill] sm:$0xff] }
 0xe8b   :  { %13762 = vmatmul.mubr.msk.bf16.vlgmr.msra.gmra.mrb[116].mxu1 %vm5847_vm2, %v19163_v27  ;;  %13774 = vmatmul.mubr.msk.bf16.vlgmr.msra.gmra.mrb[148].mxu0 %vm5847_vm2, %v19163_v27 }
 0xe8c   :  { %13219 = vmatpush3.bf16.msra.mxu1 %v19974_v0  ;;  %11224 = vmatprep.mubr.bf16.mxu1 %v18997_v47  ;;  %v20014_v0 = vld [vmem:[#allocation129_spill] sm:$0xff] }
 0xe8d   :  { %13220 = vmatprep.subr.bf16.mxu1 %v19975_v46  ;;  %v20015_v46 = vld [vmem:[#allocation138_spill] sm:$0xff] }
 0xe90   :  { %13221 = vmatpush3.bf16.msra.mxu1 %v19976_v37  ;;  %v20016_v37 = vld [vmem:[#allocation130_spill] sm:$0xff] }
 0xe91   :  { %13222 = vmatprep.subr.bf16.mxu1 %v19977_v26 }
 0xe94   :  { %13223 = vmatpush3.bf16.msra.mxu1 %v19978_v44 }
 0xe95   :  { %13224 = vmatprep.subr.bf16.mxu1 %v19979_v40  ;;  %v20017_v40 = vld [vmem:[#allocation139_spill] sm:$0xff] }
 0xe98   :  { %13225 = vmatpush3.bf16.msra.mxu1 %v19980_v43 }
 0xe99   :  { %13226 = vmatprep.subr.bf16.mxu1 %v19981_v55 }
 0xe9c   :  { %13227 = vmatpush3.bf16.msra.mxu1 %v19982_v32 }
 0xe9d   :  { %13228 = vmatprep.subr.bf16.mxu1 %v19983_v38 }
 0xea0   :  { %13229 = vmatpush3.bf16.msra.mxu1 %v19984_v24  ;;  %v13119_v33 = vpop.f32.mrb[128].mxu0  ;;  %v20018_v24 = vld [vmem:[#allocation131_spill] sm:$0xff] }
 0xea1   :  { %v13120_v39 = vpop.f32.mrb[129].mxu0  ;;  %13230 = vmatprep.subr.bf16.mxu1 %v19985_v45  ;;  %v20021_v45 = vld [vmem:[#allocation153_spill] sm:$0xff] }
 0xea2   :  { %v19182_v51 = vadd.f32 %v13120_v39, %v13119_v33  ;;  %v13122_v35 = vpop.f32.mrb[130].mxu0  ;;  %v20019_v33 = vld [vmem:[#allocation140_spill] sm:$0xff] }
 0xea3   :  { %v13123_v30 = vpop.f32.mrb[131].mxu0  ;;  %v20020_v39 = vld [vmem:[#allocation132_spill] sm:$0xff] }
 0xea4   :  { %v19184_v49 = vadd.f32 %v13123_v30, %v13122_v35  ;;  %13231 = vmatpush3.bf16.msra.mxu1 %v19986_v28  ;;  %v20022_v35 = vld [vmem:[#allocation145_spill] sm:$0xff]  ;;  %v20023_v30 = vld [vmem:[#allocation154_spill] sm:$0xff] }
 0xea5   :  { %13232 = vmatprep.subr.bf16.mxu1 %v19987_v61  ;;  %v20024_v28 = vld [vmem:[#allocation146_spill] sm:$0xff]  ;;  %v20025_v61 = vld [vmem:[#allocation155_spill] sm:$0xff] }
 0xea8   :  { %13233 = vmatpush3.bf16.msra.mxu1 %v19988_v52  ;;  %v20026_v52 = vld [vmem:[#allocation147_spill] sm:$0xff] }
 0xea9   :  { %13262 = vmatprep.subr.bf16.mxu1 %v19989_v54  ;;  %v20027_v54 = vld [vmem:[#allocation156_spill] sm:$0xff] }
 0xeab   :  { %11225 = vmatmul.mubr.bf16.vlgmr.msra.gmra.mrb[120].mxu1 %v18995_v48 }
 0xeac   :  { %13263 = vmatpush3.bf16.msra.mxu1 %v19990_v31  ;;  %11306 = vmatprep.mubr.bf16.mxu1 %v19026_v34  ;;  %v20028_v31 = vld [vmem:[#allocation148_spill] sm:$0xff] }
 0xead   :  { %13264 = vmatprep.subr.bf16.mxu1 %v19991_v53  ;;  %v20029_v53 = vld [vmem:[#allocation157_spill] sm:$0xff] }
 0xeb0   :  { %13265 = vmatpush3.bf16.msra.mxu1 %v19992_v63  ;;  %v20030_v63 = vld [vmem:[#allocation149_spill] sm:$0xff] }
 0xeb1   :  { %13266 = vmatprep.subr.bf16.mxu1 %v19993_v8  ;;  %v20031_v8 = vld [vmem:[#allocation158_spill] sm:$0xff] }
 0xeb4   :  { %13267 = vmatpush3.bf16.msra.mxu1 %v19994_v9  ;;  %v20032_v9 = vld [vmem:[#allocation150_spill] sm:$0xff] }
 0xeb5   :  { %13268 = vmatprep.subr.bf16.mxu1 %v19995_v10  ;;  %v20033_v10 = vld [vmem:[#allocation159_spill] sm:$0xff] }
 0xeb8   :  { %13269 = vmatpush3.bf16.msra.mxu1 %v19996_v13  ;;  %v20034_v13 = vld [vmem:[#allocation151_spill] sm:$0xff] }
 0xeb9   :  { %13270 = vmatprep.subr.bf16.mxu1 %v19997_v11  ;;  %v20035_v11 = vld [vmem:[#allocation160_spill] sm:$0xff] }
 0xebc   :  { %13271 = vmatpush3.bf16.msra.mxu1 %v19998_v12  ;;  %v20036_v12 = vld [vmem:[#allocation152_spill] sm:$0xff] }
 0xebd   :  { %13272 = vmatprep.subr.bf16.mxu1 %v19999_v16  ;;  %v20037_v16 = vld [vmem:[#allocation185_spill] sm:$0xff] }
 0xec0   :  { %13273 = vmatpush3.bf16.msra.mxu1 %v20000_v17  ;;  %v13163_v56 = vpop.f32.mrb[132].mxu0  ;;  %v20038_v17 = vld [vmem:[#allocation177_spill] sm:$0xff] }
 0xec1   :  { %v13164_v1 = vpop.f32.mrb[133].mxu0  ;;  %13274 = vmatprep.subr.bf16.mxu1 %v20001_v20  ;;  %v20041_v20 = vld [vmem:[#allocation187_spill] sm:$0xff] }
 0xec2   :  { %v19204_v57 = vadd.f32 %v13164_v1, %v13163_v56  ;;  %v13166_v21 = vpop.f32.mrb[134].mxu0  ;;  %v20039_v56 = vld [vmem:[#allocation186_spill] sm:$0xff] }
 0xec3   :  { %v13167_v22 = vpop.f32.mrb[135].mxu0  ;;  %v20040_v1 = vld [vmem:[#allocation178_spill] sm:$0xff] }
 0xec4   :  { %v19206_v2 = vadd.f32 %v13167_v22, %v13166_v21  ;;  %13275 = vmatpush3.bf16.msra.mxu1 %v20002_v23  ;;  %v20042_v21 = vld [vmem:[#allocation179_spill] sm:$0xff]  ;;  %v20043_v22 = vld [vmem:[#allocation188_spill] sm:$0xff] }
 0xec5   :  { %13276 = vmatprep.subr.bf16.mxu1 %v20003_v58 }
 0xec8   :  { %13277 = vmatpush3.bf16.msra.mxu1 %v20004_v59  ;;  %v20044_v59 = vld [vmem:[#allocation180_spill] sm:$0xff] }
 0xec9   :  { %13306 = vmatprep.subr.bf16.mxu1 %v20005_v3 }
 0xecb   :  { %11307 = vmatmul.mubr.bf16.vlgmr.msra.gmra.mrb[124].mxu1 %v19024_v42 }
 0xecc   :  { %13307 = vmatpush3.bf16.msra.mxu1 %v20006_v60  ;;  %11388 = vmatprep.mubr.bf16.mxu1 %v19059_v50 }
 0xecd   :  { %13308 = vmatprep.subr.bf16.mxu1 %v20007_v29 }
 0xed0   :  { %13309 = vmatpush3.bf16.msra.mxu1 %v20008_v4 }
 0xed1   :  { %13310 = vmatprep.subr.bf16.mxu1 %v20009_v5 }
 0xed4   :  { %13311 = vmatpush3.bf16.msra.mxu1 %v20010_v6 }
 0xed5   :  { %13312 = vmatprep.subr.bf16.mxu1 %v20011_v62  ;;  %v20045_v62 = vld [vmem:[#allocation189_spill] sm:$0xff] }
 0xed8   :  { %13313 = vmatpush3.bf16.msra.mxu1 %v20012_v7 }
 0xed9   :  { %13314 = vmatprep.subr.bf16.mxu1 %v20013_v25 }
 0xedc   :  { %13315 = vmatpush3.bf16.msra.mxu1 %v20014_v0 }
 0xedd   :  { %13316 = vmatprep.subr.bf16.mxu1 %v20015_v46 }
 0xee0   :  { %13317 = vmatpush3.bf16.msra.mxu1 %v20016_v37  ;;  %v13207_v26 = vpop.f32.mrb[136].mxu0 }
 0xee1   :  { %v13208_v44 = vpop.f32.mrb[137].mxu0  ;;  %13318 = vmatprep.subr.bf16.mxu1 %v20017_v40  ;;  %v20047_v40 = vld [vmem:[#allocation190_spill] sm:$0xff] }
 0xee2   :  { %v19226_v43 = vadd.f32 %v13208_v44, %v13207_v26  ;;  %v13210_v55 = vpop.f32.mrb[138].mxu0  ;;  %v20046_v26 = vld [vmem:[#allocation181_spill] sm:$0xff] }
 0xee3   :  { %v13211_v32 = vpop.f32.mrb[139].mxu0 }
 0xee4   :  { %v19228_v38 = vadd.f32 %v13211_v32, %v13210_v55  ;;  %13319 = vmatpush3.bf16.msra.mxu1 %v20018_v24  ;;  %v20048_v24 = vld [vmem:[#allocation182_spill] sm:$0xff] }
 0xee5   :  { %13320 = vmatprep.subr.bf16.mxu1 %v20019_v33  ;;  %v20049_v33 = vld [vmem:[#allocation191_spill] sm:$0xff] }
 0xee8   :  { %13321 = vmatpush3.bf16.msra.mxu1 %v20020_v39  ;;  %v20050_v39 = vld [vmem:[#allocation183_spill] sm:$0xff] }
 0xee9   :  { %13339 = vmatprep.subr.bf16.mxu1 %v20021_v45  ;;  %v20052_v45 = vld [vmem:[#allocation184_spill] sm:$0xff] }
 0xeeb   :  { %11389 = vmatmul.mubr.bf16.vlgmr.msra.gmra.mrb[128].mxu1 %v19057_v36 }
 0xeec   :  { %13340 = vmatpush3.bf16.msra.mxu1 %v20022_v35  ;;  %11699 = vmatprep.mubr.bf16.mxu1 %v18997_v47  ;;  %v20053_v35 = vld [vmem:[#allocation217_spill] sm:$0xff] }
 0xeed   :  { %13341 = vmatprep.subr.bf16.mxu1 %v20023_v30  ;;  %v20057_v30 = vld [vmem:[#allocation219_spill] sm:$0xff] }
 0xef0   :  { %13342 = vmatpush3.bf16.msra.mxu1 %v20024_v28  ;;  %v20058_v28 = vld [vmem:[#allocation211_spill] sm:$0xff] }
 0xef1   :  { %13343 = vmatprep.subr.bf16.mxu1 %v20025_v61  ;;  %v20059_v61 = vld [vmem:[#allocation220_spill] sm:$0xff] }
 0xef4   :  { %13344 = vmatpush3.bf16.msra.mxu1 %v20026_v52  ;;  %v20060_v52 = vld [vmem:[#allocation212_spill] sm:$0xff] }
 0xef5   :  { %13345 = vmatprep.subr.bf16.mxu1 %v20027_v54  ;;  %v20061_v54 = vld [vmem:[#allocation221_spill] sm:$0xff] }
 0xef8   :  { %13346 = vmatpush3.bf16.msra.mxu1 %v20028_v31 }
 0xef9   :  { %13347 = vmatprep.subr.bf16.mxu1 %v20029_v53 }
 0xefc   :  { %13348 = vmatpush3.bf16.msra.mxu1 %v20030_v63  ;;  %v20062_v63 = vld [vmem:[#allocation213_spill] sm:$0xff] }
 0xefd   :  { %13349 = vmatprep.subr.bf16.mxu1 %v20031_v8 }
 0xf00   :  { %13350 = vmatpush3.bf16.msra.mxu1 %v20032_v9 }
 0xf01   :  { %13351 = vmatprep.subr.bf16.mxu1 %v20033_v10 }
 0xf04   :  { %13352 = vmatpush3.bf16.msra.mxu1 %v20034_v13 }
 0xf05   :  { %13353 = vmatprep.subr.bf16.mxu1 %v20035_v11 }
 0xf08   :  { %13354 = vmatpush3.bf16.msra.mxu1 %v20036_v12 }
 0xf09   :  { %13383 = vmatprep.subr.bf16.mxu1 %v20037_v16  ;;  %v20063_v16 = vld [vmem:[#allocation222_spill] sm:$0xff] }
 0xf0b   :  { %11700 = vmatmul.mubr.bf16.vlgmr.msra.gmra.mrb[132].mxu1 %v18995_v48 }
 0xf0c   :  { %13384 = vmatpush3.bf16.msra.mxu1 %v20038_v17  ;;  %11781 = vmatprep.mubr.bf16.mxu1 %v19026_v34 }
 0xf0d   :  { %13385 = vmatprep.subr.bf16.mxu1 %v20039_v56 }
 0xf10   :  { %13386 = vmatpush3.bf16.msra.mxu1 %v20040_v1 }
 0xf11   :  { %13387 = vmatprep.subr.bf16.mxu1 %v20041_v20 }
 0xf14   :  { %13388 = vmatpush3.bf16.msra.mxu1 %v20042_v21 }
 0xf15   :  { %13389 = vmatprep.subr.bf16.mxu1 %v20043_v22  ;;  %v20064_v22 = vld [vmem:[#allocation214_spill] sm:$0xff] }
 0xf17   :  { %v13141_v23 = vpop.f32.mrb[108].mxu1  ;;  %v13256_v58 = vpop.f32.mrb[140].mxu0 }
 0xf18   :  { %13390 = vmatpush3.bf16.msra.mxu1 %v20044_v59  ;;  %v13142_v3 = vpop.f32.mrb[109].mxu1  ;;  %v13257_v60 = vpop.f32.mrb[141].mxu0 }
 0xf19   :  { %v13143_v29 = vadd.f32 %v13142_v3, %v13141_v23  ;;  %v19261_v4 = vadd.f32 %v13257_v60, %v13256_v58  ;;  %v13144_v5 = vpop.f32.mrb[110].mxu1  ;;  %v13259_v6 = vpop.f32.mrb[142].mxu0  ;;  %13391 = vmatprep.subr.bf16.mxu1 %v20045_v62  ;;  %v20065_v58 = vld [vmem:[#allocation223_spill] sm:$0xff]  ;;  %v14233_v62 = vld [vmem:[%s19558_s9 + $0x10] sm:$0xff]  }
 0xf1a   :  { %v13145_v7 = vpop.f32.mrb[111].mxu1  ;;  %v13260_v25 = vpop.f32.mrb[143].mxu0  ;;  %v20066_v60 = vld [vmem:[#allocation215_spill] sm:$0xff]  ;;  %13779 = vmatprep.mubr.msk.bf16.mxu0 %vm11454_vm7, %v14233_v62  ;;  %v20101_v62 = vld [vmem:[#allocation301_spill] sm:$0xff] }
 0xf1b   :  { %v10932_v0 = vadd.f32 %v13143_v29, %v19182_v51  ;;  %v13146_v46 = vadd.f32 %v13145_v7, %v13144_v5  ;;  %v19265_v37 = vadd.f32 %v13260_v25, %v13259_v6  ;;  %v20051_v51 = vld [vmem:[#allocation192_spill] sm:$0xff]  ;;  %v20069_v6 = vld [vmem:[#allocation237_spill] sm:$0xff]  ;;  %v20073_v25 = vld [vmem:[#allocation239_spill] sm:$0xff] }
 0xf1c   :  { %13392 = vmatpush3.bf16.msra.mxu1 %v20046_v26  ;;  %v20067_v29 = vld [vmem:[#allocation224_spill] sm:$0xff]  ;;  %v20070_v7 = vld [vmem:[#allocation229_spill] sm:$0xff] }
 0xf1d   :  { %v10935_v44 = vadd.f32 %v13146_v46, %v19184_v49  ;;  %13393 = vmatprep.subr.bf16.mxu1 %v20047_v40  ;;  %v10973_v55 = vadd.f32 %v19204_v57, %v10932_v0  ;;  %v20054_v49 = vld [vmem:[#allocation209_spill] sm:$0xff]  ;;  %v20055_v57 = vld [vmem:[#allocation218_spill] sm:$0xff]  ;;  %v20068_v5 = vld [vmem:[#allocation216_spill] sm:$0xff] }
 0xf1e   :  { %v20074_v0 = vld [vmem:[#allocation231_spill] sm:$0xff]  ;;  %v20075_v46 = vld [vmem:[#allocation240_spill] sm:$0xff]  ;;  %v20078_v40 = vld [vmem:[#allocation233_spill] sm:$0xff] }
 0xf1f   :  { %v10976_v32 = vadd.f32 %v19206_v2, %v10935_v44  ;;  %v20056_v2 = vld [vmem:[#allocation210_spill] sm:$0xff]  ;;  %v20076_v26 = vld [vmem:[#allocation232_spill] sm:$0xff]  ;;  %v20077_v44 = vld [vmem:[#allocation241_spill] sm:$0xff] }
 0xf20   :  { %13394 = vmatpush3.bf16.msra.mxu1 %v20048_v24 }
 0xf21   :  { %13395 = vmatprep.subr.bf16.mxu1 %v20049_v33 }
 0xf24   :  { %13396 = vmatpush3.bf16.msra.mxu1 %v20050_v39 }
 0xf25   :  { %13397 = vmatprep.subr.bf16.mxu1 %v20051_v51  ;;  %v20080_v51 = vld [vmem:[#allocation234_spill] sm:$0xff] }
 0xf28   :  { %13398 = vmatpush3.bf16.msra.mxu1 %v20052_v45 }
 0xf29   :  { %13427 = vmatprep.subr.bf16.mxu1 %v20053_v35 }
 0xf2b   :  { %11782 = vmatmul.mubr.bf16.vlgmr.msra.gmra.mrb[136].mxu1 %v19024_v42 }
 0xf2c   :  { %13428 = vmatpush3.bf16.msra.mxu1 %v20054_v49  ;;  %11863 = vmatprep.mubr.bf16.mxu1 %v19059_v50 }
 0xf2d   :  { %13429 = vmatprep.subr.bf16.mxu1 %v20055_v57 }
 0xf30   :  { %13430 = vmatpush3.bf16.msra.mxu1 %v20056_v2 }
 0xf31   :  { %13431 = vmatprep.subr.bf16.mxu1 %v20057_v30  ;;  %v20081_v30 = vld [vmem:[#allocation243_spill] sm:$0xff] }
 0xf34   :  { %13432 = vmatpush3.bf16.msra.mxu1 %v20058_v28 }
 0xf35   :  { %13433 = vmatprep.subr.bf16.mxu1 %v20059_v61  ;;  %v20082_v61 = vld [vmem:[#allocation235_spill] sm:$0xff] }
 0xf38   :  { %13434 = vmatpush3.bf16.msra.mxu1 %v20060_v52  ;;  %v20083_v52 = vld [vmem:[#allocation244_spill] sm:$0xff] }
 0xf39   :  { %13435 = vmatprep.subr.bf16.mxu1 %v20061_v54  ;;  %v20084_v54 = vld [vmem:[#allocation236_spill] sm:$0xff] }
 0xf3b   :  { %v13185_v31 = vpop.f32.mrb[112].mxu1  ;;  %v13300_v53 = vpop.f32.mrb[144].mxu0 }
 0xf3c   :  { %13436 = vmatpush3.bf16.msra.mxu1 %v20062_v63  ;;  %v13186_v8 = vpop.f32.mrb[113].mxu1  ;;  %v13301_v9 = vpop.f32.mrb[145].mxu0  ;;  %v20087_v63 = vld [vmem:[#allocation270_spill] sm:$0xff] }
 0xf3d   :  { %v13187_v10 = vadd.f32 %v13186_v8, %v13185_v31  ;;  %v19289_v13 = vadd.f32 %v13301_v9, %v13300_v53  ;;  %v13188_v11 = vpop.f32.mrb[114].mxu1  ;;  %v13303_v12 = vpop.f32.mrb[146].mxu0  ;;  %13437 = vmatprep.subr.bf16.mxu1 %v20063_v16  ;;  %v20085_v31 = vld [vmem:[#allocation269_spill] sm:$0xff]  ;;  %v20088_v8 = vld [vmem:[#allocation262_spill] sm:$0xff]  ;;  %v20089_v9 = vld [vmem:[#allocation271_spill] sm:$0xff] }
 0xf3e   :  { %v13189_v17 = vpop.f32.mrb[115].mxu1  ;;  %v13304_v56 = vpop.f32.mrb[147].mxu0  ;;  %v20086_v53 = vld [vmem:[#allocation261_spill] sm:$0xff] }
 0xf3f   :  { %v11014_v1 = vadd.f32 %v13187_v10, %v10973_v55  ;;  %v13190_v20 = vadd.f32 %v13189_v17, %v13188_v11  ;;  %v19292_v21 = vadd.f32 %v13304_v56, %v13303_v12  ;;  %v20090_v10 = vld [vmem:[#allocation263_spill] sm:$0xff]  ;;  %v20091_v11 = vld [vmem:[#allocation272_spill] sm:$0xff]  ;;  %v20093_v16 = vld [vmem:[#allocation273_spill] sm:$0xff] }
 0xf40   :  { %13438 = vmatpush3.bf16.msra.mxu1 %v20064_v22  ;;  %v20092_v12 = vld [vmem:[#allocation264_spill] sm:$0xff]  ;;  %v20094_v17 = vld [vmem:[#allocation265_spill] sm:$0xff]  ;;  %v20096_v22 = vld [vmem:[#allocation266_spill] sm:$0xff] }
 0xf41   :  { %v11017_v23 = vadd.f32 %v13190_v20, %v10976_v32  ;;  %13439 = vmatprep.subr.bf16.mxu1 %v20065_v58  ;;  %v11055_v59 = vadd.f32 %v19226_v43, %v11014_v1  ;;  %v20071_v43 = vld [vmem:[#allocation238_spill] sm:$0xff]  ;;  %v20097_v58 = vld [vmem:[#allocation275_spill] sm:$0xff] }
 0xf43   :  { %v11058_v3 = vadd.f32 %v19228_v38, %v11017_v23  ;;  %v20072_v38 = vld [vmem:[#allocation230_spill] sm:$0xff] }
 0xf44   :  { %13440 = vmatpush3.bf16.msra.mxu1 %v20066_v60 }
 0xf45   :  { %13441 = vmatprep.subr.bf16.mxu1 %v20067_v29  ;;  %v20098_v29 = vld [vmem:[#allocation267_spill] sm:$0xff] }
 0xf48   :  { %13442 = vmatpush3.bf16.msra.mxu1 %v20068_v5  ;;  %v20099_v5 = vld [vmem:[#allocation276_spill] sm:$0xff] }
 0xf49   :  { %13457 = vmatprep.subr.bf16.mxu1 %v20069_v6  ;;  %v20100_v6 = vld [vmem:[#allocation268_spill] sm:$0xff] }
 0xf4b   :  { %11864 = vmatmul.mubr.bf16.vlgmr.msra.gmra.mrb[140].mxu1 %v19057_v36 }
 0xf4c   :  { %13458 = vmatpush3.bf16.msra.mxu1 %v20070_v7  ;;  %12108 = vmatprep.mubr.bf16.mxu1 %v18997_v47  ;;  %v20079_v47 = vld [vmem:[#allocation242_spill] sm:$0xff]  ;;  %v20102_v7 = vld [vmem:[#allocation293_spill] sm:$0xff] }
 0xf4d   :  { %13459 = vmatprep.subr.bf16.mxu1 %v20071_v43  ;;  %v20103_v43 = vld [vmem:[#allocation302_spill] sm:$0xff] }
 0xf50   :  { %13460 = vmatpush3.bf16.msra.mxu1 %v20072_v38  ;;  %v20105_v38 = vld [vmem:[#allocation303_spill] sm:$0xff] }
 0xf51   :  { %13461 = vmatprep.subr.bf16.mxu1 %v20073_v25  ;;  %v20107_v25 = vld [vmem:[#allocation304_spill] sm:$0xff] }
 0xf54   :  { %13462 = vmatpush3.bf16.msra.mxu1 %v20074_v0  ;;  %v20108_v0 = vld [vmem:[#allocation296_spill] sm:$0xff] }
 0xf55   :  { %13463 = vmatprep.subr.bf16.mxu1 %v20075_v46  ;;  %v20109_v46 = vld [vmem:[#allocation305_spill] sm:$0xff] }
 0xf58   :  { %13464 = vmatpush3.bf16.msra.mxu1 %v20076_v26  ;;  %v20110_v26 = vld [vmem:[#allocation297_spill] sm:$0xff] }
 0xf59   :  { %13465 = vmatprep.subr.bf16.mxu1 %v20077_v44 }
 0xf5c   :  { %13466 = vmatpush3.bf16.msra.mxu1 %v20078_v40 }
 0xf5d   :  { %13467 = vmatprep.subr.bf16.mxu1 %v20079_v47 }
 0xf5e   :  { %v11095_v55 = vpop.f32.mrb[116].mxu1  ;;  %v19318_v32 = vpop.f32.mrb[148].mxu0 }
 0xf5f   :  { %v11096_v24 = vadd.f32 %v11095_v55, %v11055_v59  ;;  %v13763_v33 = vpop.f32.mrb[117].mxu1  ;;  %v13775_v39 = vpop.f32.mrb[149].mxu0  ;;  %v20112_v55 = vld [vmem:[#allocation298_spill] sm:$0xff] }
 0xf60   :  { %13468 = vmatpush3.bf16.msra.mxu1 %v20080_v51  ;;  %v11098_v45 = vpop.f32.mrb[118].mxu1  ;;  %v19321_v35 = vpop.f32.mrb[150].mxu0  ;;  %v20113_v33 = vld [vmem:[#allocation307_spill] sm:$0xff] }
 0xf61   :  { %v11099_v49 = vadd.f32 %v11098_v45, %v11058_v3  ;;  %v13764_v57 = vpop.f32.mrb[119].mxu1  ;;  %v13776_v2 = vpop.f32.mrb[151].mxu0  ;;  %13469 = vmatprep.subr.bf16.mxu1 %v20081_v30 }
 0xf62   :  { %v20115_v2 = vld [vmem:[#allocation308_spill] sm:$0xff] }
 0xf63   :  { %v19324_v28 = vpack.c.bf16 %v11099_v49, %v11096_v24  ;;  %v20114_v49 = vld [vmem:[#allocation299_spill] sm:$0xff] }
 0xf64   :  { %13470 = vmatpush3.bf16.msra.mxu1 %v20082_v61  ;;  %v20116_v61 = vld [vmem:[#allocation300_spill] sm:$0xff] }
 0xf65   :  { %13471 = vmatprep.subr.bf16.mxu1 %v20083_v52 }
 0xf68   :  { %13472 = vmatpush3.bf16.msra.mxu1 %v20084_v54 }
 0xf69   :  { %13501 = vmatprep.subr.bf16.mxu1 %v20085_v31 }
 0xf6b   :  { %12109 = vmatmul.mubr.bf16.vlgmr.msra.gmra.mrb[144].mxu1 %v18995_v48  ;;  %v20095_v48 = vld [vmem:[#allocation274_spill] sm:$0xff] }
 0xf6c   :  { %13502 = vmatpush3.bf16.msra.mxu1 %v20086_v53  ;;  %12190 = vmatprep.mubr.bf16.mxu1 %v19026_v34 }
 0xf6d   :  { %13503 = vmatprep.subr.bf16.mxu1 %v20087_v63 }
 0xf70   :  { %13504 = vmatpush3.bf16.msra.mxu1 %v20088_v8 }
 0xf71   :  { %13505 = vmatprep.subr.bf16.mxu1 %v20089_v9 }
 0xf74   :  { %13506 = vmatpush3.bf16.msra.mxu1 %v20090_v10 }
 0xf75   :  { %13507 = vmatprep.subr.bf16.mxu1 %v20091_v11 }
 0xf78   :  { %13508 = vmatpush3.bf16.msra.mxu1 %v20092_v12 }
 0xf79   :  { %13509 = vmatprep.subr.bf16.mxu1 %v20093_v16  ;;  %v14235_v16 = vld [vmem:[%s19558_s9] sm:$0xff]  }
 0xf7c   :  { %13510 = vmatpush3.bf16.msra.mxu1 %v20094_v17  ;;  %v14236_v17 = vld [vmem:[%s19558_s9 + $0x8] sm:$0xff]  }
 0xf7d   :  { %13511 = vmatprep.subr.bf16.mxu1 %v20095_v48  ;;  %v20118_v48 = vld [vmem:[#allocation161_spill] sm:$0xff] }
 0xf7e   :  { %v13234_v56 = vpop.f32.mrb[120].mxu1 }
 0xf7f   :  { %v13235_v34 = vpop.f32.mrb[121].mxu1 }
 0xf80   :  { %v13236_v1 = vadd.f32 %v13235_v34, %v13234_v56  ;;  %v13237_v20 = vpop.f32.mrb[122].mxu1  ;;  %13512 = vmatpush3.bf16.msra.mxu1 %v20096_v22  ;;  %v20119_v56 = vld [vmem:[#allocation170_spill] sm:$0xff] }
 0xf81   :  { %v13238_v23 = vpop.f32.mrb[123].mxu1  ;;  %13513 = vmatprep.subr.bf16.mxu1 %v20097_v58 }
 0xf82   :  { %v11268_v59 = vadd.f32 %v19261_v4, %v13236_v1  ;;  %v13239_v3 = vadd.f32 %v13238_v23, %v13237_v20  ;;  %v20104_v4 = vld [vmem:[#allocation294_spill] sm:$0xff]  ;;  %v20121_v23 = vld [vmem:[#allocation171_spill] sm:$0xff] }
 0xf83   :  { %v20120_v1 = vld [vmem:[#allocation162_spill] sm:$0xff] }
 0xf84   :  { %v11271_v60 = vadd.f32 %v19265_v37, %v13239_v3  ;;  %13514 = vmatpush3.bf16.msra.mxu1 %v20098_v29  ;;  %v20106_v37 = vld [vmem:[#allocation295_spill] sm:$0xff]  ;;  %v20124_v29 = vld [vmem:[#allocation164_spill] sm:$0xff] }
 0xf85   :  { %13515 = vmatprep.subr.bf16.mxu1 %v20099_v5  ;;  %v20122_v3 = vld [vmem:[#allocation163_spill] sm:$0xff]  ;;  %v20125_v5 = vld [vmem:[#allocation173_spill] sm:$0xff] }
 0xf88   :  { %13516 = vmatpush3.bf16.msra.mxu1 %v20100_v6  ;;  %v20126_v6 = vld [vmem:[#allocation165_spill] sm:$0xff] }
 0xf89   :  { %13545 = vmatprep.subr.bf16.mxu1 %v20101_v62  ;;  %v20127_v62 = vld [vmem:[#allocation174_spill] sm:$0xff] }
 0xf8b   :  { %12191 = vmatmul.mubr.bf16.vlgmr.msra.gmra.mrb[148].mxu1 %v19024_v42  ;;  %v20111_v42 = vld [vmem:[#allocation306_spill] sm:$0xff] }
 0xf8c   :  { %13546 = vmatpush3.bf16.msra.mxu1 %v20102_v7  ;;  %12272 = vmatprep.mubr.bf16.mxu1 %v19059_v50  ;;  %v20128_v7 = vld [vmem:[#allocation166_spill] sm:$0xff] }
 0xf8d   :  { %13547 = vmatprep.subr.bf16.mxu1 %v20103_v43  ;;  %v20129_v43 = vld [vmem:[#allocation175_spill] sm:$0xff] }
 0xf90   :  { %13548 = vmatpush3.bf16.msra.mxu1 %v20104_v4  ;;  %v20130_v4 = vld [vmem:[#allocation167_spill] sm:$0xff] }
 0xf91   :  { %13549 = vmatprep.subr.bf16.mxu1 %v20105_v38  ;;  %v20131_v38 = vld [vmem:[#allocation176_spill] sm:$0xff] }
 0xf94   :  { %13550 = vmatpush3.bf16.msra.mxu1 %v20106_v37  ;;  %v20132_v37 = vld [vmem:[#allocation168_spill] sm:$0xff] }
 0xf95   :  { %13551 = vmatprep.subr.bf16.mxu1 %v20107_v25  ;;  %v20133_v25 = vld [vmem:[#allocation201_spill] sm:$0xff] }
 0xf98   :  { %13552 = vmatpush3.bf16.msra.mxu1 %v20108_v0  ;;  %v20134_v0 = vld [vmem:[#allocation193_spill] sm:$0xff] }
 0xf99   :  { %13553 = vmatprep.subr.bf16.mxu1 %v20109_v46  ;;  %v20135_v46 = vld [vmem:[#allocation202_spill] sm:$0xff] }
 0xf9c   :  { %13554 = vmatpush3.bf16.msra.mxu1 %v20110_v26 }
 0xf9d   :  { %13555 = vmatprep.subr.bf16.mxu1 %v20111_v42  ;;  %v20136_v42 = vld [vmem:[#allocation194_spill] sm:$0xff] }
 0xf9e   :  { %v13278_v44 = vpop.f32.mrb[124].mxu1 }
 0xf9f   :  { %v13279_v50 = vpop.f32.mrb[125].mxu1 }
 0xfa0   :  { %v13280_v40 = vadd.f32 %v13279_v50, %v13278_v44  ;;  %v13281_v47 = vpop.f32.mrb[126].mxu1  ;;  %13556 = vmatpush3.bf16.msra.mxu1 %v20112_v55 }
 0xfa1   :  { %v13282_v24 = vpop.f32.mrb[127].mxu1  ;;  %13557 = vmatprep.subr.bf16.mxu1 %v20113_v33  ;;  %v20138_v33 = vld [vmem:[#allocation195_spill] sm:$0xff] }
 0xfa2   :  { %v11309_v39 = vadd.f32 %v13280_v40, %v11268_v59  ;;  %v13283_v51 = vadd.f32 %v13282_v24, %v13281_v47  ;;  %v20137_v47 = vld [vmem:[#allocation203_spill] sm:$0xff] }
 0xfa4   :  { %v11312_v45 = vadd.f32 %v13283_v51, %v11271_v60  ;;  %13558 = vmatpush3.bf16.msra.mxu1 %v20114_v49  ;;  %v11350_v57 = vadd.f32 %v19289_v13, %v11309_v39  ;;  %v20123_v60 = vld [vmem:[#allocation172_spill] sm:$0xff]  ;;  %v20142_v49 = vld [vmem:[#allocation197_spill] sm:$0xff] }
 0xfa5   :  { %13559 = vmatprep.subr.bf16.mxu1 %v20115_v2  ;;  %v20139_v39 = vld [vmem:[#allocation204_spill] sm:$0xff]  ;;  %v20144_v2 = vld [vmem:[#allocation198_spill] sm:$0xff] }
 0xfa6   :  { %v11353_v30 = vadd.f32 %v19292_v21, %v11312_v45  ;;  %v20140_v51 = vld [vmem:[#allocation196_spill] sm:$0xff]  ;;  %v20141_v45 = vld [vmem:[#allocation205_spill] sm:$0xff] }
 0xfa8   :  { %13560 = vmatpush3.bf16.msra.mxu1 %v20116_v61  ;;  %v20146_v61 = vld [vmem:[#allocation199_spill] sm:$0xff] }
 0xfab   :  { %12273 = vmatmul.mubr.bf16.vlgmr.msra.gmra.mrb[152].mxu1 %v19057_v36  ;;  %v14234_v36 = vld [vmem:[%s19558_s9 + $0x18] sm:$0xff]  }
 0xfbe   :  { %v13322_v52 = vpop.f32.mrb[128].mxu1 }
 0xfbf   :  { %v13323_v54 = vpop.f32.mrb[129].mxu1 }
 0xfc0   :  { %v13324_v31 = vadd.f32 %v13323_v54, %v13322_v52  ;;  %v13325_v53 = vpop.f32.mrb[130].mxu1  ;;  %v20147_v52 = vld [vmem:[#allocation208_spill] sm:$0xff] }
 0xfc1   :  { %v13326_v63 = vpop.f32.mrb[131].mxu1  ;;  %v20148_v54 = vld [vmem:[#allocation200_spill] sm:$0xff] }
 0xfc2   :  { %v11391_v8 = vadd.f32 %v13324_v31, %v11350_v57  ;;  %v13327_v9 = vadd.f32 %v13326_v63, %v13325_v53  ;;  %v20143_v57 = vld [vmem:[#allocation206_spill] sm:$0xff]  ;;  %v20149_v31 = vld [vmem:[#allocation225_spill] sm:$0xff] }
 0xfc3   :  { %v20150_v63 = vld [vmem:[#allocation226_spill] sm:$0xff] }
 0xfc4   :  { %v11432_v10 = vadd.f32 %v19318_v32, %v11391_v8  ;;  %v11394_v11 = vadd.f32 %v13327_v9, %v11353_v30  ;;  %v11531_v32 = vsel %vm11461_vm8, %v19324_v28, 0  ;;  %v20145_v30 = vld [vmem:[#allocation207_spill] sm:$0xff] }
 0xfc6   :  { %v11435_v13 = vadd.f32 %v19321_v35, %v11394_v11  ;;  %v20117_v35 = vld [vmem:[#allocation169_spill] sm:$0xff] }
 0xfc8   :  { %v11443_v12 = vpack.c.bf16 %v11435_v13, %v11432_v10 }
 0xfca   :  { %13887 = vmatprep.subr.msk.bf16.mxu0 %vm11461_vm8, %v11443_v12  ;;  %v11463_v21 = vsel %vm11461_vm8, %v11443_v12, 0  ;;  %v20151_v12 = vld [vmem:[#allocation227_spill] sm:$0xff] }
 0xfcb   :  { %13778 = vmatpush3.bf16.msra.mxu0 %v11463_v21  ;;  %v20152_v21 = vld [vmem:[#allocation228_spill] sm:$0xff] }
 0xfcc   :  { %13888 = vmatprep.subr.msk.bf16.mxu0 %vm11461_vm8, %v19324_v28 }
 0xfce   :  { %13780 = vmatmul.mubr.msk.bf16.vlgmr.msra.gmra.mrb[152].mxu0 %vm11454_vm7, %v14234_v36 }
 0xfcf   :  { %13784 = vmatpush3.bf16.msra.mxu0 %v11531_v32  ;;  %13785 = vmatprep.mubr.msk.bf16.mxu0 %vm11454_vm7, %v14235_v16 }
 0xfd0   :  { %13361 = vmatprep.subr.bf16.mxu0 %v20117_v35 }
 0xfda   :  { %13786 = vmatmul.mubr.msk.bf16.vlgmr.msra.gmra.mrb[152].mxu0 %vm11454_vm7, %v14236_v17 }
 0xfdb   :  { %13362 = vmatpush3.bf16.msra.mxu0 %v20118_v48  ;;  %11740 = vmatprep.mubr.bf16.mxu0 %v19090_v19 }
 0xfdc   :  { %13363 = vmatprep.subr.bf16.mxu0 %v20119_v56 }
 0xfde   :  { %v13355_v34 = vpop.f32.mrb[132].mxu1 }
 0xfdf   :  { %13364 = vmatpush3.bf16.msra.mxu0 %v20120_v1  ;;  %v13356_v28 = vpop.f32.mrb[133].mxu1 }
 0xfe0   :  { %v19395_v20 = vadd.f32 %v13356_v28, %v13355_v34  ;;  %v13358_v22 = vpop.f32.mrb[134].mxu1  ;;  %13365 = vmatprep.subr.bf16.mxu0 %v20121_v23 }
 0xfe1   :  { %v13359_v58 = vpop.f32.mrb[135].mxu1 }
 0xfe2   :  { %v19398_v59 = vadd.f32 %v13359_v58, %v13358_v22 }
 0xfe3   :  { %13366 = vmatpush3.bf16.msra.mxu0 %v20122_v3 }
 0xfe4   :  { %13367 = vmatprep.subr.bf16.mxu0 %v20123_v60 }
 0xfe7   :  { %13368 = vmatpush3.bf16.msra.mxu0 %v20124_v29 }
 0xfe8   :  { %13369 = vmatprep.subr.bf16.mxu0 %v20125_v5 }
 0xfeb   :  { %13370 = vmatpush3.bf16.msra.mxu0 %v20126_v6 }
 0xfec   :  { %13371 = vmatprep.subr.bf16.mxu0 %v20127_v62  ;;  %v14237_v62 = vld [vmem:[%s19558_s9 + $0x20] sm:$0xff]  }
 0xfef   :  { %13372 = vmatpush3.bf16.msra.mxu0 %v20128_v7 }
 0xff0   :  { %13373 = vmatprep.subr.bf16.mxu0 %v20129_v43 }
 0xff3   :  { %13374 = vmatpush3.bf16.msra.mxu0 %v20130_v4 }
 0xff4   :  { %13375 = vmatprep.subr.bf16.mxu0 %v20131_v38 }
 0xff7   :  { %13376 = vmatpush3.bf16.msra.mxu0 %v20132_v37 }
 0xff8   :  { %13405 = vmatprep.subr.bf16.mxu0 %v20133_v25 }
 0xffa   :  { %11741 = vmatmul.mubr.bf16.vlgmr.msra.gmra.mrb[156].mxu0 %v19088_v18 }
 0xffb   :  { %13406 = vmatpush3.bf16.msra.mxu0 %v20134_v0  ;;  %11822 = vmatprep.mubr.bf16.mxu0 %v19134_v15 }
 0xffc   :  { %13407 = vmatprep.subr.bf16.mxu0 %v20135_v46 }
 0xffe   :  { %v13399_v26 = vpop.f32.mrb[136].mxu1 }
 0xfff   :  { %13408 = vmatpush3.bf16.msra.mxu0 %v20136_v42  ;;  %v13400_v44 = vpop.f32.mrb[137].mxu1 }
0x1000   :  { %v13401_v50 = vadd.f32 %v13400_v44, %v13399_v26  ;;  %v13402_v40 = vpop.f32.mrb[138].mxu1  ;;  %13409 = vmatprep.subr.bf16.mxu0 %v20137_v47 }
0x1001   :  { %v13403_v55 = vpop.f32.mrb[139].mxu1 }
0x1002   :  { %v13404_v24 = vadd.f32 %v13403_v55, %v13402_v40 }
0x1003   :  { %13410 = vmatpush3.bf16.msra.mxu0 %v20138_v33 }
0x1004   :  { %13411 = vmatprep.subr.bf16.mxu0 %v20139_v39 }
0x1007   :  { %13412 = vmatpush3.bf16.msra.mxu0 %v20140_v51 }
0x1008   :  { %13413 = vmatprep.subr.bf16.mxu0 %v20141_v45 }
0x100b   :  { %13414 = vmatpush3.bf16.msra.mxu0 %v20142_v49 }
0x100c   :  { %13415 = vmatprep.subr.bf16.mxu0 %v20143_v57 }
0x100f   :  { %13416 = vmatpush3.bf16.msra.mxu0 %v20144_v2 }
0x1010   :  { %13417 = vmatprep.subr.bf16.mxu0 %v20145_v30 }
0x1013   :  { %13418 = vmatpush3.bf16.msra.mxu0 %v20146_v61 }
0x1014   :  { %13419 = vmatprep.subr.bf16.mxu0 %v20147_v52 }
0x1017   :  { %13420 = vmatpush3.bf16.msra.mxu0 %v20148_v54 }
0x1018   :  { %13789 = vmatprep.subr.bf16.mxu0 %v19877_v41 }
0x101a   :  { %11823 = vmatmul.mubr.bf16.vlgmr.msra.gmra.mrb[160].mxu0 %v19132_v14 }
0x101b   :  { %13790 = vmatpush3.bf16.msra.mxu0 %v20149_v31  ;;  %13797 = vmatprep.mubr.msk.bf16.mxu0 %vm14254_vm0, %v19877_v41 }
0x101c   :  { %13791 = vmatprep.subr.bf16.mxu0 %v19877_v41 }
0x101e   :  { %v13443_v53 = vpop.f32.mrb[140].mxu1 }
0x101f   :  { %13792 = vmatpush3.bf16.msra.mxu0 %v20150_v63  ;;  %v13444_v8 = vpop.f32.mrb[141].mxu1  ;;  %v20155_v63 = vld [vmem:[#allocation254_spill] sm:$0xff] }
0x1020   :  { %v13445_v9 = vadd.f32 %v13444_v8, %v13443_v53  ;;  %v13446_v10 = vpop.f32.mrb[142].mxu1  ;;  %13793 = vmatprep.subr.bf16.mxu0 %v19877_v41  ;;  %v20154_v53 = vld [vmem:[#allocation245_spill] sm:$0xff]  ;;  %v20156_v8 = vld [vmem:[#allocation246_spill] sm:$0xff] }
0x1021   :  { %v13447_v11 = vpop.f32.mrb[143].mxu1 }
0x1022   :  { %v13448_v13 = vadd.f32 %v13447_v11, %v13446_v10  ;;  %v20158_v10 = vld [vmem:[#allocation247_spill] sm:$0xff]  ;;  %v20159_v11 = vld [vmem:[#allocation256_spill] sm:$0xff] }
0x1023   :  { %13794 = vmatpush3.bf16.msra.mxu0 %v20151_v12  ;;  %v20161_v12 = vld [vmem:[#allocation257_spill] sm:$0xff] }
0x1024   :  { %13795 = vmatprep.subr.bf16.mxu0 %v19877_v41 }
0x1027   :  { %13796 = vmatpush3.bf16.msra.mxu0 %v20152_v21  ;;  %v20162_v21 = vld [vmem:[#allocation249_spill] sm:$0xff] }
0x102a   :  { %13798 = vmatmul.mubr.msk.bf16.vlgmr.msra.gmra.mrb[164].mxu0 %vm5847_vm2, %v19163_v27 }
0x102b   :  { %13803 = vmatprep.mubr.msk.bf16.mxu0 %vm11454_vm7, %v14237_v62  ;;  %v20176_v62 = vld [vmem:[#allocation280_spill] sm:$0xff] }
0x103e   :  { %v13473_v36 = vpop.f32.mrb[144].mxu1 }
0x103f   :  { %v13474_v16 = vpop.f32.mrb[145].mxu1 }
0x1040   :  { %v19442_v32 = vadd.f32 %v13474_v16, %v13473_v36  ;;  %v13476_v35 = vpop.f32.mrb[146].mxu1  ;;  %v20163_v36 = vld [vmem:[#allocation258_spill] sm:$0xff] }
0x1041   :  { %v13477_v17 = vpop.f32.mrb[147].mxu1  ;;  %v20164_v16 = vld [vmem:[#allocation250_spill] sm:$0xff] }
0x1042   :  { %v19444_v48 = vadd.f32 %v13477_v17, %v13476_v35  ;;  %v20166_v35 = vld [vmem:[#allocation251_spill] sm:$0xff]  ;;  %v20167_v17 = vld [vmem:[#allocation260_spill] sm:$0xff] }
0x105e   :  { %v13517_v56 = vpop.f32.mrb[148].mxu1 }
0x105f   :  { %v13518_v34 = vpop.f32.mrb[149].mxu1 }
0x1060   :  { %v19446_v1 = vadd.f32 %v13518_v34, %v13517_v56  ;;  %v13520_v28 = vpop.f32.mrb[150].mxu1  ;;  %v20168_v56 = vld [vmem:[#allocation252_spill] sm:$0xff]  ;;  %v20169_v34 = vld [vmem:[#allocation285_spill] sm:$0xff] }
0x1061   :  { %v13521_v22 = vpop.f32.mrb[151].mxu1 }
0x1062   :  { %v19448_v23 = vadd.f32 %v13521_v22, %v13520_v28  ;;  %v20170_v28 = vld [vmem:[#allocation277_spill] sm:$0xff]  ;;  %v20171_v22 = vld [vmem:[#allocation286_spill] sm:$0xff] }
0x107e   :  { %v13561_v58 = vpop.f32.mrb[152].mxu1 }
0x107f   :  { %v13562_v3 = vpop.f32.mrb[153].mxu1 }
0x1080   :  { %v19450_v60 = vadd.f32 %v13562_v3, %v13561_v58  ;;  %v13564_v29 = vpop.f32.mrb[154].mxu1  ;;  %v20172_v58 = vld [vmem:[#allocation278_spill] sm:$0xff]  ;;  %v20173_v3 = vld [vmem:[#allocation287_spill] sm:$0xff] }
0x1081   :  { %v13565_v5 = vpop.f32.mrb[155].mxu1 }
0x1082   :  { %v19452_v6 = vadd.f32 %v13565_v5, %v13564_v29  ;;  %v20174_v29 = vld [vmem:[#allocation279_spill] sm:$0xff]  ;;  %v20175_v5 = vld [vmem:[#allocation288_spill] sm:$0xff] }
0x10cd   :  { %v13377_v7 = vpop.f32.mrb[156].mxu0 }
0x10ce   :  { %v13378_v43 = vpop.f32.mrb[157].mxu0 }
0x10cf   :  { %v13379_v4 = vadd.f32 %v13378_v43, %v13377_v7  ;;  %v13380_v38 = vpop.f32.mrb[158].mxu0  ;;  %v20177_v7 = vld [vmem:[#allocation289_spill] sm:$0xff] }
0x10d0   :  { %v13381_v37 = vpop.f32.mrb[159].mxu0  ;;  %v20178_v43 = vld [vmem:[#allocation281_spill] sm:$0xff] }
0x10d1   :  { %v11743_v25 = vadd.f32 %v13379_v4, %v19395_v20  ;;  %v13382_v0 = vadd.f32 %v13381_v37, %v13380_v38  ;;  %v20180_v4 = vld [vmem:[#allocation282_spill] sm:$0xff]  ;;  %v20182_v38 = vld [vmem:[#allocation283_spill] sm:$0xff]  ;;  %v20183_v37 = vld [vmem:[#allocation292_spill] sm:$0xff] }
0x10d3   :  { %v11746_v46 = vadd.f32 %v13382_v0, %v19398_v59  ;;  %v11784_v26 = vadd.f32 %v13401_v50, %v11743_v25  ;;  %v14238_v50 = vld [vmem:[%s19558_s9 + $0x28] sm:$0xff]   ;;  %v20184_v25 = vld [vmem:[#allocation284_spill] sm:$0xff] }
0x10d4   :  { %v20185_v0 = vld [vmem:[#allocation309_spill] sm:$0xff] }
0x10d5   :  { %v11787_v42 = vadd.f32 %v13404_v24, %v11746_v46  ;;  %v20153_v24 = vld [vmem:[#allocation253_spill] sm:$0xff]  ;;  %v20186_v46 = vld [vmem:[#allocation310_spill] sm:$0xff] }
0x10ed   :  { %v13421_v44 = vpop.f32.mrb[160].mxu0 }
0x10ee   :  { %v13422_v40 = vpop.f32.mrb[161].mxu0 }
0x10ef   :  { %v13423_v47 = vadd.f32 %v13422_v40, %v13421_v44  ;;  %v13424_v55 = vpop.f32.mrb[162].mxu0 }
0x10f0   :  { %v13425_v33 = vpop.f32.mrb[163].mxu0 }
0x10f1   :  { %v11825_v39 = vadd.f32 %v13423_v47, %v11784_v26  ;;  %v13426_v51 = vadd.f32 %v13425_v33, %v13424_v55  ;;  %v20187_v26 = vld [vmem:[#allocation311_spill] sm:$0xff] }
0x10f3   :  { %v11828_v45 = vadd.f32 %v13426_v51, %v11787_v42  ;;  %v11866_v49 = vadd.f32 %v13445_v9, %v11825_v39  ;;  %v20157_v9 = vld [vmem:[#allocation255_spill] sm:$0xff]  ;;  %v20188_v42 = vld [vmem:[#allocation312_spill] sm:$0xff] }
0x10f5   :  { %v11869_v57 = vadd.f32 %v13448_v13, %v11828_v45  ;;  %v20160_v13 = vld [vmem:[#allocation248_spill] sm:$0xff] }
0x10fd   :  { %v11906_v2 = vpop.f32.mrb[164].mxu0 }
0x10fe   :  { %v11907_v30 = vadd.f32 %v11906_v2, %v11866_v49  ;;  %v13799_v61 = vpop.f32.mrb[165].mxu0 }
0x10ff   :  { %v11909_v52 = vpop.f32.mrb[166].mxu0 }
0x1100   :  { %v11910_v20 = vadd.f32 %v11909_v52, %v11869_v57  ;;  %v13800_v54 = vpop.f32.mrb[167].mxu0 }
0x1102   :  { %v11918_v31 = vpack.c.bf16 %v11910_v20, %v11907_v30 }
0x1104   :  { %13889 = vmatprep.subr.msk.bf16.mxu0 %vm11461_vm8, %v11918_v31  ;;  %v11936_v59 = vsel %vm11461_vm8, %v11918_v31, 0 }
0x1105   :  { %13802 = vmatpush3.bf16.msra.mxu0 %v11936_v59 }
0x1106   :  { %13479 = vmatprep.subr.bf16.mxu0 %v20153_v24 }
0x1108   :  { %13804 = vmatmul.mubr.msk.bf16.vlgmr.msra.gmra.mrb[152].mxu0 %vm11454_vm7, %v14238_v50 }
0x1109   :  { %13480 = vmatpush3.bf16.msra.mxu0 %v20154_v53  ;;  %12149 = vmatprep.mubr.bf16.mxu0 %v19090_v19  ;;  %v20165_v19 = vld [vmem:[#allocation259_spill] sm:$0xff] }
0x110a   :  { %13481 = vmatprep.subr.bf16.mxu0 %v20155_v63 }
0x110d   :  { %13482 = vmatpush3.bf16.msra.mxu0 %v20156_v8  ;;  %v14240_v8 = vld [vmem:[%s19558_s9 + $0x38] sm:$0xff]  }
0x110e   :  { %13483 = vmatprep.subr.bf16.mxu0 %v20157_v9 }
0x1111   :  { %13484 = vmatpush3.bf16.msra.mxu0 %v20158_v10 }
0x1112   :  { %13485 = vmatprep.subr.bf16.mxu0 %v20159_v11 }
0x1115   :  { %13486 = vmatpush3.bf16.msra.mxu0 %v20160_v13 }
0x1116   :  { %13487 = vmatprep.subr.bf16.mxu0 %v20161_v12 }
0x1119   :  { %13488 = vmatpush3.bf16.msra.mxu0 %v20162_v21 }
0x111a   :  { %13489 = vmatprep.subr.bf16.mxu0 %v20163_v36 }
0x111d   :  { %13490 = vmatpush3.bf16.msra.mxu0 %v20164_v16 }
0x111e   :  { %13491 = vmatprep.subr.bf16.mxu0 %v20165_v19 }
0x1121   :  { %13492 = vmatpush3.bf16.msra.mxu0 %v20166_v35 }
0x1122   :  { %13493 = vmatprep.subr.bf16.mxu0 %v20167_v17 }
0x1125   :  { %13494 = vmatpush3.bf16.msra.mxu0 %v20168_v56 }
0x1126   :  { %13523 = vmatprep.subr.bf16.mxu0 %v20169_v34 }
0x1128   :  { %12150 = vmatmul.mubr.bf16.vlgmr.msra.gmra.mrb[168].mxu0 %v19088_v18  ;;  %v20179_v18 = vld [vmem:[#allocation290_spill] sm:$0xff] }
0x1129   :  { %13524 = vmatpush3.bf16.msra.mxu0 %v20170_v28  ;;  %12231 = vmatprep.mubr.bf16.mxu0 %v19134_v15  ;;  %v20181_v15 = vld [vmem:[#allocation291_spill] sm:$0xff] }
0x112a   :  { %13525 = vmatprep.subr.bf16.mxu0 %v20171_v22 }
0x112d   :  { %13526 = vmatpush3.bf16.msra.mxu0 %v20172_v58 }
0x112e   :  { %13527 = vmatprep.subr.bf16.mxu0 %v20173_v3 }
0x1131   :  { %13528 = vmatpush3.bf16.msra.mxu0 %v20174_v29 }
0x1132   :  { %13529 = vmatprep.subr.bf16.mxu0 %v20175_v5 }
0x1135   :  { %13530 = vmatpush3.bf16.msra.mxu0 %v20176_v62 }
0x1136   :  { %13531 = vmatprep.subr.bf16.mxu0 %v20177_v7 }
0x1139   :  { %13532 = vmatpush3.bf16.msra.mxu0 %v20178_v43 }
0x113a   :  { %13533 = vmatprep.subr.bf16.mxu0 %v20179_v18 }
0x113d   :  { %13534 = vmatpush3.bf16.msra.mxu0 %v20180_v4 }
0x113e   :  { %13535 = vmatprep.subr.bf16.mxu0 %v20181_v15 }
0x1141   :  { %13536 = vmatpush3.bf16.msra.mxu0 %v20182_v38 }
0x1142   :  { %13537 = vmatprep.subr.bf16.mxu0 %v20183_v37 }
0x1145   :  { %13538 = vmatpush3.bf16.msra.mxu0 %v20184_v25 }
0x1146   :  { %13807 = vmatprep.subr.bf16.mxu0 %v19877_v41 }
0x1148   :  { %12232 = vmatmul.mubr.bf16.vlgmr.msra.gmra.mrb[172].mxu0 %v19132_v14  ;;  %v14239_v14 = vld [vmem:[%s19558_s9 + $0x30] sm:$0xff]  }
0x1149   :  { %13808 = vmatpush3.bf16.msra.mxu0 %v20185_v0  ;;  %13815 = vmatprep.mubr.msk.bf16.mxu0 %vm14254_vm0, %v19877_v41 }
0x114a   :  { %13809 = vmatprep.subr.bf16.mxu0 %v19877_v41 }
0x114d   :  { %13810 = vmatpush3.bf16.msra.mxu0 %v20186_v46 }
0x114e   :  { %13811 = vmatprep.subr.bf16.mxu0 %v19877_v41 }
0x1151   :  { %13812 = vmatpush3.bf16.msra.mxu0 %v20187_v26 }
0x1152   :  { %13813 = vmatprep.subr.bf16.mxu0 %v19877_v41 }
0x1155   :  { %13814 = vmatpush3.bf16.msra.mxu0 %v20188_v42 }
0x1158   :  { %13816 = vmatmul.mubr.msk.bf16.vlgmr.msra.gmra.mrb[176].mxu0 %vm5847_vm2, %v19163_v27 }
0x1159   :  { %13821 = vmatprep.mubr.msk.bf16.mxu0 %vm11454_vm7, %v14239_v14 }
0x11fb   :  { %v13495_v44 = vpop.f32.mrb[168].mxu0 }
0x11fc   :  { %v13496_v40 = vpop.f32.mrb[169].mxu0 }
0x11fd   :  { %v13497_v47 = vadd.f32 %v13496_v40, %v13495_v44  ;;  %v13498_v55 = vpop.f32.mrb[170].mxu0 }
0x11fe   :  { %v13499_v33 = vpop.f32.mrb[171].mxu0 }
0x11ff   :  { %v12152_v39 = vadd.f32 %v13497_v47, %v19442_v32  ;;  %v13500_v51 = vadd.f32 %v13499_v33, %v13498_v55 }
0x1201   :  { %v12155_v41 = vadd.f32 %v13500_v51, %v19444_v48  ;;  %v12193_v45 = vadd.f32 %v19446_v1, %v12152_v39 }
0x1203   :  { %v12196_v27 = vadd.f32 %v19448_v23, %v12155_v41 }
0x121b   :  { %v13539_v49 = vpop.f32.mrb[172].mxu0 }
0x121c   :  { %v13540_v57 = vpop.f32.mrb[173].mxu0 }
0x121d   :  { %v13541_v2 = vadd.f32 %v13540_v57, %v13539_v49  ;;  %v13542_v30 = vpop.f32.mrb[174].mxu0 }
0x121e   :  { %v13543_v61 = vpop.f32.mrb[175].mxu0 }
0x121f   :  { %v12234_v52 = vadd.f32 %v13541_v2, %v12193_v45  ;;  %v13544_v20 = vadd.f32 %v13543_v61, %v13542_v30 }
0x1221   :  { %v12237_v54 = vadd.f32 %v13544_v20, %v12196_v27  ;;  %v12275_v31 = vadd.f32 %v19450_v60, %v12234_v52  ;;  %v13030_v60 = vld [vmem:[%s19560_s11] ss:$0 sm:$0xff] }
0x1223   :  { %v12278_v59 = vadd.f32 %v19452_v6, %v12237_v54 }
0x122b   :  { %v12315_v32 = vpop.f32.mrb[176].mxu0 }
0x122c   :  { %v12316_v50 = vadd.f32 %v12315_v32, %v12275_v31  ;;  %v13817_v24 = vpop.f32.mrb[177].mxu0 }
0x122d   :  { %v12318_v48 = vpop.f32.mrb[178].mxu0 }
0x122e   :  { %v12319_v53 = vadd.f32 %v12318_v48, %v12278_v59  ;;  %v13818_v1 = vpop.f32.mrb[179].mxu0 }
0x1230   :  { %v12327_v63 = vpack.c.bf16 %v12319_v53, %v12316_v50 }
0x1232   :  { %13890 = vmatprep.subr.msk.bf16.mxu0 %vm11461_vm8, %v12327_v63  ;;  %v12345_v23 = vsel %vm11461_vm8, %v12327_v63, 0 }
0x1233   :  { %13820 = vmatpush3.bf16.msra.mxu0 %v12345_v23 }
0x1236   :  { %13822 = vmatmul.mubr.msk.bf16.vlgmr.msra.gmra.mrb[152].mxu0 %vm11454_vm7, %v14240_v8 }
0x1309   :  { %v13823_v6 = vpop.f32.mrb[152].mxu0 }
0x130a   :  { %v12409_v9 = vadd.f32 %v13823_v6, %v13030_v60  ;;  %v12381_v10 = vpop.f32.mrb[153].mxu0 }
0x130b   :  { %v12407_v11 = vadd.f32 %v13030_v60, %v12381_v10  ;;  %v13824_v13 = vpop.f32.mrb[154].mxu0 }
0x130c   :  { %14241 = vtanh.f32 %v12409_v9  ;;  %v12410_v12 = vadd.f32 %v13824_v13, %v13030_v60  ;;  %v12384_v21 = vpop.f32.mrb[155].mxu0 }
0x130d   :  { %14243 = vtanh.f32 %v12407_v11  ;;  %v12408_v36 = vadd.f32 %v13030_v60, %v12384_v21 }
0x130e   :  { %14245 = vtanh.f32 %v12410_v12 }
0x130f   :  { %14247 = vtanh.f32 %v12408_v36 }
0x1316   :  { %v14242_v16 = vpop.eup %14241 }
0x1317   :  { %v14244_v19 = vpop.eup %14243  ;;  %12417 = vst.msk [vmem:[%s19562_s13 + $0x10] sm:$0xff] %vm5847_vm2, %v14242_v16 }
0x1318   :  { %v14246_v35 = vpop.eup %14245  ;;  %12415 = vst.msk [vmem:[%s19562_s13] sm:$0xff] %vm5847_vm2, %v14244_v19 }
0x1319   :  { %v14248_v17 = vpop.eup %14247  ;;  %12418 = vst.msk [vmem:[%s19562_s13 + $0x18] sm:$0xff] %vm5847_vm2, %v14246_v35 }
0x131a   :  { %12416 = vst.msk [vmem:[%s19562_s13 + $0x8] sm:$0xff] %vm5847_vm2, %v14248_v17 }
0x131b   :  { %12427 = vsyncmov [#allocation4] }
0x131e   :  { %s12428_s6 = vpop.sfrf %12427 }
0x131f   :  { %p13031_p0 = scmp.ne.s32.totalorder %s12428_s6, 0 }
0x1321   :  { %12432 = shalt.err (%p13031_p0)  }
0x1322   :  { %12434 = vsyncmov [#allocation4 + $0x1] }
0x1325   :  { %s12435_s18 = vpop.sfrf %12434 }
0x1326   :  { %p13032_p1 = scmp.ne.s32.totalorder %s12435_s18, 0 }
0x1328   :  { %12439 = shalt.err (%p13032_p1)  }

</bundles_post_ra>
